<compile_context>
chip_gen: v7x
topology: tpu7x:2x2x1
jax: 0.10.0
libtpu: 0.0.40
codegen_flags: <defaults>
</compile_context>

<pallas_src>
import jax
import jax.numpy as jnp
from jax import lax
from jax.experimental import pallas as pl
from jax.experimental.pallas import tpu as pltpu

IN_FEATURES = 1024
OUT_FEATURES = 4096


def _default_tile_n():
    # v7x: 2 TensorCores split the ("parallel",) grid -> keep grid=4 so each
    # TC retains >=2 pipelined steps.  Single-TC chips (v5e/v6e/others):
    # tile=2048 (grid=2) cuts ~0.35us/step overhead and lengthens DMAs.
    try:
        kind = jax.devices()[0].device_kind.lower()
    except Exception:
        return 1024
    return 1024 if "v7" in kind else 2048


def _linear_hardswish_kernel(x_ref, w_ref, b_ref, o_ref):
    # x_ref: (B, K)        resident input block (reused across the grid)
    # w_ref: (TILE_N, K)   contiguous weight row-tile (PyTorch (out, in) layout)
    # b_ref: (1, TILE_N)   per-tile bias block (no dynamic in-kernel slicing)
    # o_ref: (B, TILE_N)   output tile
    l1 = lax.dot_general(
        x_ref[...],
        w_ref[...],
        dimension_numbers=(((1,), (1,)), ((), ())),  # contract on K -> (B, TILE_N)
        preferred_element_type=jnp.float32,
    )
    l1 = l1 + b_ref[...]
    l2 = l1 * jnp.clip(l1 + 3.0, 0.0, 6.0)
    o_ref[...] = (l2 * (1.0 / 6.0)).astype(o_ref.dtype)


def linear_hardswish(x, w, b, *, tile_n=None, stream_dtype=None):
    """x: (B, K); w: (N, K) (PyTorch Linear.weight layout); b: (N,).

    stream_dtype: optionally cast x/W to a narrower dtype (e.g. jnp.bfloat16)
    before streaming — halves HBM bytes on this weight-bound GEMV while the
    MXU still accumulates in f32; bias and output stay in the original dtype.
    """
    B, K = x.shape
    N, K2 = w.shape
    assert K == K2 and b.shape == (N,)

    out_dtype = x.dtype
    if stream_dtype is not None:
        x = x.astype(stream_dtype)
        w = w.astype(stream_dtype)

    if tile_n is None:
        tile_n = _default_tile_n()
    assert N % tile_n == 0

    b2d = b.reshape(1, N).astype(jnp.float32)

    # Double-buffered weight tiles dominate VMEM; add the small resident /
    # streamed blocks plus ~2 MiB headroom, instead of reserving 32 MiB.
    vmem_bytes = int(
        2 * tile_n * K * w.dtype.itemsize        # W double buffer
        + 2 * B * K * x.dtype.itemsize           # x
        + 2 * B * tile_n * jnp.dtype(out_dtype).itemsize  # out
        + 2 * tile_n * 4                         # bias
        + (2 << 20)                              # headroom
    )

    cost = pl.CostEstimate(
        flops=2 * B * K * N,
        bytes_accessed=(
            w.size * w.dtype.itemsize
            + x.size * x.dtype.itemsize
            + b2d.size * 4
            + B * N * jnp.dtype(out_dtype).itemsize
        ),
        transcendentals=0,
    )

    return pl.pallas_call(
        _linear_hardswish_kernel,
        out_shape=jax.ShapeDtypeStruct((B, N), out_dtype),
        grid_spec=pltpu.PrefetchScalarGridSpec(
            num_scalar_prefetch=0,
            grid=(N // tile_n,),
            in_specs=[
                pl.BlockSpec((B, K), lambda j: (0, 0)),        # x: resident
                pl.BlockSpec((tile_n, K), lambda j: (j, 0)),   # contiguous W row-tile
                pl.BlockSpec((1, tile_n), lambda j: (0, j)),   # bias: per-tile block
            ],
            out_specs=pl.BlockSpec((B, tile_n), lambda j: (0, j)),
        ),
        compiler_params=pltpu.CompilerParams(
            dimension_semantics=("parallel",),   # v7x shards the grid over 2 TCs
            vmem_limit_bytes=vmem_bytes,
        ),
        cost_estimate=cost,
    )(x, w, b2d)


def reference(x, w, b):
    l1 = x @ w.T + b
    l2 = l1 * jnp.clip(l1 + 3.0, 0.0, 6.0)
    return l2 / 6.0


if __name__ == "__main__":
    key = jax.random.PRNGKey(0)
    kx, kw, kb = jax.random.split(key, 3)

    # Deterministic parameters; weight stored as (out_features, in_features)
    # to match PyTorch's Linear.weight layout (contiguous HBM row-tiles).
    bound = 1.0 / (IN_FEATURES ** 0.5)
    w = jax.random.uniform(
        kw, (OUT_FEATURES, IN_FEATURES), jnp.float32, minval=-bound, maxval=bound
    )
    b = jax.random.uniform(
        kb, (OUT_FEATURES,), jnp.float32, minval=-bound, maxval=bound
    )

    # Input matching the module: x1 = torch.randn(1, 1024)
    x = jax.random.normal(kx, (1, IN_FEATURES), jnp.float32)

    ref = reference(x, w, b)

    # Exact-semantics path (f32 weights, matches the PyTorch module numerics).
    out = jax.block_until_ready(linear_hardswish(x, w, b))
    assert out.shape == (1, OUT_FEATURES)
    assert jnp.allclose(out, ref, atol=1e-4, rtol=1e-4)

    # bf16 weight-streaming path (halves HBM bytes on this weight-bound GEMV);
    # accumulation stays f32 on the MXU, tolerance loosened for bf16 rounding.
    out_bf16 = jax.block_until_ready(
        linear_hardswish(x, w, b, stream_dtype=jnp.bfloat16)
    )
    assert jnp.allclose(out_bf16, ref, atol=5e-2, rtol=5e-2)

    print("KERNEL_OK")
</pallas_src>

<mosaic_0001>
module attributes {stable_mosaic.version = 11 : i64} {
  func.func @_linear_hardswish_kernel(%arg0: i32, %arg1: memref<1x1024xf32, #tpu.memory_space<vmem>>, %arg2: memref<2048x1024xf32, #tpu.memory_space<vmem>>, %arg3: memref<1x2048xf32, #tpu.memory_space<vmem>>, %arg4: memref<1x2048xf32, #tpu.memory_space<vmem>>) attributes {dimension_semantics = [#tpu.dimension_semantics<parallel>], iteration_bounds = array<i64: 2>, scalar_prefetch = 0 : i64, scratch_operands = 0 : i64, tpu.core_type = #tpu.core_type<tc>, window_params = [{pipeline_mode = #tpu.pipeline_mode<synchronous>, transform_indices = @transform_0, window_bounds = array<i64: 1, 1024>}, {transform_indices = @transform_1, window_bounds = array<i64: 2048, 1024>}, {transform_indices = @transform_2, window_bounds = array<i64: 1, 2048>}, {transform_indices = @transform_3, window_bounds = array<i64: 1, 2048>}]} {
    %c0 = arith.constant 0 : index
    %c0_0 = arith.constant 0 : index
    %0 = vector.load %arg1[%c0, %c0_0] : memref<1x1024xf32, #tpu.memory_space<vmem>>, vector<1x1024xf32>
    %c0_1 = arith.constant 0 : index
    %c0_2 = arith.constant 0 : index
    %1 = vector.load %arg2[%c0_1, %c0_2] : memref<2048x1024xf32, #tpu.memory_space<vmem>>, vector<2048x1024xf32>
    %cst = arith.constant dense<0.000000e+00> : vector<1x2048xf32>
    %2 = tpu.matmul %0, %1, %cst {dimension_numbers = #tpu.dot_dimension_numbers<[1], [1], [0], [0], [0, 0, 1, 0], [], []>} : vector<1x1024xf32>, vector<2048x1024xf32>, vector<1x2048xf32> -> vector<1x2048xf32>
    %c0_3 = arith.constant 0 : index
    %c0_4 = arith.constant 0 : index
    %3 = vector.load %arg3[%c0_3, %c0_4] : memref<1x2048xf32, #tpu.memory_space<vmem>>, vector<1x2048xf32>
    %4 = arith.addf %2, %3 : vector<1x2048xf32>
    %cst_5 = arith.constant 3.000000e+00 : f32
    %5 = vector.broadcast %cst_5 : f32 to vector<1x2048xf32>
    %6 = arith.addf %4, %5 : vector<1x2048xf32>
    %cst_6 = arith.constant 0.000000e+00 : f32
    %cst_7 = arith.constant 6.000000e+00 : f32
    %7 = vector.broadcast %cst_6 : f32 to vector<1x2048xf32>
    %8 = arith.maximumf %7, %6 : vector<1x2048xf32>
    %9 = vector.broadcast %cst_7 : f32 to vector<1x2048xf32>
    %10 = arith.minimumf %9, %8 : vector<1x2048xf32>
    %11 = arith.mulf %4, %10 : vector<1x2048xf32>
    %cst_8 = arith.constant 0.166666672 : f32
    %12 = vector.broadcast %cst_8 : f32 to vector<1x2048xf32>
    %13 = arith.mulf %11, %12 : vector<1x2048xf32>
    %c0_9 = arith.constant 0 : index
    %c0_10 = arith.constant 0 : index
    %14 = vector.load %arg4[%c0_9, %c0_10] : memref<1x2048xf32, #tpu.memory_space<vmem>>, vector<1x2048xf32>
    tpu.vector_store %arg4[%c0_9, %c0_10], %13 {strides = array<i32>} : memref<1x2048xf32, #tpu.memory_space<vmem>>, vector<1x2048xf32>,
    return
  }
  func.func @transform_0(%arg0: i32) -> (i32, i32) {
    %c0_i32 = arith.constant 0 : i32
    %c0_i32_0 = arith.constant 0 : i32
    %c0_i32_1 = arith.constant 0 : i32
    return %c0_i32, %c0_i32_0 : i32, i32
  }
  func.func @transform_1(%arg0: i32) -> (i32, i32) {
    %c0_i32 = arith.constant 0 : i32
    %c0_i32_0 = arith.constant 0 : i32
    return %arg0, %c0_i32 : i32, i32
  }
  func.func @transform_2(%arg0: i32) -> (i32, i32) {
    %c0_i32 = arith.constant 0 : i32
    %c0_i32_0 = arith.constant 0 : i32
    return %c0_i32, %arg0 : i32, i32
  }
  func.func @transform_3(%arg0: i32) -> (i32, i32) {
    %c0_i32 = arith.constant 0 : i32
    %c0_i32_0 = arith.constant 0 : i32
    return %c0_i32, %arg0 : i32, i32
  }
}

</mosaic_0001>

<bundles_post_ra>
// kernel: tpu_custom_call.1
= control target key start
LH: loop header
LB: loop body
LE: loop exit
PB: predicated region body
PF: predicated region fallthrough
CT: control target
= control target key end

     0   :  { %8 = vsyncpa [#allocation3], 0  ;;  %s9869_s0 = inlined_call_operand.hbm [shape: f32[1,1024], index: 0, kind: input, shape index: {}]   ;;  %s9870_s1 = inlined_call_operand.hbm [shape: f32[4096,1024], index: 1, kind: input, shape index: {}]   ;;  %s9871_s2 = inlined_call_operand.hbm [shape: f32[1,4096], index: 2, kind: input, shape index: {}]   ;;  %s9872_s3 = inlined_call_operand.hbm [shape: f32[1,4096], index: 3, kind: output, shape index: {}]  }
   0x1   :  { %9 = vsyncpa [#allocation6], 0 }
   0x2   :  { %11 = vsyncpa [#allocation6 + $0x1], 0 }
   0x3   :  { %12 = vsyncpa [#allocation4], 0 }
   0x4   :  { %14 = vsyncpa [#allocation4 + $0x1], 0  ;;  %s7394_s12 = smov 0   ;;  %s7396_s13 = smov 0  }
   0x5   :  { %s7398_s14 = smov 0   ;;  %s7400_s15 = smov 0  }
   0x6 LB: > { %s7415_s16 = sadd.s32 1, %s7365_s15   ;;  %s48_s17 = sadd.s32 1, %s7361_s14  ;;  %s7365_s15 = sphi %s7400_s15, %s9895_s15   ;;  %s7361_s14 = sphi %s7398_s14, %s9894_s14   ;;  %s7357_s13 = sphi %s7396_s13, %s9893_s13   ;;  %s7353_s12 = sphi %s7394_s12, %s9892_s12  }
   0x7   : > { %s45_s18 = ssub.s32 %s7365_s15, %s7415_s16  ;;  %p55_p0 = scmp.ne.s32.totalorder %s7361_s14, %s7357_s13 }
   0x8   : > { %p46_p1 = scmp.eq.s32.totalorder %s45_s18, 0  ;;  %p56_p2 = scmp.eq.s32.totalorder %s7365_s15, 0 }
   0x9   : > { %p7165_p4 = scmp.lt.s32.totalorder %s7365_s15, 2  ;;  %s148_s20 = sand.u32 1, %s7365_s15  }
   0xa   : > { %s7426_s19 = scalar_select %p46_p1, %s7361_s14, %s48_s17  }
   0xb   : > { %p57_p5 = por %p56_p2, %p55_p0  ;;  %s150_s21 = sand.u32 1, %s7361_s14  }
   0xc   : > { %s5006_s22 = sshll.u32 %s150_s21, 14  ;;  %s5024_s23 = sshll.u32 %s7365_s15, 18 }
   0xd   : > { %s7439_s26 = scalar_lea.hbm %s9870_s1, %s5024_s23  ;;  %s152_s27 = scalar_lea.vmem [#allocation5], %s5006_s22 }
   0xe   : > { %s160_s28 = sshll.u32 %s152_s27, 4  ;;  %p7441_p6 = pnand %p7165_p4, %p57_p5  ;;  %s7445_s28 = int_to_ptr.vmem [resolvable:$true] %s160_s28 }
   0xf   : > { %s7447_s30 = scalar_lea.sflag [#allocation6], %s148_s20  ;;  %s7207_s4 = scalar_lea.hbm %s7439_s26, 262144 }
  0x10   : > { %p7208_p7 = scmp.ne.s32.totalorder %s7439_s26, %s7207_s4  ;;  %p7209_p8 = pneg %p7441_p6 }
  0x11   : > { %s7212_s7 = scalar_lea.hbm %s9870_s1, 524288  ;;  %p7213_p11 = scmp.lt.u32.totalorder %s7439_s26, %s9870_s1 }
  0x12   : > { %p7210_p9 = pnand %p7209_p8, %p7208_p7  ;;  %p7214_p12 = scmp.lt.u32.totalorder %s7212_s7, %s7207_s4 }
  0x13   : > { %p7216_p1 = scmp.lt.u32.totalorder %s7207_s4, %s7439_s26 }
  0x14   : > { %p7211_p10 = pneg %p7210_p9  ;;  %p7215_p13 = por %p7214_p12, %p7213_p11 }
  0x16   : > { %p7217_p2 = por %p7216_p1, %p7215_p13 }
  0x18   : > { %p7218_p4 = pnand %p7217_p2, %p7211_p10 }
  0x1a   : > { %7221 = shalt.err (!%p7218_p4)
}
  0x1b   : > { %s7222_s10 = scalar_lea.vmem %s7445_s28, 262144  ;;  %s7367_s11 = smov [#allocation5]  }
  0x1c   : > { %p7223_p5 = scmp.ne.s32.totalorder %s7445_s28, %s7222_s10  ;;  %s7227_s17 = sshll.u32 %s7367_s11, 4  ;;  %s7228_s17 = int_to_ptr.vmem [resolvable:$false] %s7227_s17 }
  0x1d   : > { %s7229_s18 = scalar_lea.vmem %s7228_s17, 524288  ;;  %p7230_p3 = scmp.lt.s32.totalorder %s7445_s28, %s7228_s17 }
  0x1e   : > { %p7225_p7 = pnand %p7223_p5, %p7209_p8  ;;  %p7231_p11 = scmp.lt.s32.totalorder %s7229_s18, %s7222_s10 }
  0x20   : > { %p7226_p9 = pneg %p7225_p7  ;;  %p7232_p12 = por %p7231_p11, %p7230_p3 }
  0x22   : > { %p7233_p13 = pnand %p7232_p12, %p7226_p9 }
  0x24   : > { %7236 = shalt.err (!%p7233_p13)
}
  0x25   : > { %s7368_s20 = smov 1024   ;;  %s7369_s22 = smov 64  }
  0x26   : > { %7156 = dma.hbm_to_vmem [thread:$0]  (!%p7441_p6), %s7439_s26, 262144, %s7445_s28, %s7447_s30, %s7368_s20, %s7368_s20, %s7369_s22  }
  0x27   : > { %s7476_s23 = sadd.s32 4294967295, %s7365_s15   ;;  %s5002_s24 = sadd.s32 4294967294, %s7365_s15  }
  0x28   : > { %p61_p3 = scmp.ne.s32.totalorder %s7357_s13, %s7353_s12  ;;  %p9873_p10 = scmp.eq.s32.totalorder %s7476_s23, 0 }
  0x29   : > { %p111_p1 = scmp.eq.s32.totalorder %s7476_s23, 1  ;;  %p117_p2 = scmp.eq.s32.totalorder %s5002_s24, 1 }
  0x2a   : > { %p7485_p4 = por %p9873_p10, %p61_p3  ;;  %p5003_p5 = scmp.ge.s32.totalorder %s7365_s15, 1 }
  0x2b   : > { %p7493_p7 = por %p111_p1, %p55_p0  ;;  %p7497_p9 = por %p117_p2, %p61_p3 }
  0x2c   : > { %s9879_s25 = scalar_select %p7485_p4, 1, 0 }
  0x2d   : > { %s9880_s26 = scalar_select %p7493_p7, 1, 0 }
  0x2e   : > { %s9881_s27 = scalar_select %p7497_p9, 1, 0 }
  0x2f   : > { %p124_p11 = scmp.lt.s32.totalorder %s7365_s15, 3  ;;  %s5010_s28 = sshll.u32 %s150_s21, 4 }
  0x30   : > { %s7370_s5 = smov [#allocation2]   ;;  %s5025_s7 = sshll.u32 %s7365_s15, 8 }
  0x31   : > { %p7504_p12 = pnand %p5003_p5, %p124_p11  ;;  %s137_s6 = sshll.u32 %s7370_s5, 4  ;;  %s7508_s6 = int_to_ptr.vmem [resolvable:$true] %s137_s6 }
  0x32   : > { %s7516_s10 = scalar_lea.hbm %s9871_s2, %s5025_s7  ;;  %s174_s21 = scalar_lea.vmem [#allocation7], %s5010_s28 }
  0x33   : > { %s9882_s4 = scalar_select %p7504_p12, 1, 0 }
  0x34   : > { %p7149_p0 = pneg %p7504_p12  ;;  %s182_s11 = sshll.u32 %s174_s21, 4  ;;  %s183_s11 = int_to_ptr.vmem [resolvable:$true] %s182_s11 }
  0x35   : > { %s7237_s18 = scalar_lea.hbm %s7516_s10, 256  ;;  %s7242_s24 = scalar_lea.hbm %s9871_s2, 512 }
  0x36   : > { %p7520_p13 = pnand %p7149_p0, %p9873_p10  ;;  %p7238_p3 = scmp.ne.s32.totalorder %s7516_s10, %s7237_s18 }
  0x37   : > { %p7243_p5 = scmp.lt.u32.totalorder %s7516_s10, %s9871_s2  ;;  %p7244_p11 = scmp.lt.u32.totalorder %s7242_s24, %s7237_s18 }
  0x38   : > { %s9883_s17 = scalar_select %p7520_p13, 1, 0 }
  0x39   : > { %p7240_p1 = pnand %p7238_p3, %p7209_p8  ;;  %p7245_p0 = por %p7244_p11, %p7243_p5 }
  0x3a   : > { %p7246_p10 = scmp.lt.u32.totalorder %s7237_s18, %s7516_s10 }
  0x3b   : > { %p7241_p2 = pneg %p7240_p1 }
  0x3c   : > { %p7247_p9 = por %p7246_p10, %p7245_p0 }
  0x3e   : > { %p7248_p7 = pnand %p7247_p9, %p7241_p2 }
  0x40   : > { %7251 = shalt.err (!%p7248_p7)
}
  0x41   : > { %s7252_s28 = scalar_lea.vmem %s183_s11, 256  ;;  %s7371_s8 = smov [#allocation7]  }
  0x42   : > { %p7253_p4 = scmp.ne.s32.totalorder %s183_s11, %s7252_s28  ;;  %s7257_s9 = sshll.u32 %s7371_s8, 4  ;;  %s7258_s9 = int_to_ptr.vmem [resolvable:$false] %s7257_s9 }
  0x43   : > { %s7259_s21 = scalar_lea.vmem %s7258_s9, 512  ;;  %p7260_p12 = scmp.lt.s32.totalorder %s183_s11, %s7258_s9 }
  0x44   : > { %p7255_p3 = pnand %p7253_p4, %p7209_p8  ;;  %p7261_p13 = scmp.lt.s32.totalorder %s7259_s21, %s7252_s28 }
  0x46   : > { %p7256_p1 = pneg %p7255_p3  ;;  %p7262_p5 = por %p7261_p13, %p7260_p12 }
  0x48   : > { %p7263_p11 = pnand %p7262_p5, %p7256_p1 }
  0x4a   : > { %7266 = shalt.err (!%p7263_p11)
}
  0x4b   : > { %7159 = dma.hbm_to_vmem [thread:$0]  (!%p7441_p6), %s7516_s10, 256, %s183_s11, %s7447_s30  }
  0x4c   : > { %s7267_s22 = scalar_lea.hbm %s9869_s0, 128  ;;  %p9884_p10 = scmp.ne.s32.totalorder %s9883_s17, 0 }
  0x4d   : > { %p7268_p8 = scmp.ne.s32.totalorder %s9869_s0, %s7267_s22  ;;  %p7274_p12 = scmp.lt.u32.totalorder %s7267_s22, %s9869_s0 }
  0x4e   : > { %p7269_p4 = pneg %p9884_p10 }
  0x50   : > { %p7270_p7 = pnand %p7269_p4, %p7268_p8 }
  0x52   : > { %p7271_p9 = pneg %p7270_p7 }
  0x54   : > { %p7276_p13 = pnand %p7274_p12, %p7271_p9 }
  0x56   : > { %7279 = shalt.err (!%p7276_p13)
}
  0x57   : > { %s7280_s29 = scalar_lea.vmem %s7508_s6, 128  ;;  %p7288_p3 = scmp.lt.s32.totalorder %s7508_s6, %s7508_s6 }
  0x58   : > { %p7281_p6 = scmp.ne.s32.totalorder %s7508_s6, %s7280_s29  ;;  %p7289_p1 = scmp.lt.s32.totalorder %s7280_s29, %s7280_s29 }
  0x5a   : > { %p7283_p2 = pnand %p7281_p6, %p7269_p4  ;;  %p7290_p5 = por %p7289_p1, %p7288_p3 }
  0x5c   : > { %p7284_p0 = pneg %p7283_p2 }
  0x5e   : > { %p7291_p11 = pnand %p7290_p5, %p7284_p0 }
  0x60   : > { %7294 = shalt.err (!%p7291_p11)
}
  0x61   : > { %7152 = dma.hbm_to_vmem [thread:$0]  (!%p9884_p10), %s9869_s0, 128, %s7508_s6, [#allocation3]  }
  0x62   : > { %p9885_p8 = scmp.ne.s32.totalorder %s9882_s4, 0 }
  0x63   : > { %p9886_p7 = scmp.eq.s32.totalorder (!%p9885_p8), %s7476_s23, 0 }
  0x64   : > { %191 = sbr.rel (%p9885_p8) target bundleno = 2416 (0x970), region = 32 }
  0x6b   : > { %7340 = dma.done.wait (%p9886_p7), [#allocation3], 128   ;;  %p9887_p4 = pmov %p9886_p7 }
  0x6c   : > { %s197_s11 = sand.u32 1, %s7476_s23   ;;  %s7573_s8 = sand.u32 1, %s7357_s13  }
  0x6d   : > { %7342 = vsyncadd (%p9887_p4), [#allocation3], 4294967168  ;;  %s5015_s17 = sshll.u32 %s7573_s8, 14  ;;  %s198_s9 = scalar_lea.sflag [#allocation6], %s197_s11 }
  0x6e   : > { %s7576_s21 = scalar_lea.vmem [#allocation5], %s5015_s17  ;;  %p9888_p10 = scmp.ne.s32.totalorder %s9879_s25, 0 }
  0x70   : > { %7344 = dma.done.wait (%p9888_p10), %s198_s9, 262400  }
  0x71   : > { %7346 = vsyncadd (%p9888_p10), %s198_s9, 4294704896  ;;  %v243_v0 = vld [vmem:[%s7576_s21 + $0x8] sm:$0xff]  ;;  %v242_v5 = vld [vmem:[%s7576_s21] sm:$0xff]  ;;  %v2293_v62 = vlaneseq  ;;  %s5016_s25 = sshll.u32 %s7573_s8, 4  ;;  %s5026_s18 = sshll.u32 %s7476_s23, 8 }
  0x72   : > { %v251_v1 = vld [vmem:[%s7576_s21 + $0x48] sm:$0xff]  ;;  %v250_v6 = vld [vmem:[%s7576_s21 + $0x40] sm:$0xff]  ;;  %s8401_s4 = scalar_lea.vmem [#allocation7], %s5016_s25  ;;  %s8993_s6 = scalar_lea.vmem [#allocation8], %s5016_s25 }
  0x73   : > { %v499_v2 = vld [vmem:[%s7576_s21 + $0x808] sm:$0xff]  ;;  %v5027_v3 = vpack.c.bf16 %v251_v1, %v243_v0  ;;  %v5029_v8 = vpack.c.bf16 %v250_v6, %v242_v5  ;;  %v498_v9 = vld [vmem:[%s7576_s21 + $0x800] sm:$0xff]  ;;  %s4900_s20 = sshll.u32 %s8993_s6, 4  ;;  %s9824_s5 = scalar_lea.hbm %s9872_s3, %s5026_s18  ;;  %s9826_s20 = int_to_ptr.vmem [resolvable:$true] %s4900_s20 }
  0x74   : > { %v507_v4 = vld [vmem:[%s7576_s21 + $0x848] sm:$0xff]  ;;  %v506_v10 = vld [vmem:[%s7576_s21 + $0x840] sm:$0xff]  ;;  %s4886_s23 = scalar_lea.sflag [#allocation4], %s7573_s8  ;;  %s7295_s7 = scalar_lea.vmem %s9826_s20, 256 }
  0x75   : > { %v5283_v7 = vpack.c.bf16 %v507_v4, %v499_v2  ;;  %v259_v11 = vld [vmem:[%s7576_s21 + $0x88] sm:$0xff]  ;;  %5028 = vmatprep.subr.bf16.mxu0 %v5027_v3  ;;  %v5285_v12 = vpack.c.bf16 %v506_v10, %v498_v9  ;;  %v258_v18 = vld [vmem:[%s7576_s21 + $0x80] sm:$0xff]  ;;  %v7626_v3 = vshrl.u32 %v2293_v62, 7  ;;  %p7296_p9 = scmp.ne.s32.totalorder %s9826_s20, %s7295_s7  ;;  %p9889_p12 = scmp.ne.s32.totalorder %s9880_s26, 0 }
  0x76   : > { %v267_v13 = vld [vmem:[%s7576_s21 + $0xc8] sm:$0xff]  ;;  %5030 = vmatpush1.bf16.xpose.msra.mxu0 %v5029_v8  ;;  %v266_v19 = vld [vmem:[%s7576_s21 + $0xc0] sm:$0xff]  ;;  %s7373_s28 = smov [#allocation8]  }
  0x77   : > { %v515_v14 = vld [vmem:[%s7576_s21 + $0x888] sm:$0xff]  ;;  %5284 = vmatprep.subr.bf16.mxu1 %v5283_v7  ;;  %v5031_v16 = vpack.c.bf16 %v267_v13, %v259_v11  ;;  %v514_v20 = vld [vmem:[%s7576_s21 + $0x880] sm:$0xff]  ;;  %v5033_v26 = vpack.c.bf16 %v266_v19, %v258_v18  ;;  %p7297_p13 = pnand %p7296_p9, %p9889_p12  ;;  %s7299_s29 = sshll.u32 %s7373_s28, 4  ;;  %s7300_s29 = int_to_ptr.vmem [resolvable:$false] %s7299_s29 }
  0x78   : > { %v523_v15 = vld [vmem:[%s7576_s21 + $0x8c8] sm:$0xff]  ;;  %5286 = vmatpush1.bf16.xpose.msra.mxu1 %v5285_v12  ;;  %v522_v21 = vld [vmem:[%s7576_s21 + $0x8c0] sm:$0xff]  ;;  %v7637_v12 = vsub.s32 1, %v7626_v3  ;;  %s7301_s30 = scalar_lea.vmem %s7300_s29, 512  ;;  %p7302_p2 = scmp.lt.s32.totalorder %s9826_s20, %s7300_s29 }
  0x79   : > { %v5287_v17 = vpack.c.bf16 %v523_v15, %v515_v14  ;;  %5032 = vmatprep.subr.bf16.mxu0 %v5031_v16  ;;  %v275_v22 = vld [vmem:[%s7576_s21 + $0x108] sm:$0xff]  ;;  %v5289_v27 = vpack.c.bf16 %v522_v21, %v514_v20  ;;  %v274_v30 = vld [vmem:[%s7576_s21 + $0x100] sm:$0xff]  ;;  %p7298_p6 = pneg %p7297_p13  ;;  %p7303_p0 = scmp.lt.s32.totalorder %s7301_s30, %s7295_s7 }
  0x7a   : > { %v283_v23 = vld [vmem:[%s7576_s21 + $0x148] sm:$0xff]  ;;  %v282_v31 = vld [vmem:[%s7576_s21 + $0x140] sm:$0xff] }
  0x7b   : > { %5288 = vmatprep.subr.bf16.mxu1 %v5287_v17  ;;  %v531_v24 = vld [vmem:[%s7576_s21 + $0x908] sm:$0xff]  ;;  %v5035_v28 = vpack.c.bf16 %v283_v23, %v275_v22  ;;  %v530_v32 = vld [vmem:[%s7576_s21 + $0x900] sm:$0xff]  ;;  %v5037_v38 = vpack.c.bf16 %v282_v31, %v274_v30  ;;  %v7639_v17 = vld [vmem:[#allocation2] sm:$0xff]  ;;  %p7304_p3 = por %p7303_p0, %p7302_p2 }
  0x7c   : > { %v539_v25 = vld [vmem:[%s7576_s21 + $0x948] sm:$0xff]  ;;  %v538_v33 = vld [vmem:[%s7576_s21 + $0x940] sm:$0xff]  ;;  %v7643_v18 = vrot.slane %v7639_v17, %v7637_v12 }
  0x7d   : > { %v5291_v29 = vpack.c.bf16 %v539_v25, %v531_v24  ;;  %v291_v34 = vld [vmem:[%s7576_s21 + $0x188] sm:$0xff]  ;;  %v5293_v39 = vpack.c.bf16 %v538_v33, %v530_v32  ;;  %v290_v42 = vld [vmem:[%s7576_s21 + $0x180] sm:$0xff]  ;;  %p7305_p1 = pnand %p7304_p3, %p7298_p6 }
  0x7e   : > { %5034 = vmatpush1.bf16.xpose.msra.mxu0 %v5033_v26  ;;  %v299_v35 = vld [vmem:[%s7576_s21 + $0x1c8] sm:$0xff]  ;;  %v298_v43 = vld [vmem:[%s7576_s21 + $0x1c0] sm:$0xff]  ;;  %2479 = vmatprep.mubr.f32.mxu0 %v7643_v18 }
  0x7f   : > { %5036 = vmatprep.subr.bf16.mxu0 %v5035_v28  ;;  %v547_v36 = vld [vmem:[%s7576_s21 + $0x988] sm:$0xff]  ;;  %v5039_v40 = vpack.c.bf16 %v299_v35, %v291_v34  ;;  %v546_v44 = vld [vmem:[%s7576_s21 + $0x980] sm:$0xff]  ;;  %v5041_v50 = vpack.c.bf16 %v298_v43, %v290_v42  ;;  %2763 = vmatprep.mubr.f32.mxu1 %v7643_v18 }
  0x80   : > { %5290 = vmatpush1.bf16.xpose.msra.mxu1 %v5289_v27  ;;  %v555_v37 = vld [vmem:[%s7576_s21 + $0x9c8] sm:$0xff]  ;;  %v554_v45 = vld [vmem:[%s7576_s21 + $0x9c0] sm:$0xff] }
  0x81   : > { %5292 = vmatprep.subr.bf16.mxu1 %v5291_v29  ;;  %v5295_v41 = vpack.c.bf16 %v555_v37, %v547_v36  ;;  %v307_v46 = vld [vmem:[%s7576_s21 + $0x208] sm:$0xff]  ;;  %v5297_v51 = vpack.c.bf16 %v554_v45, %v546_v44  ;;  %v306_v54 = vld [vmem:[%s7576_s21 + $0x200] sm:$0xff] }
  0x82   : > { %v315_v47 = vld [vmem:[%s7576_s21 + $0x248] sm:$0xff]  ;;  %v314_v55 = vld [vmem:[%s7576_s21 + $0x240] sm:$0xff] }
  0x83   : > { %v563_v48 = vld [vmem:[%s7576_s21 + $0xa08] sm:$0xff]  ;;  %v5043_v52 = vpack.c.bf16 %v315_v47, %v307_v46  ;;  %v562_v56 = vld [vmem:[%s7576_s21 + $0xa00] sm:$0xff]  ;;  %v5045_v63 = vpack.c.bf16 %v314_v55, %v306_v54 }
  0x84   : > { %v571_v49 = vld [vmem:[%s7576_s21 + $0xa48] sm:$0xff]  ;;  %v570_v57 = vld [vmem:[%s7576_s21 + $0xa40] sm:$0xff] }
  0x85   : > { %v5299_v53 = vpack.c.bf16 %v571_v49, %v563_v48  ;;  %v323_v58 = vld [vmem:[%s7576_s21 + $0x288] sm:$0xff]  ;;  %v5301_v0 = vpack.c.bf16 %v570_v57, %v562_v56  ;;  %v322_v4 = vld [vmem:[%s7576_s21 + $0x280] sm:$0xff] }
  0x86   : > { %5038 = vmatpush1.bf16.xpose.msra.mxu0 %v5037_v38  ;;  %v331_v59 = vld [vmem:[%s7576_s21 + $0x2c8] sm:$0xff]  ;;  %v330_v5 = vld [vmem:[%s7576_s21 + $0x2c0] sm:$0xff] }
  0x87   : > { %5040 = vmatprep.subr.bf16.mxu0 %v5039_v40  ;;  %v579_v60 = vld [vmem:[%s7576_s21 + $0xa88] sm:$0xff]  ;;  %v5047_v1 = vpack.c.bf16 %v331_v59, %v323_v58  ;;  %v578_v6 = vld [vmem:[%s7576_s21 + $0xa80] sm:$0xff]  ;;  %v5049_v13 = vpack.c.bf16 %v330_v5, %v322_v4 }
  0x88   : > { %5294 = vmatpush1.bf16.xpose.msra.mxu1 %v5293_v39  ;;  %v587_v61 = vld [vmem:[%s7576_s21 + $0xac8] sm:$0xff]  ;;  %v586_v7 = vld [vmem:[%s7576_s21 + $0xac0] sm:$0xff] }
  0x89   : > { %5296 = vmatprep.subr.bf16.mxu1 %v5295_v41  ;;  %v5303_v2 = vpack.c.bf16 %v587_v61, %v579_v60  ;;  %v339_v8 = vld [vmem:[%s7576_s21 + $0x308] sm:$0xff]  ;;  %v5305_v14 = vpack.c.bf16 %v586_v7, %v578_v6  ;;  %v338_v19 = vld [vmem:[%s7576_s21 + $0x300] sm:$0xff] }
  0x8a   : > { %v347_v9 = vld [vmem:[%s7576_s21 + $0x348] sm:$0xff]  ;;  %v346_v20 = vld [vmem:[%s7576_s21 + $0x340] sm:$0xff] }
  0x8b   : > { %v595_v10 = vld [vmem:[%s7576_s21 + $0xb08] sm:$0xff]  ;;  %v5051_v15 = vpack.c.bf16 %v347_v9, %v339_v8  ;;  %v594_v21 = vld [vmem:[%s7576_s21 + $0xb00] sm:$0xff]  ;;  %v5053_v27 = vpack.c.bf16 %v346_v20, %v338_v19 }
  0x8c   : > { %v603_v11 = vld [vmem:[%s7576_s21 + $0xb48] sm:$0xff]  ;;  %v602_v22 = vld [vmem:[%s7576_s21 + $0xb40] sm:$0xff] }
  0x8d   : > { %v5307_v16 = vpack.c.bf16 %v603_v11, %v595_v10  ;;  %v355_v23 = vld [vmem:[%s7576_s21 + $0x388] sm:$0xff]  ;;  %v5309_v28 = vpack.c.bf16 %v602_v22, %v594_v21  ;;  %v354_v31 = vld [vmem:[%s7576_s21 + $0x380] sm:$0xff] }
  0x8e   : > { %5042 = vmatpush1.bf16.xpose.msra.mxu0 %v5041_v50  ;;  %v363_v24 = vld [vmem:[%s7576_s21 + $0x3c8] sm:$0xff]  ;;  %v362_v32 = vld [vmem:[%s7576_s21 + $0x3c0] sm:$0xff] }
  0x8f   : > { %5044 = vmatprep.subr.bf16.mxu0 %v5043_v52  ;;  %v611_v25 = vld [vmem:[%s7576_s21 + $0xb88] sm:$0xff]  ;;  %v5055_v29 = vpack.c.bf16 %v363_v24, %v355_v23  ;;  %v610_v33 = vld [vmem:[%s7576_s21 + $0xb80] sm:$0xff]  ;;  %v5057_v39 = vpack.c.bf16 %v362_v32, %v354_v31 }
  0x90   : > { %5298 = vmatpush1.bf16.xpose.msra.mxu1 %v5297_v51  ;;  %v619_v26 = vld [vmem:[%s7576_s21 + $0xbc8] sm:$0xff]  ;;  %v618_v34 = vld [vmem:[%s7576_s21 + $0xbc0] sm:$0xff] }
  0x91   : > { %5300 = vmatprep.subr.bf16.mxu1 %v5299_v53  ;;  %v5311_v30 = vpack.c.bf16 %v619_v26, %v611_v25  ;;  %v371_v35 = vld [vmem:[%s7576_s21 + $0x408] sm:$0xff]  ;;  %v5313_v40 = vpack.c.bf16 %v618_v34, %v610_v33  ;;  %v370_v43 = vld [vmem:[%s7576_s21 + $0x400] sm:$0xff] }
  0x92   : > { %v379_v36 = vld [vmem:[%s7576_s21 + $0x448] sm:$0xff]  ;;  %v378_v44 = vld [vmem:[%s7576_s21 + $0x440] sm:$0xff] }
  0x93   : > { %v627_v37 = vld [vmem:[%s7576_s21 + $0xc08] sm:$0xff]  ;;  %v5059_v41 = vpack.c.bf16 %v379_v36, %v371_v35  ;;  %v626_v45 = vld [vmem:[%s7576_s21 + $0xc00] sm:$0xff]  ;;  %v5061_v51 = vpack.c.bf16 %v378_v44, %v370_v43 }
  0x94   : > { %v635_v38 = vld [vmem:[%s7576_s21 + $0xc48] sm:$0xff]  ;;  %v634_v46 = vld [vmem:[%s7576_s21 + $0xc40] sm:$0xff] }
  0x95   : > { %v5315_v42 = vpack.c.bf16 %v635_v38, %v627_v37  ;;  %v387_v47 = vld [vmem:[%s7576_s21 + $0x488] sm:$0xff]  ;;  %v5317_v52 = vpack.c.bf16 %v634_v46, %v626_v45  ;;  %v386_v55 = vld [vmem:[%s7576_s21 + $0x480] sm:$0xff] }
  0x96   : > { %5046 = vmatpush1.bf16.xpose.msra.mxu0 %v5045_v63  ;;  %v395_v48 = vld [vmem:[%s7576_s21 + $0x4c8] sm:$0xff]  ;;  %v394_v56 = vld [vmem:[%s7576_s21 + $0x4c0] sm:$0xff] }
  0x97   : > { %5048 = vmatprep.subr.bf16.mxu0 %v5047_v1  ;;  %v643_v49 = vld [vmem:[%s7576_s21 + $0xc88] sm:$0xff]  ;;  %v5063_v53 = vpack.c.bf16 %v395_v48, %v387_v47  ;;  %v642_v57 = vld [vmem:[%s7576_s21 + $0xc80] sm:$0xff]  ;;  %v5065_v63 = vpack.c.bf16 %v394_v56, %v386_v55 }
  0x98   : > { %5302 = vmatpush1.bf16.xpose.msra.mxu1 %v5301_v0  ;;  %v651_v50 = vld [vmem:[%s7576_s21 + $0xcc8] sm:$0xff]  ;;  %v650_v58 = vld [vmem:[%s7576_s21 + $0xcc0] sm:$0xff] }
  0x99   : > { %5304 = vmatprep.subr.bf16.mxu1 %v5303_v2  ;;  %v5319_v54 = vpack.c.bf16 %v651_v50, %v643_v49  ;;  %v403_v59 = vld [vmem:[%s7576_s21 + $0x508] sm:$0xff]  ;;  %v5321_v0 = vpack.c.bf16 %v650_v58, %v642_v57  ;;  %v402_v4 = vld [vmem:[%s7576_s21 + $0x500] sm:$0xff] }
  0x9a   : > { %v411_v60 = vld [vmem:[%s7576_s21 + $0x548] sm:$0xff]  ;;  %v410_v5 = vld [vmem:[%s7576_s21 + $0x540] sm:$0xff] }
  0x9b   : > { %v659_v61 = vld [vmem:[%s7576_s21 + $0xd08] sm:$0xff]  ;;  %v5067_v1 = vpack.c.bf16 %v411_v60, %v403_v59  ;;  %v658_v6 = vld [vmem:[%s7576_s21 + $0xd00] sm:$0xff] }
  0x9c   : > { %v667_v62 = vld [vmem:[%s7576_s21 + $0xd48] sm:$0xff]  ;;  %v666_v7 = vld [vmem:[%s7576_s21 + $0xd40] sm:$0xff] }
  0x9d   : > { %v5323_v2 = vpack.c.bf16 %v667_v62, %v659_v61  ;;  %v419_v8 = vld [vmem:[%s7576_s21 + $0x588] sm:$0xff]  ;;  %v418_v19 = vld [vmem:[%s7576_s21 + $0x580] sm:$0xff] }
  0x9e   : > { %5050 = vmatpush1.bf16.xpose.msra.mxu0 %v5049_v13  ;;  %v427_v9 = vld [vmem:[%s7576_s21 + $0x5c8] sm:$0xff]  ;;  %v5069_v13 = vpack.c.bf16 %v410_v5, %v402_v4  ;;  %v426_v20 = vld [vmem:[%s7576_s21 + $0x5c0] sm:$0xff] }
  0x9f   : > { %5052 = vmatprep.subr.bf16.mxu0 %v5051_v15  ;;  %v675_v10 = vld [vmem:[%s7576_s21 + $0xd88] sm:$0xff]  ;;  %v5071_v15 = vpack.c.bf16 %v427_v9, %v419_v8  ;;  %v674_v21 = vld [vmem:[%s7576_s21 + $0xd80] sm:$0xff]  ;;  %v245_v8 = vld [vmem:[%s7576_s21 + $0x18] sm:$0xff] }
  0xa0   : > { %5306 = vmatpush1.bf16.xpose.msra.mxu1 %v5305_v14  ;;  %v683_v11 = vld [vmem:[%s7576_s21 + $0xdc8] sm:$0xff]  ;;  %v5325_v14 = vpack.c.bf16 %v666_v7, %v658_v6  ;;  %v682_v22 = vld [vmem:[%s7576_s21 + $0xdc0] sm:$0xff]  ;;  %v253_v9 = vld [vmem:[%s7576_s21 + $0x58] sm:$0xff] }
  0xa1   : > { %5308 = vmatprep.subr.bf16.mxu1 %v5307_v16  ;;  %v5327_v16 = vpack.c.bf16 %v683_v11, %v675_v10  ;;  %v435_v23 = vld [vmem:[%s7576_s21 + $0x608] sm:$0xff]  ;;  %v434_v31 = vld [vmem:[%s7576_s21 + $0x600] sm:$0xff]  ;;  %v501_v10 = vld [vmem:[%s7576_s21 + $0x818] sm:$0xff] }
  0xa2   : > { %v443_v24 = vld [vmem:[%s7576_s21 + $0x648] sm:$0xff]  ;;  %v442_v32 = vld [vmem:[%s7576_s21 + $0x640] sm:$0xff]  ;;  %v509_v11 = vld [vmem:[%s7576_s21 + $0x858] sm:$0xff] }
  0xa3   : > { %v691_v25 = vld [vmem:[%s7576_s21 + $0xe08] sm:$0xff]  ;;  %v690_v33 = vld [vmem:[%s7576_s21 + $0xe00] sm:$0xff] }
  0xa4   : > { %v699_v26 = vld [vmem:[%s7576_s21 + $0xe48] sm:$0xff]  ;;  %v698_v34 = vld [vmem:[%s7576_s21 + $0xe40] sm:$0xff] }
  0xa5   : > { %v451_v35 = vld [vmem:[%s7576_s21 + $0x688] sm:$0xff]  ;;  %v450_v43 = vld [vmem:[%s7576_s21 + $0x680] sm:$0xff] }
  0xa6   : > { %5054 = vmatpush1.bf16.xpose.msra.mxu0 %v5053_v27  ;;  %v5073_v27 = vpack.c.bf16 %v426_v20, %v418_v19  ;;  %v459_v36 = vld [vmem:[%s7576_s21 + $0x6c8] sm:$0xff]  ;;  %v458_v44 = vld [vmem:[%s7576_s21 + $0x6c0] sm:$0xff]  ;;  %v7728_v19 = vsub.s32 0, %v7626_v3  ;;  %v244_v20 = vld [vmem:[%s7576_s21 + $0x10] sm:$0xff] }
  0xa7   : > { %5056 = vmatprep.subr.bf16.mxu0 %v5055_v29  ;;  %v5075_v29 = vpack.c.bf16 %v443_v24, %v435_v23  ;;  %v707_v37 = vld [vmem:[%s7576_s21 + $0xe88] sm:$0xff]  ;;  %v706_v45 = vld [vmem:[%s7576_s21 + $0xe80] sm:$0xff]  ;;  %v508_v23 = vld [vmem:[%s7576_s21 + $0x850] sm:$0xff] }
  0xa8   : > { %5310 = vmatpush1.bf16.xpose.msra.mxu1 %v5309_v28  ;;  %v5329_v28 = vpack.c.bf16 %v682_v22, %v674_v21  ;;  %v715_v38 = vld [vmem:[%s7576_s21 + $0xec8] sm:$0xff]  ;;  %v714_v46 = vld [vmem:[%s7576_s21 + $0xec0] sm:$0xff]  ;;  %v252_v21 = vld [vmem:[%s7576_s21 + $0x50] sm:$0xff] }
  0xa9   : > { %5312 = vmatprep.subr.bf16.mxu1 %v5311_v30  ;;  %v5331_v30 = vpack.c.bf16 %v699_v26, %v691_v25  ;;  %v467_v47 = vld [vmem:[%s7576_s21 + $0x708] sm:$0xff]  ;;  %v466_v55 = vld [vmem:[%s7576_s21 + $0x700] sm:$0xff]  ;;  %v500_v22 = vld [vmem:[%s7576_s21 + $0x810] sm:$0xff]  ;;  %v7737_v26 = vsub.s32 3, %v7626_v3 }
  0xaa   : > { %v475_v48 = vld [vmem:[%s7576_s21 + $0x748] sm:$0xff]  ;;  %v474_v56 = vld [vmem:[%s7576_s21 + $0x740] sm:$0xff]  ;;  %v261_v24 = vld [vmem:[%s7576_s21 + $0x98] sm:$0xff] }
  0xab   : > { %v723_v49 = vld [vmem:[%s7576_s21 + $0xf08] sm:$0xff]  ;;  %v722_v57 = vld [vmem:[%s7576_s21 + $0xf00] sm:$0xff]  ;;  %v269_v25 = vld [vmem:[%s7576_s21 + $0xd8] sm:$0xff] }
  0xac   : > { %v731_v50 = vld [vmem:[%s7576_s21 + $0xf48] sm:$0xff]  ;;  %v730_v58 = vld [vmem:[%s7576_s21 + $0xf40] sm:$0xff] }
  0xad   : > { %v483_v59 = vld [vmem:[%s7576_s21 + $0x788] sm:$0xff]  ;;  %v482_v4 = vld [vmem:[%s7576_s21 + $0x780] sm:$0xff] }
  0xae   : > { %5058 = vmatpush1.bf16.xpose.msra.mxu0 %v5057_v39  ;;  %v5077_v39 = vpack.c.bf16 %v442_v32, %v434_v31  ;;  %v491_v60 = vld [vmem:[%s7576_s21 + $0x7c8] sm:$0xff]  ;;  %v490_v5 = vld [vmem:[%s7576_s21 + $0x7c0] sm:$0xff]  ;;  %v5349_v31 = vpack.c.bf16 %v508_v23, %v500_v22  ;;  %v5095_v32 = vpack.c.bf16 %v269_v25, %v261_v24  ;;  %v324_v24 = vld [vmem:[%s7576_s21 + $0x290] sm:$0xff] }
  0xaf   : > { %5060 = vmatprep.subr.bf16.mxu0 %v5059_v41  ;;  %v5079_v41 = vpack.c.bf16 %v459_v36, %v451_v35  ;;  %v739_v61 = vld [vmem:[%s7576_s21 + $0xf88] sm:$0xff]  ;;  %v738_v6 = vld [vmem:[%s7576_s21 + $0xf80] sm:$0xff]  ;;  %v260_v35 = vld [vmem:[%s7576_s21 + $0x90] sm:$0xff] }
  0xb0   : > { %5314 = vmatpush1.bf16.xpose.msra.mxu1 %v5313_v40  ;;  %v5333_v40 = vpack.c.bf16 %v698_v34, %v690_v33  ;;  %v747_v62 = vld [vmem:[%s7576_s21 + $0xfc8] sm:$0xff]  ;;  %v746_v7 = vld [vmem:[%s7576_s21 + $0xfc0] sm:$0xff]  ;;  %v7747_v34 = vrot.slane %v7639_v17, %v7737_v26  ;;  %v268_v36 = vld [vmem:[%s7576_s21 + $0xd0] sm:$0xff] }
  0xb1   : > { %5316 = vmatprep.subr.bf16.mxu1 %v5315_v42  ;;  %v5335_v42 = vpack.c.bf16 %v715_v38, %v707_v37  ;;  %v516_v37 = vld [vmem:[%s7576_s21 + $0x890] sm:$0xff] }
  0xb2   : > { %v524_v38 = vld [vmem:[%s7576_s21 + $0x8d0] sm:$0xff] }
  0xb3   : > { %v332_v25 = vld [vmem:[%s7576_s21 + $0x2d0] sm:$0xff] }
  0xb6   : > { %5062 = vmatpush1.bf16.xpose.msra.mxu0 %v5061_v51  ;;  %v5081_v51 = vpack.c.bf16 %v458_v44, %v450_v43  ;;  %v5097_v43 = vpack.c.bf16 %v268_v36, %v260_v35  ;;  %v5353_v44 = vpack.c.bf16 %v524_v38, %v516_v37  ;;  %v5113_v35 = vpack.c.bf16 %v332_v25, %v324_v24 }
  0xb7   : > { %5064 = vmatprep.subr.bf16.mxu0 %v5063_v53  ;;  %v5083_v53 = vpack.c.bf16 %v475_v48, %v467_v47  ;;  %v276_v47 = vld [vmem:[%s7576_s21 + $0x110] sm:$0xff] }
  0xb8   : > { %5318 = vmatpush1.bf16.xpose.msra.mxu1 %v5317_v52  ;;  %v5337_v52 = vpack.c.bf16 %v714_v46, %v706_v45  ;;  %v284_v48 = vld [vmem:[%s7576_s21 + $0x150] sm:$0xff] }
  0xb9   : > { %5320 = vmatprep.subr.bf16.mxu1 %v5319_v54  ;;  %v5339_v54 = vpack.c.bf16 %v731_v50, %v723_v49  ;;  %v532_v49 = vld [vmem:[%s7576_s21 + $0x910] sm:$0xff] }
  0xba   : > { %v540_v50 = vld [vmem:[%s7576_s21 + $0x950] sm:$0xff] }
  0xbe   : > { %5066 = vmatpush1.bf16.xpose.msra.mxu0 %v5065_v63  ;;  %v5085_v63 = vpack.c.bf16 %v474_v56, %v466_v55  ;;  %v5101_v55 = vpack.c.bf16 %v284_v48, %v276_v47  ;;  %v5357_v56 = vpack.c.bf16 %v540_v50, %v532_v49 }
  0xbf   : > { %5068 = vmatprep.subr.bf16.mxu0 %v5067_v1  ;;  %v5087_v1 = vpack.c.bf16 %v491_v60, %v483_v59  ;;  %v292_v59 = vld [vmem:[%s7576_s21 + $0x190] sm:$0xff] }
  0xc0   : > { %5322 = vmatpush1.bf16.xpose.msra.mxu1 %v5321_v0  ;;  %v5341_v0 = vpack.c.bf16 %v730_v58, %v722_v57  ;;  %v300_v60 = vld [vmem:[%s7576_s21 + $0x1d0] sm:$0xff] }
  0xc1   : > { %5324 = vmatprep.subr.bf16.mxu1 %v5323_v2  ;;  %v5343_v2 = vpack.c.bf16 %v747_v62, %v739_v61  ;;  %v548_v61 = vld [vmem:[%s7576_s21 + $0x990] sm:$0xff] }
  0xc2   : > { %v556_v62 = vld [vmem:[%s7576_s21 + $0x9d0] sm:$0xff] }
  0xc6   : > { %5070 = vmatpush1.bf16.xpose.msra.mxu0 %v5069_v13  ;;  %v5089_v13 = vpack.c.bf16 %v490_v5, %v482_v4  ;;  %v5105_v4 = vpack.c.bf16 %v300_v60, %v292_v59  ;;  %v5361_v5 = vpack.c.bf16 %v556_v62, %v548_v61 }
  0xc7   : > { %5072 = vmatprep.subr.bf16.mxu0 %v5071_v15  ;;  %v5091_v15 = vpack.c.bf16 %v253_v9, %v245_v8  ;;  %v308_v8 = vld [vmem:[%s7576_s21 + $0x210] sm:$0xff] }
  0xc8   : > { %5326 = vmatpush1.bf16.xpose.msra.mxu1 %v5325_v14  ;;  %v5345_v14 = vpack.c.bf16 %v746_v7, %v738_v6  ;;  %v316_v9 = vld [vmem:[%s7576_s21 + $0x250] sm:$0xff] }
  0xc9   : > { %5328 = vmatprep.subr.bf16.mxu1 %v5327_v16  ;;  %v5347_v16 = vpack.c.bf16 %v509_v11, %v501_v10  ;;  %v564_v10 = vld [vmem:[%s7576_s21 + $0xa10] sm:$0xff] }
  0xca   : > { %v572_v11 = vld [vmem:[%s7576_s21 + $0xa50] sm:$0xff] }
  0xce   : > { %5074 = vmatpush1.bf16.xpose.msra.mxu0 %v5073_v27  ;;  %v7741_v27 = vrot.slane %v7639_v17, %v7728_v19 }
  0xcf   : > { %5076 = vmatprep.subr.bf16.mxu0 %v5075_v29  ;;  %v525_v29 = vld [vmem:[%s7576_s21 + $0x8d8] sm:$0xff] }
  0xd0   : > { %5330 = vmatpush1.bf16.xpose.msra.mxu1 %v5329_v28  ;;  %v517_v28 = vld [vmem:[%s7576_s21 + $0x898] sm:$0xff] }
  0xd1   : > { %5332 = vmatprep.subr.bf16.mxu1 %v5331_v30  ;;  %v5093_v30 = vpack.c.bf16 %v252_v21, %v244_v20  ;;  %v5351_v33 = vpack.c.bf16 %v525_v29, %v517_v28  ;;  %v5109_v20 = vpack.c.bf16 %v316_v9, %v308_v8  ;;  %v5365_v21 = vpack.c.bf16 %v572_v11, %v564_v10  ;;  %v580_v28 = vld [vmem:[%s7576_s21 + $0xa90] sm:$0xff] }
  0xd2   : > { %v588_v29 = vld [vmem:[%s7576_s21 + $0xad0] sm:$0xff] }
  0xd3   : > { %v5369_v36 = vpack.c.bf16 %v588_v29, %v580_v28 }
  0xd6   : > { %5078 = vmatpush1.bf16.xpose.msra.mxu0 %v5077_v39  ;;  %v277_v39 = vld [vmem:[%s7576_s21 + $0x118] sm:$0xff] }
  0xd7   : > { %5080 = vmatprep.subr.bf16.mxu0 %v5079_v41  ;;  %v533_v41 = vld [vmem:[%s7576_s21 + $0x918] sm:$0xff] }
  0xd8   : > { %5334 = vmatpush1.bf16.xpose.msra.mxu1 %v5333_v40  ;;  %v285_v40 = vld [vmem:[%s7576_s21 + $0x158] sm:$0xff] }
  0xd9   : > { %5336 = vmatprep.subr.bf16.mxu1 %v5335_v42  ;;  %v541_v42 = vld [vmem:[%s7576_s21 + $0x958] sm:$0xff]  ;;  %v5099_v45 = vpack.c.bf16 %v285_v40, %v277_v39  ;;  %v340_v39 = vld [vmem:[%s7576_s21 + $0x310] sm:$0xff] }
  0xda   : > { %v5355_v46 = vpack.c.bf16 %v541_v42, %v533_v41  ;;  %v348_v40 = vld [vmem:[%s7576_s21 + $0x350] sm:$0xff] }
  0xdb   : > { %v596_v41 = vld [vmem:[%s7576_s21 + $0xb10] sm:$0xff]  ;;  %v5117_v47 = vpack.c.bf16 %v348_v40, %v340_v39 }
  0xdc   : > { %v604_v42 = vld [vmem:[%s7576_s21 + $0xb50] sm:$0xff] }
  0xdd   : > { %v5373_v48 = vpack.c.bf16 %v604_v42, %v596_v41 }
  0xde   : > { %5082 = vmatpush1.bf16.xpose.msra.mxu0 %v5081_v51  ;;  %v293_v51 = vld [vmem:[%s7576_s21 + $0x198] sm:$0xff] }
  0xdf   : > { %5084 = vmatprep.subr.bf16.mxu0 %v5083_v53  ;;  %v549_v53 = vld [vmem:[%s7576_s21 + $0x998] sm:$0xff] }
  0xe0   : > { %5338 = vmatpush1.bf16.xpose.msra.mxu1 %v5337_v52  ;;  %v301_v52 = vld [vmem:[%s7576_s21 + $0x1d8] sm:$0xff] }
  0xe1   : > { %5340 = vmatprep.subr.bf16.mxu1 %v5339_v54  ;;  %v557_v54 = vld [vmem:[%s7576_s21 + $0x9d8] sm:$0xff]  ;;  %v5103_v57 = vpack.c.bf16 %v301_v52, %v293_v51  ;;  %v356_v51 = vld [vmem:[%s7576_s21 + $0x390] sm:$0xff] }
  0xe2   : > { %v5359_v58 = vpack.c.bf16 %v557_v54, %v549_v53  ;;  %v364_v52 = vld [vmem:[%s7576_s21 + $0x3d0] sm:$0xff] }
  0xe3   : > { %v612_v53 = vld [vmem:[%s7576_s21 + $0xb90] sm:$0xff]  ;;  %v5121_v59 = vpack.c.bf16 %v364_v52, %v356_v51 }
  0xe4   : > { %v620_v54 = vld [vmem:[%s7576_s21 + $0xbd0] sm:$0xff] }
  0xe5   : > { %v5377_v60 = vpack.c.bf16 %v620_v54, %v612_v53 }
  0xe6   : > { %5086 = vmatpush1.bf16.xpose.msra.mxu0 %v5085_v63  ;;  %v309_v63 = vld [vmem:[%s7576_s21 + $0x218] sm:$0xff] }
  0xe7   : > { %5088 = vmatprep.subr.bf16.mxu0 %v5087_v1  ;;  %v565_v1 = vld [vmem:[%s7576_s21 + $0xa18] sm:$0xff] }
  0xe8   : > { %5342 = vmatpush1.bf16.xpose.msra.mxu1 %v5341_v0  ;;  %v317_v0 = vld [vmem:[%s7576_s21 + $0x258] sm:$0xff] }
  0xe9   : > { %5344 = vmatprep.subr.bf16.mxu1 %v5343_v2  ;;  %v573_v2 = vld [vmem:[%s7576_s21 + $0xa58] sm:$0xff]  ;;  %v5107_v6 = vpack.c.bf16 %v317_v0, %v309_v63  ;;  %v372_v63 = vld [vmem:[%s7576_s21 + $0x410] sm:$0xff] }
  0xea   : > { %v5363_v7 = vpack.c.bf16 %v573_v2, %v565_v1  ;;  %v380_v0 = vld [vmem:[%s7576_s21 + $0x450] sm:$0xff] }
  0xeb   : > { %v628_v1 = vld [vmem:[%s7576_s21 + $0xc10] sm:$0xff]  ;;  %v5125_v8 = vpack.c.bf16 %v380_v0, %v372_v63 }
  0xec   : > { %v636_v2 = vld [vmem:[%s7576_s21 + $0xc50] sm:$0xff] }
  0xed   : > { %v5381_v9 = vpack.c.bf16 %v636_v2, %v628_v1 }
  0xee   : > { %5090 = vmatpush1.bf16.xpose.msra.mxu0 %v5089_v13  ;;  %v325_v13 = vld [vmem:[%s7576_s21 + $0x298] sm:$0xff] }
  0xef   : > { %5092 = vmatprep.subr.bf16.mxu0 %v5091_v15  ;;  %v581_v15 = vld [vmem:[%s7576_s21 + $0xa98] sm:$0xff] }
  0xf0   : > { %5346 = vmatpush1.bf16.xpose.msra.mxu1 %v5345_v14  ;;  %v333_v14 = vld [vmem:[%s7576_s21 + $0x2d8] sm:$0xff] }
  0xf1   : > { %5348 = vmatprep.subr.bf16.mxu1 %v5347_v16  ;;  %v589_v16 = vld [vmem:[%s7576_s21 + $0xad8] sm:$0xff]  ;;  %v5111_v22 = vpack.c.bf16 %v333_v14, %v325_v13  ;;  %v388_v13 = vld [vmem:[%s7576_s21 + $0x490] sm:$0xff] }
  0xf2   : > { %v5367_v23 = vpack.c.bf16 %v589_v16, %v581_v15  ;;  %v396_v14 = vld [vmem:[%s7576_s21 + $0x4d0] sm:$0xff] }
  0xf3   : > { %v644_v15 = vld [vmem:[%s7576_s21 + $0xc90] sm:$0xff]  ;;  %v5129_v24 = vpack.c.bf16 %v396_v14, %v388_v13 }
  0xf4   : > { %v652_v16 = vld [vmem:[%s7576_s21 + $0xcd0] sm:$0xff] }
  0xf5   : > { %2480 = vmatmul.mubr.f32.vlgmr.msra.gmra.mrb[0].mxu0 %v7741_v27  ;;  %v5385_v25 = vpack.c.bf16 %v652_v16, %v644_v15 }
  0xf6   : > { %5094 = vmatpush1.bf16.xpose.msra.mxu0 %v5093_v30  ;;  %2550 = vmatprep.mubr.f32.mxu0 %v7747_v34  ;;  %v341_v30 = vld [vmem:[%s7576_s21 + $0x318] sm:$0xff] }
  0xf7   : > { %2764 = vmatmul.mubr.f32.vlgmr.msra.gmra.mrb[0].mxu1 %v7741_v27  ;;  %5096 = vmatprep.subr.bf16.mxu0 %v5095_v32  ;;  %v597_v32 = vld [vmem:[%s7576_s21 + $0xb18] sm:$0xff] }
  0xf8   : > { %5350 = vmatpush1.bf16.xpose.msra.mxu1 %v5349_v31  ;;  %2834 = vmatprep.mubr.f32.mxu1 %v7747_v34  ;;  %v349_v31 = vld [vmem:[%s7576_s21 + $0x358] sm:$0xff] }
  0xf9   : > { %5352 = vmatprep.subr.bf16.mxu1 %v5351_v33  ;;  %v605_v33 = vld [vmem:[%s7576_s21 + $0xb58] sm:$0xff]  ;;  %v5115_v37 = vpack.c.bf16 %v349_v31, %v341_v30  ;;  %v404_v30 = vld [vmem:[%s7576_s21 + $0x510] sm:$0xff] }
  0xfa   : > { %v5371_v38 = vpack.c.bf16 %v605_v33, %v597_v32  ;;  %v412_v31 = vld [vmem:[%s7576_s21 + $0x550] sm:$0xff] }
  0xfb   : > { %v660_v32 = vld [vmem:[%s7576_s21 + $0xd10] sm:$0xff]  ;;  %v5133_v39 = vpack.c.bf16 %v412_v31, %v404_v30 }
  0xfc   : > { %v668_v33 = vld [vmem:[%s7576_s21 + $0xd50] sm:$0xff] }
  0xfd   : > { %v5389_v40 = vpack.c.bf16 %v668_v33, %v660_v32 }
  0xfe   : > { %5098 = vmatpush1.bf16.xpose.msra.mxu0 %v5097_v43  ;;  %v357_v43 = vld [vmem:[%s7576_s21 + $0x398] sm:$0xff] }
  0xff   : > { %5100 = vmatprep.subr.bf16.mxu0 %v5099_v45  ;;  %v613_v45 = vld [vmem:[%s7576_s21 + $0xb98] sm:$0xff] }
 0x100   : > { %5354 = vmatpush1.bf16.xpose.msra.mxu1 %v5353_v44  ;;  %v365_v44 = vld [vmem:[%s7576_s21 + $0x3d8] sm:$0xff] }
 0x101   : > { %5356 = vmatprep.subr.bf16.mxu1 %v5355_v46  ;;  %v621_v46 = vld [vmem:[%s7576_s21 + $0xbd8] sm:$0xff]  ;;  %v5119_v49 = vpack.c.bf16 %v365_v44, %v357_v43  ;;  %v420_v43 = vld [vmem:[%s7576_s21 + $0x590] sm:$0xff] }
 0x102   : > { %v5375_v50 = vpack.c.bf16 %v621_v46, %v613_v45  ;;  %v428_v44 = vld [vmem:[%s7576_s21 + $0x5d0] sm:$0xff] }
 0x103   : > { %v676_v45 = vld [vmem:[%s7576_s21 + $0xd90] sm:$0xff]  ;;  %v5137_v51 = vpack.c.bf16 %v428_v44, %v420_v43 }
 0x104   : > { %v684_v46 = vld [vmem:[%s7576_s21 + $0xdd0] sm:$0xff] }
 0x105   : > { %v5393_v52 = vpack.c.bf16 %v684_v46, %v676_v45 }
 0x106   : > { %5102 = vmatpush1.bf16.xpose.msra.mxu0 %v5101_v55  ;;  %v373_v55 = vld [vmem:[%s7576_s21 + $0x418] sm:$0xff] }
 0x107   : > { %5104 = vmatprep.subr.bf16.mxu0 %v5103_v57  ;;  %v629_v57 = vld [vmem:[%s7576_s21 + $0xc18] sm:$0xff] }
 0x108   : > { %5358 = vmatpush1.bf16.xpose.msra.mxu1 %v5357_v56  ;;  %v381_v56 = vld [vmem:[%s7576_s21 + $0x458] sm:$0xff] }
 0x109   : > { %5360 = vmatprep.subr.bf16.mxu1 %v5359_v58  ;;  %v637_v58 = vld [vmem:[%s7576_s21 + $0xc58] sm:$0xff]  ;;  %v5123_v61 = vpack.c.bf16 %v381_v56, %v373_v55  ;;  %v436_v55 = vld [vmem:[%s7576_s21 + $0x610] sm:$0xff] }
 0x10a   : > { %v5379_v62 = vpack.c.bf16 %v637_v58, %v629_v57  ;;  %v444_v56 = vld [vmem:[%s7576_s21 + $0x650] sm:$0xff] }
 0x10b   : > { %v692_v57 = vld [vmem:[%s7576_s21 + $0xe10] sm:$0xff]  ;;  %v5141_v63 = vpack.c.bf16 %v444_v56, %v436_v55  ;;  %v519_v56 = vld [vmem:[%s7576_s21 + $0x8a8] sm:$0xff] }
 0x10c   : > { %v700_v58 = vld [vmem:[%s7576_s21 + $0xe50] sm:$0xff] }
 0x10d   : > { %v5397_v0 = vpack.c.bf16 %v700_v58, %v692_v57  ;;  %v527_v57 = vld [vmem:[%s7576_s21 + $0x8e8] sm:$0xff] }
 0x10e   : > { %5106 = vmatpush1.bf16.xpose.msra.mxu0 %v5105_v4  ;;  %v389_v4 = vld [vmem:[%s7576_s21 + $0x498] sm:$0xff] }
 0x10f   : > { %5108 = vmatprep.subr.bf16.mxu0 %v5107_v6  ;;  %v645_v6 = vld [vmem:[%s7576_s21 + $0xc98] sm:$0xff] }
 0x110   : > { %5362 = vmatpush1.bf16.xpose.msra.mxu1 %v5361_v5  ;;  %v397_v5 = vld [vmem:[%s7576_s21 + $0x4d8] sm:$0xff] }
 0x111   : > { %5364 = vmatprep.subr.bf16.mxu1 %v5363_v7  ;;  %v653_v7 = vld [vmem:[%s7576_s21 + $0xcd8] sm:$0xff]  ;;  %v5127_v10 = vpack.c.bf16 %v397_v5, %v389_v4  ;;  %v452_v4 = vld [vmem:[%s7576_s21 + $0x690] sm:$0xff] }
 0x112   : > { %v5383_v11 = vpack.c.bf16 %v653_v7, %v645_v6  ;;  %v460_v5 = vld [vmem:[%s7576_s21 + $0x6d0] sm:$0xff] }
 0x113   : > { %v708_v6 = vld [vmem:[%s7576_s21 + $0xe90] sm:$0xff]  ;;  %v5145_v13 = vpack.c.bf16 %v460_v5, %v452_v4  ;;  %v279_v4 = vld [vmem:[%s7576_s21 + $0x128] sm:$0xff] }
 0x114   : > { %v716_v7 = vld [vmem:[%s7576_s21 + $0xed0] sm:$0xff]  ;;  %v287_v5 = vld [vmem:[%s7576_s21 + $0x168] sm:$0xff] }
 0x115   : > { %v5401_v14 = vpack.c.bf16 %v716_v7, %v708_v6  ;;  %v543_v6 = vld [vmem:[%s7576_s21 + $0x968] sm:$0xff] }
 0x116   : > { %5110 = vmatpush1.bf16.xpose.msra.mxu0 %v5109_v20  ;;  %v405_v20 = vld [vmem:[%s7576_s21 + $0x518] sm:$0xff] }
 0x117   : > { %5112 = vmatprep.subr.bf16.mxu0 %v5111_v22  ;;  %v661_v22 = vld [vmem:[%s7576_s21 + $0xd18] sm:$0xff] }
 0x118   : > { %5366 = vmatpush1.bf16.xpose.msra.mxu1 %v5365_v21  ;;  %v413_v21 = vld [vmem:[%s7576_s21 + $0x558] sm:$0xff] }
 0x119   : > { %5368 = vmatprep.subr.bf16.mxu1 %v5367_v23  ;;  %v669_v23 = vld [vmem:[%s7576_s21 + $0xd58] sm:$0xff]  ;;  %v5131_v28 = vpack.c.bf16 %v413_v21, %v405_v20  ;;  %v468_v20 = vld [vmem:[%s7576_s21 + $0x710] sm:$0xff] }
 0x11a   : > { %v5387_v29 = vpack.c.bf16 %v669_v23, %v661_v22  ;;  %v476_v21 = vld [vmem:[%s7576_s21 + $0x750] sm:$0xff] }
 0x11b   : > { %v724_v22 = vld [vmem:[%s7576_s21 + $0xf10] sm:$0xff]  ;;  %v5149_v30 = vpack.c.bf16 %v476_v21, %v468_v20  ;;  %v303_v20 = vld [vmem:[%s7576_s21 + $0x1e8] sm:$0xff] }
 0x11c   : > { %v732_v23 = vld [vmem:[%s7576_s21 + $0xf50] sm:$0xff]  ;;  %v551_v21 = vld [vmem:[%s7576_s21 + $0x9a8] sm:$0xff] }
 0x11d   : > { %v5405_v31 = vpack.c.bf16 %v732_v23, %v724_v22  ;;  %v559_v22 = vld [vmem:[%s7576_s21 + $0x9e8] sm:$0xff] }
 0x11e   : > { %5114 = vmatpush1.bf16.xpose.msra.mxu0 %v5113_v35  ;;  %v421_v35 = vld [vmem:[%s7576_s21 + $0x598] sm:$0xff] }
 0x11f   : > { %5116 = vmatprep.subr.bf16.mxu0 %v5115_v37  ;;  %v677_v37 = vld [vmem:[%s7576_s21 + $0xd98] sm:$0xff] }
 0x120   : > { %5370 = vmatpush1.bf16.xpose.msra.mxu1 %v5369_v36  ;;  %v429_v36 = vld [vmem:[%s7576_s21 + $0x5d8] sm:$0xff] }
 0x121   : > { %5372 = vmatprep.subr.bf16.mxu1 %v5371_v38  ;;  %v685_v38 = vld [vmem:[%s7576_s21 + $0xdd8] sm:$0xff]  ;;  %v5135_v41 = vpack.c.bf16 %v429_v36, %v421_v35  ;;  %v484_v35 = vld [vmem:[%s7576_s21 + $0x790] sm:$0xff] }
 0x122   : > { %v5391_v42 = vpack.c.bf16 %v685_v38, %v677_v37  ;;  %v492_v36 = vld [vmem:[%s7576_s21 + $0x7d0] sm:$0xff] }
 0x123   : > { %v740_v37 = vld [vmem:[%s7576_s21 + $0xf90] sm:$0xff]  ;;  %v5153_v43 = vpack.c.bf16 %v492_v36, %v484_v35  ;;  %v319_v35 = vld [vmem:[%s7576_s21 + $0x268] sm:$0xff] }
 0x124   : > { %v748_v38 = vld [vmem:[%s7576_s21 + $0xfd0] sm:$0xff]  ;;  %v567_v36 = vld [vmem:[%s7576_s21 + $0xa28] sm:$0xff] }
 0x125   : > { %v5409_v44 = vpack.c.bf16 %v748_v38, %v740_v37  ;;  %v575_v37 = vld [vmem:[%s7576_s21 + $0xa68] sm:$0xff] }
 0x126   : > { %5118 = vmatpush1.bf16.xpose.msra.mxu0 %v5117_v47  ;;  %v437_v47 = vld [vmem:[%s7576_s21 + $0x618] sm:$0xff] }
 0x127   : > { %5120 = vmatprep.subr.bf16.mxu0 %v5119_v49  ;;  %v693_v49 = vld [vmem:[%s7576_s21 + $0xe18] sm:$0xff] }
 0x128   : > { %5374 = vmatpush1.bf16.xpose.msra.mxu1 %v5373_v48  ;;  %v445_v48 = vld [vmem:[%s7576_s21 + $0x658] sm:$0xff] }
 0x129   : > { %5376 = vmatprep.subr.bf16.mxu1 %v5375_v50  ;;  %v701_v50 = vld [vmem:[%s7576_s21 + $0xe58] sm:$0xff]  ;;  %v5139_v53 = vpack.c.bf16 %v445_v48, %v437_v47  ;;  %v7874_v47 = vsub.s32 2, %v7626_v3  ;;  %v246_v48 = vld [vmem:[%s7576_s21 + $0x20] sm:$0xff] }
 0x12a   : > { %v5395_v54 = vpack.c.bf16 %v701_v50, %v693_v49  ;;  %v254_v49 = vld [vmem:[%s7576_s21 + $0x60] sm:$0xff] }
 0x12b   : > { %v502_v50 = vld [vmem:[%s7576_s21 + $0x820] sm:$0xff]  ;;  %v7887_v55 = vrot.slane %v7639_v17, %v7874_v47  ;;  %v5157_v58 = vpack.c.bf16 %v254_v49, %v246_v48  ;;  %v335_v48 = vld [vmem:[%s7576_s21 + $0x2e8] sm:$0xff] }
 0x12c   : > { %v583_v49 = vld [vmem:[%s7576_s21 + $0xaa8] sm:$0xff] }
 0x12e   : > { %5122 = vmatpush1.bf16.xpose.msra.mxu0 %v5121_v59  ;;  %v453_v59 = vld [vmem:[%s7576_s21 + $0x698] sm:$0xff] }
 0x12f   : > { %5124 = vmatprep.subr.bf16.mxu0 %v5123_v61  ;;  %v709_v61 = vld [vmem:[%s7576_s21 + $0xe98] sm:$0xff] }
 0x130   : > { %5378 = vmatpush1.bf16.xpose.msra.mxu1 %v5377_v60  ;;  %v461_v60 = vld [vmem:[%s7576_s21 + $0x6d8] sm:$0xff] }
 0x131   : > { %5380 = vmatprep.subr.bf16.mxu1 %v5379_v62  ;;  %v717_v62 = vld [vmem:[%s7576_s21 + $0xed8] sm:$0xff]  ;;  %v5143_v1 = vpack.c.bf16 %v461_v60, %v453_v59 }
 0x132   : > { %v5399_v2 = vpack.c.bf16 %v717_v62, %v709_v61  ;;  %v5415_v61 = vpack.c.bf16 %v527_v57, %v519_v56  ;;  %v326_v57 = vld [vmem:[%s7576_s21 + $0x2a0] sm:$0xff] }
 0x136   : > { %5126 = vmatpush1.bf16.xpose.msra.mxu0 %v5125_v8  ;;  %v469_v8 = vld [vmem:[%s7576_s21 + $0x718] sm:$0xff] }
 0x137   : > { %5128 = vmatprep.subr.bf16.mxu0 %v5127_v10  ;;  %v725_v10 = vld [vmem:[%s7576_s21 + $0xf18] sm:$0xff] }
 0x138   : > { %5382 = vmatpush1.bf16.xpose.msra.mxu1 %v5381_v9  ;;  %v477_v9 = vld [vmem:[%s7576_s21 + $0x758] sm:$0xff] }
 0x139   : > { %5384 = vmatprep.subr.bf16.mxu1 %v5383_v11  ;;  %v733_v11 = vld [vmem:[%s7576_s21 + $0xf58] sm:$0xff]  ;;  %v5147_v15 = vpack.c.bf16 %v477_v9, %v469_v8  ;;  %v5163_v9 = vpack.c.bf16 %v287_v5, %v279_v4 }
 0x13a   : > { %v5403_v16 = vpack.c.bf16 %v733_v11, %v725_v10  ;;  %v278_v11 = vld [vmem:[%s7576_s21 + $0x120] sm:$0xff] }
 0x13e   : > { %5130 = vmatpush1.bf16.xpose.msra.mxu0 %v5129_v24  ;;  %v485_v24 = vld [vmem:[%s7576_s21 + $0x798] sm:$0xff] }
 0x13f   : > { %5132 = vmatprep.subr.bf16.mxu0 %v5131_v28  ;;  %v741_v28 = vld [vmem:[%s7576_s21 + $0xf98] sm:$0xff] }
 0x140   : > { %5386 = vmatpush1.bf16.xpose.msra.mxu1 %v5385_v25  ;;  %v493_v25 = vld [vmem:[%s7576_s21 + $0x7d8] sm:$0xff] }
 0x141   : > { %5388 = vmatprep.subr.bf16.mxu1 %v5387_v29  ;;  %v749_v29 = vld [vmem:[%s7576_s21 + $0xfd8] sm:$0xff]  ;;  %v5151_v32 = vpack.c.bf16 %v493_v25, %v485_v24 }
 0x142   : > { %v5407_v33 = vpack.c.bf16 %v749_v29, %v741_v28  ;;  %v5423_v28 = vpack.c.bf16 %v559_v22, %v551_v21  ;;  %v294_v29 = vld [vmem:[%s7576_s21 + $0x1a0] sm:$0xff] }
 0x143   : > { %v358_v22 = vld [vmem:[%s7576_s21 + $0x3a0] sm:$0xff] }
 0x146   : > { %5134 = vmatpush1.bf16.xpose.msra.mxu0 %v5133_v39  ;;  %v247_v39 = vld [vmem:[%s7576_s21 + $0x28] sm:$0xff] }
 0x147   : > { %5136 = vmatprep.subr.bf16.mxu0 %v5135_v41  ;;  %v503_v41 = vld [vmem:[%s7576_s21 + $0x828] sm:$0xff] }
 0x148   : > { %5390 = vmatpush1.bf16.xpose.msra.mxu1 %v5389_v40  ;;  %v255_v40 = vld [vmem:[%s7576_s21 + $0x68] sm:$0xff] }
 0x149   : > { %5392 = vmatprep.subr.bf16.mxu1 %v5391_v42  ;;  %v511_v42 = vld [vmem:[%s7576_s21 + $0x868] sm:$0xff]  ;;  %v5155_v45 = vpack.c.bf16 %v255_v40, %v247_v39 }
 0x14a   : > { %v5411_v46 = vpack.c.bf16 %v511_v42, %v503_v41  ;;  %v5427_v41 = vpack.c.bf16 %v575_v37, %v567_v36  ;;  %v310_v42 = vld [vmem:[%s7576_s21 + $0x220] sm:$0xff] }
 0x14b   : > { %v374_v37 = vld [vmem:[%s7576_s21 + $0x420] sm:$0xff] }
 0x14e   : > { %5138 = vmatpush1.bf16.xpose.msra.mxu0 %v5137_v51  ;;  %v510_v51 = vld [vmem:[%s7576_s21 + $0x860] sm:$0xff] }
 0x14f   : > { %5140 = vmatprep.subr.bf16.mxu0 %v5139_v53  ;;  %v271_v53 = vld [vmem:[%s7576_s21 + $0xe8] sm:$0xff]  ;;  %v5413_v59 = vpack.c.bf16 %v510_v51, %v502_v50 }
 0x150   : > { %5394 = vmatpush1.bf16.xpose.msra.mxu1 %v5393_v52  ;;  %v263_v52 = vld [vmem:[%s7576_s21 + $0xa8] sm:$0xff] }
 0x151   : > { %5396 = vmatprep.subr.bf16.mxu1 %v5395_v54  ;;  %v7883_v54 = vsub.s32 5, %v7626_v3  ;;  %v5159_v60 = vpack.c.bf16 %v271_v53, %v263_v52  ;;  %v591_v50 = vld [vmem:[%s7576_s21 + $0xae8] sm:$0xff] }
 0x152   : > { %v5431_v56 = vpack.c.bf16 %v591_v50, %v583_v49  ;;  %v390_v50 = vld [vmem:[%s7576_s21 + $0x4a0] sm:$0xff] }
 0x153   : > { %v7893_v62 = vrot.slane %v7639_v17, %v7883_v54  ;;  %v535_v17 = vld [vmem:[%s7576_s21 + $0x928] sm:$0xff] }
 0x154   : > { %v5419_v10 = vpack.c.bf16 %v543_v6, %v535_v17  ;;  %v342_v6 = vld [vmem:[%s7576_s21 + $0x320] sm:$0xff] }
 0x156   : > { %5142 = vmatpush1.bf16.xpose.msra.mxu0 %v5141_v63  ;;  %v262_v63 = vld [vmem:[%s7576_s21 + $0xa0] sm:$0xff] }
 0x157   : > { %5144 = vmatprep.subr.bf16.mxu0 %v5143_v1  ;;  %v518_v1 = vld [vmem:[%s7576_s21 + $0x8a0] sm:$0xff] }
 0x158   : > { %5398 = vmatpush1.bf16.xpose.msra.mxu1 %v5397_v0  ;;  %v270_v0 = vld [vmem:[%s7576_s21 + $0xe0] sm:$0xff] }
 0x159   : > { %5400 = vmatprep.subr.bf16.mxu1 %v5399_v2  ;;  %v526_v2 = vld [vmem:[%s7576_s21 + $0x8e0] sm:$0xff]  ;;  %v5161_v7 = vpack.c.bf16 %v270_v0, %v262_v63  ;;  %v351_v63 = vld [vmem:[%s7576_s21 + $0x368] sm:$0xff] }
 0x15a   : > { %v5417_v8 = vpack.c.bf16 %v526_v2, %v518_v1  ;;  %v599_v0 = vld [vmem:[%s7576_s21 + $0xb28] sm:$0xff] }
 0x15b   : > { %v607_v1 = vld [vmem:[%s7576_s21 + $0xb68] sm:$0xff] }
 0x15c   : > { %v5435_v17 = vpack.c.bf16 %v607_v1, %v599_v0  ;;  %v406_v1 = vld [vmem:[%s7576_s21 + $0x520] sm:$0xff] }
 0x15e   : > { %5146 = vmatpush1.bf16.xpose.msra.mxu0 %v5145_v13  ;;  %v286_v13 = vld [vmem:[%s7576_s21 + $0x160] sm:$0xff] }
 0x15f   : > { %5148 = vmatprep.subr.bf16.mxu0 %v5147_v15  ;;  %v542_v15 = vld [vmem:[%s7576_s21 + $0x960] sm:$0xff]  ;;  %v5165_v23 = vpack.c.bf16 %v286_v13, %v278_v11  ;;  %v367_v11 = vld [vmem:[%s7576_s21 + $0x3e8] sm:$0xff] }
 0x160   : > { %5402 = vmatpush1.bf16.xpose.msra.mxu1 %v5401_v14  ;;  %v534_v14 = vld [vmem:[%s7576_s21 + $0x920] sm:$0xff]  ;;  %v615_v13 = vld [vmem:[%s7576_s21 + $0xba8] sm:$0xff] }
 0x161   : > { %5404 = vmatprep.subr.bf16.mxu1 %v5403_v16  ;;  %v295_v16 = vld [vmem:[%s7576_s21 + $0x1a8] sm:$0xff]  ;;  %v5421_v24 = vpack.c.bf16 %v542_v15, %v534_v14 }
 0x162   : > { %v5167_v25 = vpack.c.bf16 %v303_v20, %v295_v16  ;;  %v623_v14 = vld [vmem:[%s7576_s21 + $0xbe8] sm:$0xff] }
 0x163   : > { %v5439_v21 = vpack.c.bf16 %v623_v14, %v615_v13  ;;  %v422_v14 = vld [vmem:[%s7576_s21 + $0x5a0] sm:$0xff] }
 0x166   : > { %5150 = vmatpush1.bf16.xpose.msra.mxu0 %v5149_v30  ;;  %v302_v30 = vld [vmem:[%s7576_s21 + $0x1e0] sm:$0xff] }
 0x167   : > { %5152 = vmatprep.subr.bf16.mxu0 %v5151_v32  ;;  %v558_v32 = vld [vmem:[%s7576_s21 + $0x9e0] sm:$0xff]  ;;  %v5169_v38 = vpack.c.bf16 %v302_v30, %v294_v29  ;;  %v383_v29 = vld [vmem:[%s7576_s21 + $0x468] sm:$0xff] }
 0x168   : > { %5406 = vmatpush1.bf16.xpose.msra.mxu1 %v5405_v31  ;;  %v550_v31 = vld [vmem:[%s7576_s21 + $0x9a0] sm:$0xff]  ;;  %v631_v30 = vld [vmem:[%s7576_s21 + $0xc28] sm:$0xff] }
 0x169   : > { %5408 = vmatprep.subr.bf16.mxu1 %v5407_v33  ;;  %v311_v33 = vld [vmem:[%s7576_s21 + $0x228] sm:$0xff]  ;;  %v5425_v39 = vpack.c.bf16 %v558_v32, %v550_v31 }
 0x16a   : > { %v5171_v40 = vpack.c.bf16 %v319_v35, %v311_v33  ;;  %v639_v31 = vld [vmem:[%s7576_s21 + $0xc68] sm:$0xff] }
 0x16b   : > { %v5443_v36 = vpack.c.bf16 %v639_v31, %v631_v30  ;;  %v438_v31 = vld [vmem:[%s7576_s21 + $0x620] sm:$0xff] }
 0x16e   : > { %5154 = vmatpush1.bf16.xpose.msra.mxu0 %v5153_v43  ;;  %v318_v43 = vld [vmem:[%s7576_s21 + $0x260] sm:$0xff] }
 0x16f   : > { %5156 = vmatprep.subr.bf16.mxu0 %v5155_v45  ;;  %v574_v45 = vld [vmem:[%s7576_s21 + $0xa60] sm:$0xff]  ;;  %v5173_v51 = vpack.c.bf16 %v318_v43, %v310_v42  ;;  %v399_v42 = vld [vmem:[%s7576_s21 + $0x4e8] sm:$0xff] }
 0x170   : > { %5410 = vmatpush1.bf16.xpose.msra.mxu1 %v5409_v44  ;;  %v566_v44 = vld [vmem:[%s7576_s21 + $0xa20] sm:$0xff]  ;;  %v647_v43 = vld [vmem:[%s7576_s21 + $0xca8] sm:$0xff] }
 0x171   : > { %5412 = vmatprep.subr.bf16.mxu1 %v5411_v46  ;;  %v327_v46 = vld [vmem:[%s7576_s21 + $0x2a8] sm:$0xff]  ;;  %v5429_v52 = vpack.c.bf16 %v574_v45, %v566_v44 }
 0x172   : > { %v5175_v53 = vpack.c.bf16 %v335_v48, %v327_v46  ;;  %v655_v44 = vld [vmem:[%s7576_s21 + $0xce8] sm:$0xff] }
 0x173   : > { %v5447_v49 = vpack.c.bf16 %v655_v44, %v647_v43  ;;  %v454_v44 = vld [vmem:[%s7576_s21 + $0x6a0] sm:$0xff] }
 0x175   : > { %2551 = vmatmul.mubr.f32.vlgmr.msra.gmra.mrb[0].mxu0 %v7887_v55 }
 0x176   : > { %5158 = vmatpush1.bf16.xpose.msra.mxu0 %v5157_v58  ;;  %2621 = vmatprep.mubr.f32.mxu0 %v7893_v62  ;;  %v334_v58 = vld [vmem:[%s7576_s21 + $0x2e0] sm:$0xff] }
 0x177   : > { %2835 = vmatmul.mubr.f32.vlgmr.msra.gmra.mrb[0].mxu1 %v7887_v55  ;;  %5160 = vmatprep.subr.bf16.mxu0 %v5159_v60  ;;  %v590_v60 = vld [vmem:[%s7576_s21 + $0xae0] sm:$0xff]  ;;  %v5177_v2 = vpack.c.bf16 %v334_v58, %v326_v57  ;;  %v415_v57 = vld [vmem:[%s7576_s21 + $0x568] sm:$0xff] }
 0x178   : > { %5414 = vmatpush1.bf16.xpose.msra.mxu1 %v5413_v59  ;;  %2905 = vmatprep.mubr.f32.mxu1 %v7893_v62  ;;  %v582_v59 = vld [vmem:[%s7576_s21 + $0xaa0] sm:$0xff]  ;;  %v663_v58 = vld [vmem:[%s7576_s21 + $0xd28] sm:$0xff] }
 0x179   : > { %5416 = vmatprep.subr.bf16.mxu1 %v5415_v61  ;;  %v343_v61 = vld [vmem:[%s7576_s21 + $0x328] sm:$0xff]  ;;  %v5433_v4 = vpack.c.bf16 %v590_v60, %v582_v59 }
 0x17a   : > { %v5179_v5 = vpack.c.bf16 %v351_v63, %v343_v61  ;;  %v671_v59 = vld [vmem:[%s7576_s21 + $0xd68] sm:$0xff] }
 0x17b   : > { %v5451_v0 = vpack.c.bf16 %v671_v59, %v663_v58  ;;  %v470_v59 = vld [vmem:[%s7576_s21 + $0x720] sm:$0xff] }
 0x17e   : > { %5162 = vmatpush1.bf16.xpose.msra.mxu0 %v5161_v7  ;;  %v350_v7 = vld [vmem:[%s7576_s21 + $0x360] sm:$0xff] }
 0x17f   : > { %5164 = vmatprep.subr.bf16.mxu0 %v5163_v9  ;;  %v606_v9 = vld [vmem:[%s7576_s21 + $0xb60] sm:$0xff]  ;;  %v5181_v15 = vpack.c.bf16 %v350_v7, %v342_v6  ;;  %v431_v6 = vld [vmem:[%s7576_s21 + $0x5e8] sm:$0xff] }
 0x180   : > { %5418 = vmatpush1.bf16.xpose.msra.mxu1 %v5417_v8  ;;  %v598_v8 = vld [vmem:[%s7576_s21 + $0xb20] sm:$0xff]  ;;  %v679_v7 = vld [vmem:[%s7576_s21 + $0xda8] sm:$0xff] }
 0x181   : > { %5420 = vmatprep.subr.bf16.mxu1 %v5419_v10  ;;  %v359_v10 = vld [vmem:[%s7576_s21 + $0x3a8] sm:$0xff]  ;;  %v5437_v16 = vpack.c.bf16 %v606_v9, %v598_v8 }
 0x182   : > { %v5183_v20 = vpack.c.bf16 %v367_v11, %v359_v10  ;;  %v687_v8 = vld [vmem:[%s7576_s21 + $0xde8] sm:$0xff] }
 0x183   : > { %v5455_v13 = vpack.c.bf16 %v687_v8, %v679_v7  ;;  %v486_v8 = vld [vmem:[%s7576_s21 + $0x7a0] sm:$0xff] }
 0x186   : > { %5166 = vmatpush1.bf16.xpose.msra.mxu0 %v5165_v23  ;;  %v366_v23 = vld [vmem:[%s7576_s21 + $0x3e0] sm:$0xff] }
 0x187   : > { %5168 = vmatprep.subr.bf16.mxu0 %v5167_v25  ;;  %v622_v25 = vld [vmem:[%s7576_s21 + $0xbe0] sm:$0xff]  ;;  %v5185_v32 = vpack.c.bf16 %v366_v23, %v358_v22  ;;  %v447_v22 = vld [vmem:[%s7576_s21 + $0x668] sm:$0xff] }
 0x188   : > { %5422 = vmatpush1.bf16.xpose.msra.mxu1 %v5421_v24  ;;  %v614_v24 = vld [vmem:[%s7576_s21 + $0xba0] sm:$0xff]  ;;  %v695_v23 = vld [vmem:[%s7576_s21 + $0xe28] sm:$0xff] }
 0x189   : > { %5424 = vmatprep.subr.bf16.mxu1 %v5423_v28  ;;  %v375_v28 = vld [vmem:[%s7576_s21 + $0x428] sm:$0xff]  ;;  %v5441_v33 = vpack.c.bf16 %v622_v25, %v614_v24 }
 0x18a   : > { %v5187_v35 = vpack.c.bf16 %v383_v29, %v375_v28  ;;  %v703_v24 = vld [vmem:[%s7576_s21 + $0xe68] sm:$0xff] }
 0x18b   : > { %v5459_v30 = vpack.c.bf16 %v703_v24, %v695_v23  ;;  %v8020_v24 = vsub.s32 4, %v7626_v3 }
 0x18e   : > { %5170 = vmatpush1.bf16.xpose.msra.mxu0 %v5169_v38  ;;  %v382_v38 = vld [vmem:[%s7576_s21 + $0x460] sm:$0xff] }
 0x18f   : > { %5172 = vmatprep.subr.bf16.mxu0 %v5171_v40  ;;  %v638_v40 = vld [vmem:[%s7576_s21 + $0xc60] sm:$0xff]  ;;  %v5189_v45 = vpack.c.bf16 %v382_v38, %v374_v37  ;;  %v463_v37 = vld [vmem:[%s7576_s21 + $0x6e8] sm:$0xff] }
 0x190   : > { %5426 = vmatpush1.bf16.xpose.msra.mxu1 %v5425_v39  ;;  %v630_v39 = vld [vmem:[%s7576_s21 + $0xc20] sm:$0xff]  ;;  %v711_v38 = vld [vmem:[%s7576_s21 + $0xea8] sm:$0xff] }
 0x191   : > { %5428 = vmatprep.subr.bf16.mxu1 %v5427_v41  ;;  %v391_v41 = vld [vmem:[%s7576_s21 + $0x4a8] sm:$0xff]  ;;  %v5445_v46 = vpack.c.bf16 %v638_v40, %v630_v39 }
 0x192   : > { %v5191_v48 = vpack.c.bf16 %v399_v42, %v391_v41  ;;  %v719_v39 = vld [vmem:[%s7576_s21 + $0xee8] sm:$0xff] }
 0x193   : > { %v5463_v43 = vpack.c.bf16 %v719_v39, %v711_v38  ;;  %v529_v38 = vld [vmem:[%s7576_s21 + $0x8f8] sm:$0xff] }
 0x196   : > { %5174 = vmatpush1.bf16.xpose.msra.mxu0 %v5173_v51  ;;  %v398_v51 = vld [vmem:[%s7576_s21 + $0x4e0] sm:$0xff] }
 0x197   : > { %5176 = vmatprep.subr.bf16.mxu0 %v5175_v53  ;;  %v654_v53 = vld [vmem:[%s7576_s21 + $0xce0] sm:$0xff]  ;;  %v5193_v60 = vpack.c.bf16 %v398_v51, %v390_v50  ;;  %v479_v50 = vld [vmem:[%s7576_s21 + $0x768] sm:$0xff] }
 0x198   : > { %5430 = vmatpush1.bf16.xpose.msra.mxu1 %v5429_v52  ;;  %v646_v52 = vld [vmem:[%s7576_s21 + $0xca0] sm:$0xff]  ;;  %v727_v51 = vld [vmem:[%s7576_s21 + $0xf28] sm:$0xff] }
 0x199   : > { %5432 = vmatprep.subr.bf16.mxu1 %v5431_v56  ;;  %v407_v56 = vld [vmem:[%s7576_s21 + $0x528] sm:$0xff]  ;;  %v5449_v61 = vpack.c.bf16 %v654_v53, %v646_v52 }
 0x19a   : > { %v5195_v63 = vpack.c.bf16 %v415_v57, %v407_v56  ;;  %v735_v52 = vld [vmem:[%s7576_s21 + $0xf68] sm:$0xff] }
 0x19b   : > { %v5467_v58 = vpack.c.bf16 %v735_v52, %v727_v51  ;;  %v537_v51 = vld [vmem:[%s7576_s21 + $0x938] sm:$0xff] }
 0x19c   : > { %v545_v52 = vld [vmem:[%s7576_s21 + $0x978] sm:$0xff] }
 0x19e   : > { %5178 = vmatpush1.bf16.xpose.msra.mxu0 %v5177_v2  ;;  %v414_v2 = vld [vmem:[%s7576_s21 + $0x560] sm:$0xff] }
 0x19f   : > { %5180 = vmatprep.subr.bf16.mxu0 %v5179_v5  ;;  %v670_v5 = vld [vmem:[%s7576_s21 + $0xd60] sm:$0xff]  ;;  %v5197_v9 = vpack.c.bf16 %v414_v2, %v406_v1  ;;  %v495_v1 = vld [vmem:[%s7576_s21 + $0x7e8] sm:$0xff] }
 0x1a0   : > { %5434 = vmatpush1.bf16.xpose.msra.mxu1 %v5433_v4  ;;  %v662_v4 = vld [vmem:[%s7576_s21 + $0xd20] sm:$0xff]  ;;  %v743_v2 = vld [vmem:[%s7576_s21 + $0xfa8] sm:$0xff] }
 0x1a1   : > { %5436 = vmatprep.subr.bf16.mxu1 %v5435_v17  ;;  %v423_v17 = vld [vmem:[%s7576_s21 + $0x5a8] sm:$0xff]  ;;  %v5453_v10 = vpack.c.bf16 %v670_v5, %v662_v4 }
 0x1a2   : > { %v5199_v11 = vpack.c.bf16 %v431_v6, %v423_v17  ;;  %v751_v4 = vld [vmem:[%s7576_s21 + $0xfe8] sm:$0xff] }
 0x1a3   : > { %v5471_v7 = vpack.c.bf16 %v751_v4, %v743_v2  ;;  %v553_v2 = vld [vmem:[%s7576_s21 + $0x9b8] sm:$0xff] }
 0x1a4   : > { %v561_v4 = vld [vmem:[%s7576_s21 + $0x9f8] sm:$0xff] }
 0x1a6   : > { %5182 = vmatpush1.bf16.xpose.msra.mxu0 %v5181_v15  ;;  %v430_v15 = vld [vmem:[%s7576_s21 + $0x5e0] sm:$0xff] }
 0x1a7   : > { %5184 = vmatprep.subr.bf16.mxu0 %v5183_v20  ;;  %v686_v20 = vld [vmem:[%s7576_s21 + $0xde0] sm:$0xff]  ;;  %v5201_v25 = vpack.c.bf16 %v430_v15, %v422_v14  ;;  %v257_v14 = vld [vmem:[%s7576_s21 + $0x78] sm:$0xff] }
 0x1a8   : > { %5438 = vmatpush1.bf16.xpose.msra.mxu1 %v5437_v16  ;;  %v678_v16 = vld [vmem:[%s7576_s21 + $0xda0] sm:$0xff]  ;;  %v505_v15 = vld [vmem:[%s7576_s21 + $0x838] sm:$0xff] }
 0x1a9   : > { %5440 = vmatprep.subr.bf16.mxu1 %v5439_v21  ;;  %v439_v21 = vld [vmem:[%s7576_s21 + $0x628] sm:$0xff]  ;;  %v5457_v28 = vpack.c.bf16 %v686_v20, %v678_v16  ;;  %v513_v16 = vld [vmem:[%s7576_s21 + $0x878] sm:$0xff] }
 0x1aa   : > { %v5203_v29 = vpack.c.bf16 %v447_v22, %v439_v21  ;;  %v5475_v23 = vpack.c.bf16 %v513_v16, %v505_v15  ;;  %v569_v15 = vld [vmem:[%s7576_s21 + $0xa38] sm:$0xff] }
 0x1ab   : > { %v577_v16 = vld [vmem:[%s7576_s21 + $0xa78] sm:$0xff] }
 0x1ae   : > { %5186 = vmatpush1.bf16.xpose.msra.mxu0 %v5185_v32  ;;  %v446_v32 = vld [vmem:[%s7576_s21 + $0x660] sm:$0xff] }
 0x1af   : > { %5188 = vmatprep.subr.bf16.mxu0 %v5187_v35  ;;  %v702_v35 = vld [vmem:[%s7576_s21 + $0xe60] sm:$0xff]  ;;  %v5205_v40 = vpack.c.bf16 %v446_v32, %v438_v31  ;;  %v265_v31 = vld [vmem:[%s7576_s21 + $0xb8] sm:$0xff] }
 0x1b0   : > { %5442 = vmatpush1.bf16.xpose.msra.mxu1 %v5441_v33  ;;  %v694_v33 = vld [vmem:[%s7576_s21 + $0xe20] sm:$0xff]  ;;  %v273_v32 = vld [vmem:[%s7576_s21 + $0xf8] sm:$0xff] }
 0x1b1   : > { %5444 = vmatprep.subr.bf16.mxu1 %v5443_v36  ;;  %v455_v36 = vld [vmem:[%s7576_s21 + $0x6a8] sm:$0xff]  ;;  %v5461_v41 = vpack.c.bf16 %v702_v35, %v694_v33  ;;  %v8029_v33 = vsub.s32 7, %v7626_v3  ;;  %v8031_v35 = vld [vmem:[#allocation2] sm:$0xff] }
 0x1b2   : > { %v5207_v42 = vpack.c.bf16 %v463_v37, %v455_v36  ;;  %v8035_v36 = vrot.slane %v8031_v35, %v8020_v24  ;;  %v521_v37 = vld [vmem:[%s7576_s21 + $0x8b8] sm:$0xff] }
 0x1b6   : > { %5190 = vmatpush1.bf16.xpose.msra.mxu0 %v5189_v45  ;;  %v462_v45 = vld [vmem:[%s7576_s21 + $0x6e0] sm:$0xff] }
 0x1b7   : > { %5192 = vmatprep.subr.bf16.mxu0 %v5191_v48  ;;  %v718_v48 = vld [vmem:[%s7576_s21 + $0xee0] sm:$0xff]  ;;  %v5209_v53 = vpack.c.bf16 %v462_v45, %v454_v44  ;;  %v264_v44 = vld [vmem:[%s7576_s21 + $0xb0] sm:$0xff] }
 0x1b8   : > { %5446 = vmatpush1.bf16.xpose.msra.mxu1 %v5445_v46  ;;  %v710_v46 = vld [vmem:[%s7576_s21 + $0xea0] sm:$0xff]  ;;  %v272_v45 = vld [vmem:[%s7576_s21 + $0xf0] sm:$0xff] }
 0x1b9   : > { %5448 = vmatprep.subr.bf16.mxu1 %v5447_v49  ;;  %v471_v49 = vld [vmem:[%s7576_s21 + $0x728] sm:$0xff]  ;;  %v5465_v56 = vpack.c.bf16 %v718_v48, %v710_v46  ;;  %v520_v46 = vld [vmem:[%s7576_s21 + $0x8b0] sm:$0xff] }
 0x1ba   : > { %v5211_v57 = vpack.c.bf16 %v479_v50, %v471_v49  ;;  %v528_v48 = vld [vmem:[%s7576_s21 + $0x8f0] sm:$0xff]  ;;  %v281_v49 = vld [vmem:[%s7576_s21 + $0x138] sm:$0xff] }
 0x1bb   : > { %v289_v50 = vld [vmem:[%s7576_s21 + $0x178] sm:$0xff] }
 0x1be   : > { %5194 = vmatpush1.bf16.xpose.msra.mxu0 %v5193_v60  ;;  %v478_v60 = vld [vmem:[%s7576_s21 + $0x760] sm:$0xff] }
 0x1bf   : > { %5196 = vmatprep.subr.bf16.mxu0 %v5195_v63  ;;  %v734_v63 = vld [vmem:[%s7576_s21 + $0xf60] sm:$0xff]  ;;  %v5213_v5 = vpack.c.bf16 %v478_v60, %v470_v59  ;;  %v280_v59 = vld [vmem:[%s7576_s21 + $0x130] sm:$0xff] }
 0x1c0   : > { %5450 = vmatpush1.bf16.xpose.msra.mxu1 %v5449_v61  ;;  %v726_v61 = vld [vmem:[%s7576_s21 + $0xf20] sm:$0xff]  ;;  %v288_v60 = vld [vmem:[%s7576_s21 + $0x170] sm:$0xff] }
 0x1c1   : > { %5452 = vmatprep.subr.bf16.mxu1 %v5451_v0  ;;  %v487_v0 = vld [vmem:[%s7576_s21 + $0x7a8] sm:$0xff]  ;;  %v5469_v17 = vpack.c.bf16 %v734_v63, %v726_v61  ;;  %v536_v61 = vld [vmem:[%s7576_s21 + $0x930] sm:$0xff] }
 0x1c2   : > { %v5215_v6 = vpack.c.bf16 %v495_v1, %v487_v0  ;;  %v544_v63 = vld [vmem:[%s7576_s21 + $0x970] sm:$0xff]  ;;  %v297_v0 = vld [vmem:[%s7576_s21 + $0x1b8] sm:$0xff] }
 0x1c3   : > { %v305_v1 = vld [vmem:[%s7576_s21 + $0x1f8] sm:$0xff] }
 0x1c6   : > { %5198 = vmatpush1.bf16.xpose.msra.mxu0 %v5197_v9  ;;  %v494_v9 = vld [vmem:[%s7576_s21 + $0x7e0] sm:$0xff] }
 0x1c7   : > { %5200 = vmatprep.subr.bf16.mxu0 %v5199_v11  ;;  %v750_v11 = vld [vmem:[%s7576_s21 + $0xfe0] sm:$0xff]  ;;  %v5217_v20 = vpack.c.bf16 %v494_v9, %v486_v8  ;;  %v296_v8 = vld [vmem:[%s7576_s21 + $0x1b0] sm:$0xff] }
 0x1c8   : > { %5454 = vmatpush1.bf16.xpose.msra.mxu1 %v5453_v10  ;;  %v742_v10 = vld [vmem:[%s7576_s21 + $0xfa0] sm:$0xff]  ;;  %v304_v9 = vld [vmem:[%s7576_s21 + $0x1f0] sm:$0xff] }
 0x1c9   : > { %5456 = vmatprep.subr.bf16.mxu1 %v5455_v13  ;;  %v249_v13 = vld [vmem:[%s7576_s21 + $0x38] sm:$0xff]  ;;  %v5473_v21 = vpack.c.bf16 %v750_v11, %v742_v10  ;;  %v552_v10 = vld [vmem:[%s7576_s21 + $0x9b0] sm:$0xff] }
 0x1ca   : > { %v5219_v22 = vpack.c.bf16 %v257_v14, %v249_v13  ;;  %v560_v11 = vld [vmem:[%s7576_s21 + $0x9f0] sm:$0xff]  ;;  %v313_v13 = vld [vmem:[%s7576_s21 + $0x238] sm:$0xff] }
 0x1cb   : > { %v321_v14 = vld [vmem:[%s7576_s21 + $0x278] sm:$0xff] }
 0x1ce   : > { %5202 = vmatpush1.bf16.xpose.msra.mxu0 %v5201_v25  ;;  %v248_v25 = vld [vmem:[%s7576_s21 + $0x30] sm:$0xff] }
 0x1cf   : > { %5204 = vmatprep.subr.bf16.mxu0 %v5203_v29  ;;  %v504_v29 = vld [vmem:[%s7576_s21 + $0x830] sm:$0xff] }
 0x1d0   : > { %5458 = vmatpush1.bf16.xpose.msra.mxu1 %v5457_v28  ;;  %v256_v28 = vld [vmem:[%s7576_s21 + $0x70] sm:$0xff] }
 0x1d1   : > { %5460 = vmatprep.subr.bf16.mxu1 %v5459_v30  ;;  %v512_v30 = vld [vmem:[%s7576_s21 + $0x870] sm:$0xff]  ;;  %v5221_v39 = vpack.c.bf16 %v256_v28, %v248_v25 }
 0x1d2   : > { %v312_v25 = vld [vmem:[%s7576_s21 + $0x230] sm:$0xff] }
 0x1d3   : > { %v320_v28 = vld [vmem:[%s7576_s21 + $0x270] sm:$0xff] }
 0x1d6   : > { %5206 = vmatpush1.bf16.xpose.msra.mxu0 %v5205_v40  ;;  %v5477_v40 = vpack.c.bf16 %v512_v30, %v504_v29  ;;  %v568_v29 = vld [vmem:[%s7576_s21 + $0xa30] sm:$0xff] }
 0x1d7   : > { %5208 = vmatprep.subr.bf16.mxu0 %v5207_v42  ;;  %v5479_v42 = vpack.c.bf16 %v529_v38, %v521_v37  ;;  %v576_v30 = vld [vmem:[%s7576_s21 + $0xa70] sm:$0xff]  ;;  %v585_v37 = vld [vmem:[%s7576_s21 + $0xab8] sm:$0xff] }
 0x1d8   : > { %5462 = vmatpush1.bf16.xpose.msra.mxu1 %v5461_v41  ;;  %v5223_v41 = vpack.c.bf16 %v273_v32, %v265_v31  ;;  %v329_v31 = vld [vmem:[%s7576_s21 + $0x2b8] sm:$0xff] }
 0x1d9   : > { %5464 = vmatprep.subr.bf16.mxu1 %v5463_v43  ;;  %v8041_v43 = vrot.slane %v8031_v35, %v8029_v33  ;;  %v337_v32 = vld [vmem:[%s7576_s21 + $0x2f8] sm:$0xff] }
 0x1da   : > { %v593_v38 = vld [vmem:[%s7576_s21 + $0xaf8] sm:$0xff] }
 0x1de   : > { %5210 = vmatpush1.bf16.xpose.msra.mxu0 %v5209_v53  ;;  %v5225_v53 = vpack.c.bf16 %v272_v45, %v264_v44  ;;  %v328_v44 = vld [vmem:[%s7576_s21 + $0x2b0] sm:$0xff] }
 0x1df   : > { %5212 = vmatprep.subr.bf16.mxu0 %v5211_v57  ;;  %v5227_v57 = vpack.c.bf16 %v289_v50, %v281_v49  ;;  %v336_v45 = vld [vmem:[%s7576_s21 + $0x2f0] sm:$0xff]  ;;  %v345_v49 = vld [vmem:[%s7576_s21 + $0x338] sm:$0xff] }
 0x1e0   : > { %5466 = vmatpush1.bf16.xpose.msra.mxu1 %v5465_v56  ;;  %v5481_v56 = vpack.c.bf16 %v528_v48, %v520_v46  ;;  %v584_v46 = vld [vmem:[%s7576_s21 + $0xab0] sm:$0xff]  ;;  %v353_v50 = vld [vmem:[%s7576_s21 + $0x378] sm:$0xff] }
 0x1e1   : > { %5468 = vmatprep.subr.bf16.mxu1 %v5467_v58  ;;  %v5483_v58 = vpack.c.bf16 %v545_v52, %v537_v51  ;;  %v592_v48 = vld [vmem:[%s7576_s21 + $0xaf0] sm:$0xff]  ;;  %v601_v51 = vld [vmem:[%s7576_s21 + $0xb38] sm:$0xff] }
 0x1e2   : > { %v609_v52 = vld [vmem:[%s7576_s21 + $0xb78] sm:$0xff] }
 0x1e6   : > { %5214 = vmatpush1.bf16.xpose.msra.mxu0 %v5213_v5  ;;  %v5229_v5 = vpack.c.bf16 %v288_v60, %v280_v59  ;;  %v344_v59 = vld [vmem:[%s7576_s21 + $0x330] sm:$0xff] }
 0x1e7   : > { %5216 = vmatprep.subr.bf16.mxu0 %v5215_v6  ;;  %v5231_v6 = vpack.c.bf16 %v305_v1, %v297_v0  ;;  %v352_v60 = vld [vmem:[%s7576_s21 + $0x370] sm:$0xff]  ;;  %v361_v0 = vld [vmem:[%s7576_s21 + $0x3b8] sm:$0xff] }
 0x1e8   : > { %5470 = vmatpush1.bf16.xpose.msra.mxu1 %v5469_v17  ;;  %v5485_v17 = vpack.c.bf16 %v544_v63, %v536_v61  ;;  %v600_v61 = vld [vmem:[%s7576_s21 + $0xb30] sm:$0xff]  ;;  %v369_v1 = vld [vmem:[%s7576_s21 + $0x3f8] sm:$0xff] }
 0x1e9   : > { %5472 = vmatprep.subr.bf16.mxu1 %v5471_v7  ;;  %v5487_v7 = vpack.c.bf16 %v561_v4, %v553_v2  ;;  %v608_v63 = vld [vmem:[%s7576_s21 + $0xb70] sm:$0xff]  ;;  %v617_v2 = vld [vmem:[%s7576_s21 + $0xbb8] sm:$0xff] }
 0x1ea   : > { %v625_v4 = vld [vmem:[%s7576_s21 + $0xbf8] sm:$0xff] }
 0x1ee   : > { %5218 = vmatpush1.bf16.xpose.msra.mxu0 %v5217_v20  ;;  %v5233_v20 = vpack.c.bf16 %v304_v9, %v296_v8  ;;  %v360_v8 = vld [vmem:[%s7576_s21 + $0x3b0] sm:$0xff] }
 0x1ef   : > { %5220 = vmatprep.subr.bf16.mxu0 %v5219_v22  ;;  %v5235_v22 = vpack.c.bf16 %v321_v14, %v313_v13  ;;  %v368_v9 = vld [vmem:[%s7576_s21 + $0x3f0] sm:$0xff]  ;;  %v377_v13 = vld [vmem:[%s7576_s21 + $0x438] sm:$0xff] }
 0x1f0   : > { %5474 = vmatpush1.bf16.xpose.msra.mxu1 %v5473_v21  ;;  %v5489_v21 = vpack.c.bf16 %v560_v11, %v552_v10  ;;  %v616_v10 = vld [vmem:[%s7576_s21 + $0xbb0] sm:$0xff]  ;;  %v385_v14 = vld [vmem:[%s7576_s21 + $0x478] sm:$0xff] }
 0x1f1   : > { %5476 = vmatprep.subr.bf16.mxu1 %v5475_v23  ;;  %v5491_v23 = vpack.c.bf16 %v577_v16, %v569_v15  ;;  %v624_v11 = vld [vmem:[%s7576_s21 + $0xbf0] sm:$0xff]  ;;  %v633_v15 = vld [vmem:[%s7576_s21 + $0xc38] sm:$0xff] }
 0x1f2   : > { %v641_v16 = vld [vmem:[%s7576_s21 + $0xc78] sm:$0xff] }
 0x1f5   : > { %2622 = vmatmul.mubr.f32.vlgmr.msra.gmra.mrb[0].mxu0 %v8035_v36 }
 0x1f6   : > { %5222 = vmatpush1.bf16.xpose.msra.mxu0 %v5221_v39  ;;  %2692 = vmatprep.mubr.f32.mxu0 %v8041_v43  ;;  %v5237_v39 = vpack.c.bf16 %v320_v28, %v312_v25  ;;  %v376_v25 = vld [vmem:[%s7576_s21 + $0x430] sm:$0xff] }
 0x1f7   : > { %2906 = vmatmul.mubr.f32.vlgmr.msra.gmra.mrb[0].mxu1 %v8035_v36  ;;  %5224 = vmatprep.subr.bf16.mxu0 %v5223_v41  ;;  %v5239_v41 = vpack.c.bf16 %v337_v32, %v329_v31  ;;  %v384_v28 = vld [vmem:[%s7576_s21 + $0x470] sm:$0xff]  ;;  %v393_v31 = vld [vmem:[%s7576_s21 + $0x4b8] sm:$0xff] }
 0x1f8   : > { %5478 = vmatpush1.bf16.xpose.msra.mxu1 %v5477_v40  ;;  %2976 = vmatprep.mubr.f32.mxu1 %v8041_v43  ;;  %v5493_v40 = vpack.c.bf16 %v576_v30, %v568_v29  ;;  %v632_v29 = vld [vmem:[%s7576_s21 + $0xc30] sm:$0xff]  ;;  %v401_v32 = vld [vmem:[%s7576_s21 + $0x4f8] sm:$0xff] }
 0x1f9   : > { %5480 = vmatprep.subr.bf16.mxu1 %v5479_v42  ;;  %v5495_v42 = vpack.c.bf16 %v593_v38, %v585_v37  ;;  %v640_v30 = vld [vmem:[%s7576_s21 + $0xc70] sm:$0xff]  ;;  %v649_v37 = vld [vmem:[%s7576_s21 + $0xcb8] sm:$0xff] }
 0x1fa   : > { %v657_v38 = vld [vmem:[%s7576_s21 + $0xcf8] sm:$0xff] }
 0x1fe   : > { %5226 = vmatpush1.bf16.xpose.msra.mxu0 %v5225_v53  ;;  %v5241_v53 = vpack.c.bf16 %v336_v45, %v328_v44  ;;  %v392_v44 = vld [vmem:[%s7576_s21 + $0x4b0] sm:$0xff] }
 0x1ff   : > { %5228 = vmatprep.subr.bf16.mxu0 %v5227_v57  ;;  %v5243_v57 = vpack.c.bf16 %v353_v50, %v345_v49  ;;  %v400_v45 = vld [vmem:[%s7576_s21 + $0x4f0] sm:$0xff]  ;;  %v409_v49 = vld [vmem:[%s7576_s21 + $0x538] sm:$0xff] }
 0x200   : > { %5482 = vmatpush1.bf16.xpose.msra.mxu1 %v5481_v56  ;;  %v5497_v56 = vpack.c.bf16 %v592_v48, %v584_v46  ;;  %v648_v46 = vld [vmem:[%s7576_s21 + $0xcb0] sm:$0xff]  ;;  %v417_v50 = vld [vmem:[%s7576_s21 + $0x578] sm:$0xff] }
 0x201   : > { %5484 = vmatprep.subr.bf16.mxu1 %v5483_v58  ;;  %v5499_v58 = vpack.c.bf16 %v609_v52, %v601_v51  ;;  %v656_v48 = vld [vmem:[%s7576_s21 + $0xcf0] sm:$0xff]  ;;  %v665_v51 = vld [vmem:[%s7576_s21 + $0xd38] sm:$0xff] }
 0x202   : > { %v673_v52 = vld [vmem:[%s7576_s21 + $0xd78] sm:$0xff] }
 0x206   : > { %5230 = vmatpush1.bf16.xpose.msra.mxu0 %v5229_v5  ;;  %v5245_v5 = vpack.c.bf16 %v352_v60, %v344_v59  ;;  %v408_v59 = vld [vmem:[%s7576_s21 + $0x530] sm:$0xff] }
 0x207   : > { %5232 = vmatprep.subr.bf16.mxu0 %v5231_v6  ;;  %v5247_v6 = vpack.c.bf16 %v369_v1, %v361_v0  ;;  %v416_v60 = vld [vmem:[%s7576_s21 + $0x570] sm:$0xff]  ;;  %v425_v0 = vld [vmem:[%s7576_s21 + $0x5b8] sm:$0xff] }
 0x208   : > { %5486 = vmatpush1.bf16.xpose.msra.mxu1 %v5485_v17  ;;  %v5501_v17 = vpack.c.bf16 %v608_v63, %v600_v61  ;;  %v664_v61 = vld [vmem:[%s7576_s21 + $0xd30] sm:$0xff]  ;;  %v433_v1 = vld [vmem:[%s7576_s21 + $0x5f8] sm:$0xff] }
 0x209   : > { %5488 = vmatprep.subr.bf16.mxu1 %v5487_v7  ;;  %v5503_v7 = vpack.c.bf16 %v625_v4, %v617_v2  ;;  %v672_v63 = vld [vmem:[%s7576_s21 + $0xd70] sm:$0xff]  ;;  %v681_v2 = vld [vmem:[%s7576_s21 + $0xdb8] sm:$0xff] }
 0x20a   : > { %v689_v4 = vld [vmem:[%s7576_s21 + $0xdf8] sm:$0xff] }
 0x20e   : > { %5234 = vmatpush1.bf16.xpose.msra.mxu0 %v5233_v20  ;;  %v5249_v20 = vpack.c.bf16 %v368_v9, %v360_v8  ;;  %v424_v8 = vld [vmem:[%s7576_s21 + $0x5b0] sm:$0xff] }
 0x20f   : > { %5236 = vmatprep.subr.bf16.mxu0 %v5235_v22  ;;  %v5251_v22 = vpack.c.bf16 %v385_v14, %v377_v13  ;;  %v432_v9 = vld [vmem:[%s7576_s21 + $0x5f0] sm:$0xff]  ;;  %v441_v13 = vld [vmem:[%s7576_s21 + $0x638] sm:$0xff] }
 0x210   : > { %5490 = vmatpush1.bf16.xpose.msra.mxu1 %v5489_v21  ;;  %v5505_v21 = vpack.c.bf16 %v624_v11, %v616_v10  ;;  %v680_v10 = vld [vmem:[%s7576_s21 + $0xdb0] sm:$0xff]  ;;  %v449_v14 = vld [vmem:[%s7576_s21 + $0x678] sm:$0xff] }
 0x211   : > { %5492 = vmatprep.subr.bf16.mxu1 %v5491_v23  ;;  %v5507_v23 = vpack.c.bf16 %v641_v16, %v633_v15  ;;  %v688_v11 = vld [vmem:[%s7576_s21 + $0xdf0] sm:$0xff]  ;;  %v697_v15 = vld [vmem:[%s7576_s21 + $0xe38] sm:$0xff] }
 0x212   : > { %v705_v16 = vld [vmem:[%s7576_s21 + $0xe78] sm:$0xff] }
 0x216   : > { %5238 = vmatpush1.bf16.xpose.msra.mxu0 %v5237_v39  ;;  %v5253_v39 = vpack.c.bf16 %v384_v28, %v376_v25  ;;  %v440_v25 = vld [vmem:[%s7576_s21 + $0x630] sm:$0xff] }
 0x217   : > { %5240 = vmatprep.subr.bf16.mxu0 %v5239_v41  ;;  %v5255_v41 = vpack.c.bf16 %v401_v32, %v393_v31  ;;  %v448_v28 = vld [vmem:[%s7576_s21 + $0x670] sm:$0xff]  ;;  %v457_v31 = vld [vmem:[%s7576_s21 + $0x6b8] sm:$0xff] }
 0x218   : > { %5494 = vmatpush1.bf16.xpose.msra.mxu1 %v5493_v40  ;;  %v5509_v40 = vpack.c.bf16 %v640_v30, %v632_v29  ;;  %v696_v29 = vld [vmem:[%s7576_s21 + $0xe30] sm:$0xff]  ;;  %v465_v32 = vld [vmem:[%s7576_s21 + $0x6f8] sm:$0xff] }
 0x219   : > { %5496 = vmatprep.subr.bf16.mxu1 %v5495_v42  ;;  %v5511_v42 = vpack.c.bf16 %v657_v38, %v649_v37  ;;  %v704_v30 = vld [vmem:[%s7576_s21 + $0xe70] sm:$0xff]  ;;  %v713_v37 = vld [vmem:[%s7576_s21 + $0xeb8] sm:$0xff] }
 0x21a   : > { %v721_v38 = vld [vmem:[%s7576_s21 + $0xef8] sm:$0xff] }
 0x21e   : > { %5242 = vmatpush1.bf16.xpose.msra.mxu0 %v5241_v53  ;;  %v5257_v53 = vpack.c.bf16 %v400_v45, %v392_v44  ;;  %v456_v44 = vld [vmem:[%s7576_s21 + $0x6b0] sm:$0xff] }
 0x21f   : > { %5244 = vmatprep.subr.bf16.mxu0 %v5243_v57  ;;  %v5259_v57 = vpack.c.bf16 %v417_v50, %v409_v49  ;;  %v464_v45 = vld [vmem:[%s7576_s21 + $0x6f0] sm:$0xff]  ;;  %v473_v49 = vld [vmem:[%s7576_s21 + $0x738] sm:$0xff] }
 0x220   : > { %5498 = vmatpush1.bf16.xpose.msra.mxu1 %v5497_v56  ;;  %v5513_v56 = vpack.c.bf16 %v656_v48, %v648_v46  ;;  %v712_v46 = vld [vmem:[%s7576_s21 + $0xeb0] sm:$0xff]  ;;  %v481_v50 = vld [vmem:[%s7576_s21 + $0x778] sm:$0xff] }
 0x221   : > { %5500 = vmatprep.subr.bf16.mxu1 %v5499_v58  ;;  %v5515_v58 = vpack.c.bf16 %v673_v52, %v665_v51  ;;  %v720_v48 = vld [vmem:[%s7576_s21 + $0xef0] sm:$0xff]  ;;  %v729_v51 = vld [vmem:[%s7576_s21 + $0xf38] sm:$0xff] }
 0x222   : > { %v737_v52 = vld [vmem:[%s7576_s21 + $0xf78] sm:$0xff] }
 0x226   : > { %5246 = vmatpush1.bf16.xpose.msra.mxu0 %v5245_v5  ;;  %v5261_v5 = vpack.c.bf16 %v416_v60, %v408_v59  ;;  %v472_v59 = vld [vmem:[%s7576_s21 + $0x730] sm:$0xff] }
 0x227   : > { %5248 = vmatprep.subr.bf16.mxu0 %v5247_v6  ;;  %v5263_v6 = vpack.c.bf16 %v433_v1, %v425_v0  ;;  %v480_v60 = vld [vmem:[%s7576_s21 + $0x770] sm:$0xff]  ;;  %v489_v0 = vld [vmem:[%s7576_s21 + $0x7b8] sm:$0xff] }
 0x228   : > { %5502 = vmatpush1.bf16.xpose.msra.mxu1 %v5501_v17  ;;  %v5517_v17 = vpack.c.bf16 %v672_v63, %v664_v61  ;;  %v728_v61 = vld [vmem:[%s7576_s21 + $0xf30] sm:$0xff]  ;;  %v497_v1 = vld [vmem:[%s7576_s21 + $0x7f8] sm:$0xff] }
 0x229   : > { %5504 = vmatprep.subr.bf16.mxu1 %v5503_v7  ;;  %v5519_v7 = vpack.c.bf16 %v689_v4, %v681_v2  ;;  %v736_v63 = vld [vmem:[%s7576_s21 + $0xf70] sm:$0xff]  ;;  %v745_v2 = vld [vmem:[%s7576_s21 + $0xfb8] sm:$0xff] }
 0x22a   : > { %v753_v4 = vld [vmem:[%s7576_s21 + $0xff8] sm:$0xff] }
 0x22e   : > { %5250 = vmatpush1.bf16.xpose.msra.mxu0 %v5249_v20  ;;  %v5265_v20 = vpack.c.bf16 %v432_v9, %v424_v8  ;;  %v488_v8 = vld [vmem:[%s7576_s21 + $0x7b0] sm:$0xff] }
 0x22f   : > { %5252 = vmatprep.subr.bf16.mxu0 %v5251_v22  ;;  %v5267_v22 = vpack.c.bf16 %v449_v14, %v441_v13  ;;  %v496_v9 = vld [vmem:[%s7576_s21 + $0x7f0] sm:$0xff]  ;;  %v755_v13 = vld [vmem:[%s7576_s21 + $0x1008] sm:$0xff] }
 0x230   : > { %5506 = vmatpush1.bf16.xpose.msra.mxu1 %v5505_v21  ;;  %v5521_v21 = vpack.c.bf16 %v688_v11, %v680_v10  ;;  %v744_v10 = vld [vmem:[%s7576_s21 + $0xfb0] sm:$0xff]  ;;  %v763_v14 = vld [vmem:[%s7576_s21 + $0x1048] sm:$0xff] }
 0x231   : > { %5508 = vmatprep.subr.bf16.mxu1 %v5507_v23  ;;  %v5523_v23 = vpack.c.bf16 %v705_v16, %v697_v15  ;;  %v752_v11 = vld [vmem:[%s7576_s21 + $0xff0] sm:$0xff]  ;;  %v1011_v15 = vld [vmem:[%s7576_s21 + $0x1808] sm:$0xff] }
 0x232   : > { %v1019_v16 = vld [vmem:[%s7576_s21 + $0x1848] sm:$0xff] }
 0x236   : > { %5254 = vmatpush1.bf16.xpose.msra.mxu0 %v5253_v39  ;;  %v5269_v39 = vpack.c.bf16 %v448_v28, %v440_v25  ;;  %v8168_v25 = vsub.s32 6, %v7626_v3  ;;  %v754_v28 = vld [vmem:[%s7576_s21 + $0x1000] sm:$0xff] }
 0x237   : > { %5256 = vmatprep.subr.bf16.mxu0 %v5255_v41  ;;  %v5271_v41 = vpack.c.bf16 %v465_v32, %v457_v31  ;;  %v1018_v31 = vld [vmem:[%s7576_s21 + $0x1840] sm:$0xff]  ;;  %v771_v32 = vld [vmem:[%s7576_s21 + $0x1088] sm:$0xff] }
 0x238   : > { %5510 = vmatpush1.bf16.xpose.msra.mxu1 %v5509_v40  ;;  %v5525_v40 = vpack.c.bf16 %v704_v30, %v696_v29  ;;  %v762_v29 = vld [vmem:[%s7576_s21 + $0x1040] sm:$0xff] }
 0x239   : > { %5512 = vmatprep.subr.bf16.mxu1 %v5511_v42  ;;  %v5527_v42 = vpack.c.bf16 %v721_v38, %v713_v37  ;;  %v1010_v30 = vld [vmem:[%s7576_s21 + $0x1800] sm:$0xff]  ;;  %v779_v37 = vld [vmem:[%s7576_s21 + $0x10c8] sm:$0xff]  ;;  %v8178_v38 = vrot.slane %v8031_v35, %v8168_v25 }
 0x23a   : > { %v770_v35 = vld [vmem:[%s7576_s21 + $0x1080] sm:$0xff] }
 0x23e   : > { %5258 = vmatpush1.bf16.xpose.msra.mxu0 %v5257_v53  ;;  %v5273_v53 = vpack.c.bf16 %v464_v45, %v456_v44  ;;  %v5543_v44 = vpack.c.bf16 %v779_v37, %v771_v32  ;;  %v1082_v32 = vld [vmem:[%s7576_s21 + $0x1a40] sm:$0xff]  ;;  %v835_v37 = vld [vmem:[%s7576_s21 + $0x1288] sm:$0xff] }
 0x23f   : > { %5260 = vmatprep.subr.bf16.mxu0 %v5259_v57  ;;  %v5275_v57 = vpack.c.bf16 %v481_v50, %v473_v49  ;;  %v1034_v49 = vld [vmem:[%s7576_s21 + $0x18c0] sm:$0xff]  ;;  %v787_v50 = vld [vmem:[%s7576_s21 + $0x1108] sm:$0xff] }
 0x240   : > { %5514 = vmatpush1.bf16.xpose.msra.mxu1 %v5513_v56  ;;  %v5529_v56 = vpack.c.bf16 %v720_v48, %v712_v46  ;;  %v778_v46 = vld [vmem:[%s7576_s21 + $0x10c0] sm:$0xff] }
 0x241   : > { %5516 = vmatprep.subr.bf16.mxu1 %v5515_v58  ;;  %v5531_v58 = vpack.c.bf16 %v737_v52, %v729_v51  ;;  %v1026_v48 = vld [vmem:[%s7576_s21 + $0x1880] sm:$0xff]  ;;  %v795_v51 = vld [vmem:[%s7576_s21 + $0x1148] sm:$0xff] }
 0x242   : > { %v1043_v52 = vld [vmem:[%s7576_s21 + $0x1908] sm:$0xff] }
 0x246   : > { %5262 = vmatpush1.bf16.xpose.msra.mxu0 %v5261_v5  ;;  %v5277_v5 = vpack.c.bf16 %v480_v60, %v472_v59  ;;  %v786_v60 = vld [vmem:[%s7576_s21 + $0x1100] sm:$0xff] }
 0x247   : > { %5264 = vmatprep.subr.bf16.mxu0 %v5263_v6  ;;  %v5279_v6 = vpack.c.bf16 %v497_v1, %v489_v0  ;;  %v1050_v0 = vld [vmem:[%s7576_s21 + $0x1940] sm:$0xff]  ;;  %v803_v1 = vld [vmem:[%s7576_s21 + $0x1188] sm:$0xff] }
 0x248   : > { %5518 = vmatpush1.bf16.xpose.msra.mxu1 %v5517_v17  ;;  %v5533_v17 = vpack.c.bf16 %v736_v63, %v728_v61  ;;  %v794_v61 = vld [vmem:[%s7576_s21 + $0x1140] sm:$0xff] }
 0x249   : > { %5520 = vmatprep.subr.bf16.mxu1 %v5519_v7  ;;  %v5535_v7 = vpack.c.bf16 %v753_v4, %v745_v2  ;;  %v1042_v63 = vld [vmem:[%s7576_s21 + $0x1900] sm:$0xff]  ;;  %v811_v2 = vld [vmem:[%s7576_s21 + $0x11c8] sm:$0xff] }
 0x24a   : > { %v1059_v4 = vld [vmem:[%s7576_s21 + $0x1988] sm:$0xff] }
 0x24e   : > { %5266 = vmatpush1.bf16.xpose.msra.mxu0 %v5265_v20  ;;  %v5281_v20 = vpack.c.bf16 %v496_v9, %v488_v8  ;;  %v802_v9 = vld [vmem:[%s7576_s21 + $0x1180] sm:$0xff] }
 0x24f   : > { %5268 = vmatprep.subr.bf16.mxu0 %v5267_v22  ;;  %v5539_v22 = vpack.c.bf16 %v763_v14, %v755_v13  ;;  %v1066_v13 = vld [vmem:[%s7576_s21 + $0x19c0] sm:$0xff]  ;;  %v819_v14 = vld [vmem:[%s7576_s21 + $0x1208] sm:$0xff] }
 0x250   : > { %5522 = vmatpush1.bf16.xpose.msra.mxu1 %v5521_v21  ;;  %v5537_v21 = vpack.c.bf16 %v752_v11, %v744_v10  ;;  %v810_v10 = vld [vmem:[%s7576_s21 + $0x11c0] sm:$0xff] }
 0x251   : > { %5524 = vmatprep.subr.bf16.mxu1 %v5523_v23  ;;  %v5795_v23 = vpack.c.bf16 %v1019_v16, %v1011_v15  ;;  %v1058_v11 = vld [vmem:[%s7576_s21 + $0x1980] sm:$0xff]  ;;  %v827_v15 = vld [vmem:[%s7576_s21 + $0x1248] sm:$0xff] }
 0x252   : > { %v1075_v16 = vld [vmem:[%s7576_s21 + $0x1a08] sm:$0xff] }
 0x256   : > { %5270 = vmatpush1.bf16.xpose.msra.mxu0 %v5269_v39  ;;  %v1027_v39 = vld [vmem:[%s7576_s21 + $0x1888] sm:$0xff] }
 0x257   : > { %5272 = vmatprep.subr.bf16.mxu0 %v5271_v41  ;;  %v5541_v41 = vpack.c.bf16 %v762_v29, %v754_v28  ;;  %v818_v29 = vld [vmem:[%s7576_s21 + $0x1200] sm:$0xff] }
 0x258   : > { %5526 = vmatpush1.bf16.xpose.msra.mxu1 %v5525_v40  ;;  %v1035_v40 = vld [vmem:[%s7576_s21 + $0x18c8] sm:$0xff] }
 0x259   : > { %5528 = vmatprep.subr.bf16.mxu1 %v5527_v42  ;;  %v5797_v42 = vpack.c.bf16 %v1018_v31, %v1010_v30  ;;  %v5799_v45 = vpack.c.bf16 %v1035_v40, %v1027_v39  ;;  %v826_v30 = vld [vmem:[%s7576_s21 + $0x1240] sm:$0xff]  ;;  %v843_v39 = vld [vmem:[%s7576_s21 + $0x12c8] sm:$0xff] }
 0x25a   : > { %v1074_v31 = vld [vmem:[%s7576_s21 + $0x1a00] sm:$0xff]  ;;  %v1091_v40 = vld [vmem:[%s7576_s21 + $0x1a88] sm:$0xff] }
 0x25e   : > { %5274 = vmatpush1.bf16.xpose.msra.mxu0 %v5273_v53  ;;  %v1051_v53 = vld [vmem:[%s7576_s21 + $0x1948] sm:$0xff] }
 0x25f   : > { %5276 = vmatprep.subr.bf16.mxu0 %v5275_v57  ;;  %v5801_v57 = vpack.c.bf16 %v1034_v49, %v1026_v48  ;;  %v5803_v59 = vpack.c.bf16 %v1051_v53, %v1043_v52  ;;  %v842_v48 = vld [vmem:[%s7576_s21 + $0x12c0] sm:$0xff]  ;;  %v859_v52 = vld [vmem:[%s7576_s21 + $0x1348] sm:$0xff] }
 0x260   : > { %5530 = vmatpush1.bf16.xpose.msra.mxu1 %v5529_v56  ;;  %v5545_v56 = vpack.c.bf16 %v778_v46, %v770_v35  ;;  %v834_v46 = vld [vmem:[%s7576_s21 + $0x1280] sm:$0xff]  ;;  %v1107_v53 = vld [vmem:[%s7576_s21 + $0x1b08] sm:$0xff] }
 0x261   : > { %5532 = vmatprep.subr.bf16.mxu1 %v5531_v58  ;;  %v5547_v58 = vpack.c.bf16 %v795_v51, %v787_v50  ;;  %v1090_v49 = vld [vmem:[%s7576_s21 + $0x1a80] sm:$0xff]  ;;  %v851_v51 = vld [vmem:[%s7576_s21 + $0x1308] sm:$0xff] }
 0x262   : > { %v1098_v50 = vld [vmem:[%s7576_s21 + $0x1ac0] sm:$0xff] }
 0x266   : > { %5278 = vmatpush1.bf16.xpose.msra.mxu0 %v5277_v5  ;;  %v1067_v5 = vld [vmem:[%s7576_s21 + $0x19c8] sm:$0xff] }
 0x267   : > { %5280 = vmatprep.subr.bf16.mxu0 %v5279_v6  ;;  %v5805_v6 = vpack.c.bf16 %v1050_v0, %v1042_v63  ;;  %v5807_v8 = vpack.c.bf16 %v1067_v5, %v1059_v4  ;;  %v858_v63 = vld [vmem:[%s7576_s21 + $0x1340] sm:$0xff]  ;;  %v875_v4 = vld [vmem:[%s7576_s21 + $0x13c8] sm:$0xff] }
 0x268   : > { %5534 = vmatpush1.bf16.xpose.msra.mxu1 %v5533_v17  ;;  %v5549_v17 = vpack.c.bf16 %v794_v61, %v786_v60  ;;  %v850_v61 = vld [vmem:[%s7576_s21 + $0x1300] sm:$0xff]  ;;  %v1123_v5 = vld [vmem:[%s7576_s21 + $0x1b88] sm:$0xff] }
 0x269   : > { %5536 = vmatprep.subr.bf16.mxu1 %v5535_v7  ;;  %v5551_v7 = vpack.c.bf16 %v811_v2, %v803_v1  ;;  %v1106_v0 = vld [vmem:[%s7576_s21 + $0x1b00] sm:$0xff]  ;;  %v867_v2 = vld [vmem:[%s7576_s21 + $0x1388] sm:$0xff] }
 0x26a   : > { %v1114_v1 = vld [vmem:[%s7576_s21 + $0x1b40] sm:$0xff] }
 0x26e   : > { %5282 = vmatpush1.bf16.xpose.msra.mxu0 %v5281_v20  ;;  %v1083_v20 = vld [vmem:[%s7576_s21 + $0x1a48] sm:$0xff] }
 0x26f   : > { %5540 = vmatprep.subr.bf16.mxu0 %v5539_v22  ;;  %v5809_v22 = vpack.c.bf16 %v1066_v13, %v1058_v11  ;;  %v5811_v28 = vpack.c.bf16 %v1083_v20, %v1075_v16  ;;  %v874_v11 = vld [vmem:[%s7576_s21 + $0x13c0] sm:$0xff]  ;;  %v891_v16 = vld [vmem:[%s7576_s21 + $0x1448] sm:$0xff] }
 0x270   : > { %5538 = vmatpush1.bf16.xpose.msra.mxu1 %v5537_v21  ;;  %v5553_v21 = vpack.c.bf16 %v810_v10, %v802_v9  ;;  %v866_v10 = vld [vmem:[%s7576_s21 + $0x1380] sm:$0xff]  ;;  %v1139_v20 = vld [vmem:[%s7576_s21 + $0x1c08] sm:$0xff] }
 0x271   : > { %5796 = vmatprep.subr.bf16.mxu1 %v5795_v23  ;;  %v5555_v23 = vpack.c.bf16 %v827_v15, %v819_v14  ;;  %v1122_v13 = vld [vmem:[%s7576_s21 + $0x1b80] sm:$0xff]  ;;  %v883_v15 = vld [vmem:[%s7576_s21 + $0x1408] sm:$0xff] }
 0x272   : > { %v1130_v14 = vld [vmem:[%s7576_s21 + $0x1bc0] sm:$0xff] }
 0x275   : > { %2693 = vmatmul.mubr.f32.vlgmr.msra.gmra.mrb[0].mxu0 %v8178_v38 }
 0x276   : > { %5542 = vmatpush1.bf16.xpose.msra.mxu0 %v5541_v41  ;;  %3047 = vmatprep.mubr.f32.mxu0 %v7643_v18  ;;  %v1099_v41 = vld [vmem:[%s7576_s21 + $0x1ac8] sm:$0xff] }
 0x277   : > { %2977 = vmatmul.mubr.f32.vlgmr.msra.gmra.mrb[0].mxu1 %v8178_v38  ;;  %5544 = vmatprep.subr.bf16.mxu0 %v5543_v44  ;;  %v5813_v44 = vpack.c.bf16 %v1082_v32, %v1074_v31  ;;  %v5815_v35 = vpack.c.bf16 %v1099_v41, %v1091_v40  ;;  %v890_v31 = vld [vmem:[%s7576_s21 + $0x1440] sm:$0xff]  ;;  %v907_v40 = vld [vmem:[%s7576_s21 + $0x14c8] sm:$0xff] }
 0x278   : > { %5798 = vmatpush1.bf16.xpose.msra.mxu1 %v5797_v42  ;;  %3331 = vmatprep.mubr.f32.mxu1 %v7643_v18  ;;  %v5557_v42 = vpack.c.bf16 %v826_v30, %v818_v29  ;;  %v882_v30 = vld [vmem:[%s7576_s21 + $0x1400] sm:$0xff]  ;;  %v1155_v41 = vld [vmem:[%s7576_s21 + $0x1c88] sm:$0xff] }
 0x279   : > { %5800 = vmatprep.subr.bf16.mxu1 %v5799_v45  ;;  %v5559_v45 = vpack.c.bf16 %v843_v39, %v835_v37  ;;  %v1138_v32 = vld [vmem:[%s7576_s21 + $0x1c00] sm:$0xff]  ;;  %v899_v39 = vld [vmem:[%s7576_s21 + $0x1488] sm:$0xff] }
 0x27a   : > { %v1146_v37 = vld [vmem:[%s7576_s21 + $0x1c40] sm:$0xff] }
 0x27e   : > { %5546 = vmatpush1.bf16.xpose.msra.mxu0 %v5545_v56  ;;  %v1115_v56 = vld [vmem:[%s7576_s21 + $0x1b48] sm:$0xff] }
 0x27f   : > { %5548 = vmatprep.subr.bf16.mxu0 %v5547_v58  ;;  %v5817_v58 = vpack.c.bf16 %v1098_v50, %v1090_v49  ;;  %v5819_v60 = vpack.c.bf16 %v1115_v56, %v1107_v53  ;;  %v906_v49 = vld [vmem:[%s7576_s21 + $0x14c0] sm:$0xff]  ;;  %v923_v53 = vld [vmem:[%s7576_s21 + $0x1548] sm:$0xff] }
 0x280   : > { %5802 = vmatpush1.bf16.xpose.msra.mxu1 %v5801_v57  ;;  %v5561_v57 = vpack.c.bf16 %v842_v48, %v834_v46  ;;  %v898_v48 = vld [vmem:[%s7576_s21 + $0x1480] sm:$0xff]  ;;  %v1171_v56 = vld [vmem:[%s7576_s21 + $0x1d08] sm:$0xff] }
 0x281   : > { %5804 = vmatprep.subr.bf16.mxu1 %v5803_v59  ;;  %v5563_v59 = vpack.c.bf16 %v859_v52, %v851_v51  ;;  %v1154_v50 = vld [vmem:[%s7576_s21 + $0x1c80] sm:$0xff]  ;;  %v915_v52 = vld [vmem:[%s7576_s21 + $0x1508] sm:$0xff] }
 0x282   : > { %v1162_v51 = vld [vmem:[%s7576_s21 + $0x1cc0] sm:$0xff] }
 0x286   : > { %5550 = vmatpush1.bf16.xpose.msra.mxu0 %v5549_v17  ;;  %v1131_v17 = vld [vmem:[%s7576_s21 + $0x1bc8] sm:$0xff] }
 0x287   : > { %5552 = vmatprep.subr.bf16.mxu0 %v5551_v7  ;;  %v5821_v7 = vpack.c.bf16 %v1114_v1, %v1106_v0  ;;  %v5823_v9 = vpack.c.bf16 %v1131_v17, %v1123_v5  ;;  %v922_v0 = vld [vmem:[%s7576_s21 + $0x1540] sm:$0xff]  ;;  %v939_v5 = vld [vmem:[%s7576_s21 + $0x15c8] sm:$0xff] }
 0x288   : > { %5806 = vmatpush1.bf16.xpose.msra.mxu1 %v5805_v6  ;;  %v5565_v6 = vpack.c.bf16 %v858_v63, %v850_v61  ;;  %v914_v63 = vld [vmem:[%s7576_s21 + $0x1500] sm:$0xff]  ;;  %v1187_v17 = vld [vmem:[%s7576_s21 + $0x1d88] sm:$0xff] }
 0x289   : > { %5808 = vmatprep.subr.bf16.mxu1 %v5807_v8  ;;  %v5567_v8 = vpack.c.bf16 %v875_v4, %v867_v2  ;;  %v1170_v1 = vld [vmem:[%s7576_s21 + $0x1d00] sm:$0xff]  ;;  %v931_v4 = vld [vmem:[%s7576_s21 + $0x1588] sm:$0xff] }
 0x28a   : > { %v1178_v2 = vld [vmem:[%s7576_s21 + $0x1d40] sm:$0xff] }
 0x28e   : > { %5554 = vmatpush1.bf16.xpose.msra.mxu0 %v5553_v21  ;;  %v1147_v21 = vld [vmem:[%s7576_s21 + $0x1c48] sm:$0xff] }
 0x28f   : > { %5556 = vmatprep.subr.bf16.mxu0 %v5555_v23  ;;  %v5825_v23 = vpack.c.bf16 %v1130_v14, %v1122_v13  ;;  %v5827_v29 = vpack.c.bf16 %v1147_v21, %v1139_v20  ;;  %v938_v13 = vld [vmem:[%s7576_s21 + $0x15c0] sm:$0xff]  ;;  %v955_v20 = vld [vmem:[%s7576_s21 + $0x1648] sm:$0xff] }
 0x290   : > { %5810 = vmatpush1.bf16.xpose.msra.mxu1 %v5809_v22  ;;  %v5569_v22 = vpack.c.bf16 %v874_v11, %v866_v10  ;;  %v930_v11 = vld [vmem:[%s7576_s21 + $0x1580] sm:$0xff]  ;;  %v1203_v21 = vld [vmem:[%s7576_s21 + $0x1e08] sm:$0xff] }
 0x291   : > { %5812 = vmatprep.subr.bf16.mxu1 %v5811_v28  ;;  %v5571_v28 = vpack.c.bf16 %v891_v16, %v883_v15  ;;  %v1186_v14 = vld [vmem:[%s7576_s21 + $0x1d80] sm:$0xff]  ;;  %v947_v16 = vld [vmem:[%s7576_s21 + $0x1608] sm:$0xff] }
 0x292   : > { %v1194_v15 = vld [vmem:[%s7576_s21 + $0x1dc0] sm:$0xff] }
 0x296   : > { %5558 = vmatpush1.bf16.xpose.msra.mxu0 %v5557_v42  ;;  %v1163_v42 = vld [vmem:[%s7576_s21 + $0x1cc8] sm:$0xff] }
 0x297   : > { %5560 = vmatprep.subr.bf16.mxu0 %v5559_v45  ;;  %v5829_v45 = vpack.c.bf16 %v1146_v37, %v1138_v32  ;;  %v5831_v46 = vpack.c.bf16 %v1163_v42, %v1155_v41  ;;  %v954_v32 = vld [vmem:[%s7576_s21 + $0x1640] sm:$0xff]  ;;  %v971_v41 = vld [vmem:[%s7576_s21 + $0x16c8] sm:$0xff] }
 0x298   : > { %5814 = vmatpush1.bf16.xpose.msra.mxu1 %v5813_v44  ;;  %v5573_v44 = vpack.c.bf16 %v890_v31, %v882_v30  ;;  %v946_v31 = vld [vmem:[%s7576_s21 + $0x1600] sm:$0xff]  ;;  %v1219_v42 = vld [vmem:[%s7576_s21 + $0x1e88] sm:$0xff] }
 0x299   : > { %5816 = vmatprep.subr.bf16.mxu1 %v5815_v35  ;;  %v5575_v35 = vpack.c.bf16 %v907_v40, %v899_v39  ;;  %v1202_v37 = vld [vmem:[%s7576_s21 + $0x1e00] sm:$0xff]  ;;  %v963_v40 = vld [vmem:[%s7576_s21 + $0x1688] sm:$0xff] }
 0x29a   : > { %v1210_v39 = vld [vmem:[%s7576_s21 + $0x1e40] sm:$0xff] }
 0x29e   : > { %5562 = vmatpush1.bf16.xpose.msra.mxu0 %v5561_v57  ;;  %v1179_v57 = vld [vmem:[%s7576_s21 + $0x1d48] sm:$0xff] }
 0x29f   : > { %5564 = vmatprep.subr.bf16.mxu0 %v5563_v59  ;;  %v5833_v59 = vpack.c.bf16 %v1162_v51, %v1154_v50  ;;  %v5835_v61 = vpack.c.bf16 %v1179_v57, %v1171_v56  ;;  %v970_v50 = vld [vmem:[%s7576_s21 + $0x16c0] sm:$0xff]  ;;  %v987_v56 = vld [vmem:[%s7576_s21 + $0x1748] sm:$0xff] }
 0x2a0   : > { %5818 = vmatpush1.bf16.xpose.msra.mxu1 %v5817_v58  ;;  %v5577_v58 = vpack.c.bf16 %v906_v49, %v898_v48  ;;  %v962_v49 = vld [vmem:[%s7576_s21 + $0x1680] sm:$0xff]  ;;  %v1235_v57 = vld [vmem:[%s7576_s21 + $0x1f08] sm:$0xff] }
 0x2a1   : > { %5820 = vmatprep.subr.bf16.mxu1 %v5819_v60  ;;  %v5579_v60 = vpack.c.bf16 %v923_v53, %v915_v52  ;;  %v1218_v51 = vld [vmem:[%s7576_s21 + $0x1e80] sm:$0xff]  ;;  %v979_v53 = vld [vmem:[%s7576_s21 + $0x1708] sm:$0xff] }
 0x2a2   : > { %v1226_v52 = vld [vmem:[%s7576_s21 + $0x1ec0] sm:$0xff] }
 0x2a6   : > { %5566 = vmatpush1.bf16.xpose.msra.mxu0 %v5565_v6  ;;  %v1195_v6 = vld [vmem:[%s7576_s21 + $0x1dc8] sm:$0xff] }
 0x2a7   : > { %5568 = vmatprep.subr.bf16.mxu0 %v5567_v8  ;;  %v5837_v8 = vpack.c.bf16 %v1178_v2, %v1170_v1  ;;  %v5839_v10 = vpack.c.bf16 %v1195_v6, %v1187_v17  ;;  %v986_v1 = vld [vmem:[%s7576_s21 + $0x1740] sm:$0xff]  ;;  %v1003_v17 = vld [vmem:[%s7576_s21 + $0x17c8] sm:$0xff] }
 0x2a8   : > { %5822 = vmatpush1.bf16.xpose.msra.mxu1 %v5821_v7  ;;  %v5581_v7 = vpack.c.bf16 %v922_v0, %v914_v63  ;;  %v978_v0 = vld [vmem:[%s7576_s21 + $0x1700] sm:$0xff]  ;;  %v1251_v6 = vld [vmem:[%s7576_s21 + $0x1f88] sm:$0xff] }
 0x2a9   : > { %5824 = vmatprep.subr.bf16.mxu1 %v5823_v9  ;;  %v5583_v9 = vpack.c.bf16 %v939_v5, %v931_v4  ;;  %v1234_v2 = vld [vmem:[%s7576_s21 + $0x1f00] sm:$0xff]  ;;  %v995_v5 = vld [vmem:[%s7576_s21 + $0x1788] sm:$0xff] }
 0x2aa   : > { %v1242_v4 = vld [vmem:[%s7576_s21 + $0x1f40] sm:$0xff] }
 0x2ae   : > { %5570 = vmatpush1.bf16.xpose.msra.mxu0 %v5569_v22  ;;  %v1211_v22 = vld [vmem:[%s7576_s21 + $0x1e48] sm:$0xff] }
 0x2af   : > { %5572 = vmatprep.subr.bf16.mxu0 %v5571_v28  ;;  %v5841_v28 = vpack.c.bf16 %v1194_v15, %v1186_v14  ;;  %v5843_v30 = vpack.c.bf16 %v1211_v22, %v1203_v21  ;;  %v1002_v14 = vld [vmem:[%s7576_s21 + $0x17c0] sm:$0xff]  ;;  %v765_v21 = vld [vmem:[%s7576_s21 + $0x1058] sm:$0xff] }
 0x2b0   : > { %5826 = vmatpush1.bf16.xpose.msra.mxu1 %v5825_v23  ;;  %v5585_v23 = vpack.c.bf16 %v938_v13, %v930_v11  ;;  %v994_v13 = vld [vmem:[%s7576_s21 + $0x1780] sm:$0xff]  ;;  %v1013_v22 = vld [vmem:[%s7576_s21 + $0x1818] sm:$0xff] }
 0x2b1   : > { %5828 = vmatprep.subr.bf16.mxu1 %v5827_v29  ;;  %v5587_v29 = vpack.c.bf16 %v955_v20, %v947_v16  ;;  %v1250_v15 = vld [vmem:[%s7576_s21 + $0x1f80] sm:$0xff]  ;;  %v757_v20 = vld [vmem:[%s7576_s21 + $0x1018] sm:$0xff] }
 0x2b2   : > { %v1258_v16 = vld [vmem:[%s7576_s21 + $0x1fc0] sm:$0xff] }
 0x2b6   : > { %5574 = vmatpush1.bf16.xpose.msra.mxu0 %v5573_v44  ;;  %v1227_v44 = vld [vmem:[%s7576_s21 + $0x1ec8] sm:$0xff] }
 0x2b7   : > { %5576 = vmatprep.subr.bf16.mxu0 %v5575_v35  ;;  %v5845_v35 = vpack.c.bf16 %v1210_v39, %v1202_v37  ;;  %v5847_v48 = vpack.c.bf16 %v1227_v44, %v1219_v42  ;;  %v764_v37 = vld [vmem:[%s7576_s21 + $0x1050] sm:$0xff]  ;;  %v781_v42 = vld [vmem:[%s7576_s21 + $0x10d8] sm:$0xff] }
 0x2b8   : > { %5830 = vmatpush1.bf16.xpose.msra.mxu1 %v5829_v45  ;;  %v5589_v45 = vpack.c.bf16 %v954_v32, %v946_v31  ;;  %v756_v32 = vld [vmem:[%s7576_s21 + $0x1010] sm:$0xff]  ;;  %v1029_v44 = vld [vmem:[%s7576_s21 + $0x1898] sm:$0xff] }
 0x2b9   : > { %5832 = vmatprep.subr.bf16.mxu1 %v5831_v46  ;;  %v5591_v46 = vpack.c.bf16 %v971_v41, %v963_v40  ;;  %v1012_v39 = vld [vmem:[%s7576_s21 + $0x1810] sm:$0xff]  ;;  %v773_v41 = vld [vmem:[%s7576_s21 + $0x1098] sm:$0xff] }
 0x2ba   : > { %v1020_v40 = vld [vmem:[%s7576_s21 + $0x1850] sm:$0xff] }
 0x2be   : > { %5578 = vmatpush1.bf16.xpose.msra.mxu0 %v5577_v58  ;;  %v1243_v58 = vld [vmem:[%s7576_s21 + $0x1f48] sm:$0xff] }
 0x2bf   : > { %5580 = vmatprep.subr.bf16.mxu0 %v5579_v60  ;;  %v5849_v60 = vpack.c.bf16 %v1226_v52, %v1218_v51  ;;  %v5851_v63 = vpack.c.bf16 %v1243_v58, %v1235_v57  ;;  %v780_v51 = vld [vmem:[%s7576_s21 + $0x10d0] sm:$0xff]  ;;  %v797_v57 = vld [vmem:[%s7576_s21 + $0x1158] sm:$0xff] }
 0x2c0   : > { %5834 = vmatpush1.bf16.xpose.msra.mxu1 %v5833_v59  ;;  %v5593_v59 = vpack.c.bf16 %v970_v50, %v962_v49  ;;  %v772_v50 = vld [vmem:[%s7576_s21 + $0x1090] sm:$0xff]  ;;  %v1045_v58 = vld [vmem:[%s7576_s21 + $0x1918] sm:$0xff] }
 0x2c1   : > { %5836 = vmatprep.subr.bf16.mxu1 %v5835_v61  ;;  %v5595_v61 = vpack.c.bf16 %v987_v56, %v979_v53  ;;  %v1028_v52 = vld [vmem:[%s7576_s21 + $0x1890] sm:$0xff]  ;;  %v789_v56 = vld [vmem:[%s7576_s21 + $0x1118] sm:$0xff] }
 0x2c2   : > { %v1036_v53 = vld [vmem:[%s7576_s21 + $0x18d0] sm:$0xff] }
 0x2c6   : > { %5582 = vmatpush1.bf16.xpose.msra.mxu0 %v5581_v7  ;;  %v1259_v7 = vld [vmem:[%s7576_s21 + $0x1fc8] sm:$0xff] }
 0x2c7   : > { %5584 = vmatprep.subr.bf16.mxu0 %v5583_v9  ;;  %v5853_v9 = vpack.c.bf16 %v1242_v4, %v1234_v2  ;;  %v5855_v11 = vpack.c.bf16 %v1259_v7, %v1251_v6  ;;  %v796_v2 = vld [vmem:[%s7576_s21 + $0x1150] sm:$0xff]  ;;  %v813_v6 = vld [vmem:[%s7576_s21 + $0x11d8] sm:$0xff] }
 0x2c8   : > { %5838 = vmatpush1.bf16.xpose.msra.mxu1 %v5837_v8  ;;  %v5597_v8 = vpack.c.bf16 %v986_v1, %v978_v0  ;;  %v788_v1 = vld [vmem:[%s7576_s21 + $0x1110] sm:$0xff]  ;;  %v1061_v7 = vld [vmem:[%s7576_s21 + $0x1998] sm:$0xff] }
 0x2c9   : > { %5840 = vmatprep.subr.bf16.mxu1 %v5839_v10  ;;  %v5599_v10 = vpack.c.bf16 %v1003_v17, %v995_v5  ;;  %v1044_v4 = vld [vmem:[%s7576_s21 + $0x1910] sm:$0xff]  ;;  %v805_v17 = vld [vmem:[%s7576_s21 + $0x1198] sm:$0xff] }
 0x2ca   : > { %v1052_v5 = vld [vmem:[%s7576_s21 + $0x1950] sm:$0xff] }
 0x2ce   : > { %5586 = vmatpush1.bf16.xpose.msra.mxu0 %v5585_v23  ;;  %v1021_v23 = vld [vmem:[%s7576_s21 + $0x1858] sm:$0xff] }
 0x2cf   : > { %5588 = vmatprep.subr.bf16.mxu0 %v5587_v29  ;;  %v5857_v29 = vpack.c.bf16 %v1258_v16, %v1250_v15  ;;  %v5859_v31 = vpack.c.bf16 %v1021_v23, %v1013_v22  ;;  %v812_v15 = vld [vmem:[%s7576_s21 + $0x11d0] sm:$0xff]  ;;  %v829_v22 = vld [vmem:[%s7576_s21 + $0x1258] sm:$0xff] }
 0x2d0   : > { %5842 = vmatpush1.bf16.xpose.msra.mxu1 %v5841_v28  ;;  %v5601_v28 = vpack.c.bf16 %v1002_v14, %v994_v13  ;;  %v804_v14 = vld [vmem:[%s7576_s21 + $0x1190] sm:$0xff]  ;;  %v1077_v23 = vld [vmem:[%s7576_s21 + $0x1a18] sm:$0xff] }
 0x2d1   : > { %5844 = vmatprep.subr.bf16.mxu1 %v5843_v30  ;;  %v5603_v30 = vpack.c.bf16 %v765_v21, %v757_v20  ;;  %v1060_v16 = vld [vmem:[%s7576_s21 + $0x1990] sm:$0xff]  ;;  %v821_v21 = vld [vmem:[%s7576_s21 + $0x1218] sm:$0xff] }
 0x2d2   : > { %v1068_v20 = vld [vmem:[%s7576_s21 + $0x19d0] sm:$0xff] }
 0x2d6   : > { %5590 = vmatpush1.bf16.xpose.msra.mxu0 %v5589_v45  ;;  %v1037_v45 = vld [vmem:[%s7576_s21 + $0x18d8] sm:$0xff] }
 0x2d7   : > { %5592 = vmatprep.subr.bf16.mxu0 %v5591_v46  ;;  %v5861_v46 = vpack.c.bf16 %v1020_v40, %v1012_v39  ;;  %v5863_v49 = vpack.c.bf16 %v1037_v45, %v1029_v44  ;;  %v828_v39 = vld [vmem:[%s7576_s21 + $0x1250] sm:$0xff]  ;;  %v845_v44 = vld [vmem:[%s7576_s21 + $0x12d8] sm:$0xff] }
 0x2d8   : > { %5846 = vmatpush1.bf16.xpose.msra.mxu1 %v5845_v35  ;;  %v5605_v35 = vpack.c.bf16 %v764_v37, %v756_v32  ;;  %v820_v37 = vld [vmem:[%s7576_s21 + $0x1210] sm:$0xff]  ;;  %v1093_v45 = vld [vmem:[%s7576_s21 + $0x1a98] sm:$0xff] }
 0x2d9   : > { %5848 = vmatprep.subr.bf16.mxu1 %v5847_v48  ;;  %v5607_v48 = vpack.c.bf16 %v781_v42, %v773_v41  ;;  %v1076_v40 = vld [vmem:[%s7576_s21 + $0x1a10] sm:$0xff]  ;;  %v837_v42 = vld [vmem:[%s7576_s21 + $0x1298] sm:$0xff] }
 0x2da   : > { %v1084_v41 = vld [vmem:[%s7576_s21 + $0x1a50] sm:$0xff] }
 0x2de   : > { %5594 = vmatpush1.bf16.xpose.msra.mxu0 %v5593_v59  ;;  %v1053_v59 = vld [vmem:[%s7576_s21 + $0x1958] sm:$0xff] }
 0x2df   : > { %5596 = vmatprep.subr.bf16.mxu0 %v5595_v61  ;;  %v5865_v61 = vpack.c.bf16 %v1036_v53, %v1028_v52  ;;  %v5867_v0 = vpack.c.bf16 %v1053_v59, %v1045_v58  ;;  %v844_v52 = vld [vmem:[%s7576_s21 + $0x12d0] sm:$0xff]  ;;  %v861_v58 = vld [vmem:[%s7576_s21 + $0x1358] sm:$0xff] }
 0x2e0   : > { %5850 = vmatpush1.bf16.xpose.msra.mxu1 %v5849_v60  ;;  %v5609_v60 = vpack.c.bf16 %v780_v51, %v772_v50  ;;  %v836_v51 = vld [vmem:[%s7576_s21 + $0x1290] sm:$0xff]  ;;  %v1109_v59 = vld [vmem:[%s7576_s21 + $0x1b18] sm:$0xff] }
 0x2e1   : > { %5852 = vmatprep.subr.bf16.mxu1 %v5851_v63  ;;  %v5611_v63 = vpack.c.bf16 %v797_v57, %v789_v56  ;;  %v1092_v53 = vld [vmem:[%s7576_s21 + $0x1a90] sm:$0xff]  ;;  %v853_v57 = vld [vmem:[%s7576_s21 + $0x1318] sm:$0xff] }
 0x2e2   : > { %v1100_v56 = vld [vmem:[%s7576_s21 + $0x1ad0] sm:$0xff] }
 0x2e6   : > { %5598 = vmatpush1.bf16.xpose.msra.mxu0 %v5597_v8  ;;  %v1069_v8 = vld [vmem:[%s7576_s21 + $0x19d8] sm:$0xff] }
 0x2e7   : > { %5600 = vmatprep.subr.bf16.mxu0 %v5599_v10  ;;  %v5869_v10 = vpack.c.bf16 %v1052_v5, %v1044_v4  ;;  %v5871_v13 = vpack.c.bf16 %v1069_v8, %v1061_v7  ;;  %v860_v4 = vld [vmem:[%s7576_s21 + $0x1350] sm:$0xff]  ;;  %v877_v7 = vld [vmem:[%s7576_s21 + $0x13d8] sm:$0xff] }
 0x2e8   : > { %5854 = vmatpush1.bf16.xpose.msra.mxu1 %v5853_v9  ;;  %v5613_v9 = vpack.c.bf16 %v796_v2, %v788_v1  ;;  %v852_v2 = vld [vmem:[%s7576_s21 + $0x1310] sm:$0xff]  ;;  %v1125_v8 = vld [vmem:[%s7576_s21 + $0x1b98] sm:$0xff] }
 0x2e9   : > { %5856 = vmatprep.subr.bf16.mxu1 %v5855_v11  ;;  %v5615_v11 = vpack.c.bf16 %v813_v6, %v805_v17  ;;  %v1108_v5 = vld [vmem:[%s7576_s21 + $0x1b10] sm:$0xff]  ;;  %v869_v6 = vld [vmem:[%s7576_s21 + $0x1398] sm:$0xff] }
 0x2ea   : > { %v1116_v17 = vld [vmem:[%s7576_s21 + $0x1b50] sm:$0xff] }
 0x2ee   : > { %5602 = vmatpush1.bf16.xpose.msra.mxu0 %v5601_v28  ;;  %v1085_v28 = vld [vmem:[%s7576_s21 + $0x1a58] sm:$0xff] }
 0x2ef   : > { %5604 = vmatprep.subr.bf16.mxu0 %v5603_v30  ;;  %v5873_v30 = vpack.c.bf16 %v1068_v20, %v1060_v16  ;;  %v5875_v32 = vpack.c.bf16 %v1085_v28, %v1077_v23  ;;  %v876_v16 = vld [vmem:[%s7576_s21 + $0x13d0] sm:$0xff]  ;;  %v893_v23 = vld [vmem:[%s7576_s21 + $0x1458] sm:$0xff] }
 0x2f0   : > { %5858 = vmatpush1.bf16.xpose.msra.mxu1 %v5857_v29  ;;  %v5617_v29 = vpack.c.bf16 %v812_v15, %v804_v14  ;;  %v868_v15 = vld [vmem:[%s7576_s21 + $0x1390] sm:$0xff]  ;;  %v1141_v28 = vld [vmem:[%s7576_s21 + $0x1c18] sm:$0xff] }
 0x2f1   : > { %5860 = vmatprep.subr.bf16.mxu1 %v5859_v31  ;;  %v5619_v31 = vpack.c.bf16 %v829_v22, %v821_v21  ;;  %v1124_v20 = vld [vmem:[%s7576_s21 + $0x1b90] sm:$0xff]  ;;  %v885_v22 = vld [vmem:[%s7576_s21 + $0x1418] sm:$0xff] }
 0x2f2   : > { %v1132_v21 = vld [vmem:[%s7576_s21 + $0x1bd0] sm:$0xff] }
 0x2f5   : > { %3048 = vmatmul.mubr.f32.vlgmr.msra.gmra.mrb[2].mxu0 %v7741_v27 }
 0x2f6   : > { %5606 = vmatpush1.bf16.xpose.msra.mxu0 %v5605_v35  ;;  %3118 = vmatprep.mubr.f32.mxu0 %v7747_v34  ;;  %v1101_v35 = vld [vmem:[%s7576_s21 + $0x1ad8] sm:$0xff] }
 0x2f7   : > { %3332 = vmatmul.mubr.f32.vlgmr.msra.gmra.mrb[2].mxu1 %v7741_v27  ;;  %5608 = vmatprep.subr.bf16.mxu0 %v5607_v48  ;;  %v5877_v48 = vpack.c.bf16 %v1084_v41, %v1076_v40  ;;  %v5879_v50 = vpack.c.bf16 %v1101_v35, %v1093_v45  ;;  %v892_v40 = vld [vmem:[%s7576_s21 + $0x1450] sm:$0xff]  ;;  %v909_v45 = vld [vmem:[%s7576_s21 + $0x14d8] sm:$0xff] }
 0x2f8   : > { %5862 = vmatpush1.bf16.xpose.msra.mxu1 %v5861_v46  ;;  %3402 = vmatprep.mubr.f32.mxu1 %v7747_v34  ;;  %v5621_v46 = vpack.c.bf16 %v828_v39, %v820_v37  ;;  %v884_v39 = vld [vmem:[%s7576_s21 + $0x1410] sm:$0xff]  ;;  %v1157_v35 = vld [vmem:[%s7576_s21 + $0x1c98] sm:$0xff] }
 0x2f9   : > { %5864 = vmatprep.subr.bf16.mxu1 %v5863_v49  ;;  %v5623_v49 = vpack.c.bf16 %v845_v44, %v837_v42  ;;  %v1140_v41 = vld [vmem:[%s7576_s21 + $0x1c10] sm:$0xff]  ;;  %v901_v44 = vld [vmem:[%s7576_s21 + $0x1498] sm:$0xff] }
 0x2fa   : > { %v1148_v42 = vld [vmem:[%s7576_s21 + $0x1c50] sm:$0xff] }
 0x2fe   : > { %5610 = vmatpush1.bf16.xpose.msra.mxu0 %v5609_v60  ;;  %v1117_v60 = vld [vmem:[%s7576_s21 + $0x1b58] sm:$0xff] }
 0x2ff   : > { %5612 = vmatprep.subr.bf16.mxu0 %v5611_v63  ;;  %v5881_v63 = vpack.c.bf16 %v1100_v56, %v1092_v53  ;;  %v5883_v1 = vpack.c.bf16 %v1117_v60, %v1109_v59  ;;  %v908_v53 = vld [vmem:[%s7576_s21 + $0x14d0] sm:$0xff]  ;;  %v925_v59 = vld [vmem:[%s7576_s21 + $0x1558] sm:$0xff] }
 0x300   : > { %5866 = vmatpush1.bf16.xpose.msra.mxu1 %v5865_v61  ;;  %v5625_v61 = vpack.c.bf16 %v844_v52, %v836_v51  ;;  %v900_v52 = vld [vmem:[%s7576_s21 + $0x1490] sm:$0xff]  ;;  %v1173_v60 = vld [vmem:[%s7576_s21 + $0x1d18] sm:$0xff] }
 0x301   : > { %5868 = vmatprep.subr.bf16.mxu1 %v5867_v0  ;;  %v5627_v0 = vpack.c.bf16 %v861_v58, %v853_v57  ;;  %v1156_v56 = vld [vmem:[%s7576_s21 + $0x1c90] sm:$0xff]  ;;  %v917_v58 = vld [vmem:[%s7576_s21 + $0x1518] sm:$0xff] }
 0x302   : > { %v1164_v57 = vld [vmem:[%s7576_s21 + $0x1cd0] sm:$0xff] }
 0x306   : > { %5614 = vmatpush1.bf16.xpose.msra.mxu0 %v5613_v9  ;;  %v1133_v9 = vld [vmem:[%s7576_s21 + $0x1bd8] sm:$0xff] }
 0x307   : > { %5616 = vmatprep.subr.bf16.mxu0 %v5615_v11  ;;  %v5885_v11 = vpack.c.bf16 %v1116_v17, %v1108_v5  ;;  %v5887_v14 = vpack.c.bf16 %v1133_v9, %v1125_v8  ;;  %v924_v5 = vld [vmem:[%s7576_s21 + $0x1550] sm:$0xff]  ;;  %v941_v8 = vld [vmem:[%s7576_s21 + $0x15d8] sm:$0xff] }
 0x308   : > { %5870 = vmatpush1.bf16.xpose.msra.mxu1 %v5869_v10  ;;  %v5629_v10 = vpack.c.bf16 %v860_v4, %v852_v2  ;;  %v916_v4 = vld [vmem:[%s7576_s21 + $0x1510] sm:$0xff]  ;;  %v1189_v9 = vld [vmem:[%s7576_s21 + $0x1d98] sm:$0xff] }
 0x309   : > { %5872 = vmatprep.subr.bf16.mxu1 %v5871_v13  ;;  %v5631_v13 = vpack.c.bf16 %v877_v7, %v869_v6  ;;  %v1172_v17 = vld [vmem:[%s7576_s21 + $0x1d10] sm:$0xff]  ;;  %v933_v7 = vld [vmem:[%s7576_s21 + $0x1598] sm:$0xff] }
 0x30a   : > { %v1180_v6 = vld [vmem:[%s7576_s21 + $0x1d50] sm:$0xff] }
 0x30e   : > { %5618 = vmatpush1.bf16.xpose.msra.mxu0 %v5617_v29  ;;  %v1149_v29 = vld [vmem:[%s7576_s21 + $0x1c58] sm:$0xff] }
 0x30f   : > { %5620 = vmatprep.subr.bf16.mxu0 %v5619_v31  ;;  %v5889_v31 = vpack.c.bf16 %v1132_v21, %v1124_v20  ;;  %v5891_v37 = vpack.c.bf16 %v1149_v29, %v1141_v28  ;;  %v932_v28 = vld [vmem:[%s7576_s21 + $0x1590] sm:$0xff] }
 0x310   : > { %5874 = vmatpush1.bf16.xpose.msra.mxu1 %v5873_v30  ;;  %v5633_v30 = vpack.c.bf16 %v876_v16, %v868_v15  ;;  %v5647_v15 = vpack.c.bf16 %v941_v8, %v933_v7  ;;  %v940_v29 = vld [vmem:[%s7576_s21 + $0x15d0] sm:$0xff] }
 0x311   : > { %5876 = vmatprep.subr.bf16.mxu1 %v5875_v32  ;;  %v5635_v32 = vpack.c.bf16 %v893_v23, %v885_v22 }
 0x316   : > { %5622 = vmatpush1.bf16.xpose.msra.mxu0 %v5621_v46  ;;  %v1165_v46 = vld [vmem:[%s7576_s21 + $0x1cd8] sm:$0xff] }
 0x317   : > { %5624 = vmatprep.subr.bf16.mxu0 %v5623_v49  ;;  %v5893_v49 = vpack.c.bf16 %v1148_v42, %v1140_v41  ;;  %v5895_v51 = vpack.c.bf16 %v1165_v46, %v1157_v35 }
 0x318   : > { %5878 = vmatpush1.bf16.xpose.msra.mxu1 %v5877_v48  ;;  %v5637_v48 = vpack.c.bf16 %v892_v40, %v884_v39  ;;  %v957_v39 = vld [vmem:[%s7576_s21 + $0x1658] sm:$0xff] }
 0x319   : > { %5880 = vmatprep.subr.bf16.mxu1 %v5879_v50  ;;  %v5639_v50 = vpack.c.bf16 %v909_v45, %v901_v44  ;;  %v1205_v44 = vld [vmem:[%s7576_s21 + $0x1e18] sm:$0xff] }
 0x31a   : > { %v1213_v45 = vld [vmem:[%s7576_s21 + $0x1e58] sm:$0xff] }
 0x31e   : > { %5626 = vmatpush1.bf16.xpose.msra.mxu0 %v5625_v61  ;;  %v1181_v61 = vld [vmem:[%s7576_s21 + $0x1d58] sm:$0xff] }
 0x31f   : > { %5628 = vmatprep.subr.bf16.mxu0 %v5627_v0  ;;  %v5897_v0 = vpack.c.bf16 %v1164_v57, %v1156_v56  ;;  %v5899_v2 = vpack.c.bf16 %v1181_v61, %v1173_v60  ;;  %v5907_v60 = vpack.c.bf16 %v1213_v45, %v1205_v44  ;;  %v964_v45 = vld [vmem:[%s7576_s21 + $0x1690] sm:$0xff] }
 0x320   : > { %5882 = vmatpush1.bf16.xpose.msra.mxu1 %v5881_v63  ;;  %v5641_v63 = vpack.c.bf16 %v908_v53, %v900_v52 }
 0x321   : > { %5884 = vmatprep.subr.bf16.mxu1 %v5883_v1  ;;  %v5643_v1 = vpack.c.bf16 %v925_v59, %v917_v58  ;;  %v7372_v58 = vmov 1966171168  }
 0x322   : > { %v4788_v59 = vunpack.c.l.s4 %v7372_v58 }
 0x326   : > { %5630 = vmatpush1.bf16.xpose.msra.mxu0 %v5629_v10  ;;  %v1197_v10 = vld [vmem:[%s7576_s21 + $0x1dd8] sm:$0xff] }
 0x327   : > { %5632 = vmatprep.subr.bf16.mxu0 %v5631_v13  ;;  %v2290_v13 = vld [vmem:[%s8401_s4] sm:$0xff]  ;;  %v5903_v16 = vpack.c.bf16 %v1197_v10, %v1189_v9  ;;  %v4789_v9 = vunpack.c.0.s8 %v4788_v59 }
 0x328   : > { %5886 = vmatpush1.bf16.xpose.msra.mxu1 %v5885_v11  ;;  %v5645_v11 = vpack.c.bf16 %v924_v5, %v916_v4  ;;  %v2338_v20 = vrot.slane %v2290_v13, %v7728_v19  ;;  %v2346_v21 = vrot.slane %v2290_v13, %v7874_v47  ;;  %v2342_v22 = vrot.slane %v2290_v13, %v7637_v12  ;;  %v948_v5 = vld [vmem:[%s7576_s21 + $0x1610] sm:$0xff] }
 0x329   : > { %5888 = vmatprep.subr.bf16.mxu1 %v5887_v14  ;;  %v5901_v14 = vpack.c.bf16 %v1180_v6, %v1172_v17  ;;  %v2350_v23 = vrot.slane %v2290_v13, %v7737_v26  ;;  %v956_v17 = vld [vmem:[%s7576_s21 + $0x1650] sm:$0xff]  ;;  %v973_v13 = vld [vmem:[%s7576_s21 + $0x16d8] sm:$0xff] }
 0x32a   : > { %v1204_v6 = vld [vmem:[%s7576_s21 + $0x1e10] sm:$0xff] }
 0x32b   : > { %v1212_v10 = vld [vmem:[%s7576_s21 + $0x1e50] sm:$0xff] }
 0x32e   : > { %5634 = vmatpush1.bf16.xpose.msra.mxu0 %v5633_v30  ;;  %v1188_v30 = vld [vmem:[%s7576_s21 + $0x1d90] sm:$0xff] }
 0x32f   : > { %5636 = vmatprep.subr.bf16.mxu0 %v5635_v32  ;;  %v1196_v32 = vld [vmem:[%s7576_s21 + $0x1dd0] sm:$0xff] }
 0x330   : > { %5890 = vmatpush1.bf16.xpose.msra.mxu1 %v5889_v31  ;;  %v5905_v52 = vpack.c.bf16 %v1196_v32, %v1188_v30  ;;  %v5909_v30 = vpack.c.bf16 %v1212_v10, %v1204_v6  ;;  %v996_v10 = vld [vmem:[%s7576_s21 + $0x1790] sm:$0xff] }
 0x331   : > { %5892 = vmatprep.subr.bf16.mxu1 %v5891_v37  ;;  %v949_v37 = vld [vmem:[%s7576_s21 + $0x1618] sm:$0xff] }
 0x332   : > { %v5651_v53 = vpack.c.bf16 %v957_v39, %v949_v37  ;;  %v8425_v39 = vsub.s32 %v4789_v9, %v7626_v3  ;;  %v1228_v3 = vld [vmem:[%s7576_s21 + $0x1ed0] sm:$0xff] }
 0x336   : > { %5638 = vmatpush1.bf16.xpose.msra.mxu0 %v5637_v48 }
 0x337   : > { %5640 = vmatprep.subr.bf16.mxu0 %v5639_v50 }
 0x338   : > { %5894 = vmatpush1.bf16.xpose.msra.mxu1 %v5893_v49  ;;  %v5649_v49 = vpack.c.bf16 %v940_v29, %v932_v28 }
 0x339   : > { %5896 = vmatprep.subr.bf16.mxu1 %v5895_v51 }
 0x33e   : > { %5642 = vmatpush1.bf16.xpose.msra.mxu0 %v5641_v63 }
 0x33f   : > { %5644 = vmatprep.subr.bf16.mxu0 %v5643_v1 }
 0x340   : > { %5898 = vmatpush1.bf16.xpose.msra.mxu1 %v5897_v0 }
 0x341   : > { %5900 = vmatprep.subr.bf16.mxu1 %v5899_v2 }
 0x346   : > { %5646 = vmatpush1.bf16.xpose.msra.mxu0 %v5645_v11  ;;  %v965_v11 = vld [vmem:[%s7576_s21 + $0x1698] sm:$0xff] }
 0x347   : > { %5648 = vmatprep.subr.bf16.mxu0 %v5647_v15 }
 0x348   : > { %5902 = vmatpush1.bf16.xpose.msra.mxu1 %v5901_v14  ;;  %v2694_v31 = vpop.f32.mrb[0].mxu0 }
 0x349   : > { %5904 = vmatprep.subr.bf16.mxu1 %v5903_v16  ;;  %v7075_v40 = vadd.f32 %v2694_v31, %v2338_v20  ;;  %v2696_v42 = vpop.f32.mrb[1].mxu0  ;;  %v1221_v16 = vld [vmem:[%s7576_s21 + $0x1e98] sm:$0xff]  ;;  %v5655_v31 = vpack.c.bf16 %v973_v13, %v965_v11  ;;  %v1004_v11 = vld [vmem:[%s7576_s21 + $0x17d0] sm:$0xff] }
 0x34a   : > { %v2978_v41 = vpop.f32.mrb[0].mxu1  ;;  %v7076_v46 = vadd.f32 %v2696_v42, %v2342_v22  ;;  %v1229_v20 = vld [vmem:[%s7576_s21 + $0x1ed8] sm:$0xff]  ;;  %v1252_v13 = vld [vmem:[%s7576_s21 + $0x1f90] sm:$0xff] }
 0x34b   : > { %v7077_v35 = vadd.f32 %v2978_v41, %v2346_v21  ;;  %v2980_v48 = vpop.f32.mrb[1].mxu1  ;;  %v4687_v50 = vadd.f32 3.0, %v7075_v40 }
 0x34c   : > { %v7078_v51 = vadd.f32 %v2980_v48, %v2350_v23  ;;  %v4688_v57 = vadd.f32 3.0, %v7076_v46  ;;  %v5653_v23 = vpack.c.bf16 %v956_v17, %v948_v5  ;;  %v1253_v5 = vld [vmem:[%s7576_s21 + $0x1f98] sm:$0xff] }
 0x34d   : > { %v4689_v56 = vadd.f32 3.0, %v7077_v35  ;;  %v4703_v61 = vmax.f32 %v4687_v50, 0.0  ;;  %v989_v50 = vld [vmem:[%s7576_s21 + $0x1758] sm:$0xff] }
 0x34e   : > { %v4690_v63 = vadd.f32 3.0, %v7078_v51  ;;  %v4704_v1 = vmax.f32 %v4688_v57, 0.0  ;;  %5650 = vmatpush1.bf16.xpose.msra.mxu0 %v5649_v49  ;;  %v981_v49 = vld [vmem:[%s7576_s21 + $0x1718] sm:$0xff] }
 0x34f   : > { %v4705_v0 = vmax.f32 %v4689_v56, 0.0  ;;  %v4719_v2 = vmin.f32 %v4703_v61, 6.0  ;;  %5652 = vmatprep.subr.bf16.mxu0 %v5651_v53  ;;  %v1245_v53 = vld [vmem:[%s7576_s21 + $0x1f58] sm:$0xff]  ;;  %v5659_v59 = vpack.c.bf16 %v989_v50, %v981_v49  ;;  %v980_v61 = vld [vmem:[%s7576_s21 + $0x1710] sm:$0xff]  ;;  %v774_v49 = vld [vmem:[%s7576_s21 + $0x10a0] sm:$0xff] }
 0x350   : > { %v4706_v4 = vmax.f32 %v4690_v63, 0.0  ;;  %5906 = vmatpush1.bf16.xpose.msra.mxu1 %v5905_v52  ;;  %v4720_v8 = vmin.f32 %v4704_v1, 6.0  ;;  %v1237_v52 = vld [vmem:[%s7576_s21 + $0x1f18] sm:$0xff]  ;;  %v988_v63 = vld [vmem:[%s7576_s21 + $0x1750] sm:$0xff]  ;;  %v782_v50 = vld [vmem:[%s7576_s21 + $0x10e0] sm:$0xff] }
 0x351   : > { %v4721_v7 = vmin.f32 %v4705_v0, 6.0  ;;  %5908 = vmatprep.subr.bf16.mxu1 %v5907_v60  ;;  %v4735_v14 = vmul.f32 %v7075_v40, %v4719_v2  ;;  %v5911_v40 = vpack.c.bf16 %v1229_v20, %v1221_v16  ;;  %v5915_v60 = vpack.c.bf16 %v1245_v53, %v1237_v52  ;;  %v1236_v0 = vld [vmem:[%s7576_s21 + $0x1f10] sm:$0xff]  ;;  %v997_v2 = vld [vmem:[%s7576_s21 + $0x1798] sm:$0xff]  ;;  %v767_v16 = vld [vmem:[%s7576_s21 + $0x1068] sm:$0xff] }
 0x352   : > { %v4722_v15 = vmin.f32 %v4706_v4, 6.0  ;;  %v4736_v22 = vmul.f32 %v7076_v46, %v4720_v8  ;;  %v1220_v46 = vld [vmem:[%s7576_s21 + $0x1e90] sm:$0xff]  ;;  %v1005_v4 = vld [vmem:[%s7576_s21 + $0x17d8] sm:$0xff]  ;;  %v5661_v6 = vpack.c.bf16 %v988_v63, %v980_v61  ;;  %v1015_v20 = vld [vmem:[%s7576_s21 + $0x1828] sm:$0xff]  ;;  %v5673_v61 = vpack.c.bf16 %v782_v50, %v774_v49 }
 0x353   : > { %v4737_v21 = vmul.f32 %v7077_v35, %v4721_v7  ;;  %v4751_v28 = vmul.f32 0.16666667, %v4735_v14  ;;  %v972_v35 = vld [vmem:[%s7576_s21 + $0x16d0] sm:$0xff]  ;;  %v5913_v58 = vpack.c.bf16 %v1228_v3, %v1220_v46  ;;  %v1261_v17 = vld [vmem:[%s7576_s21 + $0x1fd8] sm:$0xff]  ;;  %v5663_v8 = vpack.c.bf16 %v1005_v4, %v997_v2  ;;  %v1030_v52 = vld [vmem:[%s7576_s21 + $0x18a0] sm:$0xff] }
 0x354   : > { %v4738_v29 = vmul.f32 %v7078_v51, %v4722_v15  ;;  %v4752_v37 = vmul.f32 0.16666667, %v4736_v22  ;;  %v5657_v56 = vpack.c.bf16 %v972_v35, %v964_v45  ;;  %v1244_v1 = vld [vmem:[%s7576_s21 + $0x1f50] sm:$0xff]  ;;  %v5919_v9 = vpack.c.bf16 %v1261_v17, %v1253_v5  ;;  %v759_v15 = vld [vmem:[%s7576_s21 + $0x1028] sm:$0xff]  ;;  %v1038_v53 = vld [vmem:[%s7576_s21 + $0x18e0] sm:$0xff] }
 0x355   : > { %v4753_v32 = vmul.f32 0.16666667, %v4737_v21  ;;  %v5917_v7 = vpack.c.bf16 %v1244_v1, %v1236_v0  ;;  %v1260_v14 = vld [vmem:[%s7576_s21 + $0x1fd0] sm:$0xff]  ;;  %v1023_v21 = vld [vmem:[%s7576_s21 + $0x1868] sm:$0xff]  ;;  %v5665_v22 = vpack.c.bf16 %v1004_v11, %v996_v10  ;;  %v5929_v63 = vpack.c.bf16 %v1038_v53, %v1030_v52  ;;  %v790_v2 = vld [vmem:[%s7576_s21 + $0x1120] sm:$0xff] }
 0x356   : > { %v4754_v41 = vmul.f32 0.16666667, %v4738_v29  ;;  %v4783_v42 = vcombine.low %v4751_v28, %v4752_v37  ;;  %5654 = vmatpush1.bf16.xpose.msra.mxu0 %v5653_v23  ;;  %v5921_v23 = vpack.c.bf16 %v1260_v14, %v1252_v13  ;;  %v5667_v28 = vpack.c.bf16 %v767_v16, %v759_v15  ;;  %v1022_v37 = vld [vmem:[%s7576_s21 + $0x1860] sm:$0xff] }
 0x357   : > { %5656 = vmatprep.subr.bf16.mxu0 %v5655_v31  ;;  %v5923_v29 = vpack.c.bf16 %v1023_v21, %v1015_v20  ;;  %v766_v31 = vld [vmem:[%s7576_s21 + $0x1060] sm:$0xff] }
 0x358   : > { %v4784_v44 = vcombine.low %v4753_v32, %v4754_v41  ;;  %5910 = vmatpush1.bf16.xpose.msra.mxu1 %v5909_v30  ;;  %v8431_v48 = vrot.slane %v4783_v42, %v8425_v39  ;;  %v758_v30 = vld [vmem:[%s7576_s21 + $0x1020] sm:$0xff]  ;;  %v783_v41 = vld [vmem:[%s7576_s21 + $0x10e8] sm:$0xff] }
 0x359   : > { %5912 = vmatprep.subr.bf16.mxu1 %v5911_v40  ;;  %v1014_v32 = vld [vmem:[%s7576_s21 + $0x1820] sm:$0xff]  ;;  %v775_v40 = vld [vmem:[%s7576_s21 + $0x10a8] sm:$0xff]  ;;  %v5669_v45 = vpack.c.bf16 %v766_v31, %v758_v30 }
 0x35a   : > { %v8437_v51 = vrot.slane %v4784_v44, %v8425_v39  ;;  %v1031_v42 = vld [vmem:[%s7576_s21 + $0x18a8] sm:$0xff]  ;;  %v5925_v35 = vpack.c.bf16 %v1022_v37, %v1014_v32  ;;  %v5671_v46 = vpack.c.bf16 %v783_v41, %v775_v40  ;;  %v798_v4 = vld [vmem:[%s7576_s21 + $0x1160] sm:$0xff] }
 0x35b   : > { %v1039_v44 = vld [vmem:[%s7576_s21 + $0x18e8] sm:$0xff]  ;;  %v1046_v5 = vld [vmem:[%s7576_s21 + $0x1920] sm:$0xff]  ;;  %v5677_v10 = vpack.c.bf16 %v798_v4, %v790_v2 }
 0x35c   : > { %v4815_v57 = vcombine.low %v8431_v48, %v8437_v51  ;;  %v5927_v3 = vpack.c.bf16 %v1039_v44, %v1031_v42  ;;  %v1054_v17 = vld [vmem:[%s7576_s21 + $0x1960] sm:$0xff]  ;;  %v1765_v48 = vld [vmem:[%s7576_s21 + $0x2f98] sm:$0xff] }
 0x35d   : > { %v5933_v11 = vpack.c.bf16 %v1054_v17, %v1046_v5  ;;  %v806_v15 = vld [vmem:[%s7576_s21 + $0x11a0] sm:$0xff]  ;;  %v1773_v51 = vld [vmem:[%s7576_s21 + $0x2fd8] sm:$0xff] }
 0x35e   : > { %5658 = vmatpush1.bf16.xpose.msra.mxu0 %v5657_v56  ;;  %v791_v56 = vld [vmem:[%s7576_s21 + $0x1128] sm:$0xff]  ;;  %v814_v16 = vld [vmem:[%s7576_s21 + $0x11e0] sm:$0xff] }
 0x35f   : > { %5660 = vmatprep.subr.bf16.mxu0 %v5659_v59  ;;  %v1047_v59 = vld [vmem:[%s7576_s21 + $0x1928] sm:$0xff]  ;;  %v1062_v20 = vld [vmem:[%s7576_s21 + $0x19a0] sm:$0xff]  ;;  %v5681_v30 = vpack.c.bf16 %v814_v16, %v806_v15 }
 0x360   : > { %5914 = vmatpush1.bf16.xpose.msra.mxu1 %v5913_v58  ;;  %v799_v58 = vld [vmem:[%s7576_s21 + $0x1168] sm:$0xff]  ;;  %v1070_v21 = vld [vmem:[%s7576_s21 + $0x19e0] sm:$0xff] }
 0x361   : > { %5916 = vmatprep.subr.bf16.mxu1 %v5915_v60  ;;  %v1055_v60 = vld [vmem:[%s7576_s21 + $0x1968] sm:$0xff]  ;;  %v5675_v0 = vpack.c.bf16 %v799_v58, %v791_v56  ;;  %v5937_v31 = vpack.c.bf16 %v1070_v21, %v1062_v20  ;;  %v822_v40 = vld [vmem:[%s7576_s21 + $0x1220] sm:$0xff] }
 0x362   : > { %v5931_v1 = vpack.c.bf16 %v1055_v60, %v1047_v59  ;;  %v830_v41 = vld [vmem:[%s7576_s21 + $0x1260] sm:$0xff] }
 0x363   : > { %v1078_v42 = vld [vmem:[%s7576_s21 + $0x1a20] sm:$0xff]  ;;  %v5685_v49 = vpack.c.bf16 %v830_v41, %v822_v40 }
 0x364   : > { %v1086_v44 = vld [vmem:[%s7576_s21 + $0x1a60] sm:$0xff] }
 0x365   : > { %v5941_v50 = vpack.c.bf16 %v1086_v44, %v1078_v42  ;;  %v838_v56 = vld [vmem:[%s7576_s21 + $0x12a0] sm:$0xff] }
 0x366   : > { %5662 = vmatpush1.bf16.xpose.msra.mxu0 %v5661_v6  ;;  %v807_v6 = vld [vmem:[%s7576_s21 + $0x11a8] sm:$0xff]  ;;  %v846_v58 = vld [vmem:[%s7576_s21 + $0x12e0] sm:$0xff] }
 0x367   : > { %5664 = vmatprep.subr.bf16.mxu0 %v5663_v8  ;;  %v1063_v8 = vld [vmem:[%s7576_s21 + $0x19a8] sm:$0xff]  ;;  %v1094_v59 = vld [vmem:[%s7576_s21 + $0x1aa0] sm:$0xff]  ;;  %v5689_v2 = vpack.c.bf16 %v846_v58, %v838_v56 }
 0x368   : > { %5918 = vmatpush1.bf16.xpose.msra.mxu1 %v5917_v7  ;;  %v815_v7 = vld [vmem:[%s7576_s21 + $0x11e8] sm:$0xff]  ;;  %v1102_v60 = vld [vmem:[%s7576_s21 + $0x1ae0] sm:$0xff] }
 0x369   : > { %5920 = vmatprep.subr.bf16.mxu1 %v5919_v9  ;;  %v1071_v9 = vld [vmem:[%s7576_s21 + $0x19e8] sm:$0xff]  ;;  %v5679_v13 = vpack.c.bf16 %v815_v7, %v807_v6  ;;  %v5945_v4 = vpack.c.bf16 %v1102_v60, %v1094_v59  ;;  %v854_v6 = vld [vmem:[%s7576_s21 + $0x1320] sm:$0xff] }
 0x36a   : > { %v5935_v14 = vpack.c.bf16 %v1071_v9, %v1063_v8  ;;  %v862_v7 = vld [vmem:[%s7576_s21 + $0x1360] sm:$0xff] }
 0x36b   : > { %v1110_v8 = vld [vmem:[%s7576_s21 + $0x1b20] sm:$0xff]  ;;  %v5693_v15 = vpack.c.bf16 %v862_v7, %v854_v6 }
 0x36c   : > { %v1118_v9 = vld [vmem:[%s7576_s21 + $0x1b60] sm:$0xff] }
 0x36d   : > { %v5949_v16 = vpack.c.bf16 %v1118_v9, %v1110_v8 }
 0x36e   : > { %5666 = vmatpush1.bf16.xpose.msra.mxu0 %v5665_v22  ;;  %v823_v22 = vld [vmem:[%s7576_s21 + $0x1228] sm:$0xff] }
 0x36f   : > { %5668 = vmatprep.subr.bf16.mxu0 %v5667_v28  ;;  %v1079_v28 = vld [vmem:[%s7576_s21 + $0x1a28] sm:$0xff] }
 0x370   : > { %5922 = vmatpush1.bf16.xpose.msra.mxu1 %v5921_v23  ;;  %v831_v23 = vld [vmem:[%s7576_s21 + $0x1268] sm:$0xff] }
 0x371   : > { %5924 = vmatprep.subr.bf16.mxu1 %v5923_v29  ;;  %v1087_v29 = vld [vmem:[%s7576_s21 + $0x1a68] sm:$0xff]  ;;  %v5683_v32 = vpack.c.bf16 %v831_v23, %v823_v22  ;;  %v870_v22 = vld [vmem:[%s7576_s21 + $0x13a0] sm:$0xff] }
 0x372   : > { %v5939_v37 = vpack.c.bf16 %v1087_v29, %v1079_v28  ;;  %v878_v23 = vld [vmem:[%s7576_s21 + $0x13e0] sm:$0xff] }
 0x373   : > { %v1126_v28 = vld [vmem:[%s7576_s21 + $0x1ba0] sm:$0xff]  ;;  %v5697_v40 = vpack.c.bf16 %v878_v23, %v870_v22 }
 0x374   : > { %v1134_v29 = vld [vmem:[%s7576_s21 + $0x1be0] sm:$0xff] }
 0x375   : > { %3119 = vmatmul.mubr.f32.vlgmr.msra.gmra.mrb[2].mxu0 %v7887_v55  ;;  %v5953_v41 = vpack.c.bf16 %v1134_v29, %v1126_v28 }
 0x376   : > { %5670 = vmatpush1.bf16.xpose.msra.mxu0 %v5669_v45  ;;  %3189 = vmatprep.mubr.f32.mxu0 %v7893_v62  ;;  %v839_v45 = vld [vmem:[%s7576_s21 + $0x12a8] sm:$0xff] }
 0x377   : > { %3403 = vmatmul.mubr.f32.vlgmr.msra.gmra.mrb[2].mxu1 %v7887_v55  ;;  %5672 = vmatprep.subr.bf16.mxu0 %v5671_v46  ;;  %v1095_v46 = vld [vmem:[%s7576_s21 + $0x1aa8] sm:$0xff] }
 0x378   : > { %5926 = vmatpush1.bf16.xpose.msra.mxu1 %v5925_v35  ;;  %3473 = vmatprep.mubr.f32.mxu1 %v7893_v62  ;;  %v847_v35 = vld [vmem:[%s7576_s21 + $0x12e8] sm:$0xff] }
 0x379   : > { %5928 = vmatprep.subr.bf16.mxu1 %v5927_v3  ;;  %v1103_v3 = vld [vmem:[%s7576_s21 + $0x1ae8] sm:$0xff]  ;;  %v5687_v52 = vpack.c.bf16 %v847_v35, %v839_v45  ;;  %v886_v45 = vld [vmem:[%s7576_s21 + $0x1420] sm:$0xff] }
 0x37a   : > { %v5943_v53 = vpack.c.bf16 %v1103_v3, %v1095_v46  ;;  %v894_v35 = vld [vmem:[%s7576_s21 + $0x1460] sm:$0xff] }
 0x37b   : > { %v1142_v46 = vld [vmem:[%s7576_s21 + $0x1c20] sm:$0xff]  ;;  %v5701_v56 = vpack.c.bf16 %v894_v35, %v886_v45 }
 0x37c   : > { %v1150_v3 = vld [vmem:[%s7576_s21 + $0x1c60] sm:$0xff] }
 0x37d   : > { %v5957_v58 = vpack.c.bf16 %v1150_v3, %v1142_v46 }
 0x37e   : > { %5674 = vmatpush1.bf16.xpose.msra.mxu0 %v5673_v61  ;;  %v855_v61 = vld [vmem:[%s7576_s21 + $0x1328] sm:$0xff] }
 0x37f   : > { %5676 = vmatprep.subr.bf16.mxu0 %v5675_v0  ;;  %v1111_v0 = vld [vmem:[%s7576_s21 + $0x1b28] sm:$0xff] }
 0x380   : > { %5930 = vmatpush1.bf16.xpose.msra.mxu1 %v5929_v63  ;;  %v863_v63 = vld [vmem:[%s7576_s21 + $0x1368] sm:$0xff] }
 0x381   : > { %5932 = vmatprep.subr.bf16.mxu1 %v5931_v1  ;;  %v1119_v1 = vld [vmem:[%s7576_s21 + $0x1b68] sm:$0xff]  ;;  %v5691_v5 = vpack.c.bf16 %v863_v63, %v855_v61  ;;  %v902_v61 = vld [vmem:[%s7576_s21 + $0x14a0] sm:$0xff] }
 0x382   : > { %v5947_v17 = vpack.c.bf16 %v1119_v1, %v1111_v0  ;;  %v910_v63 = vld [vmem:[%s7576_s21 + $0x14e0] sm:$0xff] }
 0x383   : > { %v1158_v0 = vld [vmem:[%s7576_s21 + $0x1ca0] sm:$0xff]  ;;  %v5705_v6 = vpack.c.bf16 %v910_v63, %v902_v61 }
 0x384   : > { %v1166_v1 = vld [vmem:[%s7576_s21 + $0x1ce0] sm:$0xff] }
 0x385   : > { %v5961_v7 = vpack.c.bf16 %v1166_v1, %v1158_v0 }
 0x386   : > { %5678 = vmatpush1.bf16.xpose.msra.mxu0 %v5677_v10  ;;  %v871_v10 = vld [vmem:[%s7576_s21 + $0x13a8] sm:$0xff] }
 0x387   : > { %5680 = vmatprep.subr.bf16.mxu0 %v5679_v13  ;;  %v1127_v13 = vld [vmem:[%s7576_s21 + $0x1ba8] sm:$0xff] }
 0x388   : > { %5934 = vmatpush1.bf16.xpose.msra.mxu1 %v5933_v11  ;;  %v879_v11 = vld [vmem:[%s7576_s21 + $0x13e8] sm:$0xff] }
 0x389   : > { %5936 = vmatprep.subr.bf16.mxu1 %v5935_v14  ;;  %v1135_v14 = vld [vmem:[%s7576_s21 + $0x1be8] sm:$0xff]  ;;  %v5695_v20 = vpack.c.bf16 %v879_v11, %v871_v10  ;;  %v918_v10 = vld [vmem:[%s7576_s21 + $0x1520] sm:$0xff] }
 0x38a   : > { %v5951_v21 = vpack.c.bf16 %v1135_v14, %v1127_v13  ;;  %v926_v11 = vld [vmem:[%s7576_s21 + $0x1560] sm:$0xff] }
 0x38b   : > { %v1174_v13 = vld [vmem:[%s7576_s21 + $0x1d20] sm:$0xff]  ;;  %v5709_v22 = vpack.c.bf16 %v926_v11, %v918_v10 }
 0x38c   : > { %v1182_v14 = vld [vmem:[%s7576_s21 + $0x1d60] sm:$0xff] }
 0x38d   : > { %v5965_v23 = vpack.c.bf16 %v1182_v14, %v1174_v13 }
 0x38e   : > { %5682 = vmatpush1.bf16.xpose.msra.mxu0 %v5681_v30  ;;  %v887_v30 = vld [vmem:[%s7576_s21 + $0x1428] sm:$0xff] }
 0x38f   : > { %5684 = vmatprep.subr.bf16.mxu0 %v5683_v32  ;;  %v1143_v32 = vld [vmem:[%s7576_s21 + $0x1c28] sm:$0xff] }
 0x390   : > { %5938 = vmatpush1.bf16.xpose.msra.mxu1 %v5937_v31  ;;  %v895_v31 = vld [vmem:[%s7576_s21 + $0x1468] sm:$0xff] }
 0x391   : > { %5940 = vmatprep.subr.bf16.mxu1 %v5939_v37  ;;  %v1151_v37 = vld [vmem:[%s7576_s21 + $0x1c68] sm:$0xff]  ;;  %v5699_v42 = vpack.c.bf16 %v895_v31, %v887_v30  ;;  %v934_v30 = vld [vmem:[%s7576_s21 + $0x15a0] sm:$0xff] }
 0x392   : > { %v5955_v44 = vpack.c.bf16 %v1151_v37, %v1143_v32  ;;  %v942_v31 = vld [vmem:[%s7576_s21 + $0x15e0] sm:$0xff] }
 0x393   : > { %v1190_v32 = vld [vmem:[%s7576_s21 + $0x1da0] sm:$0xff]  ;;  %v5713_v45 = vpack.c.bf16 %v942_v31, %v934_v30 }
 0x394   : > { %v1198_v37 = vld [vmem:[%s7576_s21 + $0x1de0] sm:$0xff] }
 0x395   : > { %v5969_v35 = vpack.c.bf16 %v1198_v37, %v1190_v32 }
 0x396   : > { %5686 = vmatpush1.bf16.xpose.msra.mxu0 %v5685_v49  ;;  %v903_v49 = vld [vmem:[%s7576_s21 + $0x14a8] sm:$0xff] }
 0x397   : > { %5688 = vmatprep.subr.bf16.mxu0 %v5687_v52  ;;  %v1159_v52 = vld [vmem:[%s7576_s21 + $0x1ca8] sm:$0xff] }
 0x398   : > { %5942 = vmatpush1.bf16.xpose.msra.mxu1 %v5941_v50  ;;  %v911_v50 = vld [vmem:[%s7576_s21 + $0x14e8] sm:$0xff] }
 0x399   : > { %5944 = vmatprep.subr.bf16.mxu1 %v5943_v53  ;;  %v1167_v53 = vld [vmem:[%s7576_s21 + $0x1ce8] sm:$0xff]  ;;  %v5703_v59 = vpack.c.bf16 %v911_v50, %v903_v49  ;;  %v950_v49 = vld [vmem:[%s7576_s21 + $0x1620] sm:$0xff] }
 0x39a   : > { %v5959_v60 = vpack.c.bf16 %v1167_v53, %v1159_v52  ;;  %v958_v50 = vld [vmem:[%s7576_s21 + $0x1660] sm:$0xff] }
 0x39b   : > { %v1206_v52 = vld [vmem:[%s7576_s21 + $0x1e20] sm:$0xff]  ;;  %v5717_v61 = vpack.c.bf16 %v958_v50, %v950_v49 }
 0x39c   : > { %v1214_v53 = vld [vmem:[%s7576_s21 + $0x1e60] sm:$0xff] }
 0x39d   : > { %v5973_v63 = vpack.c.bf16 %v1214_v53, %v1206_v52 }
 0x39e   : > { %5690 = vmatpush1.bf16.xpose.msra.mxu0 %v5689_v2  ;;  %v919_v2 = vld [vmem:[%s7576_s21 + $0x1528] sm:$0xff] }
 0x39f   : > { %5692 = vmatprep.subr.bf16.mxu0 %v5691_v5  ;;  %v1175_v5 = vld [vmem:[%s7576_s21 + $0x1d28] sm:$0xff] }
 0x3a0   : > { %5946 = vmatpush1.bf16.xpose.msra.mxu1 %v5945_v4  ;;  %v927_v4 = vld [vmem:[%s7576_s21 + $0x1568] sm:$0xff] }
 0x3a1   : > { %5948 = vmatprep.subr.bf16.mxu1 %v5947_v17  ;;  %v1183_v17 = vld [vmem:[%s7576_s21 + $0x1d68] sm:$0xff]  ;;  %v5707_v8 = vpack.c.bf16 %v927_v4, %v919_v2  ;;  %v966_v2 = vld [vmem:[%s7576_s21 + $0x16a0] sm:$0xff] }
 0x3a2   : > { %v5963_v9 = vpack.c.bf16 %v1183_v17, %v1175_v5  ;;  %v974_v4 = vld [vmem:[%s7576_s21 + $0x16e0] sm:$0xff] }
 0x3a3   : > { %v1222_v5 = vld [vmem:[%s7576_s21 + $0x1ea0] sm:$0xff]  ;;  %v5721_v10 = vpack.c.bf16 %v974_v4, %v966_v2 }
 0x3a4   : > { %v1230_v17 = vld [vmem:[%s7576_s21 + $0x1ee0] sm:$0xff] }
 0x3a5   : > { %v5977_v11 = vpack.c.bf16 %v1230_v17, %v1222_v5 }
 0x3a6   : > { %5694 = vmatpush1.bf16.xpose.msra.mxu0 %v5693_v15  ;;  %v935_v15 = vld [vmem:[%s7576_s21 + $0x15a8] sm:$0xff] }
 0x3a7   : > { %5696 = vmatprep.subr.bf16.mxu0 %v5695_v20  ;;  %v1191_v20 = vld [vmem:[%s7576_s21 + $0x1da8] sm:$0xff] }
 0x3a8   : > { %5950 = vmatpush1.bf16.xpose.msra.mxu1 %v5949_v16  ;;  %v943_v16 = vld [vmem:[%s7576_s21 + $0x15e8] sm:$0xff] }
 0x3a9   : > { %5952 = vmatprep.subr.bf16.mxu1 %v5951_v21  ;;  %v1199_v21 = vld [vmem:[%s7576_s21 + $0x1de8] sm:$0xff]  ;;  %v5711_v28 = vpack.c.bf16 %v943_v16, %v935_v15  ;;  %v982_v15 = vld [vmem:[%s7576_s21 + $0x1720] sm:$0xff] }
 0x3aa   : > { %v5967_v29 = vpack.c.bf16 %v1199_v21, %v1191_v20  ;;  %v990_v16 = vld [vmem:[%s7576_s21 + $0x1760] sm:$0xff] }
 0x3ab   : > { %v1238_v20 = vld [vmem:[%s7576_s21 + $0x1f20] sm:$0xff]  ;;  %v5725_v30 = vpack.c.bf16 %v990_v16, %v982_v15 }
 0x3ac   : > { %v1246_v21 = vld [vmem:[%s7576_s21 + $0x1f60] sm:$0xff] }
 0x3ad   : > { %v5981_v31 = vpack.c.bf16 %v1246_v21, %v1238_v20 }
 0x3ae   : > { %5698 = vmatpush1.bf16.xpose.msra.mxu0 %v5697_v40  ;;  %v951_v40 = vld [vmem:[%s7576_s21 + $0x1628] sm:$0xff] }
 0x3af   : > { %5700 = vmatprep.subr.bf16.mxu0 %v5699_v42  ;;  %v1207_v42 = vld [vmem:[%s7576_s21 + $0x1e28] sm:$0xff] }
 0x3b0   : > { %5954 = vmatpush1.bf16.xpose.msra.mxu1 %v5953_v41  ;;  %v959_v41 = vld [vmem:[%s7576_s21 + $0x1668] sm:$0xff] }
 0x3b1   : > { %5956 = vmatprep.subr.bf16.mxu1 %v5955_v44  ;;  %v1215_v44 = vld [vmem:[%s7576_s21 + $0x1e68] sm:$0xff]  ;;  %v5715_v46 = vpack.c.bf16 %v959_v41, %v951_v40  ;;  %v998_v40 = vld [vmem:[%s7576_s21 + $0x17a0] sm:$0xff] }
 0x3b2   : > { %v5971_v3 = vpack.c.bf16 %v1215_v44, %v1207_v42  ;;  %v1006_v41 = vld [vmem:[%s7576_s21 + $0x17e0] sm:$0xff] }
 0x3b3   : > { %v1254_v42 = vld [vmem:[%s7576_s21 + $0x1fa0] sm:$0xff]  ;;  %v5729_v49 = vpack.c.bf16 %v1006_v41, %v998_v40 }
 0x3b4   : > { %v1262_v44 = vld [vmem:[%s7576_s21 + $0x1fe0] sm:$0xff] }
 0x3b5   : > { %v5985_v50 = vpack.c.bf16 %v1262_v44, %v1254_v42 }
 0x3b6   : > { %5702 = vmatpush1.bf16.xpose.msra.mxu0 %v5701_v56  ;;  %v967_v56 = vld [vmem:[%s7576_s21 + $0x16a8] sm:$0xff] }
 0x3b7   : > { %5704 = vmatprep.subr.bf16.mxu0 %v5703_v59  ;;  %v1223_v59 = vld [vmem:[%s7576_s21 + $0x1ea8] sm:$0xff] }
 0x3b8   : > { %5958 = vmatpush1.bf16.xpose.msra.mxu1 %v5957_v58  ;;  %v975_v58 = vld [vmem:[%s7576_s21 + $0x16e8] sm:$0xff] }
 0x3b9   : > { %5960 = vmatprep.subr.bf16.mxu1 %v5959_v60  ;;  %v1231_v60 = vld [vmem:[%s7576_s21 + $0x1ee8] sm:$0xff]  ;;  %v5719_v0 = vpack.c.bf16 %v975_v58, %v967_v56  ;;  %v760_v56 = vld [vmem:[%s7576_s21 + $0x1030] sm:$0xff] }
 0x3ba   : > { %v5975_v1 = vpack.c.bf16 %v1231_v60, %v1223_v59  ;;  %v768_v58 = vld [vmem:[%s7576_s21 + $0x1070] sm:$0xff] }
 0x3bb   : > { %v1016_v59 = vld [vmem:[%s7576_s21 + $0x1830] sm:$0xff]  ;;  %v5733_v2 = vpack.c.bf16 %v768_v58, %v760_v56 }
 0x3bc   : > { %v1024_v60 = vld [vmem:[%s7576_s21 + $0x1870] sm:$0xff] }
 0x3bd   : > { %v5989_v4 = vpack.c.bf16 %v1024_v60, %v1016_v59 }
 0x3be   : > { %5706 = vmatpush1.bf16.xpose.msra.mxu0 %v5705_v6  ;;  %v983_v6 = vld [vmem:[%s7576_s21 + $0x1728] sm:$0xff] }
 0x3bf   : > { %5708 = vmatprep.subr.bf16.mxu0 %v5707_v8  ;;  %v1239_v8 = vld [vmem:[%s7576_s21 + $0x1f28] sm:$0xff] }
 0x3c0   : > { %5962 = vmatpush1.bf16.xpose.msra.mxu1 %v5961_v7  ;;  %v991_v7 = vld [vmem:[%s7576_s21 + $0x1768] sm:$0xff] }
 0x3c1   : > { %5964 = vmatprep.subr.bf16.mxu1 %v5963_v9  ;;  %v1247_v9 = vld [vmem:[%s7576_s21 + $0x1f68] sm:$0xff]  ;;  %v5723_v13 = vpack.c.bf16 %v991_v7, %v983_v6  ;;  %v776_v6 = vld [vmem:[%s7576_s21 + $0x10b0] sm:$0xff] }
 0x3c2   : > { %v5979_v14 = vpack.c.bf16 %v1247_v9, %v1239_v8  ;;  %v784_v7 = vld [vmem:[%s7576_s21 + $0x10f0] sm:$0xff] }
 0x3c3   : > { %v1032_v8 = vld [vmem:[%s7576_s21 + $0x18b0] sm:$0xff]  ;;  %v5737_v15 = vpack.c.bf16 %v784_v7, %v776_v6 }
 0x3c4   : > { %v1040_v9 = vld [vmem:[%s7576_s21 + $0x18f0] sm:$0xff] }
 0x3c5   : > { %v5993_v16 = vpack.c.bf16 %v1040_v9, %v1032_v8 }
 0x3c6   : > { %5710 = vmatpush1.bf16.xpose.msra.mxu0 %v5709_v22  ;;  %v999_v22 = vld [vmem:[%s7576_s21 + $0x17a8] sm:$0xff] }
 0x3c7   : > { %5712 = vmatprep.subr.bf16.mxu0 %v5711_v28  ;;  %v1255_v28 = vld [vmem:[%s7576_s21 + $0x1fa8] sm:$0xff] }
 0x3c8   : > { %5966 = vmatpush1.bf16.xpose.msra.mxu1 %v5965_v23  ;;  %v1007_v23 = vld [vmem:[%s7576_s21 + $0x17e8] sm:$0xff] }
 0x3c9   : > { %5968 = vmatprep.subr.bf16.mxu1 %v5967_v29  ;;  %v1263_v29 = vld [vmem:[%s7576_s21 + $0x1fe8] sm:$0xff]  ;;  %v5727_v32 = vpack.c.bf16 %v1007_v23, %v999_v22  ;;  %v792_v22 = vld [vmem:[%s7576_s21 + $0x1130] sm:$0xff] }
 0x3ca   : > { %v5983_v37 = vpack.c.bf16 %v1263_v29, %v1255_v28  ;;  %v800_v23 = vld [vmem:[%s7576_s21 + $0x1170] sm:$0xff] }
 0x3cb   : > { %v1048_v28 = vld [vmem:[%s7576_s21 + $0x1930] sm:$0xff]  ;;  %v5741_v40 = vpack.c.bf16 %v800_v23, %v792_v22 }
 0x3cc   : > { %v1056_v29 = vld [vmem:[%s7576_s21 + $0x1970] sm:$0xff] }
 0x3cd   : > { %v5997_v41 = vpack.c.bf16 %v1056_v29, %v1048_v28 }
 0x3ce   : > { %5714 = vmatpush1.bf16.xpose.msra.mxu0 %v5713_v45  ;;  %v761_v45 = vld [vmem:[%s7576_s21 + $0x1038] sm:$0xff] }
 0x3cf   : > { %5716 = vmatprep.subr.bf16.mxu0 %v5715_v46  ;;  %v1017_v46 = vld [vmem:[%s7576_s21 + $0x1838] sm:$0xff] }
 0x3d0   : > { %5970 = vmatpush1.bf16.xpose.msra.mxu1 %v5969_v35  ;;  %v769_v35 = vld [vmem:[%s7576_s21 + $0x1078] sm:$0xff] }
 0x3d1   : > { %5972 = vmatprep.subr.bf16.mxu1 %v5971_v3  ;;  %v1025_v3 = vld [vmem:[%s7576_s21 + $0x1878] sm:$0xff]  ;;  %v5731_v52 = vpack.c.bf16 %v769_v35, %v761_v45  ;;  %v808_v45 = vld [vmem:[%s7576_s21 + $0x11b0] sm:$0xff] }
 0x3d2   : > { %v5987_v53 = vpack.c.bf16 %v1025_v3, %v1017_v46  ;;  %v816_v35 = vld [vmem:[%s7576_s21 + $0x11f0] sm:$0xff] }
 0x3d3   : > { %v1064_v46 = vld [vmem:[%s7576_s21 + $0x19b0] sm:$0xff]  ;;  %v5745_v56 = vpack.c.bf16 %v816_v35, %v808_v45 }
 0x3d4   : > { %v1072_v3 = vld [vmem:[%s7576_s21 + $0x19f0] sm:$0xff] }
 0x3d5   : > { %v6001_v58 = vpack.c.bf16 %v1072_v3, %v1064_v46 }
 0x3d6   : > { %5718 = vmatpush1.bf16.xpose.msra.mxu0 %v5717_v61  ;;  %v777_v61 = vld [vmem:[%s7576_s21 + $0x10b8] sm:$0xff] }
 0x3d7   : > { %5720 = vmatprep.subr.bf16.mxu0 %v5719_v0  ;;  %v1033_v0 = vld [vmem:[%s7576_s21 + $0x18b8] sm:$0xff] }
 0x3d8   : > { %5974 = vmatpush1.bf16.xpose.msra.mxu1 %v5973_v63  ;;  %v785_v63 = vld [vmem:[%s7576_s21 + $0x10f8] sm:$0xff] }
 0x3d9   : > { %5976 = vmatprep.subr.bf16.mxu1 %v5975_v1  ;;  %v1041_v1 = vld [vmem:[%s7576_s21 + $0x18f8] sm:$0xff]  ;;  %v5735_v5 = vpack.c.bf16 %v785_v63, %v777_v61  ;;  %v824_v61 = vld [vmem:[%s7576_s21 + $0x1230] sm:$0xff] }
 0x3da   : > { %v5991_v17 = vpack.c.bf16 %v1041_v1, %v1033_v0  ;;  %v832_v63 = vld [vmem:[%s7576_s21 + $0x1270] sm:$0xff] }
 0x3db   : > { %v1080_v0 = vld [vmem:[%s7576_s21 + $0x1a30] sm:$0xff]  ;;  %v5749_v6 = vpack.c.bf16 %v832_v63, %v824_v61 }
 0x3dc   : > { %v1088_v1 = vld [vmem:[%s7576_s21 + $0x1a70] sm:$0xff] }
 0x3dd   : > { %v6005_v7 = vpack.c.bf16 %v1088_v1, %v1080_v0 }
 0x3de   : > { %5722 = vmatpush1.bf16.xpose.msra.mxu0 %v5721_v10  ;;  %v793_v10 = vld [vmem:[%s7576_s21 + $0x1138] sm:$0xff] }
 0x3df   : > { %5724 = vmatprep.subr.bf16.mxu0 %v5723_v13  ;;  %v1049_v13 = vld [vmem:[%s7576_s21 + $0x1938] sm:$0xff] }
 0x3e0   : > { %5978 = vmatpush1.bf16.xpose.msra.mxu1 %v5977_v11  ;;  %v801_v11 = vld [vmem:[%s7576_s21 + $0x1178] sm:$0xff] }
 0x3e1   : > { %5980 = vmatprep.subr.bf16.mxu1 %v5979_v14  ;;  %v1057_v14 = vld [vmem:[%s7576_s21 + $0x1978] sm:$0xff]  ;;  %v5739_v20 = vpack.c.bf16 %v801_v11, %v793_v10  ;;  %v840_v10 = vld [vmem:[%s7576_s21 + $0x12b0] sm:$0xff] }
 0x3e2   : > { %v5995_v21 = vpack.c.bf16 %v1057_v14, %v1049_v13  ;;  %v848_v11 = vld [vmem:[%s7576_s21 + $0x12f0] sm:$0xff] }
 0x3e3   : > { %v1096_v13 = vld [vmem:[%s7576_s21 + $0x1ab0] sm:$0xff]  ;;  %v5753_v22 = vpack.c.bf16 %v848_v11, %v840_v10 }
 0x3e4   : > { %v1104_v14 = vld [vmem:[%s7576_s21 + $0x1af0] sm:$0xff] }
 0x3e5   : > { %v6009_v23 = vpack.c.bf16 %v1104_v14, %v1096_v13 }
 0x3e6   : > { %5726 = vmatpush1.bf16.xpose.msra.mxu0 %v5725_v30  ;;  %v809_v30 = vld [vmem:[%s7576_s21 + $0x11b8] sm:$0xff] }
 0x3e7   : > { %5728 = vmatprep.subr.bf16.mxu0 %v5727_v32  ;;  %v1065_v32 = vld [vmem:[%s7576_s21 + $0x19b8] sm:$0xff] }
 0x3e8   : > { %5982 = vmatpush1.bf16.xpose.msra.mxu1 %v5981_v31  ;;  %v817_v31 = vld [vmem:[%s7576_s21 + $0x11f8] sm:$0xff] }
 0x3e9   : > { %5984 = vmatprep.subr.bf16.mxu1 %v5983_v37  ;;  %v1073_v37 = vld [vmem:[%s7576_s21 + $0x19f8] sm:$0xff]  ;;  %v5743_v42 = vpack.c.bf16 %v817_v31, %v809_v30  ;;  %v856_v30 = vld [vmem:[%s7576_s21 + $0x1330] sm:$0xff] }
 0x3ea   : > { %v5999_v44 = vpack.c.bf16 %v1073_v37, %v1065_v32  ;;  %v864_v31 = vld [vmem:[%s7576_s21 + $0x1370] sm:$0xff] }
 0x3eb   : > { %v1112_v32 = vld [vmem:[%s7576_s21 + $0x1b30] sm:$0xff]  ;;  %v5757_v45 = vpack.c.bf16 %v864_v31, %v856_v30 }
 0x3ec   : > { %v1120_v37 = vld [vmem:[%s7576_s21 + $0x1b70] sm:$0xff] }
 0x3ed   : > { %v6013_v35 = vpack.c.bf16 %v1120_v37, %v1112_v32 }
 0x3ee   : > { %5730 = vmatpush1.bf16.xpose.msra.mxu0 %v5729_v49  ;;  %v825_v49 = vld [vmem:[%s7576_s21 + $0x1238] sm:$0xff] }
 0x3ef   : > { %5732 = vmatprep.subr.bf16.mxu0 %v5731_v52  ;;  %v1081_v52 = vld [vmem:[%s7576_s21 + $0x1a38] sm:$0xff] }
 0x3f0   : > { %5986 = vmatpush1.bf16.xpose.msra.mxu1 %v5985_v50  ;;  %v833_v50 = vld [vmem:[%s7576_s21 + $0x1278] sm:$0xff] }
 0x3f1   : > { %5988 = vmatprep.subr.bf16.mxu1 %v5987_v53  ;;  %v1089_v53 = vld [vmem:[%s7576_s21 + $0x1a78] sm:$0xff]  ;;  %v5747_v59 = vpack.c.bf16 %v833_v50, %v825_v49  ;;  %v872_v49 = vld [vmem:[%s7576_s21 + $0x13b0] sm:$0xff] }
 0x3f2   : > { %v6003_v60 = vpack.c.bf16 %v1089_v53, %v1081_v52  ;;  %v880_v50 = vld [vmem:[%s7576_s21 + $0x13f0] sm:$0xff] }
 0x3f3   : > { %v1128_v52 = vld [vmem:[%s7576_s21 + $0x1bb0] sm:$0xff]  ;;  %v5761_v61 = vpack.c.bf16 %v880_v50, %v872_v49 }
 0x3f4   : > { %v1136_v53 = vld [vmem:[%s7576_s21 + $0x1bf0] sm:$0xff] }
 0x3f5   : > { %3190 = vmatmul.mubr.f32.vlgmr.msra.gmra.mrb[2].mxu0 %v8035_v36  ;;  %v6017_v63 = vpack.c.bf16 %v1136_v53, %v1128_v52 }
 0x3f6   : > { %5734 = vmatpush1.bf16.xpose.msra.mxu0 %v5733_v2  ;;  %3260 = vmatprep.mubr.f32.mxu0 %v8041_v43  ;;  %v841_v2 = vld [vmem:[%s7576_s21 + $0x12b8] sm:$0xff] }
 0x3f7   : > { %3474 = vmatmul.mubr.f32.vlgmr.msra.gmra.mrb[2].mxu1 %v8035_v36  ;;  %5736 = vmatprep.subr.bf16.mxu0 %v5735_v5  ;;  %v1097_v5 = vld [vmem:[%s7576_s21 + $0x1ab8] sm:$0xff] }
 0x3f8   : > { %5990 = vmatpush1.bf16.xpose.msra.mxu1 %v5989_v4  ;;  %3544 = vmatprep.mubr.f32.mxu1 %v8041_v43  ;;  %v849_v4 = vld [vmem:[%s7576_s21 + $0x12f8] sm:$0xff] }
 0x3f9   : > { %5992 = vmatprep.subr.bf16.mxu1 %v5991_v17  ;;  %v1105_v17 = vld [vmem:[%s7576_s21 + $0x1af8] sm:$0xff]  ;;  %v5751_v8 = vpack.c.bf16 %v849_v4, %v841_v2  ;;  %v888_v2 = vld [vmem:[%s7576_s21 + $0x1430] sm:$0xff] }
 0x3fa   : > { %v6007_v9 = vpack.c.bf16 %v1105_v17, %v1097_v5  ;;  %v896_v4 = vld [vmem:[%s7576_s21 + $0x1470] sm:$0xff] }
 0x3fb   : > { %v1144_v5 = vld [vmem:[%s7576_s21 + $0x1c30] sm:$0xff]  ;;  %v5765_v10 = vpack.c.bf16 %v896_v4, %v888_v2 }
 0x3fc   : > { %v1152_v17 = vld [vmem:[%s7576_s21 + $0x1c70] sm:$0xff] }
 0x3fd   : > { %v6021_v11 = vpack.c.bf16 %v1152_v17, %v1144_v5 }
 0x3fe   : > { %5738 = vmatpush1.bf16.xpose.msra.mxu0 %v5737_v15  ;;  %v857_v15 = vld [vmem:[%s7576_s21 + $0x1338] sm:$0xff] }
 0x3ff   : > { %5740 = vmatprep.subr.bf16.mxu0 %v5739_v20  ;;  %v1113_v20 = vld [vmem:[%s7576_s21 + $0x1b38] sm:$0xff] }
 0x400   : > { %5994 = vmatpush1.bf16.xpose.msra.mxu1 %v5993_v16  ;;  %v865_v16 = vld [vmem:[%s7576_s21 + $0x1378] sm:$0xff] }
 0x401   : > { %5996 = vmatprep.subr.bf16.mxu1 %v5995_v21  ;;  %v1121_v21 = vld [vmem:[%s7576_s21 + $0x1b78] sm:$0xff]  ;;  %v5755_v28 = vpack.c.bf16 %v865_v16, %v857_v15  ;;  %v904_v15 = vld [vmem:[%s7576_s21 + $0x14b0] sm:$0xff] }
 0x402   : > { %v6011_v29 = vpack.c.bf16 %v1121_v21, %v1113_v20  ;;  %v912_v16 = vld [vmem:[%s7576_s21 + $0x14f0] sm:$0xff] }
 0x403   : > { %v1160_v20 = vld [vmem:[%s7576_s21 + $0x1cb0] sm:$0xff]  ;;  %v5769_v30 = vpack.c.bf16 %v912_v16, %v904_v15 }
 0x404   : > { %v1168_v21 = vld [vmem:[%s7576_s21 + $0x1cf0] sm:$0xff] }
 0x405   : > { %v6025_v31 = vpack.c.bf16 %v1168_v21, %v1160_v20 }
 0x406   : > { %5742 = vmatpush1.bf16.xpose.msra.mxu0 %v5741_v40  ;;  %v873_v40 = vld [vmem:[%s7576_s21 + $0x13b8] sm:$0xff] }
 0x407   : > { %5744 = vmatprep.subr.bf16.mxu0 %v5743_v42  ;;  %v1129_v42 = vld [vmem:[%s7576_s21 + $0x1bb8] sm:$0xff] }
 0x408   : > { %5998 = vmatpush1.bf16.xpose.msra.mxu1 %v5997_v41  ;;  %v881_v41 = vld [vmem:[%s7576_s21 + $0x13f8] sm:$0xff] }
 0x409   : > { %6000 = vmatprep.subr.bf16.mxu1 %v5999_v44  ;;  %v1137_v44 = vld [vmem:[%s7576_s21 + $0x1bf8] sm:$0xff]  ;;  %v5759_v46 = vpack.c.bf16 %v881_v41, %v873_v40  ;;  %v920_v40 = vld [vmem:[%s7576_s21 + $0x1530] sm:$0xff] }
 0x40a   : > { %v6015_v3 = vpack.c.bf16 %v1137_v44, %v1129_v42  ;;  %v928_v41 = vld [vmem:[%s7576_s21 + $0x1570] sm:$0xff] }
 0x40b   : > { %v1176_v42 = vld [vmem:[%s7576_s21 + $0x1d30] sm:$0xff]  ;;  %v5773_v49 = vpack.c.bf16 %v928_v41, %v920_v40 }
 0x40c   : > { %v1184_v44 = vld [vmem:[%s7576_s21 + $0x1d70] sm:$0xff] }
 0x40d   : > { %v6029_v50 = vpack.c.bf16 %v1184_v44, %v1176_v42 }
 0x40e   : > { %5746 = vmatpush1.bf16.xpose.msra.mxu0 %v5745_v56  ;;  %v889_v56 = vld [vmem:[%s7576_s21 + $0x1438] sm:$0xff] }
 0x40f   : > { %5748 = vmatprep.subr.bf16.mxu0 %v5747_v59  ;;  %v1145_v59 = vld [vmem:[%s7576_s21 + $0x1c38] sm:$0xff] }
 0x410   : > { %6002 = vmatpush1.bf16.xpose.msra.mxu1 %v6001_v58  ;;  %v897_v58 = vld [vmem:[%s7576_s21 + $0x1478] sm:$0xff] }
 0x411   : > { %6004 = vmatprep.subr.bf16.mxu1 %v6003_v60  ;;  %v1153_v60 = vld [vmem:[%s7576_s21 + $0x1c78] sm:$0xff]  ;;  %v5763_v0 = vpack.c.bf16 %v897_v58, %v889_v56  ;;  %v936_v56 = vld [vmem:[%s7576_s21 + $0x15b0] sm:$0xff] }
 0x412   : > { %v6019_v1 = vpack.c.bf16 %v1153_v60, %v1145_v59  ;;  %v944_v58 = vld [vmem:[%s7576_s21 + $0x15f0] sm:$0xff] }
 0x413   : > { %v1192_v59 = vld [vmem:[%s7576_s21 + $0x1db0] sm:$0xff]  ;;  %v5777_v2 = vpack.c.bf16 %v944_v58, %v936_v56 }
 0x414   : > { %v1200_v60 = vld [vmem:[%s7576_s21 + $0x1df0] sm:$0xff] }
 0x415   : > { %v6033_v4 = vpack.c.bf16 %v1200_v60, %v1192_v59 }
 0x416   : > { %5750 = vmatpush1.bf16.xpose.msra.mxu0 %v5749_v6  ;;  %v905_v6 = vld [vmem:[%s7576_s21 + $0x14b8] sm:$0xff] }
 0x417   : > { %5752 = vmatprep.subr.bf16.mxu0 %v5751_v8  ;;  %v1161_v8 = vld [vmem:[%s7576_s21 + $0x1cb8] sm:$0xff] }
 0x418   : > { %6006 = vmatpush1.bf16.xpose.msra.mxu1 %v6005_v7  ;;  %v913_v7 = vld [vmem:[%s7576_s21 + $0x14f8] sm:$0xff] }
 0x419   : > { %6008 = vmatprep.subr.bf16.mxu1 %v6007_v9  ;;  %v1169_v9 = vld [vmem:[%s7576_s21 + $0x1cf8] sm:$0xff]  ;;  %v5767_v13 = vpack.c.bf16 %v913_v7, %v905_v6  ;;  %v952_v6 = vld [vmem:[%s7576_s21 + $0x1630] sm:$0xff] }
 0x41a   : > { %v6023_v14 = vpack.c.bf16 %v1169_v9, %v1161_v8  ;;  %v960_v7 = vld [vmem:[%s7576_s21 + $0x1670] sm:$0xff] }
 0x41b   : > { %v1208_v8 = vld [vmem:[%s7576_s21 + $0x1e30] sm:$0xff]  ;;  %v5781_v15 = vpack.c.bf16 %v960_v7, %v952_v6 }
 0x41c   : > { %v1216_v9 = vld [vmem:[%s7576_s21 + $0x1e70] sm:$0xff] }
 0x41d   : > { %v6037_v16 = vpack.c.bf16 %v1216_v9, %v1208_v8 }
 0x41e   : > { %5754 = vmatpush1.bf16.xpose.msra.mxu0 %v5753_v22  ;;  %v921_v22 = vld [vmem:[%s7576_s21 + $0x1538] sm:$0xff] }
 0x41f   : > { %5756 = vmatprep.subr.bf16.mxu0 %v5755_v28  ;;  %v1177_v28 = vld [vmem:[%s7576_s21 + $0x1d38] sm:$0xff] }
 0x420   : > { %6010 = vmatpush1.bf16.xpose.msra.mxu1 %v6009_v23  ;;  %v929_v23 = vld [vmem:[%s7576_s21 + $0x1578] sm:$0xff] }
 0x421   : > { %6012 = vmatprep.subr.bf16.mxu1 %v6011_v29  ;;  %v1185_v29 = vld [vmem:[%s7576_s21 + $0x1d78] sm:$0xff]  ;;  %v5771_v32 = vpack.c.bf16 %v929_v23, %v921_v22  ;;  %v968_v22 = vld [vmem:[%s7576_s21 + $0x16b0] sm:$0xff] }
 0x422   : > { %v6027_v37 = vpack.c.bf16 %v1185_v29, %v1177_v28  ;;  %v976_v23 = vld [vmem:[%s7576_s21 + $0x16f0] sm:$0xff] }
 0x423   : > { %v1224_v28 = vld [vmem:[%s7576_s21 + $0x1eb0] sm:$0xff]  ;;  %v5785_v40 = vpack.c.bf16 %v976_v23, %v968_v22 }
 0x424   : > { %v1232_v29 = vld [vmem:[%s7576_s21 + $0x1ef0] sm:$0xff] }
 0x425   : > { %v6041_v41 = vpack.c.bf16 %v1232_v29, %v1224_v28 }
 0x426   : > { %5758 = vmatpush1.bf16.xpose.msra.mxu0 %v5757_v45  ;;  %v937_v45 = vld [vmem:[%s7576_s21 + $0x15b8] sm:$0xff] }
 0x427   : > { %5760 = vmatprep.subr.bf16.mxu0 %v5759_v46  ;;  %v1193_v46 = vld [vmem:[%s7576_s21 + $0x1db8] sm:$0xff] }
 0x428   : > { %6014 = vmatpush1.bf16.xpose.msra.mxu1 %v6013_v35  ;;  %v945_v35 = vld [vmem:[%s7576_s21 + $0x15f8] sm:$0xff] }
 0x429   : > { %6016 = vmatprep.subr.bf16.mxu1 %v6015_v3  ;;  %v1201_v3 = vld [vmem:[%s7576_s21 + $0x1df8] sm:$0xff]  ;;  %v5775_v52 = vpack.c.bf16 %v945_v35, %v937_v45  ;;  %v984_v45 = vld [vmem:[%s7576_s21 + $0x1730] sm:$0xff] }
 0x42a   : > { %v6031_v53 = vpack.c.bf16 %v1201_v3, %v1193_v46  ;;  %v992_v35 = vld [vmem:[%s7576_s21 + $0x1770] sm:$0xff] }
 0x42b   : > { %v1240_v46 = vld [vmem:[%s7576_s21 + $0x1f30] sm:$0xff]  ;;  %v5789_v56 = vpack.c.bf16 %v992_v35, %v984_v45 }
 0x42c   : > { %v1248_v3 = vld [vmem:[%s7576_s21 + $0x1f70] sm:$0xff] }
 0x42d   : > { %v6045_v58 = vpack.c.bf16 %v1248_v3, %v1240_v46 }
 0x42e   : > { %5762 = vmatpush1.bf16.xpose.msra.mxu0 %v5761_v61  ;;  %v953_v61 = vld [vmem:[%s7576_s21 + $0x1638] sm:$0xff] }
 0x42f   : > { %5764 = vmatprep.subr.bf16.mxu0 %v5763_v0  ;;  %v1209_v0 = vld [vmem:[%s7576_s21 + $0x1e38] sm:$0xff] }
 0x430   : > { %6018 = vmatpush1.bf16.xpose.msra.mxu1 %v6017_v63  ;;  %v961_v63 = vld [vmem:[%s7576_s21 + $0x1678] sm:$0xff] }
 0x431   : > { %6020 = vmatprep.subr.bf16.mxu1 %v6019_v1  ;;  %v1217_v1 = vld [vmem:[%s7576_s21 + $0x1e78] sm:$0xff]  ;;  %v5779_v5 = vpack.c.bf16 %v961_v63, %v953_v61  ;;  %v1000_v61 = vld [vmem:[%s7576_s21 + $0x17b0] sm:$0xff] }
 0x432   : > { %v6035_v17 = vpack.c.bf16 %v1217_v1, %v1209_v0  ;;  %v1008_v63 = vld [vmem:[%s7576_s21 + $0x17f0] sm:$0xff] }
 0x433   : > { %v1256_v0 = vld [vmem:[%s7576_s21 + $0x1fb0] sm:$0xff]  ;;  %v5793_v6 = vpack.c.bf16 %v1008_v63, %v1000_v61 }
 0x434   : > { %v1264_v1 = vld [vmem:[%s7576_s21 + $0x1ff0] sm:$0xff] }
 0x435   : > { %v6049_v7 = vpack.c.bf16 %v1264_v1, %v1256_v0 }
 0x436   : > { %5766 = vmatpush1.bf16.xpose.msra.mxu0 %v5765_v10  ;;  %v969_v10 = vld [vmem:[%s7576_s21 + $0x16b8] sm:$0xff] }
 0x437   : > { %5768 = vmatprep.subr.bf16.mxu0 %v5767_v13  ;;  %v1225_v13 = vld [vmem:[%s7576_s21 + $0x1eb8] sm:$0xff] }
 0x438   : > { %6022 = vmatpush1.bf16.xpose.msra.mxu1 %v6021_v11  ;;  %v977_v11 = vld [vmem:[%s7576_s21 + $0x16f8] sm:$0xff] }
 0x439   : > { %6024 = vmatprep.subr.bf16.mxu1 %v6023_v14  ;;  %v1233_v14 = vld [vmem:[%s7576_s21 + $0x1ef8] sm:$0xff]  ;;  %v5783_v20 = vpack.c.bf16 %v977_v11, %v969_v10  ;;  %v1266_v10 = vld [vmem:[%s7576_s21 + $0x2000] sm:$0xff] }
 0x43a   : > { %v6039_v21 = vpack.c.bf16 %v1233_v14, %v1225_v13  ;;  %v1274_v11 = vld [vmem:[%s7576_s21 + $0x2040] sm:$0xff] }
 0x43b   : > { %v1522_v13 = vld [vmem:[%s7576_s21 + $0x2800] sm:$0xff]  ;;  %v6053_v22 = vpack.c.bf16 %v1274_v11, %v1266_v10 }
 0x43c   : > { %v1530_v14 = vld [vmem:[%s7576_s21 + $0x2840] sm:$0xff] }
 0x43d   : > { %v6309_v23 = vpack.c.bf16 %v1530_v14, %v1522_v13 }
 0x43e   : > { %5770 = vmatpush1.bf16.xpose.msra.mxu0 %v5769_v30  ;;  %v985_v30 = vld [vmem:[%s7576_s21 + $0x1738] sm:$0xff] }
 0x43f   : > { %5772 = vmatprep.subr.bf16.mxu0 %v5771_v32  ;;  %v1241_v32 = vld [vmem:[%s7576_s21 + $0x1f38] sm:$0xff] }
 0x440   : > { %6026 = vmatpush1.bf16.xpose.msra.mxu1 %v6025_v31  ;;  %v993_v31 = vld [vmem:[%s7576_s21 + $0x1778] sm:$0xff] }
 0x441   : > { %6028 = vmatprep.subr.bf16.mxu1 %v6027_v37  ;;  %v1249_v37 = vld [vmem:[%s7576_s21 + $0x1f78] sm:$0xff]  ;;  %v5787_v42 = vpack.c.bf16 %v993_v31, %v985_v30  ;;  %v1282_v30 = vld [vmem:[%s7576_s21 + $0x2080] sm:$0xff] }
 0x442   : > { %v6043_v44 = vpack.c.bf16 %v1249_v37, %v1241_v32  ;;  %v1290_v31 = vld [vmem:[%s7576_s21 + $0x20c0] sm:$0xff] }
 0x443   : > { %v1538_v32 = vld [vmem:[%s7576_s21 + $0x2880] sm:$0xff]  ;;  %v6057_v45 = vpack.c.bf16 %v1290_v31, %v1282_v30 }
 0x444   : > { %v1546_v37 = vld [vmem:[%s7576_s21 + $0x28c0] sm:$0xff] }
 0x445   : > { %v6313_v35 = vpack.c.bf16 %v1546_v37, %v1538_v32 }
 0x446   : > { %5774 = vmatpush1.bf16.xpose.msra.mxu0 %v5773_v49  ;;  %v1001_v49 = vld [vmem:[%s7576_s21 + $0x17b8] sm:$0xff] }
 0x447   : > { %5776 = vmatprep.subr.bf16.mxu0 %v5775_v52  ;;  %v1257_v52 = vld [vmem:[%s7576_s21 + $0x1fb8] sm:$0xff] }
 0x448   : > { %6030 = vmatpush1.bf16.xpose.msra.mxu1 %v6029_v50  ;;  %v1009_v50 = vld [vmem:[%s7576_s21 + $0x17f8] sm:$0xff] }
 0x449   : > { %6032 = vmatprep.subr.bf16.mxu1 %v6031_v53  ;;  %v1265_v53 = vld [vmem:[%s7576_s21 + $0x1ff8] sm:$0xff]  ;;  %v5791_v59 = vpack.c.bf16 %v1009_v50, %v1001_v49  ;;  %v1298_v49 = vld [vmem:[%s7576_s21 + $0x2100] sm:$0xff] }
 0x44a   : > { %v6047_v60 = vpack.c.bf16 %v1265_v53, %v1257_v52  ;;  %v1306_v50 = vld [vmem:[%s7576_s21 + $0x2140] sm:$0xff] }
 0x44b   : > { %v1554_v52 = vld [vmem:[%s7576_s21 + $0x2900] sm:$0xff]  ;;  %v6061_v61 = vpack.c.bf16 %v1306_v50, %v1298_v49 }
 0x44c   : > { %v1562_v53 = vld [vmem:[%s7576_s21 + $0x2940] sm:$0xff] }
 0x44d   : > { %v6317_v63 = vpack.c.bf16 %v1562_v53, %v1554_v52 }
 0x44e   : > { %5778 = vmatpush1.bf16.xpose.msra.mxu0 %v5777_v2  ;;  %v1267_v2 = vld [vmem:[%s7576_s21 + $0x2008] sm:$0xff] }
 0x44f   : > { %5780 = vmatprep.subr.bf16.mxu0 %v5779_v5  ;;  %v1523_v5 = vld [vmem:[%s7576_s21 + $0x2808] sm:$0xff] }
 0x450   : > { %6034 = vmatpush1.bf16.xpose.msra.mxu1 %v6033_v4  ;;  %v1275_v4 = vld [vmem:[%s7576_s21 + $0x2048] sm:$0xff] }
 0x451   : > { %6036 = vmatprep.subr.bf16.mxu1 %v6035_v17  ;;  %v1531_v17 = vld [vmem:[%s7576_s21 + $0x2848] sm:$0xff]  ;;  %v6051_v8 = vpack.c.bf16 %v1275_v4, %v1267_v2  ;;  %v1314_v2 = vld [vmem:[%s7576_s21 + $0x2180] sm:$0xff] }
 0x452   : > { %v6307_v9 = vpack.c.bf16 %v1531_v17, %v1523_v5  ;;  %v1322_v4 = vld [vmem:[%s7576_s21 + $0x21c0] sm:$0xff] }
 0x453   : > { %v1570_v5 = vld [vmem:[%s7576_s21 + $0x2980] sm:$0xff]  ;;  %v6065_v10 = vpack.c.bf16 %v1322_v4, %v1314_v2 }
 0x454   : > { %v1578_v17 = vld [vmem:[%s7576_s21 + $0x29c0] sm:$0xff] }
 0x455   : > { %v6321_v11 = vpack.c.bf16 %v1578_v17, %v1570_v5 }
 0x456   : > { %5782 = vmatpush1.bf16.xpose.msra.mxu0 %v5781_v15  ;;  %v1283_v15 = vld [vmem:[%s7576_s21 + $0x2088] sm:$0xff] }
 0x457   : > { %5784 = vmatprep.subr.bf16.mxu0 %v5783_v20  ;;  %v1539_v20 = vld [vmem:[%s7576_s21 + $0x2888] sm:$0xff] }
 0x458   : > { %6038 = vmatpush1.bf16.xpose.msra.mxu1 %v6037_v16  ;;  %v1291_v16 = vld [vmem:[%s7576_s21 + $0x20c8] sm:$0xff] }
 0x459   : > { %6040 = vmatprep.subr.bf16.mxu1 %v6039_v21  ;;  %v1547_v21 = vld [vmem:[%s7576_s21 + $0x28c8] sm:$0xff]  ;;  %v6055_v28 = vpack.c.bf16 %v1291_v16, %v1283_v15  ;;  %v1330_v15 = vld [vmem:[%s7576_s21 + $0x2200] sm:$0xff] }
 0x45a   : > { %v6311_v29 = vpack.c.bf16 %v1547_v21, %v1539_v20  ;;  %v1338_v16 = vld [vmem:[%s7576_s21 + $0x2240] sm:$0xff] }
 0x45b   : > { %v1586_v20 = vld [vmem:[%s7576_s21 + $0x2a00] sm:$0xff]  ;;  %v6069_v30 = vpack.c.bf16 %v1338_v16, %v1330_v15 }
 0x45c   : > { %v1594_v21 = vld [vmem:[%s7576_s21 + $0x2a40] sm:$0xff] }
 0x45d   : > { %v6325_v31 = vpack.c.bf16 %v1594_v21, %v1586_v20 }
 0x45e   : > { %5786 = vmatpush1.bf16.xpose.msra.mxu0 %v5785_v40  ;;  %v1299_v40 = vld [vmem:[%s7576_s21 + $0x2108] sm:$0xff] }
 0x45f   : > { %5788 = vmatprep.subr.bf16.mxu0 %v5787_v42  ;;  %v1555_v42 = vld [vmem:[%s7576_s21 + $0x2908] sm:$0xff] }
 0x460   : > { %6042 = vmatpush1.bf16.xpose.msra.mxu1 %v6041_v41  ;;  %v1307_v41 = vld [vmem:[%s7576_s21 + $0x2148] sm:$0xff] }
 0x461   : > { %6044 = vmatprep.subr.bf16.mxu1 %v6043_v44  ;;  %v1563_v44 = vld [vmem:[%s7576_s21 + $0x2948] sm:$0xff]  ;;  %v6059_v46 = vpack.c.bf16 %v1307_v41, %v1299_v40  ;;  %v1346_v40 = vld [vmem:[%s7576_s21 + $0x2280] sm:$0xff] }
 0x462   : > { %v6315_v3 = vpack.c.bf16 %v1563_v44, %v1555_v42  ;;  %v1354_v41 = vld [vmem:[%s7576_s21 + $0x22c0] sm:$0xff] }
 0x463   : > { %v1602_v42 = vld [vmem:[%s7576_s21 + $0x2a80] sm:$0xff]  ;;  %v6073_v49 = vpack.c.bf16 %v1354_v41, %v1346_v40 }
 0x464   : > { %v1610_v44 = vld [vmem:[%s7576_s21 + $0x2ac0] sm:$0xff] }
 0x465   : > { %v6329_v50 = vpack.c.bf16 %v1610_v44, %v1602_v42 }
 0x466   : > { %5790 = vmatpush1.bf16.xpose.msra.mxu0 %v5789_v56  ;;  %v1315_v56 = vld [vmem:[%s7576_s21 + $0x2188] sm:$0xff] }
 0x467   : > { %5792 = vmatprep.subr.bf16.mxu0 %v5791_v59  ;;  %v1571_v59 = vld [vmem:[%s7576_s21 + $0x2988] sm:$0xff] }
 0x468   : > { %6046 = vmatpush1.bf16.xpose.msra.mxu1 %v6045_v58  ;;  %v1323_v58 = vld [vmem:[%s7576_s21 + $0x21c8] sm:$0xff] }
 0x469   : > { %6048 = vmatprep.subr.bf16.mxu1 %v6047_v60  ;;  %v1579_v60 = vld [vmem:[%s7576_s21 + $0x29c8] sm:$0xff]  ;;  %v6063_v0 = vpack.c.bf16 %v1323_v58, %v1315_v56  ;;  %v1362_v56 = vld [vmem:[%s7576_s21 + $0x2300] sm:$0xff] }
 0x46a   : > { %v6319_v1 = vpack.c.bf16 %v1579_v60, %v1571_v59  ;;  %v1370_v58 = vld [vmem:[%s7576_s21 + $0x2340] sm:$0xff] }
 0x46b   : > { %v1618_v59 = vld [vmem:[%s7576_s21 + $0x2b00] sm:$0xff]  ;;  %v6077_v2 = vpack.c.bf16 %v1370_v58, %v1362_v56 }
 0x46c   : > { %v1626_v60 = vld [vmem:[%s7576_s21 + $0x2b40] sm:$0xff] }
 0x46d   : > { %v6333_v4 = vpack.c.bf16 %v1626_v60, %v1618_v59 }
 0x46e   : > { %5794 = vmatpush1.bf16.xpose.msra.mxu0 %v5793_v6  ;;  %v1331_v6 = vld [vmem:[%s7576_s21 + $0x2208] sm:$0xff] }
 0x46f   : > { %6052 = vmatprep.subr.bf16.mxu0 %v6051_v8  ;;  %v1587_v8 = vld [vmem:[%s7576_s21 + $0x2a08] sm:$0xff] }
 0x470   : > { %6050 = vmatpush1.bf16.xpose.msra.mxu1 %v6049_v7  ;;  %v1339_v7 = vld [vmem:[%s7576_s21 + $0x2248] sm:$0xff] }
 0x471   : > { %6308 = vmatprep.subr.bf16.mxu1 %v6307_v9  ;;  %v1595_v9 = vld [vmem:[%s7576_s21 + $0x2a48] sm:$0xff]  ;;  %v6067_v13 = vpack.c.bf16 %v1339_v7, %v1331_v6  ;;  %v1378_v6 = vld [vmem:[%s7576_s21 + $0x2380] sm:$0xff] }
 0x472   : > { %v6323_v14 = vpack.c.bf16 %v1595_v9, %v1587_v8  ;;  %v1386_v7 = vld [vmem:[%s7576_s21 + $0x23c0] sm:$0xff] }
 0x473   : > { %v1634_v8 = vld [vmem:[%s7576_s21 + $0x2b80] sm:$0xff]  ;;  %v6081_v15 = vpack.c.bf16 %v1386_v7, %v1378_v6 }
 0x474   : > { %v1642_v9 = vld [vmem:[%s7576_s21 + $0x2bc0] sm:$0xff] }
 0x475   : > { %3261 = vmatmul.mubr.f32.vlgmr.msra.gmra.mrb[2].mxu0 %v8178_v38  ;;  %v6337_v16 = vpack.c.bf16 %v1642_v9, %v1634_v8 }
 0x476   : > { %6054 = vmatpush1.bf16.xpose.msra.mxu0 %v6053_v22  ;;  %3615 = vmatprep.mubr.f32.mxu0 %v7643_v18  ;;  %v1347_v22 = vld [vmem:[%s7576_s21 + $0x2288] sm:$0xff] }
 0x477   : > { %3545 = vmatmul.mubr.f32.vlgmr.msra.gmra.mrb[2].mxu1 %v8178_v38  ;;  %6056 = vmatprep.subr.bf16.mxu0 %v6055_v28  ;;  %v1603_v28 = vld [vmem:[%s7576_s21 + $0x2a88] sm:$0xff] }
 0x478   : > { %6310 = vmatpush1.bf16.xpose.msra.mxu1 %v6309_v23  ;;  %3899 = vmatprep.mubr.f32.mxu1 %v7643_v18  ;;  %v1355_v23 = vld [vmem:[%s7576_s21 + $0x22c8] sm:$0xff] }
 0x479   : > { %6312 = vmatprep.subr.bf16.mxu1 %v6311_v29  ;;  %v1611_v29 = vld [vmem:[%s7576_s21 + $0x2ac8] sm:$0xff]  ;;  %v6071_v32 = vpack.c.bf16 %v1355_v23, %v1347_v22  ;;  %v1394_v22 = vld [vmem:[%s7576_s21 + $0x2400] sm:$0xff] }
 0x47a   : > { %v6327_v37 = vpack.c.bf16 %v1611_v29, %v1603_v28  ;;  %v1402_v23 = vld [vmem:[%s7576_s21 + $0x2440] sm:$0xff] }
 0x47b   : > { %v1650_v28 = vld [vmem:[%s7576_s21 + $0x2c00] sm:$0xff]  ;;  %v6085_v40 = vpack.c.bf16 %v1402_v23, %v1394_v22 }
 0x47c   : > { %v1658_v29 = vld [vmem:[%s7576_s21 + $0x2c40] sm:$0xff] }
 0x47d   : > { %v6341_v41 = vpack.c.bf16 %v1658_v29, %v1650_v28 }
 0x47e   : > { %6058 = vmatpush1.bf16.xpose.msra.mxu0 %v6057_v45  ;;  %v1363_v45 = vld [vmem:[%s7576_s21 + $0x2308] sm:$0xff] }
 0x47f   : > { %6060 = vmatprep.subr.bf16.mxu0 %v6059_v46  ;;  %v1619_v46 = vld [vmem:[%s7576_s21 + $0x2b08] sm:$0xff] }
 0x480   : > { %6314 = vmatpush1.bf16.xpose.msra.mxu1 %v6313_v35  ;;  %v1371_v35 = vld [vmem:[%s7576_s21 + $0x2348] sm:$0xff] }
 0x481   : > { %6316 = vmatprep.subr.bf16.mxu1 %v6315_v3  ;;  %v1627_v3 = vld [vmem:[%s7576_s21 + $0x2b48] sm:$0xff]  ;;  %v6075_v52 = vpack.c.bf16 %v1371_v35, %v1363_v45  ;;  %v1410_v45 = vld [vmem:[%s7576_s21 + $0x2480] sm:$0xff] }
 0x482   : > { %v6331_v53 = vpack.c.bf16 %v1627_v3, %v1619_v46  ;;  %v1418_v35 = vld [vmem:[%s7576_s21 + $0x24c0] sm:$0xff] }
 0x483   : > { %v1666_v46 = vld [vmem:[%s7576_s21 + $0x2c80] sm:$0xff]  ;;  %v6089_v56 = vpack.c.bf16 %v1418_v35, %v1410_v45 }
 0x484   : > { %v1674_v3 = vld [vmem:[%s7576_s21 + $0x2cc0] sm:$0xff] }
 0x485   : > { %v6345_v58 = vpack.c.bf16 %v1674_v3, %v1666_v46 }
 0x486   : > { %6062 = vmatpush1.bf16.xpose.msra.mxu0 %v6061_v61  ;;  %v1379_v61 = vld [vmem:[%s7576_s21 + $0x2388] sm:$0xff] }
 0x487   : > { %6064 = vmatprep.subr.bf16.mxu0 %v6063_v0  ;;  %v1635_v0 = vld [vmem:[%s7576_s21 + $0x2b88] sm:$0xff] }
 0x488   : > { %6318 = vmatpush1.bf16.xpose.msra.mxu1 %v6317_v63  ;;  %v1387_v63 = vld [vmem:[%s7576_s21 + $0x23c8] sm:$0xff] }
 0x489   : > { %6320 = vmatprep.subr.bf16.mxu1 %v6319_v1  ;;  %v1643_v1 = vld [vmem:[%s7576_s21 + $0x2bc8] sm:$0xff]  ;;  %v6079_v5 = vpack.c.bf16 %v1387_v63, %v1379_v61  ;;  %v1426_v61 = vld [vmem:[%s7576_s21 + $0x2500] sm:$0xff] }
 0x48a   : > { %v6335_v17 = vpack.c.bf16 %v1643_v1, %v1635_v0  ;;  %v1434_v63 = vld [vmem:[%s7576_s21 + $0x2540] sm:$0xff] }
 0x48b   : > { %v1682_v0 = vld [vmem:[%s7576_s21 + $0x2d00] sm:$0xff]  ;;  %v6093_v6 = vpack.c.bf16 %v1434_v63, %v1426_v61 }
 0x48c   : > { %v1690_v1 = vld [vmem:[%s7576_s21 + $0x2d40] sm:$0xff] }
 0x48d   : > { %v6349_v7 = vpack.c.bf16 %v1690_v1, %v1682_v0 }
 0x48e   : > { %6066 = vmatpush1.bf16.xpose.msra.mxu0 %v6065_v10  ;;  %v1395_v10 = vld [vmem:[%s7576_s21 + $0x2408] sm:$0xff] }
 0x48f   : > { %6068 = vmatprep.subr.bf16.mxu0 %v6067_v13  ;;  %v1651_v13 = vld [vmem:[%s7576_s21 + $0x2c08] sm:$0xff] }
 0x490   : > { %6322 = vmatpush1.bf16.xpose.msra.mxu1 %v6321_v11  ;;  %v1403_v11 = vld [vmem:[%s7576_s21 + $0x2448] sm:$0xff] }
 0x491   : > { %6324 = vmatprep.subr.bf16.mxu1 %v6323_v14  ;;  %v1659_v14 = vld [vmem:[%s7576_s21 + $0x2c48] sm:$0xff]  ;;  %v6083_v20 = vpack.c.bf16 %v1403_v11, %v1395_v10  ;;  %v1442_v10 = vld [vmem:[%s7576_s21 + $0x2580] sm:$0xff] }
 0x492   : > { %v6339_v21 = vpack.c.bf16 %v1659_v14, %v1651_v13  ;;  %v1450_v11 = vld [vmem:[%s7576_s21 + $0x25c0] sm:$0xff] }
 0x493   : > { %v1698_v13 = vld [vmem:[%s7576_s21 + $0x2d80] sm:$0xff]  ;;  %v6097_v22 = vpack.c.bf16 %v1450_v11, %v1442_v10 }
 0x494   : > { %v1706_v14 = vld [vmem:[%s7576_s21 + $0x2dc0] sm:$0xff] }
 0x495   : > { %v6353_v23 = vpack.c.bf16 %v1706_v14, %v1698_v13 }
 0x496   : > { %6070 = vmatpush1.bf16.xpose.msra.mxu0 %v6069_v30  ;;  %v1411_v30 = vld [vmem:[%s7576_s21 + $0x2488] sm:$0xff] }
 0x497   : > { %6072 = vmatprep.subr.bf16.mxu0 %v6071_v32  ;;  %v1667_v32 = vld [vmem:[%s7576_s21 + $0x2c88] sm:$0xff] }
 0x498   : > { %6326 = vmatpush1.bf16.xpose.msra.mxu1 %v6325_v31  ;;  %v1419_v31 = vld [vmem:[%s7576_s21 + $0x24c8] sm:$0xff] }
 0x499   : > { %6328 = vmatprep.subr.bf16.mxu1 %v6327_v37  ;;  %v1675_v37 = vld [vmem:[%s7576_s21 + $0x2cc8] sm:$0xff]  ;;  %v6087_v42 = vpack.c.bf16 %v1419_v31, %v1411_v30  ;;  %v1458_v30 = vld [vmem:[%s7576_s21 + $0x2600] sm:$0xff] }
 0x49a   : > { %v6343_v44 = vpack.c.bf16 %v1675_v37, %v1667_v32  ;;  %v1466_v31 = vld [vmem:[%s7576_s21 + $0x2640] sm:$0xff] }
 0x49b   : > { %v1714_v32 = vld [vmem:[%s7576_s21 + $0x2e00] sm:$0xff]  ;;  %v6101_v45 = vpack.c.bf16 %v1466_v31, %v1458_v30 }
 0x49c   : > { %v1722_v37 = vld [vmem:[%s7576_s21 + $0x2e40] sm:$0xff] }
 0x49d   : > { %v6357_v35 = vpack.c.bf16 %v1722_v37, %v1714_v32 }
 0x49e   : > { %6074 = vmatpush1.bf16.xpose.msra.mxu0 %v6073_v49  ;;  %v1427_v49 = vld [vmem:[%s7576_s21 + $0x2508] sm:$0xff] }
 0x49f   : > { %6076 = vmatprep.subr.bf16.mxu0 %v6075_v52  ;;  %v1683_v52 = vld [vmem:[%s7576_s21 + $0x2d08] sm:$0xff] }
 0x4a0   : > { %6330 = vmatpush1.bf16.xpose.msra.mxu1 %v6329_v50  ;;  %v1435_v50 = vld [vmem:[%s7576_s21 + $0x2548] sm:$0xff] }
 0x4a1   : > { %6332 = vmatprep.subr.bf16.mxu1 %v6331_v53  ;;  %v1691_v53 = vld [vmem:[%s7576_s21 + $0x2d48] sm:$0xff]  ;;  %v6091_v59 = vpack.c.bf16 %v1435_v50, %v1427_v49  ;;  %v1474_v49 = vld [vmem:[%s7576_s21 + $0x2680] sm:$0xff] }
 0x4a2   : > { %v6347_v60 = vpack.c.bf16 %v1691_v53, %v1683_v52  ;;  %v1482_v50 = vld [vmem:[%s7576_s21 + $0x26c0] sm:$0xff] }
 0x4a3   : > { %v1730_v52 = vld [vmem:[%s7576_s21 + $0x2e80] sm:$0xff]  ;;  %v6105_v61 = vpack.c.bf16 %v1482_v50, %v1474_v49 }
 0x4a4   : > { %v1738_v53 = vld [vmem:[%s7576_s21 + $0x2ec0] sm:$0xff] }
 0x4a5   : > { %v6361_v63 = vpack.c.bf16 %v1738_v53, %v1730_v52 }
 0x4a6   : > { %6078 = vmatpush1.bf16.xpose.msra.mxu0 %v6077_v2  ;;  %v1443_v2 = vld [vmem:[%s7576_s21 + $0x2588] sm:$0xff] }
 0x4a7   : > { %6080 = vmatprep.subr.bf16.mxu0 %v6079_v5  ;;  %v1699_v5 = vld [vmem:[%s7576_s21 + $0x2d88] sm:$0xff] }
 0x4a8   : > { %6334 = vmatpush1.bf16.xpose.msra.mxu1 %v6333_v4  ;;  %v1451_v4 = vld [vmem:[%s7576_s21 + $0x25c8] sm:$0xff] }
 0x4a9   : > { %6336 = vmatprep.subr.bf16.mxu1 %v6335_v17  ;;  %v1707_v17 = vld [vmem:[%s7576_s21 + $0x2dc8] sm:$0xff]  ;;  %v6095_v8 = vpack.c.bf16 %v1451_v4, %v1443_v2  ;;  %v1490_v2 = vld [vmem:[%s7576_s21 + $0x2700] sm:$0xff] }
 0x4aa   : > { %v6351_v9 = vpack.c.bf16 %v1707_v17, %v1699_v5  ;;  %v1498_v4 = vld [vmem:[%s7576_s21 + $0x2740] sm:$0xff] }
 0x4ab   : > { %v1746_v5 = vld [vmem:[%s7576_s21 + $0x2f00] sm:$0xff]  ;;  %v6109_v10 = vpack.c.bf16 %v1498_v4, %v1490_v2 }
 0x4ac   : > { %v1754_v17 = vld [vmem:[%s7576_s21 + $0x2f40] sm:$0xff] }
 0x4ad   : > { %v6365_v11 = vpack.c.bf16 %v1754_v17, %v1746_v5 }
 0x4ae   : > { %6082 = vmatpush1.bf16.xpose.msra.mxu0 %v6081_v15  ;;  %v1459_v15 = vld [vmem:[%s7576_s21 + $0x2608] sm:$0xff] }
 0x4af   : > { %6084 = vmatprep.subr.bf16.mxu0 %v6083_v20  ;;  %v1715_v20 = vld [vmem:[%s7576_s21 + $0x2e08] sm:$0xff] }
 0x4b0   : > { %6338 = vmatpush1.bf16.xpose.msra.mxu1 %v6337_v16  ;;  %v1467_v16 = vld [vmem:[%s7576_s21 + $0x2648] sm:$0xff] }
 0x4b1   : > { %6340 = vmatprep.subr.bf16.mxu1 %v6339_v21  ;;  %v1723_v21 = vld [vmem:[%s7576_s21 + $0x2e48] sm:$0xff]  ;;  %v6099_v28 = vpack.c.bf16 %v1467_v16, %v1459_v15  ;;  %v1506_v15 = vld [vmem:[%s7576_s21 + $0x2780] sm:$0xff] }
 0x4b2   : > { %v6355_v29 = vpack.c.bf16 %v1723_v21, %v1715_v20  ;;  %v1514_v16 = vld [vmem:[%s7576_s21 + $0x27c0] sm:$0xff] }
 0x4b3   : > { %v1762_v20 = vld [vmem:[%s7576_s21 + $0x2f80] sm:$0xff]  ;;  %v6113_v30 = vpack.c.bf16 %v1514_v16, %v1506_v15 }
 0x4b4   : > { %v1770_v21 = vld [vmem:[%s7576_s21 + $0x2fc0] sm:$0xff] }
 0x4b5   : > { %v6369_v31 = vpack.c.bf16 %v1770_v21, %v1762_v20 }
 0x4b6   : > { %6086 = vmatpush1.bf16.xpose.msra.mxu0 %v6085_v40  ;;  %v1475_v40 = vld [vmem:[%s7576_s21 + $0x2688] sm:$0xff] }
 0x4b7   : > { %6088 = vmatprep.subr.bf16.mxu0 %v6087_v42  ;;  %v1731_v42 = vld [vmem:[%s7576_s21 + $0x2e88] sm:$0xff] }
 0x4b8   : > { %6342 = vmatpush1.bf16.xpose.msra.mxu1 %v6341_v41  ;;  %v1483_v41 = vld [vmem:[%s7576_s21 + $0x26c8] sm:$0xff] }
 0x4b9   : > { %6344 = vmatprep.subr.bf16.mxu1 %v6343_v44  ;;  %v1739_v44 = vld [vmem:[%s7576_s21 + $0x2ec8] sm:$0xff]  ;;  %v6103_v46 = vpack.c.bf16 %v1483_v41, %v1475_v40  ;;  %v1268_v40 = vld [vmem:[%s7576_s21 + $0x2010] sm:$0xff] }
 0x4ba   : > { %v6359_v3 = vpack.c.bf16 %v1739_v44, %v1731_v42  ;;  %v1276_v41 = vld [vmem:[%s7576_s21 + $0x2050] sm:$0xff] }
 0x4bb   : > { %v1524_v42 = vld [vmem:[%s7576_s21 + $0x2810] sm:$0xff]  ;;  %v6117_v49 = vpack.c.bf16 %v1276_v41, %v1268_v40 }
 0x4bc   : > { %v1532_v44 = vld [vmem:[%s7576_s21 + $0x2850] sm:$0xff] }
 0x4bd   : > { %v6373_v50 = vpack.c.bf16 %v1532_v44, %v1524_v42 }
 0x4be   : > { %6090 = vmatpush1.bf16.xpose.msra.mxu0 %v6089_v56  ;;  %v1491_v56 = vld [vmem:[%s7576_s21 + $0x2708] sm:$0xff] }
 0x4bf   : > { %6092 = vmatprep.subr.bf16.mxu0 %v6091_v59  ;;  %v1747_v59 = vld [vmem:[%s7576_s21 + $0x2f08] sm:$0xff] }
 0x4c0   : > { %6346 = vmatpush1.bf16.xpose.msra.mxu1 %v6345_v58  ;;  %v1499_v58 = vld [vmem:[%s7576_s21 + $0x2748] sm:$0xff] }
 0x4c1   : > { %6348 = vmatprep.subr.bf16.mxu1 %v6347_v60  ;;  %v1755_v60 = vld [vmem:[%s7576_s21 + $0x2f48] sm:$0xff]  ;;  %v6107_v0 = vpack.c.bf16 %v1499_v58, %v1491_v56  ;;  %v1284_v56 = vld [vmem:[%s7576_s21 + $0x2090] sm:$0xff] }
 0x4c2   : > { %v6363_v1 = vpack.c.bf16 %v1755_v60, %v1747_v59  ;;  %v1292_v58 = vld [vmem:[%s7576_s21 + $0x20d0] sm:$0xff] }
 0x4c3   : > { %v1540_v59 = vld [vmem:[%s7576_s21 + $0x2890] sm:$0xff]  ;;  %v6121_v2 = vpack.c.bf16 %v1292_v58, %v1284_v56 }
 0x4c4   : > { %v1548_v60 = vld [vmem:[%s7576_s21 + $0x28d0] sm:$0xff] }
 0x4c5   : > { %v6377_v4 = vpack.c.bf16 %v1548_v60, %v1540_v59 }
 0x4c6   : > { %6094 = vmatpush1.bf16.xpose.msra.mxu0 %v6093_v6  ;;  %v1507_v6 = vld [vmem:[%s7576_s21 + $0x2788] sm:$0xff] }
 0x4c7   : > { %6096 = vmatprep.subr.bf16.mxu0 %v6095_v8  ;;  %v1763_v8 = vld [vmem:[%s7576_s21 + $0x2f88] sm:$0xff] }
 0x4c8   : > { %6350 = vmatpush1.bf16.xpose.msra.mxu1 %v6349_v7  ;;  %v1515_v7 = vld [vmem:[%s7576_s21 + $0x27c8] sm:$0xff] }
 0x4c9   : > { %6352 = vmatprep.subr.bf16.mxu1 %v6351_v9  ;;  %v1771_v9 = vld [vmem:[%s7576_s21 + $0x2fc8] sm:$0xff]  ;;  %v6111_v13 = vpack.c.bf16 %v1515_v7, %v1507_v6  ;;  %v1300_v6 = vld [vmem:[%s7576_s21 + $0x2110] sm:$0xff] }
 0x4ca   : > { %v6367_v14 = vpack.c.bf16 %v1771_v9, %v1763_v8  ;;  %v1308_v7 = vld [vmem:[%s7576_s21 + $0x2150] sm:$0xff] }
 0x4cb   : > { %v1556_v8 = vld [vmem:[%s7576_s21 + $0x2910] sm:$0xff]  ;;  %v6125_v15 = vpack.c.bf16 %v1308_v7, %v1300_v6 }
 0x4cc   : > { %v1564_v9 = vld [vmem:[%s7576_s21 + $0x2950] sm:$0xff] }
 0x4cd   : > { %v6381_v16 = vpack.c.bf16 %v1564_v9, %v1556_v8 }
 0x4ce   : > { %6098 = vmatpush1.bf16.xpose.msra.mxu0 %v6097_v22  ;;  %v1269_v22 = vld [vmem:[%s7576_s21 + $0x2018] sm:$0xff] }
 0x4cf   : > { %6100 = vmatprep.subr.bf16.mxu0 %v6099_v28  ;;  %v1525_v28 = vld [vmem:[%s7576_s21 + $0x2818] sm:$0xff] }
 0x4d0   : > { %6354 = vmatpush1.bf16.xpose.msra.mxu1 %v6353_v23  ;;  %v1277_v23 = vld [vmem:[%s7576_s21 + $0x2058] sm:$0xff] }
 0x4d1   : > { %6356 = vmatprep.subr.bf16.mxu1 %v6355_v29  ;;  %v1533_v29 = vld [vmem:[%s7576_s21 + $0x2858] sm:$0xff]  ;;  %v6115_v32 = vpack.c.bf16 %v1277_v23, %v1269_v22  ;;  %v1316_v22 = vld [vmem:[%s7576_s21 + $0x2190] sm:$0xff] }
 0x4d2   : > { %v6371_v37 = vpack.c.bf16 %v1533_v29, %v1525_v28  ;;  %v1324_v23 = vld [vmem:[%s7576_s21 + $0x21d0] sm:$0xff] }
 0x4d3   : > { %v1572_v28 = vld [vmem:[%s7576_s21 + $0x2990] sm:$0xff]  ;;  %v6129_v40 = vpack.c.bf16 %v1324_v23, %v1316_v22 }
 0x4d4   : > { %v1580_v29 = vld [vmem:[%s7576_s21 + $0x29d0] sm:$0xff] }
 0x4d5   : > { %v6385_v41 = vpack.c.bf16 %v1580_v29, %v1572_v28 }
 0x4d6   : > { %6102 = vmatpush1.bf16.xpose.msra.mxu0 %v6101_v45  ;;  %v1285_v45 = vld [vmem:[%s7576_s21 + $0x2098] sm:$0xff] }
 0x4d7   : > { %6104 = vmatprep.subr.bf16.mxu0 %v6103_v46  ;;  %v1541_v46 = vld [vmem:[%s7576_s21 + $0x2898] sm:$0xff] }
 0x4d8   : > { %6358 = vmatpush1.bf16.xpose.msra.mxu1 %v6357_v35  ;;  %v1293_v35 = vld [vmem:[%s7576_s21 + $0x20d8] sm:$0xff] }
 0x4d9   : > { %6360 = vmatprep.subr.bf16.mxu1 %v6359_v3  ;;  %v1549_v3 = vld [vmem:[%s7576_s21 + $0x28d8] sm:$0xff]  ;;  %v6119_v52 = vpack.c.bf16 %v1293_v35, %v1285_v45  ;;  %v1332_v45 = vld [vmem:[%s7576_s21 + $0x2210] sm:$0xff] }
 0x4da   : > { %v6375_v53 = vpack.c.bf16 %v1549_v3, %v1541_v46  ;;  %v1340_v35 = vld [vmem:[%s7576_s21 + $0x2250] sm:$0xff] }
 0x4db   : > { %v1588_v46 = vld [vmem:[%s7576_s21 + $0x2a10] sm:$0xff]  ;;  %v6133_v56 = vpack.c.bf16 %v1340_v35, %v1332_v45 }
 0x4dc   : > { %v1596_v3 = vld [vmem:[%s7576_s21 + $0x2a50] sm:$0xff] }
 0x4dd   : > { %v6389_v58 = vpack.c.bf16 %v1596_v3, %v1588_v46 }
 0x4de   : > { %6106 = vmatpush1.bf16.xpose.msra.mxu0 %v6105_v61  ;;  %v1301_v61 = vld [vmem:[%s7576_s21 + $0x2118] sm:$0xff] }
 0x4df   : > { %6108 = vmatprep.subr.bf16.mxu0 %v6107_v0  ;;  %v1557_v0 = vld [vmem:[%s7576_s21 + $0x2918] sm:$0xff] }
 0x4e0   : > { %6362 = vmatpush1.bf16.xpose.msra.mxu1 %v6361_v63  ;;  %v1309_v63 = vld [vmem:[%s7576_s21 + $0x2158] sm:$0xff] }
 0x4e1   : > { %6364 = vmatprep.subr.bf16.mxu1 %v6363_v1  ;;  %v1565_v1 = vld [vmem:[%s7576_s21 + $0x2958] sm:$0xff]  ;;  %v6123_v5 = vpack.c.bf16 %v1309_v63, %v1301_v61  ;;  %v1348_v61 = vld [vmem:[%s7576_s21 + $0x2290] sm:$0xff] }
 0x4e2   : > { %v6379_v17 = vpack.c.bf16 %v1565_v1, %v1557_v0  ;;  %v1356_v63 = vld [vmem:[%s7576_s21 + $0x22d0] sm:$0xff] }
 0x4e3   : > { %v1604_v0 = vld [vmem:[%s7576_s21 + $0x2a90] sm:$0xff]  ;;  %v6137_v6 = vpack.c.bf16 %v1356_v63, %v1348_v61 }
 0x4e4   : > { %v1612_v1 = vld [vmem:[%s7576_s21 + $0x2ad0] sm:$0xff] }
 0x4e5   : > { %v6393_v7 = vpack.c.bf16 %v1612_v1, %v1604_v0 }
 0x4e6   : > { %6110 = vmatpush1.bf16.xpose.msra.mxu0 %v6109_v10  ;;  %v1317_v10 = vld [vmem:[%s7576_s21 + $0x2198] sm:$0xff] }
 0x4e7   : > { %6112 = vmatprep.subr.bf16.mxu0 %v6111_v13  ;;  %v1573_v13 = vld [vmem:[%s7576_s21 + $0x2998] sm:$0xff] }
 0x4e8   : > { %6366 = vmatpush1.bf16.xpose.msra.mxu1 %v6365_v11  ;;  %v1325_v11 = vld [vmem:[%s7576_s21 + $0x21d8] sm:$0xff] }
 0x4e9   : > { %6368 = vmatprep.subr.bf16.mxu1 %v6367_v14  ;;  %v1581_v14 = vld [vmem:[%s7576_s21 + $0x29d8] sm:$0xff]  ;;  %v6127_v20 = vpack.c.bf16 %v1325_v11, %v1317_v10  ;;  %v1364_v10 = vld [vmem:[%s7576_s21 + $0x2310] sm:$0xff] }
 0x4ea   : > { %v6383_v21 = vpack.c.bf16 %v1581_v14, %v1573_v13  ;;  %v1372_v11 = vld [vmem:[%s7576_s21 + $0x2350] sm:$0xff] }
 0x4eb   : > { %v1620_v13 = vld [vmem:[%s7576_s21 + $0x2b10] sm:$0xff]  ;;  %v6141_v22 = vpack.c.bf16 %v1372_v11, %v1364_v10 }
 0x4ec   : > { %v1628_v14 = vld [vmem:[%s7576_s21 + $0x2b50] sm:$0xff] }
 0x4ed   : > { %v6397_v23 = vpack.c.bf16 %v1628_v14, %v1620_v13 }
 0x4ee   : > { %6114 = vmatpush1.bf16.xpose.msra.mxu0 %v6113_v30  ;;  %v1333_v30 = vld [vmem:[%s7576_s21 + $0x2218] sm:$0xff] }
 0x4ef   : > { %6116 = vmatprep.subr.bf16.mxu0 %v6115_v32  ;;  %v1589_v32 = vld [vmem:[%s7576_s21 + $0x2a18] sm:$0xff] }
 0x4f0   : > { %6370 = vmatpush1.bf16.xpose.msra.mxu1 %v6369_v31  ;;  %v1341_v31 = vld [vmem:[%s7576_s21 + $0x2258] sm:$0xff] }
 0x4f1   : > { %6372 = vmatprep.subr.bf16.mxu1 %v6371_v37  ;;  %v1597_v37 = vld [vmem:[%s7576_s21 + $0x2a58] sm:$0xff]  ;;  %v6131_v42 = vpack.c.bf16 %v1341_v31, %v1333_v30  ;;  %v1380_v30 = vld [vmem:[%s7576_s21 + $0x2390] sm:$0xff] }
 0x4f2   : > { %v6387_v44 = vpack.c.bf16 %v1597_v37, %v1589_v32  ;;  %v1388_v31 = vld [vmem:[%s7576_s21 + $0x23d0] sm:$0xff] }
 0x4f3   : > { %v1636_v32 = vld [vmem:[%s7576_s21 + $0x2b90] sm:$0xff]  ;;  %v6145_v45 = vpack.c.bf16 %v1388_v31, %v1380_v30 }
 0x4f4   : > { %v1644_v37 = vld [vmem:[%s7576_s21 + $0x2bd0] sm:$0xff] }
 0x4f5   : > { %3616 = vmatmul.mubr.f32.vlgmr.msra.gmra.mrb[4].mxu0 %v7741_v27  ;;  %v6401_v35 = vpack.c.bf16 %v1644_v37, %v1636_v32 }
 0x4f6   : > { %6118 = vmatpush1.bf16.xpose.msra.mxu0 %v6117_v49  ;;  %3686 = vmatprep.mubr.f32.mxu0 %v7747_v34  ;;  %v1349_v49 = vld [vmem:[%s7576_s21 + $0x2298] sm:$0xff] }
 0x4f7   : > { %3900 = vmatmul.mubr.f32.vlgmr.msra.gmra.mrb[4].mxu1 %v7741_v27  ;;  %6120 = vmatprep.subr.bf16.mxu0 %v6119_v52  ;;  %v1605_v52 = vld [vmem:[%s7576_s21 + $0x2a98] sm:$0xff] }
 0x4f8   : > { %6374 = vmatpush1.bf16.xpose.msra.mxu1 %v6373_v50  ;;  %3970 = vmatprep.mubr.f32.mxu1 %v7747_v34  ;;  %v1357_v50 = vld [vmem:[%s7576_s21 + $0x22d8] sm:$0xff] }
 0x4f9   : > { %6376 = vmatprep.subr.bf16.mxu1 %v6375_v53  ;;  %v1613_v53 = vld [vmem:[%s7576_s21 + $0x2ad8] sm:$0xff]  ;;  %v6135_v59 = vpack.c.bf16 %v1357_v50, %v1349_v49  ;;  %v1396_v49 = vld [vmem:[%s7576_s21 + $0x2410] sm:$0xff] }
 0x4fa   : > { %v6391_v60 = vpack.c.bf16 %v1613_v53, %v1605_v52  ;;  %v1404_v50 = vld [vmem:[%s7576_s21 + $0x2450] sm:$0xff] }
 0x4fb   : > { %v1652_v52 = vld [vmem:[%s7576_s21 + $0x2c10] sm:$0xff]  ;;  %v6149_v61 = vpack.c.bf16 %v1404_v50, %v1396_v49 }
 0x4fc   : > { %v1660_v53 = vld [vmem:[%s7576_s21 + $0x2c50] sm:$0xff] }
 0x4fd   : > { %v6405_v63 = vpack.c.bf16 %v1660_v53, %v1652_v52  ;;  %v1708_v50 = vld [vmem:[%s7576_s21 + $0x2dd0] sm:$0xff]  ;;  %v1461_v52 = vld [vmem:[%s7576_s21 + $0x2618] sm:$0xff] }
 0x4fe   : > { %6122 = vmatpush1.bf16.xpose.msra.mxu0 %v6121_v2  ;;  %v1365_v2 = vld [vmem:[%s7576_s21 + $0x2318] sm:$0xff] }
 0x4ff   : > { %6124 = vmatprep.subr.bf16.mxu0 %v6123_v5  ;;  %v1621_v5 = vld [vmem:[%s7576_s21 + $0x2b18] sm:$0xff] }
 0x500   : > { %6378 = vmatpush1.bf16.xpose.msra.mxu1 %v6377_v4  ;;  %v1373_v4 = vld [vmem:[%s7576_s21 + $0x2358] sm:$0xff] }
 0x501   : > { %6380 = vmatprep.subr.bf16.mxu1 %v6379_v17  ;;  %v1629_v17 = vld [vmem:[%s7576_s21 + $0x2b58] sm:$0xff]  ;;  %v6139_v8 = vpack.c.bf16 %v1373_v4, %v1365_v2  ;;  %v1412_v2 = vld [vmem:[%s7576_s21 + $0x2490] sm:$0xff] }
 0x502   : > { %v6395_v9 = vpack.c.bf16 %v1629_v17, %v1621_v5  ;;  %v1420_v4 = vld [vmem:[%s7576_s21 + $0x24d0] sm:$0xff]  ;;  %v1469_v53 = vld [vmem:[%s7576_s21 + $0x2658] sm:$0xff] }
 0x503   : > { %v1668_v5 = vld [vmem:[%s7576_s21 + $0x2c90] sm:$0xff]  ;;  %v6153_v10 = vpack.c.bf16 %v1420_v4, %v1412_v2 }
 0x504   : > { %v1676_v17 = vld [vmem:[%s7576_s21 + $0x2cd0] sm:$0xff] }
 0x505   : > { %v6409_v11 = vpack.c.bf16 %v1676_v17, %v1668_v5 }
 0x506   : > { %6126 = vmatpush1.bf16.xpose.msra.mxu0 %v6125_v15  ;;  %v1381_v15 = vld [vmem:[%s7576_s21 + $0x2398] sm:$0xff] }
 0x507   : > { %6128 = vmatprep.subr.bf16.mxu0 %v6127_v20  ;;  %v1637_v20 = vld [vmem:[%s7576_s21 + $0x2b98] sm:$0xff] }
 0x508   : > { %6382 = vmatpush1.bf16.xpose.msra.mxu1 %v6381_v16  ;;  %v1389_v16 = vld [vmem:[%s7576_s21 + $0x23d8] sm:$0xff] }
 0x509   : > { %6384 = vmatprep.subr.bf16.mxu1 %v6383_v21  ;;  %v1645_v21 = vld [vmem:[%s7576_s21 + $0x2bd8] sm:$0xff]  ;;  %v6143_v28 = vpack.c.bf16 %v1389_v16, %v1381_v15  ;;  %v1428_v15 = vld [vmem:[%s7576_s21 + $0x2510] sm:$0xff] }
 0x50a   : > { %v6399_v29 = vpack.c.bf16 %v1645_v21, %v1637_v20  ;;  %v1436_v16 = vld [vmem:[%s7576_s21 + $0x2550] sm:$0xff] }
 0x50b   : > { %v1684_v20 = vld [vmem:[%s7576_s21 + $0x2d10] sm:$0xff]  ;;  %v6157_v30 = vpack.c.bf16 %v1436_v16, %v1428_v15 }
 0x50c   : > { %v1692_v21 = vld [vmem:[%s7576_s21 + $0x2d50] sm:$0xff] }
 0x50d   : > { %v6413_v31 = vpack.c.bf16 %v1692_v21, %v1684_v20  ;;  %v1460_v20 = vld [vmem:[%s7576_s21 + $0x2610] sm:$0xff] }
 0x50e   : > { %6130 = vmatpush1.bf16.xpose.msra.mxu0 %v6129_v40  ;;  %v1397_v40 = vld [vmem:[%s7576_s21 + $0x2418] sm:$0xff]  ;;  %v1468_v21 = vld [vmem:[%s7576_s21 + $0x2650] sm:$0xff] }
 0x50f   : > { %6132 = vmatprep.subr.bf16.mxu0 %v6131_v42  ;;  %v1653_v42 = vld [vmem:[%s7576_s21 + $0x2c18] sm:$0xff] }
 0x510   : > { %6386 = vmatpush1.bf16.xpose.msra.mxu1 %v6385_v41  ;;  %v1405_v41 = vld [vmem:[%s7576_s21 + $0x2458] sm:$0xff] }
 0x511   : > { %6388 = vmatprep.subr.bf16.mxu1 %v6387_v44  ;;  %v1661_v44 = vld [vmem:[%s7576_s21 + $0x2c58] sm:$0xff]  ;;  %v6147_v46 = vpack.c.bf16 %v1405_v41, %v1397_v40  ;;  %v7205_v40 = vld [vmem:[%s8401_s4] sm:$0xff] }
 0x512   : > { %v6403_v3 = vpack.c.bf16 %v1661_v44, %v1653_v42  ;;  %v2354_v41 = vrot.slane %v7205_v40, %v8020_v24  ;;  %v2362_v42 = vrot.slane %v7205_v40, %v8168_v25  ;;  %v2358_v44 = vrot.slane %v7205_v40, %v7883_v54 }
 0x516   : > { %6134 = vmatpush1.bf16.xpose.msra.mxu0 %v6133_v56  ;;  %v1413_v56 = vld [vmem:[%s7576_s21 + $0x2498] sm:$0xff] }
 0x517   : > { %6136 = vmatprep.subr.bf16.mxu0 %v6135_v59  ;;  %v1669_v59 = vld [vmem:[%s7576_s21 + $0x2c98] sm:$0xff] }
 0x518   : > { %6390 = vmatpush1.bf16.xpose.msra.mxu1 %v6389_v58  ;;  %v1421_v58 = vld [vmem:[%s7576_s21 + $0x24d8] sm:$0xff] }
 0x519   : > { %6392 = vmatprep.subr.bf16.mxu1 %v6391_v60  ;;  %v1677_v60 = vld [vmem:[%s7576_s21 + $0x2cd8] sm:$0xff]  ;;  %v6151_v0 = vpack.c.bf16 %v1421_v58, %v1413_v56 }
 0x51a   : > { %v6407_v1 = vpack.c.bf16 %v1677_v60, %v1669_v59  ;;  %v1717_v60 = vld [vmem:[%s7576_s21 + $0x2e18] sm:$0xff] }
 0x51e   : > { %6138 = vmatpush1.bf16.xpose.msra.mxu0 %v6137_v6  ;;  %v1429_v6 = vld [vmem:[%s7576_s21 + $0x2518] sm:$0xff] }
 0x51f   : > { %6140 = vmatprep.subr.bf16.mxu0 %v6139_v8  ;;  %v1685_v8 = vld [vmem:[%s7576_s21 + $0x2d18] sm:$0xff] }
 0x520   : > { %6394 = vmatpush1.bf16.xpose.msra.mxu1 %v6393_v7  ;;  %v1437_v7 = vld [vmem:[%s7576_s21 + $0x2558] sm:$0xff] }
 0x521   : > { %6396 = vmatprep.subr.bf16.mxu1 %v6395_v9  ;;  %v1693_v9 = vld [vmem:[%s7576_s21 + $0x2d58] sm:$0xff]  ;;  %v6155_v13 = vpack.c.bf16 %v1437_v7, %v1429_v6  ;;  %v6163_v6 = vpack.c.bf16 %v1469_v53, %v1461_v52 }
 0x522   : > { %v6411_v14 = vpack.c.bf16 %v1693_v9, %v1685_v8 }
 0x526   : > { %6142 = vmatpush1.bf16.xpose.msra.mxu0 %v6141_v22  ;;  %v1445_v22 = vld [vmem:[%s7576_s21 + $0x2598] sm:$0xff] }
 0x527   : > { %6144 = vmatprep.subr.bf16.mxu0 %v6143_v28  ;;  %v1701_v28 = vld [vmem:[%s7576_s21 + $0x2d98] sm:$0xff] }
 0x528   : > { %6398 = vmatpush1.bf16.xpose.msra.mxu1 %v6397_v23  ;;  %v1453_v23 = vld [vmem:[%s7576_s21 + $0x25d8] sm:$0xff] }
 0x529   : > { %6400 = vmatprep.subr.bf16.mxu1 %v6399_v29  ;;  %v1709_v29 = vld [vmem:[%s7576_s21 + $0x2dd8] sm:$0xff]  ;;  %v6159_v32 = vpack.c.bf16 %v1453_v23, %v1445_v22  ;;  %v1716_v22 = vld [vmem:[%s7576_s21 + $0x2e10] sm:$0xff] }
 0x52a   : > { %v6415_v37 = vpack.c.bf16 %v1709_v29, %v1701_v28  ;;  %v1724_v29 = vld [vmem:[%s7576_s21 + $0x2e50] sm:$0xff] }
 0x52e   : > { %6146 = vmatpush1.bf16.xpose.msra.mxu0 %v6145_v45  ;;  %v2366_v45 = vrot.slane %v7205_v40, %v8029_v33  ;;  %v1733_v40 = vld [vmem:[%s7576_s21 + $0x2e98] sm:$0xff] }
 0x52f   : > { %6148 = vmatprep.subr.bf16.mxu0 %v6147_v46  ;;  %v1452_v46 = vld [vmem:[%s7576_s21 + $0x25d0] sm:$0xff] }
 0x530   : > { %6402 = vmatpush1.bf16.xpose.msra.mxu1 %v6401_v35  ;;  %v1444_v35 = vld [vmem:[%s7576_s21 + $0x2590] sm:$0xff] }
 0x531   : > { %6404 = vmatprep.subr.bf16.mxu1 %v6403_v3  ;;  %v1700_v3 = vld [vmem:[%s7576_s21 + $0x2d90] sm:$0xff]  ;;  %v6161_v2 = vpack.c.bf16 %v1452_v46, %v1444_v35 }
 0x532   : > { %v6417_v17 = vpack.c.bf16 %v1708_v50, %v1700_v3  ;;  %v6421_v3 = vpack.c.bf16 %v1724_v29, %v1716_v22  ;;  %v1756_v22 = vld [vmem:[%s7576_s21 + $0x2f50] sm:$0xff] }
 0x536   : > { %6150 = vmatpush1.bf16.xpose.msra.mxu0 %v6149_v61  ;;  %v1725_v61 = vld [vmem:[%s7576_s21 + $0x2e58] sm:$0xff] }
 0x537   : > { %6152 = vmatprep.subr.bf16.mxu0 %v6151_v0  ;;  %v6419_v9 = vpack.c.bf16 %v1725_v61, %v1717_v60  ;;  %v1476_v60 = vld [vmem:[%s7576_s21 + $0x2690] sm:$0xff] }
 0x538   : > { %6406 = vmatpush1.bf16.xpose.msra.mxu1 %v6405_v63  ;;  %v1484_v61 = vld [vmem:[%s7576_s21 + $0x26d0] sm:$0xff] }
 0x539   : > { %6408 = vmatprep.subr.bf16.mxu1 %v6407_v1 }
 0x53e   : > { %6154 = vmatpush1.bf16.xpose.msra.mxu0 %v6153_v10 }
 0x53f   : > { %6156 = vmatprep.subr.bf16.mxu0 %v6155_v13 }
 0x540   : > { %6410 = vmatpush1.bf16.xpose.msra.mxu1 %v6409_v11 }
 0x541   : > { %6412 = vmatprep.subr.bf16.mxu1 %v6411_v14 }
 0x546   : > { %6158 = vmatpush1.bf16.xpose.msra.mxu0 %v6157_v30  ;;  %v1477_v30 = vld [vmem:[%s7576_s21 + $0x2698] sm:$0xff] }
 0x547   : > { %6160 = vmatprep.subr.bf16.mxu0 %v6159_v32 }
 0x548   : > { %6414 = vmatpush1.bf16.xpose.msra.mxu1 %v6413_v31  ;;  %v3262_v49 = vpop.f32.mrb[2].mxu0  ;;  %v1485_v31 = vld [vmem:[%s7576_s21 + $0x26d8] sm:$0xff] }
 0x549   : > { %6416 = vmatprep.subr.bf16.mxu1 %v6415_v37  ;;  %v7079_v56 = vadd.f32 %v3262_v49, %v2354_v41  ;;  %v3264_v59 = vpop.f32.mrb[3].mxu0  ;;  %v1741_v41 = vld [vmem:[%s7576_s21 + $0x2ed8] sm:$0xff]  ;;  %v6167_v49 = vpack.c.bf16 %v1485_v31, %v1477_v30  ;;  %v6431_v31 = vpack.c.bf16 %v1773_v51, %v1765_v48  ;;  %v1327_v48 = vld [vmem:[%s7576_s21 + $0x21e8] sm:$0xff] }
 0x54a   : > { %v3546_v58 = vpop.f32.mrb[2].mxu1  ;;  %v7080_v0 = vadd.f32 %v3264_v59, %v2358_v44  ;;  %v6423_v53 = vpack.c.bf16 %v1741_v41, %v1733_v40  ;;  %v1764_v40 = vld [vmem:[%s7576_s21 + $0x2f90] sm:$0xff]  ;;  %v1575_v51 = vld [vmem:[%s7576_s21 + $0x29a8] sm:$0xff] }
 0x54b   : > { %v7081_v63 = vadd.f32 %v3546_v58, %v2362_v42  ;;  %v3548_v1 = vpop.f32.mrb[3].mxu1  ;;  %v4691_v4 = vadd.f32 3.0, %v7079_v56  ;;  %v1772_v41 = vld [vmem:[%s7576_s21 + $0x2fd0] sm:$0xff] }
 0x54c   : > { %v7082_v5 = vadd.f32 %v3548_v1, %v2366_v45  ;;  %v4692_v8 = vadd.f32 3.0, %v7080_v0  ;;  %v6165_v45 = vpack.c.bf16 %v1468_v21, %v1460_v20  ;;  %v1740_v1 = vld [vmem:[%s7576_s21 + $0x2ed0] sm:$0xff] }
 0x54d   : > { %v4693_v7 = vadd.f32 3.0, %v7081_v63  ;;  %v4707_v10 = vmax.f32 %v4691_v4, 0.0  ;;  %v1501_v4 = vld [vmem:[%s7576_s21 + $0x2758] sm:$0xff]  ;;  %v1748_v20 = vld [vmem:[%s7576_s21 + $0x2f10] sm:$0xff] }
 0x54e   : > { %v4694_v11 = vadd.f32 3.0, %v7082_v5  ;;  %v4708_v14 = vmax.f32 %v4692_v8, 0.0  ;;  %6162 = vmatpush1.bf16.xpose.msra.mxu0 %v6161_v2  ;;  %v1493_v2 = vld [vmem:[%s7576_s21 + $0x2718] sm:$0xff]  ;;  %v6429_v29 = vpack.c.bf16 %v1756_v22, %v1748_v20  ;;  %v1302_v20 = vld [vmem:[%s7576_s21 + $0x2120] sm:$0xff] }
 0x54f   : > { %v4709_v13 = vmax.f32 %v4693_v7, 0.0  ;;  %v4723_v15 = vmin.f32 %v4707_v10, 6.0  ;;  %6164 = vmatprep.subr.bf16.mxu0 %v6163_v6  ;;  %v1757_v6 = vld [vmem:[%s7576_s21 + $0x2f58] sm:$0xff]  ;;  %v6169_v7 = vpack.c.bf16 %v1484_v61, %v1476_v60  ;;  %v6171_v10 = vpack.c.bf16 %v1501_v4, %v1493_v2  ;;  %v1295_v60 = vld [vmem:[%s7576_s21 + $0x20e8] sm:$0xff]  ;;  %v1558_v22 = vld [vmem:[%s7576_s21 + $0x2920] sm:$0xff] }
 0x550   : > { %v4710_v16 = vmax.f32 %v4694_v11, 0.0  ;;  %6418 = vmatpush1.bf16.xpose.msra.mxu1 %v6417_v17  ;;  %v4724_v28 = vmin.f32 %v4708_v14, 6.0  ;;  %v1749_v17 = vld [vmem:[%s7576_s21 + $0x2f18] sm:$0xff]  ;;  %v1543_v61 = vld [vmem:[%s7576_s21 + $0x28a8] sm:$0xff] }
 0x551   : > { %v4725_v23 = vmin.f32 %v4709_v13, 6.0  ;;  %6420 = vmatprep.subr.bf16.mxu1 %v6419_v9  ;;  %v4739_v32 = vmul.f32 %v7079_v56, %v4723_v15  ;;  %v6427_v11 = vpack.c.bf16 %v1757_v6, %v1749_v17  ;;  %v4823_v13 = vrot.slane %v4815_v57, %v8425_v39  ;;  %v1492_v15 = vld [vmem:[%s7576_s21 + $0x2710] sm:$0xff]  ;;  %v1294_v17 = vld [vmem:[%s7576_s21 + $0x20e0] sm:$0xff] }
 0x552   : > { %v4726_v37 = vmin.f32 %v4710_v16, 6.0  ;;  %v4740_v44 = vmul.f32 %v7080_v0, %v4724_v28  ;;  %v1500_v16 = vld [vmem:[%s7576_s21 + $0x2750] sm:$0xff]  ;;  %v1517_v28 = vld [vmem:[%s7576_s21 + $0x27d8] sm:$0xff]  ;;  %v1542_v6 = vld [vmem:[%s7576_s21 + $0x28a0] sm:$0xff] }
 0x553   : > { %v4741_v42 = vmul.f32 %v7081_v63, %v4725_v23  ;;  %v4755_v35 = vmul.f32 0.16666667, %v4739_v32  ;;  %v1732_v63 = vld [vmem:[%s7576_s21 + $0x2e90] sm:$0xff]  ;;  %v1509_v23 = vld [vmem:[%s7576_s21 + $0x2798] sm:$0xff]  ;;  %v6173_v57 = vpack.c.bf16 %v1500_v16, %v1492_v15 }
 0x554   : > { %v4742_v46 = vmul.f32 %v7082_v5, %v4726_v37  ;;  %v4756_v52 = vmul.f32 0.16666667, %v4740_v44  ;;  %v6425_v9 = vpack.c.bf16 %v1740_v1, %v1732_v63  ;;  %v6175_v30 = vpack.c.bf16 %v1517_v28, %v1509_v23  ;;  %v1508_v32 = vld [vmem:[%s7576_s21 + $0x2790] sm:$0xff]  ;;  %v1279_v44 = vld [vmem:[%s7576_s21 + $0x2068] sm:$0xff]  ;;  %v1566_v23 = vld [vmem:[%s7576_s21 + $0x2960] sm:$0xff] }
 0x555   : > { %v4757_v50 = vmul.f32 0.16666667, %v4741_v42  ;;  %v1516_v37 = vld [vmem:[%s7576_s21 + $0x27d0] sm:$0xff]  ;;  %v1271_v42 = vld [vmem:[%s7576_s21 + $0x2028] sm:$0xff] }
 0x556   : > { %v4758_v56 = vmul.f32 0.16666667, %v4742_v46  ;;  %v4785_v58 = vcombine.low %v4755_v35, %v4756_v52  ;;  %6166 = vmatpush1.bf16.xpose.msra.mxu0 %v6165_v45  ;;  %v1527_v45 = vld [vmem:[%s7576_s21 + $0x2828] sm:$0xff]  ;;  %v6177_v46 = vpack.c.bf16 %v1516_v37, %v1508_v32  ;;  %v1270_v52 = vld [vmem:[%s7576_s21 + $0x2020] sm:$0xff] }
 0x557   : > { %6168 = vmatprep.subr.bf16.mxu0 %v6167_v49  ;;  %v1535_v35 = vld [vmem:[%s7576_s21 + $0x2868] sm:$0xff]  ;;  %v6179_v49 = vpack.c.bf16 %v1279_v44, %v1271_v42  ;;  %v1318_v37 = vld [vmem:[%s7576_s21 + $0x21a0] sm:$0xff] }
 0x558   : > { %v4786_v59 = vcombine.low %v4757_v50, %v4758_v56  ;;  %6422 = vmatpush1.bf16.xpose.msra.mxu1 %v6421_v3  ;;  %v4807_v0 = vrot.slane %v4785_v58, %v8425_v39  ;;  %v6433_v3 = vpack.c.bf16 %v1772_v41, %v1764_v40  ;;  %v6435_v50 = vpack.c.bf16 %v1535_v35, %v1527_v45  ;;  %v1526_v56 = vld [vmem:[%s7576_s21 + $0x2820] sm:$0xff]  ;;  %v1551_v63 = vld [vmem:[%s7576_s21 + $0x28e8] sm:$0xff] }
 0x559   : > { %6424 = vmatprep.subr.bf16.mxu1 %v6423_v53  ;;  %v1278_v53 = vld [vmem:[%s7576_s21 + $0x2060] sm:$0xff]  ;;  %v6439_v4 = vpack.c.bf16 %v1551_v63, %v1543_v61  ;;  %v1319_v28 = vld [vmem:[%s7576_s21 + $0x21a8] sm:$0xff] }
 0x55a   : > { %v4814_v5 = vrot.slane %v4786_v59, %v8425_v39  ;;  %v1534_v58 = vld [vmem:[%s7576_s21 + $0x2860] sm:$0xff]  ;;  %v1287_v59 = vld [vmem:[%s7576_s21 + $0x20a8] sm:$0xff] }
 0x55b   : > { %v6437_v1 = vpack.c.bf16 %v1534_v58, %v1526_v56  ;;  %v6183_v2 = vpack.c.bf16 %v1295_v60, %v1287_v59  ;;  %v1326_v40 = vld [vmem:[%s7576_s21 + $0x21e0] sm:$0xff]  ;;  %v1335_v44 = vld [vmem:[%s7576_s21 + $0x2228] sm:$0xff] }
 0x55c   : > { %v4816_v8 = vcombine.low %v4807_v0, %v4814_v5  ;;  %v6181_v0 = vpack.c.bf16 %v1278_v53, %v1270_v52  ;;  %v1286_v5 = vld [vmem:[%s7576_s21 + $0x20a0] sm:$0xff]  ;;  %v1343_v45 = vld [vmem:[%s7576_s21 + $0x2268] sm:$0xff] }
 0x55d   : > { %v1574_v41 = vld [vmem:[%s7576_s21 + $0x29a0] sm:$0xff]  ;;  %v1591_v35 = vld [vmem:[%s7576_s21 + $0x2a28] sm:$0xff] }
 0x55e   : > { %v4830_v14 = vrot.slane %v4816_v8, %v8425_v39  ;;  %6170 = vmatpush1.bf16.xpose.msra.mxu0 %v6169_v7  ;;  %v1550_v7 = vld [vmem:[%s7576_s21 + $0x28e0] sm:$0xff]  ;;  %v1303_v8 = vld [vmem:[%s7576_s21 + $0x2128] sm:$0xff] }
 0x55f   : > { %6172 = vmatprep.subr.bf16.mxu0 %v6171_v10  ;;  %v1559_v10 = vld [vmem:[%s7576_s21 + $0x2928] sm:$0xff]  ;;  %v1582_v42 = vld [vmem:[%s7576_s21 + $0x29e0] sm:$0xff] }
 0x560   : > { %6426 = vmatpush1.bf16.xpose.msra.mxu1 %v6425_v9  ;;  %v4831_v21 = vcombine.low %v4823_v13, %v4830_v14  ;;  %v1311_v9 = vld [vmem:[%s7576_s21 + $0x2168] sm:$0xff]  ;;  %v6185_v13 = vpack.c.bf16 %v1294_v17, %v1286_v5  ;;  %v6441_v14 = vpack.c.bf16 %v1550_v7, %v1542_v6  ;;  %v1334_v53 = vld [vmem:[%s7576_s21 + $0x2220] sm:$0xff] }
 0x561   : > { %6428 = vmatprep.subr.bf16.mxu1 %v6427_v11  ;;  %v1567_v11 = vld [vmem:[%s7576_s21 + $0x2968] sm:$0xff]  ;;  %v6187_v15 = vpack.c.bf16 %v1311_v9, %v1303_v8  ;;  %v1342_v56 = vld [vmem:[%s7576_s21 + $0x2260] sm:$0xff] }
 0x562   : > { %4883 = vst [vmem:[%s8993_s6] sm:$0xff] %v4831_v21  ;;  %v6443_v16 = vpack.c.bf16 %v1567_v11, %v1559_v10  ;;  %v1310_v21 = vld [vmem:[%s7576_s21 + $0x2160] sm:$0xff]  ;;  %v1351_v60 = vld [vmem:[%s7576_s21 + $0x22a8] sm:$0xff] }
 0x563   : > { %v1590_v58 = vld [vmem:[%s7576_s21 + $0x2a20] sm:$0xff]  ;;  %v1359_v61 = vld [vmem:[%s7576_s21 + $0x22e8] sm:$0xff] }
 0x564   : > { %v1598_v59 = vld [vmem:[%s7576_s21 + $0x2a60] sm:$0xff]  ;;  %v1607_v63 = vld [vmem:[%s7576_s21 + $0x2aa8] sm:$0xff] }
 0x565   : > { %v1350_v17 = vld [vmem:[%s7576_s21 + $0x22a0] sm:$0xff]  ;;  %v1367_v9 = vld [vmem:[%s7576_s21 + $0x2328] sm:$0xff] }
 0x566   : > { %6174 = vmatpush1.bf16.xpose.msra.mxu0 %v6173_v57  ;;  %v1583_v57 = vld [vmem:[%s7576_s21 + $0x29e8] sm:$0xff]  ;;  %v1358_v6 = vld [vmem:[%s7576_s21 + $0x22e0] sm:$0xff] }
 0x567   : > { %6176 = vmatprep.subr.bf16.mxu0 %v6175_v30  ;;  %v6445_v30 = vpack.c.bf16 %v1566_v23, %v1558_v22  ;;  %v6447_v32 = vpack.c.bf16 %v1583_v57, %v1575_v51  ;;  %v1606_v7 = vld [vmem:[%s7576_s21 + $0x2aa0] sm:$0xff]  ;;  %v1375_v10 = vld [vmem:[%s7576_s21 + $0x2368] sm:$0xff] }
 0x568   : > { %6430 = vmatpush1.bf16.xpose.msra.mxu1 %v6429_v29  ;;  %v6189_v29 = vpack.c.bf16 %v1310_v21, %v1302_v20  ;;  %v1614_v8 = vld [vmem:[%s7576_s21 + $0x2ae0] sm:$0xff]  ;;  %v1623_v11 = vld [vmem:[%s7576_s21 + $0x2b28] sm:$0xff] }
 0x569   : > { %6432 = vmatprep.subr.bf16.mxu1 %v6431_v31  ;;  %v6191_v31 = vpack.c.bf16 %v1327_v48, %v1319_v28  ;;  %v1366_v21 = vld [vmem:[%s7576_s21 + $0x2320] sm:$0xff]  ;;  %v1383_v48 = vld [vmem:[%s7576_s21 + $0x23a8] sm:$0xff] }
 0x56a   : > { %v1374_v22 = vld [vmem:[%s7576_s21 + $0x2360] sm:$0xff]  ;;  %v1391_v51 = vld [vmem:[%s7576_s21 + $0x23e8] sm:$0xff] }
 0x56b   : > { %v1622_v23 = vld [vmem:[%s7576_s21 + $0x2b20] sm:$0xff]  ;;  %v1639_v57 = vld [vmem:[%s7576_s21 + $0x2ba8] sm:$0xff] }
 0x56c   : > { %v1630_v28 = vld [vmem:[%s7576_s21 + $0x2b60] sm:$0xff] }
 0x56e   : > { %6178 = vmatpush1.bf16.xpose.msra.mxu0 %v6177_v46  ;;  %v1599_v46 = vld [vmem:[%s7576_s21 + $0x2a68] sm:$0xff] }
 0x56f   : > { %6180 = vmatprep.subr.bf16.mxu0 %v6179_v49  ;;  %v6449_v49 = vpack.c.bf16 %v1582_v42, %v1574_v41  ;;  %v6451_v52 = vpack.c.bf16 %v1599_v46, %v1591_v35  ;;  %v1390_v41 = vld [vmem:[%s7576_s21 + $0x23e0] sm:$0xff]  ;;  %v1407_v35 = vld [vmem:[%s7576_s21 + $0x2468] sm:$0xff] }
 0x570   : > { %6434 = vmatpush1.bf16.xpose.msra.mxu1 %v6433_v3  ;;  %v6193_v3 = vpack.c.bf16 %v1326_v40, %v1318_v37  ;;  %v1382_v40 = vld [vmem:[%s7576_s21 + $0x23a0] sm:$0xff]  ;;  %v1655_v46 = vld [vmem:[%s7576_s21 + $0x2c28] sm:$0xff] }
 0x571   : > { %6436 = vmatprep.subr.bf16.mxu1 %v6435_v50  ;;  %v6195_v50 = vpack.c.bf16 %v1343_v45, %v1335_v44  ;;  %v1638_v42 = vld [vmem:[%s7576_s21 + $0x2ba0] sm:$0xff]  ;;  %v1399_v45 = vld [vmem:[%s7576_s21 + $0x2428] sm:$0xff] }
 0x572   : > { %v1646_v44 = vld [vmem:[%s7576_s21 + $0x2be0] sm:$0xff] }
 0x575   : > { %3687 = vmatmul.mubr.f32.vlgmr.msra.gmra.mrb[4].mxu0 %v7887_v55 }
 0x576   : > { %6182 = vmatpush1.bf16.xpose.msra.mxu0 %v6181_v0  ;;  %3757 = vmatprep.mubr.f32.mxu0 %v7893_v62  ;;  %v1615_v0 = vld [vmem:[%s7576_s21 + $0x2ae8] sm:$0xff] }
 0x577   : > { %3971 = vmatmul.mubr.f32.vlgmr.msra.gmra.mrb[4].mxu1 %v7887_v55  ;;  %6184 = vmatprep.subr.bf16.mxu0 %v6183_v2  ;;  %v6453_v2 = vpack.c.bf16 %v1598_v59, %v1590_v58  ;;  %v6455_v5 = vpack.c.bf16 %v1615_v0, %v1607_v63  ;;  %v1406_v58 = vld [vmem:[%s7576_s21 + $0x2460] sm:$0xff]  ;;  %v1423_v63 = vld [vmem:[%s7576_s21 + $0x24e8] sm:$0xff] }
 0x578   : > { %6438 = vmatpush1.bf16.xpose.msra.mxu1 %v6437_v1  ;;  %4041 = vmatprep.mubr.f32.mxu1 %v7893_v62  ;;  %v6197_v1 = vpack.c.bf16 %v1342_v56, %v1334_v53  ;;  %v1398_v56 = vld [vmem:[%s7576_s21 + $0x2420] sm:$0xff]  ;;  %v1671_v0 = vld [vmem:[%s7576_s21 + $0x2ca8] sm:$0xff] }
 0x579   : > { %6440 = vmatprep.subr.bf16.mxu1 %v6439_v4  ;;  %v6199_v4 = vpack.c.bf16 %v1359_v61, %v1351_v60  ;;  %v1654_v59 = vld [vmem:[%s7576_s21 + $0x2c20] sm:$0xff]  ;;  %v1415_v61 = vld [vmem:[%s7576_s21 + $0x24a8] sm:$0xff] }
 0x57a   : > { %v1662_v60 = vld [vmem:[%s7576_s21 + $0x2c60] sm:$0xff] }
 0x57e   : > { %6186 = vmatpush1.bf16.xpose.msra.mxu0 %v6185_v13  ;;  %v1631_v13 = vld [vmem:[%s7576_s21 + $0x2b68] sm:$0xff] }
 0x57f   : > { %6188 = vmatprep.subr.bf16.mxu0 %v6187_v15  ;;  %v6457_v15 = vpack.c.bf16 %v1614_v8, %v1606_v7  ;;  %v6459_v20 = vpack.c.bf16 %v1631_v13, %v1623_v11  ;;  %v1422_v7 = vld [vmem:[%s7576_s21 + $0x24e0] sm:$0xff]  ;;  %v1439_v11 = vld [vmem:[%s7576_s21 + $0x2568] sm:$0xff] }
 0x580   : > { %6442 = vmatpush1.bf16.xpose.msra.mxu1 %v6441_v14  ;;  %v6201_v14 = vpack.c.bf16 %v1358_v6, %v1350_v17  ;;  %v1414_v6 = vld [vmem:[%s7576_s21 + $0x24a0] sm:$0xff]  ;;  %v1687_v13 = vld [vmem:[%s7576_s21 + $0x2d28] sm:$0xff] }
 0x581   : > { %6444 = vmatprep.subr.bf16.mxu1 %v6443_v16  ;;  %v6203_v16 = vpack.c.bf16 %v1375_v10, %v1367_v9  ;;  %v1670_v8 = vld [vmem:[%s7576_s21 + $0x2ca0] sm:$0xff]  ;;  %v1431_v10 = vld [vmem:[%s7576_s21 + $0x2528] sm:$0xff] }
 0x582   : > { %v1678_v9 = vld [vmem:[%s7576_s21 + $0x2ce0] sm:$0xff] }
 0x586   : > { %6190 = vmatpush1.bf16.xpose.msra.mxu0 %v6189_v29  ;;  %v1647_v29 = vld [vmem:[%s7576_s21 + $0x2be8] sm:$0xff] }
 0x587   : > { %6192 = vmatprep.subr.bf16.mxu0 %v6191_v31  ;;  %v6461_v31 = vpack.c.bf16 %v1630_v28, %v1622_v23  ;;  %v6463_v37 = vpack.c.bf16 %v1647_v29, %v1639_v57  ;;  %v1438_v23 = vld [vmem:[%s7576_s21 + $0x2560] sm:$0xff]  ;;  %v1455_v57 = vld [vmem:[%s7576_s21 + $0x25e8] sm:$0xff] }
 0x588   : > { %6446 = vmatpush1.bf16.xpose.msra.mxu1 %v6445_v30  ;;  %v6205_v30 = vpack.c.bf16 %v1374_v22, %v1366_v21  ;;  %v1430_v22 = vld [vmem:[%s7576_s21 + $0x2520] sm:$0xff]  ;;  %v1703_v29 = vld [vmem:[%s7576_s21 + $0x2da8] sm:$0xff] }
 0x589   : > { %6448 = vmatprep.subr.bf16.mxu1 %v6447_v32  ;;  %v6207_v32 = vpack.c.bf16 %v1391_v51, %v1383_v48  ;;  %v1686_v28 = vld [vmem:[%s7576_s21 + $0x2d20] sm:$0xff]  ;;  %v1447_v51 = vld [vmem:[%s7576_s21 + $0x25a8] sm:$0xff] }
 0x58a   : > { %v1694_v48 = vld [vmem:[%s7576_s21 + $0x2d60] sm:$0xff] }
 0x58e   : > { %6194 = vmatpush1.bf16.xpose.msra.mxu0 %v6193_v3  ;;  %v1663_v3 = vld [vmem:[%s7576_s21 + $0x2c68] sm:$0xff] }
 0x58f   : > { %6196 = vmatprep.subr.bf16.mxu0 %v6195_v50  ;;  %v6465_v50 = vpack.c.bf16 %v1646_v44, %v1638_v42  ;;  %v6467_v53 = vpack.c.bf16 %v1663_v3, %v1655_v46  ;;  %v1454_v42 = vld [vmem:[%s7576_s21 + $0x25e0] sm:$0xff]  ;;  %v1471_v46 = vld [vmem:[%s7576_s21 + $0x2668] sm:$0xff] }
 0x590   : > { %6450 = vmatpush1.bf16.xpose.msra.mxu1 %v6449_v49  ;;  %v6209_v49 = vpack.c.bf16 %v1390_v41, %v1382_v40  ;;  %v1446_v41 = vld [vmem:[%s7576_s21 + $0x25a0] sm:$0xff]  ;;  %v1719_v3 = vld [vmem:[%s7576_s21 + $0x2e28] sm:$0xff] }
 0x591   : > { %6452 = vmatprep.subr.bf16.mxu1 %v6451_v52  ;;  %v6211_v52 = vpack.c.bf16 %v1407_v35, %v1399_v45  ;;  %v1702_v44 = vld [vmem:[%s7576_s21 + $0x2da0] sm:$0xff]  ;;  %v1463_v35 = vld [vmem:[%s7576_s21 + $0x2628] sm:$0xff] }
 0x592   : > { %v1710_v45 = vld [vmem:[%s7576_s21 + $0x2de0] sm:$0xff] }
 0x596   : > { %6198 = vmatpush1.bf16.xpose.msra.mxu0 %v6197_v1  ;;  %v1679_v1 = vld [vmem:[%s7576_s21 + $0x2ce8] sm:$0xff] }
 0x597   : > { %6200 = vmatprep.subr.bf16.mxu0 %v6199_v4  ;;  %v6469_v4 = vpack.c.bf16 %v1662_v60, %v1654_v59  ;;  %v6471_v17 = vpack.c.bf16 %v1679_v1, %v1671_v0  ;;  %v1470_v59 = vld [vmem:[%s7576_s21 + $0x2660] sm:$0xff]  ;;  %v1487_v0 = vld [vmem:[%s7576_s21 + $0x26e8] sm:$0xff] }
 0x598   : > { %6454 = vmatpush1.bf16.xpose.msra.mxu1 %v6453_v2  ;;  %v6213_v2 = vpack.c.bf16 %v1406_v58, %v1398_v56  ;;  %v1462_v58 = vld [vmem:[%s7576_s21 + $0x2620] sm:$0xff]  ;;  %v1735_v1 = vld [vmem:[%s7576_s21 + $0x2ea8] sm:$0xff] }
 0x599   : > { %6456 = vmatprep.subr.bf16.mxu1 %v6455_v5  ;;  %v6215_v5 = vpack.c.bf16 %v1423_v63, %v1415_v61  ;;  %v1718_v60 = vld [vmem:[%s7576_s21 + $0x2e20] sm:$0xff]  ;;  %v1479_v63 = vld [vmem:[%s7576_s21 + $0x26a8] sm:$0xff] }
 0x59a   : > { %v1726_v61 = vld [vmem:[%s7576_s21 + $0x2e60] sm:$0xff] }
 0x59e   : > { %6202 = vmatpush1.bf16.xpose.msra.mxu0 %v6201_v14  ;;  %v1695_v14 = vld [vmem:[%s7576_s21 + $0x2d68] sm:$0xff] }
 0x59f   : > { %6204 = vmatprep.subr.bf16.mxu0 %v6203_v16  ;;  %v6473_v16 = vpack.c.bf16 %v1678_v9, %v1670_v8  ;;  %v6475_v21 = vpack.c.bf16 %v1695_v14, %v1687_v13  ;;  %v1486_v8 = vld [vmem:[%s7576_s21 + $0x26e0] sm:$0xff]  ;;  %v1503_v13 = vld [vmem:[%s7576_s21 + $0x2768] sm:$0xff] }
 0x5a0   : > { %6458 = vmatpush1.bf16.xpose.msra.mxu1 %v6457_v15  ;;  %v6217_v15 = vpack.c.bf16 %v1422_v7, %v1414_v6  ;;  %v1478_v7 = vld [vmem:[%s7576_s21 + $0x26a0] sm:$0xff]  ;;  %v1751_v14 = vld [vmem:[%s7576_s21 + $0x2f28] sm:$0xff] }
 0x5a1   : > { %6460 = vmatprep.subr.bf16.mxu1 %v6459_v20  ;;  %v6219_v20 = vpack.c.bf16 %v1439_v11, %v1431_v10  ;;  %v1734_v9 = vld [vmem:[%s7576_s21 + $0x2ea0] sm:$0xff]  ;;  %v1495_v11 = vld [vmem:[%s7576_s21 + $0x2728] sm:$0xff] }
 0x5a2   : > { %v1742_v10 = vld [vmem:[%s7576_s21 + $0x2ee0] sm:$0xff] }
 0x5a6   : > { %6206 = vmatpush1.bf16.xpose.msra.mxu0 %v6205_v30  ;;  %v1711_v30 = vld [vmem:[%s7576_s21 + $0x2de8] sm:$0xff] }
 0x5a7   : > { %6208 = vmatprep.subr.bf16.mxu0 %v6207_v32  ;;  %v6477_v32 = vpack.c.bf16 %v1694_v48, %v1686_v28  ;;  %v6479_v40 = vpack.c.bf16 %v1711_v30, %v1703_v29  ;;  %v1502_v28 = vld [vmem:[%s7576_s21 + $0x2760] sm:$0xff]  ;;  %v1519_v29 = vld [vmem:[%s7576_s21 + $0x27e8] sm:$0xff] }
 0x5a8   : > { %6462 = vmatpush1.bf16.xpose.msra.mxu1 %v6461_v31  ;;  %v6221_v31 = vpack.c.bf16 %v1438_v23, %v1430_v22  ;;  %v1494_v23 = vld [vmem:[%s7576_s21 + $0x2720] sm:$0xff]  ;;  %v1767_v30 = vld [vmem:[%s7576_s21 + $0x2fa8] sm:$0xff] }
 0x5a9   : > { %6464 = vmatprep.subr.bf16.mxu1 %v6463_v37  ;;  %v6223_v37 = vpack.c.bf16 %v1455_v57, %v1447_v51  ;;  %v1750_v48 = vld [vmem:[%s7576_s21 + $0x2f20] sm:$0xff]  ;;  %v1511_v57 = vld [vmem:[%s7576_s21 + $0x27a8] sm:$0xff] }
 0x5aa   : > { %v1758_v51 = vld [vmem:[%s7576_s21 + $0x2f60] sm:$0xff] }
 0x5ae   : > { %6210 = vmatpush1.bf16.xpose.msra.mxu0 %v6209_v49  ;;  %v1727_v49 = vld [vmem:[%s7576_s21 + $0x2e68] sm:$0xff] }
 0x5af   : > { %6212 = vmatprep.subr.bf16.mxu0 %v6211_v52  ;;  %v6481_v52 = vpack.c.bf16 %v1710_v45, %v1702_v44  ;;  %v6483_v56 = vpack.c.bf16 %v1727_v49, %v1719_v3  ;;  %v1518_v44 = vld [vmem:[%s7576_s21 + $0x27e0] sm:$0xff]  ;;  %v1281_v3 = vld [vmem:[%s7576_s21 + $0x2078] sm:$0xff] }
 0x5b0   : > { %6466 = vmatpush1.bf16.xpose.msra.mxu1 %v6465_v50  ;;  %v6225_v50 = vpack.c.bf16 %v1454_v42, %v1446_v41  ;;  %v1510_v42 = vld [vmem:[%s7576_s21 + $0x27a0] sm:$0xff]  ;;  %v1529_v49 = vld [vmem:[%s7576_s21 + $0x2838] sm:$0xff] }
 0x5b1   : > { %6468 = vmatprep.subr.bf16.mxu1 %v6467_v53  ;;  %v6227_v53 = vpack.c.bf16 %v1471_v46, %v1463_v35  ;;  %v1766_v45 = vld [vmem:[%s7576_s21 + $0x2fa0] sm:$0xff]  ;;  %v1273_v46 = vld [vmem:[%s7576_s21 + $0x2038] sm:$0xff] }
 0x5b2   : > { %v1774_v35 = vld [vmem:[%s7576_s21 + $0x2fe0] sm:$0xff] }
 0x5b6   : > { %6214 = vmatpush1.bf16.xpose.msra.mxu0 %v6213_v2  ;;  %v1743_v2 = vld [vmem:[%s7576_s21 + $0x2ee8] sm:$0xff] }
 0x5b7   : > { %6216 = vmatprep.subr.bf16.mxu0 %v6215_v5  ;;  %v6485_v5 = vpack.c.bf16 %v1726_v61, %v1718_v60  ;;  %v6487_v6 = vpack.c.bf16 %v1743_v2, %v1735_v1  ;;  %v1280_v60 = vld [vmem:[%s7576_s21 + $0x2070] sm:$0xff]  ;;  %v1297_v1 = vld [vmem:[%s7576_s21 + $0x20f8] sm:$0xff] }
 0x5b8   : > { %6470 = vmatpush1.bf16.xpose.msra.mxu1 %v6469_v4  ;;  %v6229_v4 = vpack.c.bf16 %v1470_v59, %v1462_v58  ;;  %v1272_v59 = vld [vmem:[%s7576_s21 + $0x2030] sm:$0xff]  ;;  %v1545_v2 = vld [vmem:[%s7576_s21 + $0x28b8] sm:$0xff] }
 0x5b9   : > { %6472 = vmatprep.subr.bf16.mxu1 %v6471_v17  ;;  %v6231_v17 = vpack.c.bf16 %v1487_v0, %v1479_v63  ;;  %v1528_v61 = vld [vmem:[%s7576_s21 + $0x2830] sm:$0xff]  ;;  %v1289_v0 = vld [vmem:[%s7576_s21 + $0x20b8] sm:$0xff] }
 0x5ba   : > { %v1536_v63 = vld [vmem:[%s7576_s21 + $0x2870] sm:$0xff] }
 0x5be   : > { %6218 = vmatpush1.bf16.xpose.msra.mxu0 %v6217_v15  ;;  %v1759_v15 = vld [vmem:[%s7576_s21 + $0x2f68] sm:$0xff] }
 0x5bf   : > { %6220 = vmatprep.subr.bf16.mxu0 %v6219_v20  ;;  %v6489_v20 = vpack.c.bf16 %v1742_v10, %v1734_v9  ;;  %v6491_v22 = vpack.c.bf16 %v1759_v15, %v1751_v14  ;;  %v1296_v9 = vld [vmem:[%s7576_s21 + $0x20f0] sm:$0xff]  ;;  %v1313_v14 = vld [vmem:[%s7576_s21 + $0x2178] sm:$0xff] }
 0x5c0   : > { %6474 = vmatpush1.bf16.xpose.msra.mxu1 %v6473_v16  ;;  %v6233_v16 = vpack.c.bf16 %v1486_v8, %v1478_v7  ;;  %v1288_v8 = vld [vmem:[%s7576_s21 + $0x20b0] sm:$0xff]  ;;  %v1561_v15 = vld [vmem:[%s7576_s21 + $0x2938] sm:$0xff] }
 0x5c1   : > { %6476 = vmatprep.subr.bf16.mxu1 %v6475_v21  ;;  %v6235_v21 = vpack.c.bf16 %v1503_v13, %v1495_v11  ;;  %v1544_v10 = vld [vmem:[%s7576_s21 + $0x28b0] sm:$0xff]  ;;  %v1305_v13 = vld [vmem:[%s7576_s21 + $0x2138] sm:$0xff] }
 0x5c2   : > { %v1552_v11 = vld [vmem:[%s7576_s21 + $0x28f0] sm:$0xff] }
 0x5c6   : > { %6222 = vmatpush1.bf16.xpose.msra.mxu0 %v6221_v31  ;;  %v1775_v31 = vld [vmem:[%s7576_s21 + $0x2fe8] sm:$0xff] }
 0x5c7   : > { %6224 = vmatprep.subr.bf16.mxu0 %v6223_v37  ;;  %v6493_v37 = vpack.c.bf16 %v1758_v51, %v1750_v48  ;;  %v6495_v41 = vpack.c.bf16 %v1775_v31, %v1767_v30  ;;  %v1312_v48 = vld [vmem:[%s7576_s21 + $0x2170] sm:$0xff]  ;;  %v1329_v30 = vld [vmem:[%s7576_s21 + $0x21f8] sm:$0xff] }
 0x5c8   : > { %6478 = vmatpush1.bf16.xpose.msra.mxu1 %v6477_v32  ;;  %v6237_v32 = vpack.c.bf16 %v1502_v28, %v1494_v23  ;;  %v1304_v28 = vld [vmem:[%s7576_s21 + $0x2130] sm:$0xff]  ;;  %v1577_v31 = vld [vmem:[%s7576_s21 + $0x29b8] sm:$0xff] }
 0x5c9   : > { %6480 = vmatprep.subr.bf16.mxu1 %v6479_v40  ;;  %v6239_v40 = vpack.c.bf16 %v1519_v29, %v1511_v57  ;;  %v1560_v51 = vld [vmem:[%s7576_s21 + $0x2930] sm:$0xff]  ;;  %v1321_v29 = vld [vmem:[%s7576_s21 + $0x21b8] sm:$0xff] }
 0x5ca   : > { %v1568_v57 = vld [vmem:[%s7576_s21 + $0x2970] sm:$0xff] }
 0x5ce   : > { %6226 = vmatpush1.bf16.xpose.msra.mxu0 %v6225_v50  ;;  %v1537_v50 = vld [vmem:[%s7576_s21 + $0x2878] sm:$0xff] }
 0x5cf   : > { %6228 = vmatprep.subr.bf16.mxu0 %v6227_v53  ;;  %v6497_v53 = vpack.c.bf16 %v1774_v35, %v1766_v45  ;;  %v6499_v58 = vpack.c.bf16 %v1537_v50, %v1529_v49  ;;  %v1328_v45 = vld [vmem:[%s7576_s21 + $0x21f0] sm:$0xff]  ;;  %v1345_v49 = vld [vmem:[%s7576_s21 + $0x2278] sm:$0xff] }
 0x5d0   : > { %6482 = vmatpush1.bf16.xpose.msra.mxu1 %v6481_v52  ;;  %v6241_v52 = vpack.c.bf16 %v1518_v44, %v1510_v42  ;;  %v1320_v44 = vld [vmem:[%s7576_s21 + $0x21b0] sm:$0xff]  ;;  %v1593_v50 = vld [vmem:[%s7576_s21 + $0x2a38] sm:$0xff] }
 0x5d1   : > { %6484 = vmatprep.subr.bf16.mxu1 %v6483_v56  ;;  %v6243_v56 = vpack.c.bf16 %v1281_v3, %v1273_v46  ;;  %v1576_v35 = vld [vmem:[%s7576_s21 + $0x29b0] sm:$0xff]  ;;  %v1337_v3 = vld [vmem:[%s7576_s21 + $0x2238] sm:$0xff] }
 0x5d2   : > { %v1584_v46 = vld [vmem:[%s7576_s21 + $0x29f0] sm:$0xff] }
 0x5d6   : > { %6230 = vmatpush1.bf16.xpose.msra.mxu0 %v6229_v4  ;;  %v1553_v4 = vld [vmem:[%s7576_s21 + $0x28f8] sm:$0xff] }
 0x5d7   : > { %6232 = vmatprep.subr.bf16.mxu0 %v6231_v17  ;;  %v6501_v17 = vpack.c.bf16 %v1536_v63, %v1528_v61  ;;  %v6503_v7 = vpack.c.bf16 %v1553_v4, %v1545_v2  ;;  %v1344_v61 = vld [vmem:[%s7576_s21 + $0x2270] sm:$0xff]  ;;  %v1361_v2 = vld [vmem:[%s7576_s21 + $0x22f8] sm:$0xff] }
 0x5d8   : > { %6486 = vmatpush1.bf16.xpose.msra.mxu1 %v6485_v5  ;;  %v6245_v5 = vpack.c.bf16 %v1280_v60, %v1272_v59  ;;  %v1336_v60 = vld [vmem:[%s7576_s21 + $0x2230] sm:$0xff]  ;;  %v1609_v4 = vld [vmem:[%s7576_s21 + $0x2ab8] sm:$0xff] }
 0x5d9   : > { %6488 = vmatprep.subr.bf16.mxu1 %v6487_v6  ;;  %v6247_v6 = vpack.c.bf16 %v1297_v1, %v1289_v0  ;;  %v1592_v63 = vld [vmem:[%s7576_s21 + $0x2a30] sm:$0xff]  ;;  %v1353_v1 = vld [vmem:[%s7576_s21 + $0x22b8] sm:$0xff] }
 0x5da   : > { %v1600_v0 = vld [vmem:[%s7576_s21 + $0x2a70] sm:$0xff] }
 0x5de   : > { %6234 = vmatpush1.bf16.xpose.msra.mxu0 %v6233_v16  ;;  %v1569_v16 = vld [vmem:[%s7576_s21 + $0x2978] sm:$0xff] }
 0x5df   : > { %6236 = vmatprep.subr.bf16.mxu0 %v6235_v21  ;;  %v6505_v21 = vpack.c.bf16 %v1552_v11, %v1544_v10  ;;  %v6507_v23 = vpack.c.bf16 %v1569_v16, %v1561_v15  ;;  %v1360_v10 = vld [vmem:[%s7576_s21 + $0x22f0] sm:$0xff]  ;;  %v1377_v15 = vld [vmem:[%s7576_s21 + $0x2378] sm:$0xff] }
 0x5e0   : > { %6490 = vmatpush1.bf16.xpose.msra.mxu1 %v6489_v20  ;;  %v6249_v20 = vpack.c.bf16 %v1296_v9, %v1288_v8  ;;  %v1352_v9 = vld [vmem:[%s7576_s21 + $0x22b0] sm:$0xff]  ;;  %v1625_v16 = vld [vmem:[%s7576_s21 + $0x2b38] sm:$0xff] }
 0x5e1   : > { %6492 = vmatprep.subr.bf16.mxu1 %v6491_v22  ;;  %v6251_v22 = vpack.c.bf16 %v1313_v14, %v1305_v13  ;;  %v1608_v11 = vld [vmem:[%s7576_s21 + $0x2ab0] sm:$0xff]  ;;  %v1369_v14 = vld [vmem:[%s7576_s21 + $0x2338] sm:$0xff] }
 0x5e2   : > { %v1616_v13 = vld [vmem:[%s7576_s21 + $0x2af0] sm:$0xff] }
 0x5e6   : > { %6238 = vmatpush1.bf16.xpose.msra.mxu0 %v6237_v32  ;;  %v1585_v32 = vld [vmem:[%s7576_s21 + $0x29f8] sm:$0xff] }
 0x5e7   : > { %6240 = vmatprep.subr.bf16.mxu0 %v6239_v40  ;;  %v6509_v40 = vpack.c.bf16 %v1568_v57, %v1560_v51  ;;  %v6511_v42 = vpack.c.bf16 %v1585_v32, %v1577_v31  ;;  %v1376_v51 = vld [vmem:[%s7576_s21 + $0x2370] sm:$0xff]  ;;  %v1393_v31 = vld [vmem:[%s7576_s21 + $0x23f8] sm:$0xff] }
 0x5e8   : > { %6494 = vmatpush1.bf16.xpose.msra.mxu1 %v6493_v37  ;;  %v6253_v37 = vpack.c.bf16 %v1312_v48, %v1304_v28  ;;  %v1368_v48 = vld [vmem:[%s7576_s21 + $0x2330] sm:$0xff]  ;;  %v1641_v32 = vld [vmem:[%s7576_s21 + $0x2bb8] sm:$0xff] }
 0x5e9   : > { %6496 = vmatprep.subr.bf16.mxu1 %v6495_v41  ;;  %v6255_v41 = vpack.c.bf16 %v1329_v30, %v1321_v29  ;;  %v1624_v57 = vld [vmem:[%s7576_s21 + $0x2b30] sm:$0xff]  ;;  %v1385_v30 = vld [vmem:[%s7576_s21 + $0x23b8] sm:$0xff] }
 0x5ea   : > { %v1632_v29 = vld [vmem:[%s7576_s21 + $0x2b70] sm:$0xff] }
 0x5ee   : > { %6242 = vmatpush1.bf16.xpose.msra.mxu0 %v6241_v52  ;;  %v1601_v52 = vld [vmem:[%s7576_s21 + $0x2a78] sm:$0xff] }
 0x5ef   : > { %6244 = vmatprep.subr.bf16.mxu0 %v6243_v56  ;;  %v6513_v56 = vpack.c.bf16 %v1584_v46, %v1576_v35  ;;  %v6515_v59 = vpack.c.bf16 %v1601_v52, %v1593_v50  ;;  %v1392_v35 = vld [vmem:[%s7576_s21 + $0x23f0] sm:$0xff]  ;;  %v1409_v50 = vld [vmem:[%s7576_s21 + $0x2478] sm:$0xff] }
 0x5f0   : > { %6498 = vmatpush1.bf16.xpose.msra.mxu1 %v6497_v53  ;;  %v6257_v53 = vpack.c.bf16 %v1328_v45, %v1320_v44  ;;  %v1384_v45 = vld [vmem:[%s7576_s21 + $0x23b0] sm:$0xff]  ;;  %v1657_v52 = vld [vmem:[%s7576_s21 + $0x2c38] sm:$0xff] }
 0x5f1   : > { %6500 = vmatprep.subr.bf16.mxu1 %v6499_v58  ;;  %v6259_v58 = vpack.c.bf16 %v1345_v49, %v1337_v3  ;;  %v1640_v46 = vld [vmem:[%s7576_s21 + $0x2bb0] sm:$0xff]  ;;  %v1401_v49 = vld [vmem:[%s7576_s21 + $0x2438] sm:$0xff] }
 0x5f2   : > { %v1648_v3 = vld [vmem:[%s7576_s21 + $0x2bf0] sm:$0xff] }
 0x5f5   : > { %3758 = vmatmul.mubr.f32.vlgmr.msra.gmra.mrb[4].mxu0 %v8035_v36 }
 0x5f6   : > { %6246 = vmatpush1.bf16.xpose.msra.mxu0 %v6245_v5  ;;  %3828 = vmatprep.mubr.f32.mxu0 %v8041_v43  ;;  %v1617_v5 = vld [vmem:[%s7576_s21 + $0x2af8] sm:$0xff] }
 0x5f7   : > { %4042 = vmatmul.mubr.f32.vlgmr.msra.gmra.mrb[4].mxu1 %v8035_v36  ;;  %6248 = vmatprep.subr.bf16.mxu0 %v6247_v6  ;;  %v6517_v6 = vpack.c.bf16 %v1600_v0, %v1592_v63  ;;  %v6519_v8 = vpack.c.bf16 %v1617_v5, %v1609_v4  ;;  %v1408_v63 = vld [vmem:[%s7576_s21 + $0x2470] sm:$0xff]  ;;  %v1425_v4 = vld [vmem:[%s7576_s21 + $0x24f8] sm:$0xff] }
 0x5f8   : > { %6502 = vmatpush1.bf16.xpose.msra.mxu1 %v6501_v17  ;;  %4112 = vmatprep.mubr.f32.mxu1 %v8041_v43  ;;  %v6261_v17 = vpack.c.bf16 %v1344_v61, %v1336_v60  ;;  %v1400_v61 = vld [vmem:[%s7576_s21 + $0x2430] sm:$0xff]  ;;  %v1673_v5 = vld [vmem:[%s7576_s21 + $0x2cb8] sm:$0xff] }
 0x5f9   : > { %6504 = vmatprep.subr.bf16.mxu1 %v6503_v7  ;;  %v6263_v7 = vpack.c.bf16 %v1361_v2, %v1353_v1  ;;  %v1656_v0 = vld [vmem:[%s7576_s21 + $0x2c30] sm:$0xff]  ;;  %v1417_v2 = vld [vmem:[%s7576_s21 + $0x24b8] sm:$0xff] }
 0x5fa   : > { %v1664_v1 = vld [vmem:[%s7576_s21 + $0x2c70] sm:$0xff] }
 0x5fe   : > { %6250 = vmatpush1.bf16.xpose.msra.mxu0 %v6249_v20  ;;  %v1633_v20 = vld [vmem:[%s7576_s21 + $0x2b78] sm:$0xff] }
 0x5ff   : > { %6252 = vmatprep.subr.bf16.mxu0 %v6251_v22  ;;  %v6521_v22 = vpack.c.bf16 %v1616_v13, %v1608_v11  ;;  %v6523_v28 = vpack.c.bf16 %v1633_v20, %v1625_v16  ;;  %v1424_v11 = vld [vmem:[%s7576_s21 + $0x24f0] sm:$0xff]  ;;  %v1441_v16 = vld [vmem:[%s7576_s21 + $0x2578] sm:$0xff] }
 0x600   : > { %6506 = vmatpush1.bf16.xpose.msra.mxu1 %v6505_v21  ;;  %v6265_v21 = vpack.c.bf16 %v1360_v10, %v1352_v9  ;;  %v1416_v10 = vld [vmem:[%s7576_s21 + $0x24b0] sm:$0xff]  ;;  %v1689_v20 = vld [vmem:[%s7576_s21 + $0x2d38] sm:$0xff] }
 0x601   : > { %6508 = vmatprep.subr.bf16.mxu1 %v6507_v23  ;;  %v6267_v23 = vpack.c.bf16 %v1377_v15, %v1369_v14  ;;  %v1672_v13 = vld [vmem:[%s7576_s21 + $0x2cb0] sm:$0xff]  ;;  %v1433_v15 = vld [vmem:[%s7576_s21 + $0x2538] sm:$0xff] }
 0x602   : > { %v1680_v14 = vld [vmem:[%s7576_s21 + $0x2cf0] sm:$0xff] }
 0x606   : > { %6254 = vmatpush1.bf16.xpose.msra.mxu0 %v6253_v37  ;;  %v1649_v37 = vld [vmem:[%s7576_s21 + $0x2bf8] sm:$0xff] }
 0x607   : > { %6256 = vmatprep.subr.bf16.mxu0 %v6255_v41  ;;  %v6525_v41 = vpack.c.bf16 %v1632_v29, %v1624_v57  ;;  %v6527_v44 = vpack.c.bf16 %v1649_v37, %v1641_v32  ;;  %v1440_v57 = vld [vmem:[%s7576_s21 + $0x2570] sm:$0xff]  ;;  %v1457_v32 = vld [vmem:[%s7576_s21 + $0x25f8] sm:$0xff] }
 0x608   : > { %6510 = vmatpush1.bf16.xpose.msra.mxu1 %v6509_v40  ;;  %v6269_v40 = vpack.c.bf16 %v1376_v51, %v1368_v48  ;;  %v1432_v51 = vld [vmem:[%s7576_s21 + $0x2530] sm:$0xff]  ;;  %v1705_v37 = vld [vmem:[%s7576_s21 + $0x2db8] sm:$0xff] }
 0x609   : > { %6512 = vmatprep.subr.bf16.mxu1 %v6511_v42  ;;  %v6271_v42 = vpack.c.bf16 %v1393_v31, %v1385_v30  ;;  %v1688_v29 = vld [vmem:[%s7576_s21 + $0x2d30] sm:$0xff]  ;;  %v1449_v31 = vld [vmem:[%s7576_s21 + $0x25b8] sm:$0xff] }
 0x60a   : > { %v1696_v30 = vld [vmem:[%s7576_s21 + $0x2d70] sm:$0xff] }
 0x60e   : > { %6258 = vmatpush1.bf16.xpose.msra.mxu0 %v6257_v53  ;;  %v1665_v53 = vld [vmem:[%s7576_s21 + $0x2c78] sm:$0xff] }
 0x60f   : > { %6260 = vmatprep.subr.bf16.mxu0 %v6259_v58  ;;  %v6529_v58 = vpack.c.bf16 %v1648_v3, %v1640_v46  ;;  %v6531_v60 = vpack.c.bf16 %v1665_v53, %v1657_v52  ;;  %v1456_v46 = vld [vmem:[%s7576_s21 + $0x25f0] sm:$0xff]  ;;  %v1473_v52 = vld [vmem:[%s7576_s21 + $0x2678] sm:$0xff] }
 0x610   : > { %6514 = vmatpush1.bf16.xpose.msra.mxu1 %v6513_v56  ;;  %v6273_v56 = vpack.c.bf16 %v1392_v35, %v1384_v45  ;;  %v1448_v35 = vld [vmem:[%s7576_s21 + $0x25b0] sm:$0xff]  ;;  %v1721_v53 = vld [vmem:[%s7576_s21 + $0x2e38] sm:$0xff] }
 0x611   : > { %6516 = vmatprep.subr.bf16.mxu1 %v6515_v59  ;;  %v6275_v59 = vpack.c.bf16 %v1409_v50, %v1401_v49  ;;  %v1704_v3 = vld [vmem:[%s7576_s21 + $0x2db0] sm:$0xff]  ;;  %v1465_v50 = vld [vmem:[%s7576_s21 + $0x2638] sm:$0xff] }
 0x612   : > { %v1712_v49 = vld [vmem:[%s7576_s21 + $0x2df0] sm:$0xff] }
 0x616   : > { %6262 = vmatpush1.bf16.xpose.msra.mxu0 %v6261_v17  ;;  %v1681_v17 = vld [vmem:[%s7576_s21 + $0x2cf8] sm:$0xff] }
 0x617   : > { %6264 = vmatprep.subr.bf16.mxu0 %v6263_v7  ;;  %v6533_v7 = vpack.c.bf16 %v1664_v1, %v1656_v0  ;;  %v6535_v9 = vpack.c.bf16 %v1681_v17, %v1673_v5  ;;  %v1472_v0 = vld [vmem:[%s7576_s21 + $0x2670] sm:$0xff]  ;;  %v1489_v5 = vld [vmem:[%s7576_s21 + $0x26f8] sm:$0xff] }
 0x618   : > { %6518 = vmatpush1.bf16.xpose.msra.mxu1 %v6517_v6  ;;  %v6277_v6 = vpack.c.bf16 %v1408_v63, %v1400_v61  ;;  %v1464_v63 = vld [vmem:[%s7576_s21 + $0x2630] sm:$0xff]  ;;  %v1737_v17 = vld [vmem:[%s7576_s21 + $0x2eb8] sm:$0xff] }
 0x619   : > { %6520 = vmatprep.subr.bf16.mxu1 %v6519_v8  ;;  %v6279_v8 = vpack.c.bf16 %v1425_v4, %v1417_v2  ;;  %v1720_v1 = vld [vmem:[%s7576_s21 + $0x2e30] sm:$0xff]  ;;  %v1481_v4 = vld [vmem:[%s7576_s21 + $0x26b8] sm:$0xff] }
 0x61a   : > { %v1728_v2 = vld [vmem:[%s7576_s21 + $0x2e70] sm:$0xff] }
 0x61e   : > { %6266 = vmatpush1.bf16.xpose.msra.mxu0 %v6265_v21  ;;  %v1697_v21 = vld [vmem:[%s7576_s21 + $0x2d78] sm:$0xff] }
 0x61f   : > { %6268 = vmatprep.subr.bf16.mxu0 %v6267_v23  ;;  %v6537_v23 = vpack.c.bf16 %v1680_v14, %v1672_v13  ;;  %v6539_v48 = vpack.c.bf16 %v1697_v21, %v1689_v20  ;;  %v1488_v13 = vld [vmem:[%s7576_s21 + $0x26f0] sm:$0xff]  ;;  %v1505_v20 = vld [vmem:[%s7576_s21 + $0x2778] sm:$0xff] }
 0x620   : > { %6522 = vmatpush1.bf16.xpose.msra.mxu1 %v6521_v22  ;;  %v6281_v22 = vpack.c.bf16 %v1424_v11, %v1416_v10  ;;  %v1480_v11 = vld [vmem:[%s7576_s21 + $0x26b0] sm:$0xff]  ;;  %v1753_v21 = vld [vmem:[%s7576_s21 + $0x2f38] sm:$0xff] }
 0x621   : > { %6524 = vmatprep.subr.bf16.mxu1 %v6523_v28  ;;  %v6283_v28 = vpack.c.bf16 %v1441_v16, %v1433_v15  ;;  %v1736_v14 = vld [vmem:[%s7576_s21 + $0x2eb0] sm:$0xff]  ;;  %v1497_v16 = vld [vmem:[%s7576_s21 + $0x2738] sm:$0xff] }
 0x622   : > { %v1744_v15 = vld [vmem:[%s7576_s21 + $0x2ef0] sm:$0xff] }
 0x626   : > { %6270 = vmatpush1.bf16.xpose.msra.mxu0 %v6269_v40  ;;  %v1713_v40 = vld [vmem:[%s7576_s21 + $0x2df8] sm:$0xff] }
 0x627   : > { %6272 = vmatprep.subr.bf16.mxu0 %v6271_v42  ;;  %v6541_v42 = vpack.c.bf16 %v1696_v30, %v1688_v29  ;;  %v6543_v45 = vpack.c.bf16 %v1713_v40, %v1705_v37  ;;  %v1504_v29 = vld [vmem:[%s7576_s21 + $0x2770] sm:$0xff]  ;;  %v1521_v37 = vld [vmem:[%s7576_s21 + $0x27f8] sm:$0xff] }
 0x628   : > { %6526 = vmatpush1.bf16.xpose.msra.mxu1 %v6525_v41  ;;  %v6285_v41 = vpack.c.bf16 %v1440_v57, %v1432_v51  ;;  %v1496_v57 = vld [vmem:[%s7576_s21 + $0x2730] sm:$0xff]  ;;  %v1769_v40 = vld [vmem:[%s7576_s21 + $0x2fb8] sm:$0xff] }
 0x629   : > { %6528 = vmatprep.subr.bf16.mxu1 %v6527_v44  ;;  %v6287_v44 = vpack.c.bf16 %v1457_v32, %v1449_v31  ;;  %v1752_v30 = vld [vmem:[%s7576_s21 + $0x2f30] sm:$0xff]  ;;  %v1513_v32 = vld [vmem:[%s7576_s21 + $0x27b8] sm:$0xff] }
 0x62a   : > { %v1760_v31 = vld [vmem:[%s7576_s21 + $0x2f70] sm:$0xff] }
 0x62e   : > { %6274 = vmatpush1.bf16.xpose.msra.mxu0 %v6273_v56  ;;  %v1729_v56 = vld [vmem:[%s7576_s21 + $0x2e78] sm:$0xff] }
 0x62f   : > { %6276 = vmatprep.subr.bf16.mxu0 %v6275_v59  ;;  %v6545_v59 = vpack.c.bf16 %v1712_v49, %v1704_v3  ;;  %v6547_v61 = vpack.c.bf16 %v1729_v56, %v1721_v53  ;;  %v1520_v3 = vld [vmem:[%s7576_s21 + $0x27f0] sm:$0xff]  ;;  %v1787_v53 = vld [vmem:[%s7576_s21 + $0x3048] sm:$0xff] }
 0x630   : > { %6530 = vmatpush1.bf16.xpose.msra.mxu1 %v6529_v58  ;;  %v6289_v58 = vpack.c.bf16 %v1456_v46, %v1448_v35  ;;  %v1512_v46 = vld [vmem:[%s7576_s21 + $0x27b0] sm:$0xff]  ;;  %v2035_v56 = vld [vmem:[%s7576_s21 + $0x3808] sm:$0xff] }
 0x631   : > { %6532 = vmatprep.subr.bf16.mxu1 %v6531_v60  ;;  %v6291_v60 = vpack.c.bf16 %v1473_v52, %v1465_v50  ;;  %v1768_v49 = vld [vmem:[%s7576_s21 + $0x2fb0] sm:$0xff]  ;;  %v1779_v52 = vld [vmem:[%s7576_s21 + $0x3008] sm:$0xff] }
 0x632   : > { %v1776_v50 = vld [vmem:[%s7576_s21 + $0x2ff0] sm:$0xff] }
 0x636   : > { %6278 = vmatpush1.bf16.xpose.msra.mxu0 %v6277_v6  ;;  %v1745_v6 = vld [vmem:[%s7576_s21 + $0x2ef8] sm:$0xff] }
 0x637   : > { %6280 = vmatprep.subr.bf16.mxu0 %v6279_v8  ;;  %v6549_v8 = vpack.c.bf16 %v1728_v2, %v1720_v1  ;;  %v6551_v10 = vpack.c.bf16 %v1745_v6, %v1737_v17  ;;  %v1786_v1 = vld [vmem:[%s7576_s21 + $0x3040] sm:$0xff]  ;;  %v1803_v17 = vld [vmem:[%s7576_s21 + $0x30c8] sm:$0xff] }
 0x638   : > { %6534 = vmatpush1.bf16.xpose.msra.mxu1 %v6533_v7  ;;  %v6293_v7 = vpack.c.bf16 %v1472_v0, %v1464_v63  ;;  %v1778_v0 = vld [vmem:[%s7576_s21 + $0x3000] sm:$0xff]  ;;  %v2051_v6 = vld [vmem:[%s7576_s21 + $0x3888] sm:$0xff] }
 0x639   : > { %6536 = vmatprep.subr.bf16.mxu1 %v6535_v9  ;;  %v6295_v9 = vpack.c.bf16 %v1489_v5, %v1481_v4  ;;  %v2034_v2 = vld [vmem:[%s7576_s21 + $0x3800] sm:$0xff]  ;;  %v1795_v5 = vld [vmem:[%s7576_s21 + $0x3088] sm:$0xff] }
 0x63a   : > { %v2042_v4 = vld [vmem:[%s7576_s21 + $0x3840] sm:$0xff] }
 0x63e   : > { %6282 = vmatpush1.bf16.xpose.msra.mxu0 %v6281_v22  ;;  %v1761_v22 = vld [vmem:[%s7576_s21 + $0x2f78] sm:$0xff] }
 0x63f   : > { %6284 = vmatprep.subr.bf16.mxu0 %v6283_v28  ;;  %v6553_v28 = vpack.c.bf16 %v1744_v15, %v1736_v14  ;;  %v6555_v51 = vpack.c.bf16 %v1761_v22, %v1753_v21  ;;  %v1802_v14 = vld [vmem:[%s7576_s21 + $0x30c0] sm:$0xff]  ;;  %v1819_v21 = vld [vmem:[%s7576_s21 + $0x3148] sm:$0xff] }
 0x640   : > { %6538 = vmatpush1.bf16.xpose.msra.mxu1 %v6537_v23  ;;  %v6297_v23 = vpack.c.bf16 %v1488_v13, %v1480_v11  ;;  %v1794_v13 = vld [vmem:[%s7576_s21 + $0x3080] sm:$0xff]  ;;  %v2067_v22 = vld [vmem:[%s7576_s21 + $0x3908] sm:$0xff] }
 0x641   : > { %6540 = vmatprep.subr.bf16.mxu1 %v6539_v48  ;;  %v6299_v48 = vpack.c.bf16 %v1505_v20, %v1497_v16  ;;  %v2050_v15 = vld [vmem:[%s7576_s21 + $0x3880] sm:$0xff]  ;;  %v1811_v20 = vld [vmem:[%s7576_s21 + $0x3108] sm:$0xff] }
 0x642   : > { %v2058_v16 = vld [vmem:[%s7576_s21 + $0x38c0] sm:$0xff] }
 0x646   : > { %6286 = vmatpush1.bf16.xpose.msra.mxu0 %v6285_v41  ;;  %v1777_v41 = vld [vmem:[%s7576_s21 + $0x2ff8] sm:$0xff] }
 0x647   : > { %6288 = vmatprep.subr.bf16.mxu0 %v6287_v44  ;;  %v6557_v44 = vpack.c.bf16 %v1760_v31, %v1752_v30  ;;  %v6559_v35 = vpack.c.bf16 %v1777_v41, %v1769_v40  ;;  %v1818_v30 = vld [vmem:[%s7576_s21 + $0x3140] sm:$0xff]  ;;  %v2083_v40 = vld [vmem:[%s7576_s21 + $0x3988] sm:$0xff] }
 0x648   : > { %6542 = vmatpush1.bf16.xpose.msra.mxu1 %v6541_v42  ;;  %v6301_v42 = vpack.c.bf16 %v1504_v29, %v1496_v57  ;;  %v1810_v29 = vld [vmem:[%s7576_s21 + $0x3100] sm:$0xff]  ;;  %v2091_v41 = vld [vmem:[%s7576_s21 + $0x39c8] sm:$0xff] }
 0x649   : > { %6544 = vmatprep.subr.bf16.mxu1 %v6543_v45  ;;  %v6303_v45 = vpack.c.bf16 %v1521_v37, %v1513_v32  ;;  %v2066_v31 = vld [vmem:[%s7576_s21 + $0x3900] sm:$0xff]  ;;  %v1827_v37 = vld [vmem:[%s7576_s21 + $0x3188] sm:$0xff] }
 0x64a   : > { %v2074_v32 = vld [vmem:[%s7576_s21 + $0x3940] sm:$0xff] }
 0x64e   : > { %6290 = vmatpush1.bf16.xpose.msra.mxu0 %v6289_v58  ;;  %v2043_v58 = vld [vmem:[%s7576_s21 + $0x3848] sm:$0xff] }
 0x64f   : > { %6292 = vmatprep.subr.bf16.mxu0 %v6291_v60  ;;  %v6561_v60 = vpack.c.bf16 %v1776_v50, %v1768_v49  ;;  %v6819_v63 = vpack.c.bf16 %v2043_v58, %v2035_v56  ;;  %v2082_v49 = vld [vmem:[%s7576_s21 + $0x3980] sm:$0xff]  ;;  %v2099_v56 = vld [vmem:[%s7576_s21 + $0x3a08] sm:$0xff] }
 0x650   : > { %6546 = vmatpush1.bf16.xpose.msra.mxu1 %v6545_v59  ;;  %v6305_v59 = vpack.c.bf16 %v1520_v3, %v1512_v46  ;;  %v1826_v46 = vld [vmem:[%s7576_s21 + $0x3180] sm:$0xff]  ;;  %v2107_v58 = vld [vmem:[%s7576_s21 + $0x3a48] sm:$0xff] }
 0x651   : > { %6548 = vmatprep.subr.bf16.mxu1 %v6547_v61  ;;  %v6563_v61 = vpack.c.bf16 %v1787_v53, %v1779_v52  ;;  %v1834_v3 = vld [vmem:[%s7576_s21 + $0x31c0] sm:$0xff]  ;;  %v1843_v52 = vld [vmem:[%s7576_s21 + $0x3208] sm:$0xff] }
 0x652   : > { %v2090_v50 = vld [vmem:[%s7576_s21 + $0x39c0] sm:$0xff]  ;;  %v1851_v53 = vld [vmem:[%s7576_s21 + $0x3248] sm:$0xff] }
 0x656   : > { %6294 = vmatpush1.bf16.xpose.msra.mxu0 %v6293_v7  ;;  %v2059_v7 = vld [vmem:[%s7576_s21 + $0x38c8] sm:$0xff] }
 0x657   : > { %6296 = vmatprep.subr.bf16.mxu0 %v6295_v9  ;;  %v6821_v9 = vpack.c.bf16 %v2042_v4, %v2034_v2  ;;  %v6823_v11 = vpack.c.bf16 %v2059_v7, %v2051_v6  ;;  %v2098_v2 = vld [vmem:[%s7576_s21 + $0x3a00] sm:$0xff]  ;;  %v2115_v6 = vld [vmem:[%s7576_s21 + $0x3a88] sm:$0xff] }
 0x658   : > { %6550 = vmatpush1.bf16.xpose.msra.mxu1 %v6549_v8  ;;  %v6565_v8 = vpack.c.bf16 %v1786_v1, %v1778_v0  ;;  %v1842_v0 = vld [vmem:[%s7576_s21 + $0x3200] sm:$0xff]  ;;  %v2123_v7 = vld [vmem:[%s7576_s21 + $0x3ac8] sm:$0xff] }
 0x659   : > { %6552 = vmatprep.subr.bf16.mxu1 %v6551_v10  ;;  %v6567_v10 = vpack.c.bf16 %v1803_v17, %v1795_v5  ;;  %v1850_v1 = vld [vmem:[%s7576_s21 + $0x3240] sm:$0xff]  ;;  %v1859_v5 = vld [vmem:[%s7576_s21 + $0x3288] sm:$0xff] }
 0x65a   : > { %v2106_v4 = vld [vmem:[%s7576_s21 + $0x3a40] sm:$0xff]  ;;  %v1867_v17 = vld [vmem:[%s7576_s21 + $0x32c8] sm:$0xff] }
 0x65e   : > { %6298 = vmatpush1.bf16.xpose.msra.mxu0 %v6297_v23  ;;  %v2075_v23 = vld [vmem:[%s7576_s21 + $0x3948] sm:$0xff] }
 0x65f   : > { %6300 = vmatprep.subr.bf16.mxu0 %v6299_v48  ;;  %v6825_v48 = vpack.c.bf16 %v2058_v16, %v2050_v15  ;;  %v6827_v57 = vpack.c.bf16 %v2075_v23, %v2067_v22  ;;  %v2114_v15 = vld [vmem:[%s7576_s21 + $0x3a80] sm:$0xff]  ;;  %v2131_v22 = vld [vmem:[%s7576_s21 + $0x3b08] sm:$0xff] }
 0x660   : > { %6554 = vmatpush1.bf16.xpose.msra.mxu1 %v6553_v28  ;;  %v6569_v28 = vpack.c.bf16 %v1802_v14, %v1794_v13  ;;  %v1858_v13 = vld [vmem:[%s7576_s21 + $0x3280] sm:$0xff]  ;;  %v2139_v23 = vld [vmem:[%s7576_s21 + $0x3b48] sm:$0xff] }
 0x661   : > { %6556 = vmatprep.subr.bf16.mxu1 %v6555_v51  ;;  %v6571_v51 = vpack.c.bf16 %v1819_v21, %v1811_v20  ;;  %v1866_v14 = vld [vmem:[%s7576_s21 + $0x32c0] sm:$0xff]  ;;  %v1875_v20 = vld [vmem:[%s7576_s21 + $0x3308] sm:$0xff] }
 0x662   : > { %v2122_v16 = vld [vmem:[%s7576_s21 + $0x3ac0] sm:$0xff]  ;;  %v1883_v21 = vld [vmem:[%s7576_s21 + $0x3348] sm:$0xff] }
 0x666   : > { %6302 = vmatpush1.bf16.xpose.msra.mxu0 %v6301_v42  ;;  %v6573_v42 = vpack.c.bf16 %v1818_v30, %v1810_v29  ;;  %v1874_v29 = vld [vmem:[%s7576_s21 + $0x3300] sm:$0xff] }
 0x667   : > { %6304 = vmatprep.subr.bf16.mxu0 %v6303_v45  ;;  %v1882_v30 = vld [vmem:[%s7576_s21 + $0x3340] sm:$0xff] }
 0x668   : > { %6558 = vmatpush1.bf16.xpose.msra.mxu1 %v6557_v44  ;;  %v6829_v44 = vpack.c.bf16 %v2074_v32, %v2066_v31  ;;  %v2130_v31 = vld [vmem:[%s7576_s21 + $0x3b00] sm:$0xff] }
 0x669   : > { %6560 = vmatprep.subr.bf16.mxu1 %v6559_v35  ;;  %v6831_v35 = vpack.c.bf16 %v2091_v41, %v2083_v40  ;;  %v2138_v32 = vld [vmem:[%s7576_s21 + $0x3b40] sm:$0xff]  ;;  %v2147_v40 = vld [vmem:[%s7576_s21 + $0x3b88] sm:$0xff] }
 0x66a   : > { %v2155_v41 = vld [vmem:[%s7576_s21 + $0x3bc8] sm:$0xff] }
 0x66e   : > { %6306 = vmatpush1.bf16.xpose.msra.mxu0 %v6305_v59  ;;  %v6577_v59 = vpack.c.bf16 %v1834_v3, %v1826_v46  ;;  %v1890_v46 = vld [vmem:[%s7576_s21 + $0x3380] sm:$0xff] }
 0x66f   : > { %6564 = vmatprep.subr.bf16.mxu0 %v6563_v61  ;;  %v6579_v61 = vpack.c.bf16 %v1851_v53, %v1843_v52  ;;  %v1898_v3 = vld [vmem:[%s7576_s21 + $0x33c0] sm:$0xff]  ;;  %v1907_v52 = vld [vmem:[%s7576_s21 + $0x3408] sm:$0xff] }
 0x670   : > { %6562 = vmatpush1.bf16.xpose.msra.mxu1 %v6561_v60  ;;  %v6833_v60 = vpack.c.bf16 %v2090_v50, %v2082_v49  ;;  %v2146_v49 = vld [vmem:[%s7576_s21 + $0x3b80] sm:$0xff]  ;;  %v1915_v53 = vld [vmem:[%s7576_s21 + $0x3448] sm:$0xff] }
 0x671   : > { %6820 = vmatprep.subr.bf16.mxu1 %v6819_v63  ;;  %v6835_v63 = vpack.c.bf16 %v2107_v58, %v2099_v56  ;;  %v2154_v50 = vld [vmem:[%s7576_s21 + $0x3bc0] sm:$0xff]  ;;  %v2163_v56 = vld [vmem:[%s7576_s21 + $0x3c08] sm:$0xff] }
 0x672   : > { %v2171_v58 = vld [vmem:[%s7576_s21 + $0x3c48] sm:$0xff] }
 0x675   : > { %3829 = vmatmul.mubr.f32.vlgmr.msra.gmra.mrb[4].mxu0 %v8178_v38 }
 0x676   : > { %6566 = vmatpush1.bf16.xpose.msra.mxu0 %v6565_v8  ;;  %4183 = vmatprep.mubr.f32.mxu0 %v7643_v18  ;;  %v6581_v8 = vpack.c.bf16 %v1850_v1, %v1842_v0  ;;  %v1906_v0 = vld [vmem:[%s7576_s21 + $0x3400] sm:$0xff] }
 0x677   : > { %4113 = vmatmul.mubr.f32.vlgmr.msra.gmra.mrb[4].mxu1 %v8178_v38  ;;  %6568 = vmatprep.subr.bf16.mxu0 %v6567_v10  ;;  %v6583_v10 = vpack.c.bf16 %v1867_v17, %v1859_v5  ;;  %v1914_v1 = vld [vmem:[%s7576_s21 + $0x3440] sm:$0xff]  ;;  %v1923_v5 = vld [vmem:[%s7576_s21 + $0x3488] sm:$0xff] }
 0x678   : > { %6822 = vmatpush1.bf16.xpose.msra.mxu1 %v6821_v9  ;;  %4467 = vmatprep.mubr.f32.mxu1 %v7643_v18  ;;  %v1835_v18 = vld [vmem:[%s7576_s21 + $0x31c8] sm:$0xff]  ;;  %v6837_v9 = vpack.c.bf16 %v2106_v4, %v2098_v2  ;;  %v2162_v2 = vld [vmem:[%s7576_s21 + $0x3c00] sm:$0xff] }
 0x679   : > { %6824 = vmatprep.subr.bf16.mxu1 %v6823_v11  ;;  %v6575_v45 = vpack.c.bf16 %v1835_v18, %v1827_v37  ;;  %v6839_v11 = vpack.c.bf16 %v2123_v7, %v2115_v6  ;;  %v1891_v37 = vld [vmem:[%s7576_s21 + $0x3388] sm:$0xff]  ;;  %v2170_v4 = vld [vmem:[%s7576_s21 + $0x3c40] sm:$0xff] }
 0x67a   : > { %v1899_v18 = vld [vmem:[%s7576_s21 + $0x33c8] sm:$0xff] }
 0x67b   : > { %v1931_v17 = vld [vmem:[%s7576_s21 + $0x34c8] sm:$0xff] }
 0x67c   : > { %v2179_v6 = vld [vmem:[%s7576_s21 + $0x3c88] sm:$0xff] }
 0x67d   : > { %v2187_v7 = vld [vmem:[%s7576_s21 + $0x3cc8] sm:$0xff] }
 0x67e   : > { %6570 = vmatpush1.bf16.xpose.msra.mxu0 %v6569_v28  ;;  %v6585_v28 = vpack.c.bf16 %v1866_v14, %v1858_v13  ;;  %v1922_v13 = vld [vmem:[%s7576_s21 + $0x3480] sm:$0xff] }
 0x67f   : > { %6572 = vmatprep.subr.bf16.mxu0 %v6571_v51  ;;  %v6587_v51 = vpack.c.bf16 %v1883_v21, %v1875_v20  ;;  %v1930_v14 = vld [vmem:[%s7576_s21 + $0x34c0] sm:$0xff]  ;;  %v1939_v20 = vld [vmem:[%s7576_s21 + $0x3508] sm:$0xff] }
 0x680   : > { %6826 = vmatpush1.bf16.xpose.msra.mxu1 %v6825_v48  ;;  %v6841_v48 = vpack.c.bf16 %v2122_v16, %v2114_v15  ;;  %v2178_v15 = vld [vmem:[%s7576_s21 + $0x3c80] sm:$0xff]  ;;  %v1947_v21 = vld [vmem:[%s7576_s21 + $0x3548] sm:$0xff] }
 0x681   : > { %6828 = vmatprep.subr.bf16.mxu1 %v6827_v57  ;;  %v6843_v57 = vpack.c.bf16 %v2139_v23, %v2131_v22  ;;  %v2186_v16 = vld [vmem:[%s7576_s21 + $0x3cc0] sm:$0xff]  ;;  %v2195_v22 = vld [vmem:[%s7576_s21 + $0x3d08] sm:$0xff] }
 0x682   : > { %v2203_v23 = vld [vmem:[%s7576_s21 + $0x3d48] sm:$0xff] }
 0x686   : > { %6574 = vmatpush1.bf16.xpose.msra.mxu0 %v6573_v42  ;;  %v6589_v42 = vpack.c.bf16 %v1882_v30, %v1874_v29  ;;  %v1938_v29 = vld [vmem:[%s7576_s21 + $0x3500] sm:$0xff] }
 0x687   : > { %6576 = vmatprep.subr.bf16.mxu0 %v6575_v45  ;;  %v6591_v45 = vpack.c.bf16 %v1899_v18, %v1891_v37  ;;  %v1946_v30 = vld [vmem:[%s7576_s21 + $0x3540] sm:$0xff]  ;;  %v1955_v37 = vld [vmem:[%s7576_s21 + $0x3588] sm:$0xff] }
 0x688   : > { %6830 = vmatpush1.bf16.xpose.msra.mxu1 %v6829_v44  ;;  %v6845_v44 = vpack.c.bf16 %v2138_v32, %v2130_v31  ;;  %v2194_v31 = vld [vmem:[%s7576_s21 + $0x3d00] sm:$0xff]  ;;  %v1963_v18 = vld [vmem:[%s7576_s21 + $0x35c8] sm:$0xff] }
 0x689   : > { %6832 = vmatprep.subr.bf16.mxu1 %v6831_v35  ;;  %v6847_v35 = vpack.c.bf16 %v2155_v41, %v2147_v40  ;;  %v2202_v32 = vld [vmem:[%s7576_s21 + $0x3d40] sm:$0xff]  ;;  %v2211_v40 = vld [vmem:[%s7576_s21 + $0x3d88] sm:$0xff] }
 0x68a   : > { %v2219_v41 = vld [vmem:[%s7576_s21 + $0x3dc8] sm:$0xff] }
 0x68e   : > { %6578 = vmatpush1.bf16.xpose.msra.mxu0 %v6577_v59  ;;  %v6593_v59 = vpack.c.bf16 %v1898_v3, %v1890_v46  ;;  %v1954_v46 = vld [vmem:[%s7576_s21 + $0x3580] sm:$0xff] }
 0x68f   : > { %6580 = vmatprep.subr.bf16.mxu0 %v6579_v61  ;;  %v6595_v61 = vpack.c.bf16 %v1915_v53, %v1907_v52  ;;  %v1962_v3 = vld [vmem:[%s7576_s21 + $0x35c0] sm:$0xff]  ;;  %v1971_v52 = vld [vmem:[%s7576_s21 + $0x3608] sm:$0xff] }
 0x690   : > { %6834 = vmatpush1.bf16.xpose.msra.mxu1 %v6833_v60  ;;  %v6849_v60 = vpack.c.bf16 %v2154_v50, %v2146_v49  ;;  %v2210_v49 = vld [vmem:[%s7576_s21 + $0x3d80] sm:$0xff]  ;;  %v1979_v53 = vld [vmem:[%s7576_s21 + $0x3648] sm:$0xff] }
 0x691   : > { %6836 = vmatprep.subr.bf16.mxu1 %v6835_v63  ;;  %v6851_v63 = vpack.c.bf16 %v2171_v58, %v2163_v56  ;;  %v2218_v50 = vld [vmem:[%s7576_s21 + $0x3dc0] sm:$0xff]  ;;  %v2227_v56 = vld [vmem:[%s7576_s21 + $0x3e08] sm:$0xff] }
 0x692   : > { %v2235_v58 = vld [vmem:[%s7576_s21 + $0x3e48] sm:$0xff] }
 0x696   : > { %6582 = vmatpush1.bf16.xpose.msra.mxu0 %v6581_v8  ;;  %v6597_v8 = vpack.c.bf16 %v1914_v1, %v1906_v0  ;;  %v1970_v0 = vld [vmem:[%s7576_s21 + $0x3600] sm:$0xff] }
 0x697   : > { %6584 = vmatprep.subr.bf16.mxu0 %v6583_v10  ;;  %v6599_v10 = vpack.c.bf16 %v1931_v17, %v1923_v5  ;;  %v1978_v1 = vld [vmem:[%s7576_s21 + $0x3640] sm:$0xff]  ;;  %v1987_v5 = vld [vmem:[%s7576_s21 + $0x3688] sm:$0xff] }
 0x698   : > { %6838 = vmatpush1.bf16.xpose.msra.mxu1 %v6837_v9  ;;  %v6853_v9 = vpack.c.bf16 %v2170_v4, %v2162_v2  ;;  %v2226_v2 = vld [vmem:[%s7576_s21 + $0x3e00] sm:$0xff]  ;;  %v1995_v17 = vld [vmem:[%s7576_s21 + $0x36c8] sm:$0xff] }
 0x699   : > { %6840 = vmatprep.subr.bf16.mxu1 %v6839_v11  ;;  %v6855_v11 = vpack.c.bf16 %v2187_v7, %v2179_v6  ;;  %v2234_v4 = vld [vmem:[%s7576_s21 + $0x3e40] sm:$0xff]  ;;  %v2243_v6 = vld [vmem:[%s7576_s21 + $0x3e88] sm:$0xff] }
 0x69a   : > { %v2251_v7 = vld [vmem:[%s7576_s21 + $0x3ec8] sm:$0xff] }
 0x69e   : > { %6586 = vmatpush1.bf16.xpose.msra.mxu0 %v6585_v28  ;;  %v6601_v28 = vpack.c.bf16 %v1930_v14, %v1922_v13  ;;  %v1986_v13 = vld [vmem:[%s7576_s21 + $0x3680] sm:$0xff] }
 0x69f   : > { %6588 = vmatprep.subr.bf16.mxu0 %v6587_v51  ;;  %v6603_v51 = vpack.c.bf16 %v1947_v21, %v1939_v20  ;;  %v1994_v14 = vld [vmem:[%s7576_s21 + $0x36c0] sm:$0xff]  ;;  %v2003_v20 = vld [vmem:[%s7576_s21 + $0x3708] sm:$0xff] }
 0x6a0   : > { %6842 = vmatpush1.bf16.xpose.msra.mxu1 %v6841_v48  ;;  %v6857_v48 = vpack.c.bf16 %v2186_v16, %v2178_v15  ;;  %v2242_v15 = vld [vmem:[%s7576_s21 + $0x3e80] sm:$0xff]  ;;  %v2011_v21 = vld [vmem:[%s7576_s21 + $0x3748] sm:$0xff] }
 0x6a1   : > { %6844 = vmatprep.subr.bf16.mxu1 %v6843_v57  ;;  %v6859_v57 = vpack.c.bf16 %v2203_v23, %v2195_v22  ;;  %v2250_v16 = vld [vmem:[%s7576_s21 + $0x3ec0] sm:$0xff]  ;;  %v2259_v22 = vld [vmem:[%s7576_s21 + $0x3f08] sm:$0xff] }
 0x6a2   : > { %v2267_v23 = vld [vmem:[%s7576_s21 + $0x3f48] sm:$0xff] }
 0x6a6   : > { %6590 = vmatpush1.bf16.xpose.msra.mxu0 %v6589_v42  ;;  %v6605_v42 = vpack.c.bf16 %v1946_v30, %v1938_v29  ;;  %v2002_v29 = vld [vmem:[%s7576_s21 + $0x3700] sm:$0xff] }
 0x6a7   : > { %6592 = vmatprep.subr.bf16.mxu0 %v6591_v45  ;;  %v6607_v45 = vpack.c.bf16 %v1963_v18, %v1955_v37  ;;  %v2010_v30 = vld [vmem:[%s7576_s21 + $0x3740] sm:$0xff]  ;;  %v2019_v37 = vld [vmem:[%s7576_s21 + $0x3788] sm:$0xff] }
 0x6a8   : > { %6846 = vmatpush1.bf16.xpose.msra.mxu1 %v6845_v44  ;;  %v6861_v44 = vpack.c.bf16 %v2202_v32, %v2194_v31  ;;  %v2258_v31 = vld [vmem:[%s7576_s21 + $0x3f00] sm:$0xff]  ;;  %v2027_v18 = vld [vmem:[%s7576_s21 + $0x37c8] sm:$0xff] }
 0x6a9   : > { %6848 = vmatprep.subr.bf16.mxu1 %v6847_v35  ;;  %v6863_v35 = vpack.c.bf16 %v2219_v41, %v2211_v40  ;;  %v2266_v32 = vld [vmem:[%s7576_s21 + $0x3f40] sm:$0xff]  ;;  %v2275_v40 = vld [vmem:[%s7576_s21 + $0x3f88] sm:$0xff] }
 0x6aa   : > { %v2283_v41 = vld [vmem:[%s7576_s21 + $0x3fc8] sm:$0xff] }
 0x6ae   : > { %6594 = vmatpush1.bf16.xpose.msra.mxu0 %v6593_v59  ;;  %v6609_v59 = vpack.c.bf16 %v1962_v3, %v1954_v46  ;;  %v2018_v46 = vld [vmem:[%s7576_s21 + $0x3780] sm:$0xff] }
 0x6af   : > { %6596 = vmatprep.subr.bf16.mxu0 %v6595_v61  ;;  %v6611_v61 = vpack.c.bf16 %v1979_v53, %v1971_v52  ;;  %v2026_v3 = vld [vmem:[%s7576_s21 + $0x37c0] sm:$0xff]  ;;  %v1781_v52 = vld [vmem:[%s7576_s21 + $0x3018] sm:$0xff] }
 0x6b0   : > { %6850 = vmatpush1.bf16.xpose.msra.mxu1 %v6849_v60  ;;  %v6865_v60 = vpack.c.bf16 %v2218_v50, %v2210_v49  ;;  %v2274_v49 = vld [vmem:[%s7576_s21 + $0x3f80] sm:$0xff]  ;;  %v1789_v53 = vld [vmem:[%s7576_s21 + $0x3058] sm:$0xff] }
 0x6b1   : > { %6852 = vmatprep.subr.bf16.mxu1 %v6851_v63  ;;  %v6867_v63 = vpack.c.bf16 %v2235_v58, %v2227_v56  ;;  %v2282_v50 = vld [vmem:[%s7576_s21 + $0x3fc0] sm:$0xff]  ;;  %v2037_v56 = vld [vmem:[%s7576_s21 + $0x3818] sm:$0xff] }
 0x6b2   : > { %v2045_v58 = vld [vmem:[%s7576_s21 + $0x3858] sm:$0xff] }
 0x6b6   : > { %6598 = vmatpush1.bf16.xpose.msra.mxu0 %v6597_v8  ;;  %v6613_v8 = vpack.c.bf16 %v1978_v1, %v1970_v0  ;;  %v1780_v0 = vld [vmem:[%s7576_s21 + $0x3010] sm:$0xff] }
 0x6b7   : > { %6600 = vmatprep.subr.bf16.mxu0 %v6599_v10  ;;  %v6615_v10 = vpack.c.bf16 %v1995_v17, %v1987_v5  ;;  %v1788_v1 = vld [vmem:[%s7576_s21 + $0x3050] sm:$0xff]  ;;  %v1797_v5 = vld [vmem:[%s7576_s21 + $0x3098] sm:$0xff] }
 0x6b8   : > { %6854 = vmatpush1.bf16.xpose.msra.mxu1 %v6853_v9  ;;  %v6869_v9 = vpack.c.bf16 %v2234_v4, %v2226_v2  ;;  %v2036_v2 = vld [vmem:[%s7576_s21 + $0x3810] sm:$0xff]  ;;  %v1805_v17 = vld [vmem:[%s7576_s21 + $0x30d8] sm:$0xff] }
 0x6b9   : > { %6856 = vmatprep.subr.bf16.mxu1 %v6855_v11  ;;  %v6871_v11 = vpack.c.bf16 %v2251_v7, %v2243_v6  ;;  %v2044_v4 = vld [vmem:[%s7576_s21 + $0x3850] sm:$0xff]  ;;  %v2053_v6 = vld [vmem:[%s7576_s21 + $0x3898] sm:$0xff] }
 0x6ba   : > { %v2061_v7 = vld [vmem:[%s7576_s21 + $0x38d8] sm:$0xff] }
 0x6be   : > { %6602 = vmatpush1.bf16.xpose.msra.mxu0 %v6601_v28  ;;  %v6617_v28 = vpack.c.bf16 %v1994_v14, %v1986_v13  ;;  %v1796_v13 = vld [vmem:[%s7576_s21 + $0x3090] sm:$0xff] }
 0x6bf   : > { %6604 = vmatprep.subr.bf16.mxu0 %v6603_v51  ;;  %v6619_v51 = vpack.c.bf16 %v2011_v21, %v2003_v20  ;;  %v1804_v14 = vld [vmem:[%s7576_s21 + $0x30d0] sm:$0xff]  ;;  %v1813_v20 = vld [vmem:[%s7576_s21 + $0x3118] sm:$0xff] }
 0x6c0   : > { %6858 = vmatpush1.bf16.xpose.msra.mxu1 %v6857_v48  ;;  %v6873_v48 = vpack.c.bf16 %v2250_v16, %v2242_v15  ;;  %v2052_v15 = vld [vmem:[%s7576_s21 + $0x3890] sm:$0xff]  ;;  %v1821_v21 = vld [vmem:[%s7576_s21 + $0x3158] sm:$0xff] }
 0x6c1   : > { %6860 = vmatprep.subr.bf16.mxu1 %v6859_v57  ;;  %v6875_v57 = vpack.c.bf16 %v2267_v23, %v2259_v22  ;;  %v2060_v16 = vld [vmem:[%s7576_s21 + $0x38d0] sm:$0xff]  ;;  %v2069_v22 = vld [vmem:[%s7576_s21 + $0x3918] sm:$0xff] }
 0x6c2   : > { %v2077_v23 = vld [vmem:[%s7576_s21 + $0x3958] sm:$0xff] }
 0x6c6   : > { %6606 = vmatpush1.bf16.xpose.msra.mxu0 %v6605_v42  ;;  %v6621_v42 = vpack.c.bf16 %v2010_v30, %v2002_v29  ;;  %v1820_v29 = vld [vmem:[%s7576_s21 + $0x3150] sm:$0xff] }
 0x6c7   : > { %6608 = vmatprep.subr.bf16.mxu0 %v6607_v45  ;;  %v6623_v45 = vpack.c.bf16 %v2027_v18, %v2019_v37  ;;  %v2068_v30 = vld [vmem:[%s7576_s21 + $0x3910] sm:$0xff]  ;;  %v2085_v37 = vld [vmem:[%s7576_s21 + $0x3998] sm:$0xff] }
 0x6c8   : > { %6862 = vmatpush1.bf16.xpose.msra.mxu1 %v6861_v44  ;;  %v6877_v44 = vpack.c.bf16 %v2266_v32, %v2258_v31  ;;  %v2076_v31 = vld [vmem:[%s7576_s21 + $0x3950] sm:$0xff]  ;;  %v1829_v32 = vld [vmem:[%s7576_s21 + $0x3198] sm:$0xff] }
 0x6c9   : > { %6864 = vmatprep.subr.bf16.mxu1 %v6863_v35  ;;  %v6879_v35 = vpack.c.bf16 %v2283_v41, %v2275_v40  ;;  %v2093_v18 = vld [vmem:[%s7576_s21 + $0x39d8] sm:$0xff]  ;;  %v6893_v41 = vpack.c.bf16 %v2076_v31, %v2068_v30 }
 0x6ca   : > { %v1893_v30 = vld [vmem:[%s7576_s21 + $0x3398] sm:$0xff] }
 0x6cb   : > { %v1901_v31 = vld [vmem:[%s7576_s21 + $0x33d8] sm:$0xff] }
 0x6ce   : > { %6610 = vmatpush1.bf16.xpose.msra.mxu0 %v6609_v59  ;;  %v6625_v59 = vpack.c.bf16 %v2026_v3, %v2018_v46  ;;  %v2084_v46 = vld [vmem:[%s7576_s21 + $0x3990] sm:$0xff] }
 0x6cf   : > { %6612 = vmatprep.subr.bf16.mxu0 %v6611_v61  ;;  %v6627_v61 = vpack.c.bf16 %v1789_v53, %v1781_v52  ;;  %v2092_v3 = vld [vmem:[%s7576_s21 + $0x39d0] sm:$0xff]  ;;  %v2101_v52 = vld [vmem:[%s7576_s21 + $0x3a18] sm:$0xff] }
 0x6d0   : > { %6866 = vmatpush1.bf16.xpose.msra.mxu1 %v6865_v60  ;;  %v6881_v60 = vpack.c.bf16 %v2282_v50, %v2274_v49  ;;  %v1845_v49 = vld [vmem:[%s7576_s21 + $0x3218] sm:$0xff] }
 0x6d1   : > { %6868 = vmatprep.subr.bf16.mxu1 %v6867_v63  ;;  %v6883_v63 = vpack.c.bf16 %v2045_v58, %v2037_v56  ;;  %v1853_v50 = vld [vmem:[%s7576_s21 + $0x3258] sm:$0xff]  ;;  %v6897_v58 = vpack.c.bf16 %v2092_v3, %v2084_v46 }
 0x6d2   : > { %v2109_v53 = vld [vmem:[%s7576_s21 + $0x3a58] sm:$0xff] }
 0x6d3   : > { %v1909_v46 = vld [vmem:[%s7576_s21 + $0x3418] sm:$0xff] }
 0x6d4   : > { %v1917_v3 = vld [vmem:[%s7576_s21 + $0x3458] sm:$0xff] }
 0x6d6   : > { %6614 = vmatpush1.bf16.xpose.msra.mxu0 %v6613_v8  ;;  %v6629_v8 = vpack.c.bf16 %v1788_v1, %v1780_v0  ;;  %v2100_v0 = vld [vmem:[%s7576_s21 + $0x3a10] sm:$0xff] }
 0x6d7   : > { %6616 = vmatprep.subr.bf16.mxu0 %v6615_v10  ;;  %v6631_v10 = vpack.c.bf16 %v1805_v17, %v1797_v5  ;;  %v2108_v1 = vld [vmem:[%s7576_s21 + $0x3a50] sm:$0xff]  ;;  %v2117_v5 = vld [vmem:[%s7576_s21 + $0x3a98] sm:$0xff] }
 0x6d8   : > { %6870 = vmatpush1.bf16.xpose.msra.mxu1 %v6869_v9  ;;  %v6885_v9 = vpack.c.bf16 %v2044_v4, %v2036_v2  ;;  %v1861_v2 = vld [vmem:[%s7576_s21 + $0x3298] sm:$0xff] }
 0x6d9   : > { %6872 = vmatprep.subr.bf16.mxu1 %v6871_v11  ;;  %v6887_v11 = vpack.c.bf16 %v2061_v7, %v2053_v6  ;;  %v1869_v4 = vld [vmem:[%s7576_s21 + $0x32d8] sm:$0xff]  ;;  %v6901_v7 = vpack.c.bf16 %v2108_v1, %v2100_v0 }
 0x6da   : > { %v2125_v17 = vld [vmem:[%s7576_s21 + $0x3ad8] sm:$0xff] }
 0x6db   : > { %v1925_v0 = vld [vmem:[%s7576_s21 + $0x3498] sm:$0xff] }
 0x6dc   : > { %v1933_v1 = vld [vmem:[%s7576_s21 + $0x34d8] sm:$0xff] }
 0x6de   : > { %6618 = vmatpush1.bf16.xpose.msra.mxu0 %v6617_v28  ;;  %v6889_v28 = vpack.c.bf16 %v2060_v16, %v2052_v15  ;;  %v1877_v15 = vld [vmem:[%s7576_s21 + $0x3318] sm:$0xff] }
 0x6df   : > { %6620 = vmatprep.subr.bf16.mxu0 %v6619_v51  ;;  %v6891_v51 = vpack.c.bf16 %v2077_v23, %v2069_v22  ;;  %v1885_v16 = vld [vmem:[%s7576_s21 + $0x3358] sm:$0xff] }
 0x6e0   : > { %6874 = vmatpush1.bf16.xpose.msra.mxu1 %v6873_v48  ;;  %v6635_v48 = vpack.c.bf16 %v1821_v21, %v1813_v20  ;;  %v2133_v20 = vld [vmem:[%s7576_s21 + $0x3b18] sm:$0xff] }
 0x6e1   : > { %6876 = vmatprep.subr.bf16.mxu1 %v6875_v57  ;;  %v1812_v57 = vld [vmem:[%s7576_s21 + $0x3110] sm:$0xff]  ;;  %v2141_v21 = vld [vmem:[%s7576_s21 + $0x3b58] sm:$0xff] }
 0x6e2   : > { %v6637_v40 = vpack.c.bf16 %v1820_v29, %v1812_v57  ;;  %v2132_v57 = vld [vmem:[%s7576_s21 + $0x3b10] sm:$0xff] }
 0x6e3   : > { %v2140_v29 = vld [vmem:[%s7576_s21 + $0x3b50] sm:$0xff] }
 0x6e6   : > { %6622 = vmatpush1.bf16.xpose.msra.mxu0 %v6621_v42 }
 0x6e7   : > { %6624 = vmatprep.subr.bf16.mxu0 %v6623_v45  ;;  %v1828_v45 = vld [vmem:[%s7576_s21 + $0x3190] sm:$0xff] }
 0x6e8   : > { %6878 = vmatpush1.bf16.xpose.msra.mxu1 %v6877_v44  ;;  %v6895_v44 = vpack.c.bf16 %v2093_v18, %v2085_v37  ;;  %v6909_v18 = vpack.c.bf16 %v2140_v29, %v2132_v57  ;;  %v1957_v57 = vld [vmem:[%s7576_s21 + $0x3598] sm:$0xff] }
 0x6e9   : > { %6880 = vmatprep.subr.bf16.mxu1 %v6879_v35  ;;  %v1836_v35 = vld [vmem:[%s7576_s21 + $0x31d0] sm:$0xff]  ;;  %v1965_v29 = vld [vmem:[%s7576_s21 + $0x35d8] sm:$0xff] }
 0x6ea   : > { %v6641_v56 = vpack.c.bf16 %v1836_v35, %v1828_v45  ;;  %v2148_v45 = vld [vmem:[%s7576_s21 + $0x3b90] sm:$0xff] }
 0x6eb   : > { %v2156_v35 = vld [vmem:[%s7576_s21 + $0x3bd0] sm:$0xff] }
 0x6ee   : > { %6626 = vmatpush1.bf16.xpose.msra.mxu0 %v6625_v59  ;;  %v6643_v59 = vpack.c.bf16 %v1853_v50, %v1845_v49  ;;  %v2165_v49 = vld [vmem:[%s7576_s21 + $0x3c18] sm:$0xff] }
 0x6ef   : > { %6628 = vmatprep.subr.bf16.mxu0 %v6627_v61  ;;  %v1844_v61 = vld [vmem:[%s7576_s21 + $0x3210] sm:$0xff]  ;;  %v2173_v50 = vld [vmem:[%s7576_s21 + $0x3c58] sm:$0xff] }
 0x6f0   : > { %6882 = vmatpush1.bf16.xpose.msra.mxu1 %v6881_v60  ;;  %v6899_v60 = vpack.c.bf16 %v2109_v53, %v2101_v52  ;;  %v6913_v53 = vpack.c.bf16 %v2156_v35, %v2148_v45  ;;  %v1956_v35 = vld [vmem:[%s7576_s21 + $0x3590] sm:$0xff] }
 0x6f1   : > { %6884 = vmatprep.subr.bf16.mxu1 %v6883_v63  ;;  %v1852_v63 = vld [vmem:[%s7576_s21 + $0x3250] sm:$0xff] }
 0x6f2   : > { %v6645_v6 = vpack.c.bf16 %v1852_v63, %v1844_v61  ;;  %v2164_v61 = vld [vmem:[%s7576_s21 + $0x3c10] sm:$0xff] }
 0x6f3   : > { %v2172_v63 = vld [vmem:[%s7576_s21 + $0x3c50] sm:$0xff] }
 0x6f5   : > { %4184 = vmatmul.mubr.f32.vlgmr.msra.gmra.mrb[6].mxu0 %v7741_v27 }
 0x6f6   : > { %6630 = vmatpush1.bf16.xpose.msra.mxu0 %v6629_v8  ;;  %4254 = vmatprep.mubr.f32.mxu0 %v7747_v34  ;;  %v6647_v8 = vpack.c.bf16 %v1869_v4, %v1861_v2  ;;  %v2181_v2 = vld [vmem:[%s7576_s21 + $0x3c98] sm:$0xff] }
 0x6f7   : > { %4468 = vmatmul.mubr.f32.vlgmr.msra.gmra.mrb[6].mxu1 %v7741_v27  ;;  %6632 = vmatprep.subr.bf16.mxu0 %v6631_v10  ;;  %v6633_v27 = vpack.c.bf16 %v1804_v14, %v1796_v13  ;;  %v1860_v10 = vld [vmem:[%s7576_s21 + $0x3290] sm:$0xff]  ;;  %v2189_v4 = vld [vmem:[%s7576_s21 + $0x3cd8] sm:$0xff] }
 0x6f8   : > { %6886 = vmatpush1.bf16.xpose.msra.mxu1 %v6885_v9  ;;  %4538 = vmatprep.mubr.f32.mxu1 %v7747_v34  ;;  %v1837_v34 = vld [vmem:[%s7576_s21 + $0x31d8] sm:$0xff]  ;;  %v6903_v9 = vpack.c.bf16 %v2125_v17, %v2117_v5  ;;  %v2116_v13 = vld [vmem:[%s7576_s21 + $0x3a90] sm:$0xff]  ;;  %v6917_v17 = vpack.c.bf16 %v2172_v63, %v2164_v61 }
 0x6f9   : > { %6888 = vmatprep.subr.bf16.mxu1 %v6887_v11  ;;  %v6639_v42 = vpack.c.bf16 %v1837_v34, %v1829_v32  ;;  %v1868_v11 = vld [vmem:[%s7576_s21 + $0x32d0] sm:$0xff]  ;;  %v2149_v32 = vld [vmem:[%s7576_s21 + $0x3b98] sm:$0xff] }
 0x6fa   : > { %v2124_v14 = vld [vmem:[%s7576_s21 + $0x3ad0] sm:$0xff]  ;;  %v6649_v22 = vpack.c.bf16 %v1868_v11, %v1860_v10  ;;  %v2157_v34 = vld [vmem:[%s7576_s21 + $0x3bd8] sm:$0xff] }
 0x6fb   : > { %v6905_v23 = vpack.c.bf16 %v2124_v14, %v2116_v13  ;;  %v2180_v10 = vld [vmem:[%s7576_s21 + $0x3c90] sm:$0xff]  ;;  %v1941_v13 = vld [vmem:[%s7576_s21 + $0x3518] sm:$0xff] }
 0x6fc   : > { %v2188_v11 = vld [vmem:[%s7576_s21 + $0x3cd0] sm:$0xff]  ;;  %v1949_v14 = vld [vmem:[%s7576_s21 + $0x3558] sm:$0xff] }
 0x6fe   : > { %6634 = vmatpush1.bf16.xpose.msra.mxu0 %v6633_v27  ;;  %v6651_v27 = vpack.c.bf16 %v1885_v16, %v1877_v15  ;;  %v2197_v15 = vld [vmem:[%s7576_s21 + $0x3d18] sm:$0xff] }
 0x6ff   : > { %6636 = vmatprep.subr.bf16.mxu0 %v6635_v48  ;;  %v1876_v48 = vld [vmem:[%s7576_s21 + $0x3310] sm:$0xff]  ;;  %v2205_v16 = vld [vmem:[%s7576_s21 + $0x3d58] sm:$0xff] }
 0x700   : > { %6890 = vmatpush1.bf16.xpose.msra.mxu1 %v6889_v28  ;;  %v6907_v28 = vpack.c.bf16 %v2141_v21, %v2133_v20  ;;  %v6921_v21 = vpack.c.bf16 %v2188_v11, %v2180_v10 }
 0x701   : > { %6892 = vmatprep.subr.bf16.mxu1 %v6891_v51  ;;  %v1884_v51 = vld [vmem:[%s7576_s21 + $0x3350] sm:$0xff] }
 0x702   : > { %v6653_v37 = vpack.c.bf16 %v1884_v51, %v1876_v48  ;;  %v2196_v48 = vld [vmem:[%s7576_s21 + $0x3d10] sm:$0xff] }
 0x703   : > { %v2204_v51 = vld [vmem:[%s7576_s21 + $0x3d50] sm:$0xff] }
 0x706   : > { %6638 = vmatpush1.bf16.xpose.msra.mxu0 %v6637_v40  ;;  %v6655_v40 = vpack.c.bf16 %v1901_v31, %v1893_v30  ;;  %v2213_v30 = vld [vmem:[%s7576_s21 + $0x3d98] sm:$0xff] }
 0x707   : > { %6640 = vmatprep.subr.bf16.mxu0 %v6639_v42  ;;  %v1892_v42 = vld [vmem:[%s7576_s21 + $0x3390] sm:$0xff]  ;;  %v2221_v31 = vld [vmem:[%s7576_s21 + $0x3dd8] sm:$0xff] }
 0x708   : > { %6894 = vmatpush1.bf16.xpose.msra.mxu1 %v6893_v41  ;;  %v6911_v41 = vpack.c.bf16 %v2157_v34, %v2149_v32  ;;  %v2291_v34 = vld [vmem:[%s8401_s4 + $0x8] sm:$0xff] }
 0x709   : > { %6896 = vmatprep.subr.bf16.mxu1 %v6895_v44  ;;  %v1900_v44 = vld [vmem:[%s7576_s21 + $0x33d0] sm:$0xff]  ;;  %v2382_v45 = vrot.slane %v2291_v34, %v7737_v26 }
 0x70a   : > { %v6657_v52 = vpack.c.bf16 %v1900_v44, %v1892_v42  ;;  %v2378_v42 = vrot.slane %v2291_v34, %v7874_v47  ;;  %v2374_v44 = vrot.slane %v2291_v34, %v7637_v12  ;;  %v2229_v47 = vld [vmem:[%s7576_s21 + $0x3e18] sm:$0xff] }
 0x70e   : > { %6642 = vmatpush1.bf16.xpose.msra.mxu0 %v6641_v56  ;;  %v6659_v56 = vpack.c.bf16 %v1917_v3, %v1909_v46  ;;  %v1964_v46 = vld [vmem:[%s7576_s21 + $0x35d0] sm:$0xff] }
 0x70f   : > { %6644 = vmatprep.subr.bf16.mxu0 %v6643_v59  ;;  %v1908_v59 = vld [vmem:[%s7576_s21 + $0x3410] sm:$0xff]  ;;  %v6673_v63 = vpack.c.bf16 %v1964_v46, %v1956_v35 }
 0x710   : > { %6898 = vmatpush1.bf16.xpose.msra.mxu1 %v6897_v58  ;;  %v6915_v58 = vpack.c.bf16 %v2173_v50, %v2165_v49  ;;  %v2212_v3 = vld [vmem:[%s7576_s21 + $0x3d90] sm:$0xff] }
 0x711   : > { %6900 = vmatprep.subr.bf16.mxu1 %v6899_v60  ;;  %v1916_v60 = vld [vmem:[%s7576_s21 + $0x3450] sm:$0xff] }
 0x712   : > { %v6661_v5 = vpack.c.bf16 %v1916_v60, %v1908_v59  ;;  %v2220_v50 = vld [vmem:[%s7576_s21 + $0x3dd0] sm:$0xff]  ;;  %v2237_v59 = vld [vmem:[%s7576_s21 + $0x3e58] sm:$0xff] }
 0x713   : > { %v1988_v35 = vld [vmem:[%s7576_s21 + $0x3690] sm:$0xff] }
 0x714   : > { %v1996_v46 = vld [vmem:[%s7576_s21 + $0x36d0] sm:$0xff] }
 0x716   : > { %6646 = vmatpush1.bf16.xpose.msra.mxu0 %v6645_v6  ;;  %v6663_v6 = vpack.c.bf16 %v1933_v1, %v1925_v0  ;;  %v6929_v1 = vpack.c.bf16 %v2220_v50, %v2212_v3  ;;  %v2244_v3 = vld [vmem:[%s7576_s21 + $0x3e90] sm:$0xff] }
 0x717   : > { %6648 = vmatprep.subr.bf16.mxu0 %v6647_v8  ;;  %v1924_v8 = vld [vmem:[%s7576_s21 + $0x3490] sm:$0xff] }
 0x718   : > { %6902 = vmatpush1.bf16.xpose.msra.mxu1 %v6901_v7  ;;  %v6919_v7 = vpack.c.bf16 %v2189_v4, %v2181_v2  ;;  %v2252_v50 = vld [vmem:[%s7576_s21 + $0x3ed0] sm:$0xff] }
 0x719   : > { %6904 = vmatprep.subr.bf16.mxu1 %v6903_v9  ;;  %v1932_v9 = vld [vmem:[%s7576_s21 + $0x34d0] sm:$0xff] }
 0x71a   : > { %v6665_v20 = vpack.c.bf16 %v1932_v9, %v1924_v8 }
 0x71e   : > { %6650 = vmatpush1.bf16.xpose.msra.mxu0 %v6649_v22  ;;  %v6667_v22 = vpack.c.bf16 %v1949_v14, %v1941_v13  ;;  %v1972_v13 = vld [vmem:[%s7576_s21 + $0x3610] sm:$0xff] }
 0x71f   : > { %6652 = vmatprep.subr.bf16.mxu0 %v6651_v27  ;;  %v1940_v27 = vld [vmem:[%s7576_s21 + $0x3510] sm:$0xff] }
 0x720   : > { %6906 = vmatpush1.bf16.xpose.msra.mxu1 %v6905_v23  ;;  %v6923_v23 = vpack.c.bf16 %v2205_v16, %v2197_v15  ;;  %v1980_v14 = vld [vmem:[%s7576_s21 + $0x3650] sm:$0xff] }
 0x721   : > { %6908 = vmatprep.subr.bf16.mxu1 %v6907_v28  ;;  %v1948_v28 = vld [vmem:[%s7576_s21 + $0x3550] sm:$0xff] }
 0x722   : > { %v6669_v32 = vpack.c.bf16 %v1948_v28, %v1940_v27  ;;  %v2228_v15 = vld [vmem:[%s7576_s21 + $0x3e10] sm:$0xff] }
 0x726   : > { %6654 = vmatpush1.bf16.xpose.msra.mxu0 %v6653_v37  ;;  %v6925_v37 = vpack.c.bf16 %v2204_v51, %v2196_v48  ;;  %v2245_v48 = vld [vmem:[%s7576_s21 + $0x3e98] sm:$0xff] }
 0x727   : > { %6656 = vmatprep.subr.bf16.mxu0 %v6655_v40  ;;  %v6927_v40 = vpack.c.bf16 %v2221_v31, %v2213_v30  ;;  %v2253_v51 = vld [vmem:[%s7576_s21 + $0x3ed8] sm:$0xff]  ;;  %v6677_v30 = vpack.c.bf16 %v1980_v14, %v1972_v13  ;;  %v2276_v13 = vld [vmem:[%s7576_s21 + $0x3f90] sm:$0xff] }
 0x728   : > { %6910 = vmatpush1.bf16.xpose.msra.mxu1 %v6909_v18  ;;  %v6671_v18 = vpack.c.bf16 %v1965_v29, %v1957_v57  ;;  %v2284_v14 = vld [vmem:[%s7576_s21 + $0x3fd0] sm:$0xff] }
 0x729   : > { %6912 = vmatprep.subr.bf16.mxu1 %v6911_v41  ;;  %v2370_v41 = vrot.slane %v2291_v34, %v7728_v19 }
 0x72e   : > { %6658 = vmatpush1.bf16.xpose.msra.mxu0 %v6657_v52  ;;  %v1973_v52 = vld [vmem:[%s7576_s21 + $0x3618] sm:$0xff] }
 0x72f   : > { %6660 = vmatprep.subr.bf16.mxu0 %v6659_v56 }
 0x730   : > { %6914 = vmatpush1.bf16.xpose.msra.mxu1 %v6913_v53  ;;  %v1981_v53 = vld [vmem:[%s7576_s21 + $0x3658] sm:$0xff] }
 0x731   : > { %6916 = vmatprep.subr.bf16.mxu1 %v6915_v58  ;;  %v6675_v2 = vpack.c.bf16 %v1981_v53, %v1973_v52  ;;  %v2005_v52 = vld [vmem:[%s7576_s21 + $0x3718] sm:$0xff] }
 0x732   : > { %v2013_v53 = vld [vmem:[%s7576_s21 + $0x3758] sm:$0xff] }
 0x736   : > { %6662 = vmatpush1.bf16.xpose.msra.mxu0 %v6661_v5 }
 0x737   : > { %6664 = vmatprep.subr.bf16.mxu0 %v6663_v6 }
 0x738   : > { %6918 = vmatpush1.bf16.xpose.msra.mxu1 %v6917_v17  ;;  %v6931_v17 = vpack.c.bf16 %v2237_v59, %v2229_v47  ;;  %v6681_v47 = vpack.c.bf16 %v1996_v46, %v1988_v35  ;;  %v2062_v35 = vld [vmem:[%s7576_s21 + $0x38e0] sm:$0xff]  ;;  %v1815_v46 = vld [vmem:[%s7576_s21 + $0x3128] sm:$0xff] }
 0x739   : > { %6920 = vmatprep.subr.bf16.mxu1 %v6919_v7 }
 0x73e   : > { %6666 = vmatpush1.bf16.xpose.msra.mxu0 %v6665_v20 }
 0x73f   : > { %6668 = vmatprep.subr.bf16.mxu0 %v6667_v22  ;;  %v1989_v22 = vld [vmem:[%s7576_s21 + $0x3698] sm:$0xff] }
 0x740   : > { %6922 = vmatpush1.bf16.xpose.msra.mxu1 %v6921_v21  ;;  %v2236_v21 = vld [vmem:[%s7576_s21 + $0x3e50] sm:$0xff] }
 0x741   : > { %6924 = vmatprep.subr.bf16.mxu1 %v6923_v23  ;;  %v1997_v23 = vld [vmem:[%s7576_s21 + $0x36d8] sm:$0xff]  ;;  %v6933_v34 = vpack.c.bf16 %v2236_v21, %v2228_v15  ;;  %v1783_v15 = vld [vmem:[%s7576_s21 + $0x3028] sm:$0xff] }
 0x742   : > { %v2047_v21 = vld [vmem:[%s7576_s21 + $0x3868] sm:$0xff] }
 0x746   : > { %6670 = vmatpush1.bf16.xpose.msra.mxu0 %v6669_v32 }
 0x747   : > { %6672 = vmatprep.subr.bf16.mxu0 %v6671_v18 }
 0x748   : > { %6926 = vmatpush1.bf16.xpose.msra.mxu1 %v6925_v37  ;;  %v3830_v49 = vpop.f32.mrb[4].mxu0  ;;  %v6679_v37 = vpack.c.bf16 %v1997_v23, %v1989_v22  ;;  %v6945_v23 = vpack.c.bf16 %v2284_v14, %v2276_v13  ;;  %v2111_v13 = vld [vmem:[%s7576_s21 + $0x3a68] sm:$0xff] }
 0x749   : > { %6928 = vmatprep.subr.bf16.mxu1 %v6927_v40  ;;  %v7083_v19 = vadd.f32 %v3830_v49, %v2370_v41  ;;  %v3832_v58 = vpop.f32.mrb[5].mxu0  ;;  %v6935_v41 = vpack.c.bf16 %v2253_v51, %v2245_v48  ;;  %v1782_v48 = vld [vmem:[%s7576_s21 + $0x3020] sm:$0xff] }
 0x74a   : > { %v4114_v56 = vpop.f32.mrb[4].mxu1  ;;  %v7084_v12 = vadd.f32 %v3832_v58, %v2374_v44  ;;  %v2269_v58 = vld [vmem:[%s7576_s21 + $0x3f58] sm:$0xff]  ;;  %v1790_v51 = vld [vmem:[%s7576_s21 + $0x3060] sm:$0xff] }
 0x74b   : > { %v7085_v60 = vadd.f32 %v4114_v56, %v2378_v42  ;;  %v4116_v61 = vpop.f32.mrb[5].mxu1  ;;  %v4695_v0 = vadd.f32 3.0, %v7083_v19  ;;  %v2261_v56 = vld [vmem:[%s7576_s21 + $0x3f18] sm:$0xff] }
 0x74c   : > { %v7086_v26 = vadd.f32 %v4116_v61, %v2382_v45  ;;  %v4696_v5 = vadd.f32 3.0, %v7084_v12  ;;  %v6939_v61 = vpack.c.bf16 %v2269_v58, %v2261_v56 }
 0x74d   : > { %v4697_v4 = vadd.f32 3.0, %v7085_v60  ;;  %v4711_v6 = vmax.f32 %v4695_v0, 0.0  ;;  %v2012_v0 = vld [vmem:[%s7576_s21 + $0x3750] sm:$0xff] }
 0x74e   : > { %v4698_v7 = vadd.f32 3.0, %v7086_v26  ;;  %v4712_v9 = vmax.f32 %v4696_v5, 0.0  ;;  %6674 = vmatpush1.bf16.xpose.msra.mxu0 %v6673_v63  ;;  %v2004_v63 = vld [vmem:[%s7576_s21 + $0x3710] sm:$0xff]  ;;  %v2277_v5 = vld [vmem:[%s7576_s21 + $0x3f98] sm:$0xff] }
 0x74f   : > { %v4713_v8 = vmax.f32 %v4697_v4, 0.0  ;;  %v4727_v10 = vmin.f32 %v4711_v6, 6.0  ;;  %6676 = vmatprep.subr.bf16.mxu0 %v6675_v2  ;;  %v2021_v2 = vld [vmem:[%s7576_s21 + $0x3798] sm:$0xff]  ;;  %v6685_v6 = vpack.c.bf16 %v2012_v0, %v2004_v63  ;;  %v1831_v63 = vld [vmem:[%s7576_s21 + $0x31a8] sm:$0xff] }
 0x750   : > { %v4714_v11 = vmax.f32 %v4698_v7, 0.0  ;;  %6930 = vmatpush1.bf16.xpose.msra.mxu1 %v6929_v1  ;;  %v4728_v20 = vmin.f32 %v4712_v9, 6.0  ;;  %v2268_v1 = vld [vmem:[%s7576_s21 + $0x3f50] sm:$0xff]  ;;  %v2029_v4 = vld [vmem:[%s7576_s21 + $0x37d8] sm:$0xff]  ;;  %v2087_v0 = vld [vmem:[%s7576_s21 + $0x39a8] sm:$0xff] }
 0x751   : > { %v4729_v16 = vmin.f32 %v4713_v8, 6.0  ;;  %6932 = vmatprep.subr.bf16.mxu1 %v6931_v17  ;;  %v4743_v27 = vmul.f32 %v7083_v19, %v4727_v10  ;;  %v2285_v17 = vld [vmem:[%s7576_s21 + $0x3fd8] sm:$0xff]  ;;  %v6687_v8 = vpack.c.bf16 %v2029_v4, %v2021_v2  ;;  %v2020_v10 = vld [vmem:[%s7576_s21 + $0x3790] sm:$0xff] }
 0x752   : > { %v4730_v28 = vmin.f32 %v4714_v11, 6.0  ;;  %v4744_v29 = vmul.f32 %v7084_v12, %v4728_v20  ;;  %v6683_v12 = vpack.c.bf16 %v2013_v53, %v2005_v52  ;;  %v6943_v9 = vpack.c.bf16 %v2285_v17, %v2277_v5  ;;  %v2028_v11 = vld [vmem:[%s7576_s21 + $0x37d0] sm:$0xff]  ;;  %v2039_v20 = vld [vmem:[%s7576_s21 + $0x3828] sm:$0xff]  ;;  %v1830_v17 = vld [vmem:[%s7576_s21 + $0x31a0] sm:$0xff] }
 0x753   : > { %v4745_v57 = vmul.f32 %v7085_v60, %v4729_v16  ;;  %v4759_v31 = vmul.f32 0.16666667, %v4743_v27  ;;  %v6937_v60 = vpack.c.bf16 %v2252_v50, %v2244_v3  ;;  %v1791_v16 = vld [vmem:[%s7576_s21 + $0x3068] sm:$0xff]  ;;  %v6689_v22 = vpack.c.bf16 %v2028_v11, %v2020_v10 }
 0x754   : > { %v4746_v32 = vmul.f32 %v7086_v26, %v4730_v28  ;;  %v4760_v40 = vmul.f32 0.16666667, %v4744_v29  ;;  %v2260_v26 = vld [vmem:[%s7576_s21 + $0x3f10] sm:$0xff]  ;;  %v6691_v27 = vpack.c.bf16 %v1791_v16, %v1783_v15  ;;  %v6947_v28 = vpack.c.bf16 %v2047_v21, %v2039_v20  ;;  %v2046_v29 = vld [vmem:[%s7576_s21 + $0x3860] sm:$0xff]  ;;  %v1823_v3 = vld [vmem:[%s7576_s21 + $0x3168] sm:$0xff] }
 0x755   : > { %v4761_v18 = vmul.f32 0.16666667, %v4745_v57  ;;  %v6941_v7 = vpack.c.bf16 %v2268_v1, %v2260_v26  ;;  %v2038_v57 = vld [vmem:[%s7576_s21 + $0x3820] sm:$0xff]  ;;  %v2071_v50 = vld [vmem:[%s7576_s21 + $0x3928] sm:$0xff]  ;;  %v6699_v56 = vpack.c.bf16 %v1823_v3, %v1815_v46 }
 0x756   : > { %v4762_v42 = vmul.f32 0.16666667, %v4746_v32  ;;  %v4832_v44 = vcombine.low %v4759_v31, %v4760_v40  ;;  %6678 = vmatpush1.bf16.xpose.msra.mxu0 %v6677_v30  ;;  %v1799_v30 = vld [vmem:[%s7576_s21 + $0x30a8] sm:$0xff]  ;;  %v1846_v21 = vld [vmem:[%s7576_s21 + $0x3220] sm:$0xff] }
 0x757   : > { %6680 = vmatprep.subr.bf16.mxu0 %v6679_v37  ;;  %v1807_v31 = vld [vmem:[%s7576_s21 + $0x30e8] sm:$0xff]  ;;  %v6693_v37 = vpack.c.bf16 %v1790_v51, %v1782_v48 }
 0x758   : > { %v4833_v45 = vcombine.low %v4761_v18, %v4762_v42  ;;  %6934 = vmatpush1.bf16.xpose.msra.mxu1 %v6933_v34  ;;  %v9517_v49 = vrot.slane %v4832_v44, %v8425_v39  ;;  %v2055_v32 = vld [vmem:[%s7576_s21 + $0x38a8] sm:$0xff]  ;;  %v6949_v18 = vpack.c.bf16 %v2046_v29, %v2038_v57  ;;  %v6695_v40 = vpack.c.bf16 %v1807_v31, %v1799_v30  ;;  %v1798_v42 = vld [vmem:[%s7576_s21 + $0x30a0] sm:$0xff] }
 0x759   : > { %6936 = vmatprep.subr.bf16.mxu1 %v6935_v41  ;;  %v2063_v34 = vld [vmem:[%s7576_s21 + $0x38e8] sm:$0xff]  ;;  %v1806_v44 = vld [vmem:[%s7576_s21 + $0x30e0] sm:$0xff] }
 0x75a   : > { %v9523_v19 = vrot.slane %v4833_v45, %v8425_v39  ;;  %v6951_v41 = vpack.c.bf16 %v2063_v34, %v2055_v32  ;;  %v2054_v45 = vld [vmem:[%s7576_s21 + $0x38a0] sm:$0xff]  ;;  %v2079_v52 = vld [vmem:[%s7576_s21 + $0x3968] sm:$0xff] }
 0x75b   : > { %v6953_v53 = vpack.c.bf16 %v2062_v35, %v2054_v45  ;;  %v6955_v58 = vpack.c.bf16 %v2079_v52, %v2071_v50  ;;  %v2095_v26 = vld [vmem:[%s7576_s21 + $0x39e8] sm:$0xff]  ;;  %v1862_v34 = vld [vmem:[%s7576_s21 + $0x32a0] sm:$0xff] }
 0x75c   : > { %v4864_v59 = vcombine.low %v9517_v49, %v9523_v19  ;;  %v6959_v5 = vpack.c.bf16 %v2095_v26, %v2087_v0  ;;  %v1855_v10 = vld [vmem:[%s7576_s21 + $0x3268] sm:$0xff]  ;;  %v1878_v52 = vld [vmem:[%s7576_s21 + $0x3320] sm:$0xff] }
 0x75d   : > { %v2103_v11 = vld [vmem:[%s7576_s21 + $0x3a28] sm:$0xff]  ;;  %v1894_v26 = vld [vmem:[%s7576_s21 + $0x33a0] sm:$0xff] }
 0x75e   : > { %6682 = vmatpush1.bf16.xpose.msra.mxu0 %v6681_v47  ;;  %v1814_v47 = vld [vmem:[%s7576_s21 + $0x3120] sm:$0xff]  ;;  %v6963_v20 = vpack.c.bf16 %v2111_v13, %v2103_v11  ;;  %v1871_v48 = vld [vmem:[%s7576_s21 + $0x32e8] sm:$0xff] }
 0x75f   : > { %6684 = vmatprep.subr.bf16.mxu0 %v6683_v12  ;;  %v2070_v12 = vld [vmem:[%s7576_s21 + $0x3920] sm:$0xff]  ;;  %v2119_v51 = vld [vmem:[%s7576_s21 + $0x3aa8] sm:$0xff] }
 0x760   : > { %6938 = vmatpush1.bf16.xpose.msra.mxu1 %v6937_v60  ;;  %v1822_v60 = vld [vmem:[%s7576_s21 + $0x3160] sm:$0xff]  ;;  %v2127_v57 = vld [vmem:[%s7576_s21 + $0x3ae8] sm:$0xff] }
 0x761   : > { %6940 = vmatprep.subr.bf16.mxu1 %v6939_v61  ;;  %v2078_v61 = vld [vmem:[%s7576_s21 + $0x3960] sm:$0xff]  ;;  %v6701_v1 = vpack.c.bf16 %v1822_v60, %v1814_v47  ;;  %v6967_v32 = vpack.c.bf16 %v2127_v57, %v2119_v51  ;;  %v2143_v45 = vld [vmem:[%s7576_s21 + $0x3b68] sm:$0xff] }
 0x762   : > { %v6957_v2 = vpack.c.bf16 %v2078_v61, %v2070_v12  ;;  %v1903_v47 = vld [vmem:[%s7576_s21 + $0x33e8] sm:$0xff]  ;;  %v1910_v13 = vld [vmem:[%s7576_s21 + $0x3420] sm:$0xff] }
 0x763   : > { %v2151_v60 = vld [vmem:[%s7576_s21 + $0x3ba8] sm:$0xff]  ;;  %v1926_v57 = vld [vmem:[%s7576_s21 + $0x34a0] sm:$0xff] }
 0x764   : > { %v2159_v12 = vld [vmem:[%s7576_s21 + $0x3be8] sm:$0xff] }
 0x765   : > { %v6975_v0 = vpack.c.bf16 %v2159_v12, %v2151_v60  ;;  %v1958_v12 = vld [vmem:[%s7576_s21 + $0x35a0] sm:$0xff] }
 0x766   : > { %6686 = vmatpush1.bf16.xpose.msra.mxu0 %v6685_v6  ;;  %v1838_v6 = vld [vmem:[%s7576_s21 + $0x31e0] sm:$0xff] }
 0x767   : > { %6688 = vmatprep.subr.bf16.mxu0 %v6687_v8  ;;  %v2094_v8 = vld [vmem:[%s7576_s21 + $0x39e0] sm:$0xff]  ;;  %v6705_v14 = vpack.c.bf16 %v1838_v6, %v1830_v17  ;;  %v1919_v17 = vld [vmem:[%s7576_s21 + $0x3468] sm:$0xff] }
 0x768   : > { %6942 = vmatpush1.bf16.xpose.msra.mxu1 %v6941_v7  ;;  %v2086_v7 = vld [vmem:[%s7576_s21 + $0x39a0] sm:$0xff]  ;;  %v2167_v6 = vld [vmem:[%s7576_s21 + $0x3c28] sm:$0xff] }
 0x769   : > { %6944 = vmatprep.subr.bf16.mxu1 %v6943_v9  ;;  %v1847_v9 = vld [vmem:[%s7576_s21 + $0x3228] sm:$0xff]  ;;  %v6961_v15 = vpack.c.bf16 %v2094_v8, %v2086_v7 }
 0x76a   : > { %v6707_v16 = vpack.c.bf16 %v1855_v10, %v1847_v9  ;;  %v2175_v7 = vld [vmem:[%s7576_s21 + $0x3c68] sm:$0xff] }
 0x76b   : > { %v6979_v11 = vpack.c.bf16 %v2175_v7, %v2167_v6  ;;  %v1974_v7 = vld [vmem:[%s7576_s21 + $0x3620] sm:$0xff] }
 0x76e   : > { %6690 = vmatpush1.bf16.xpose.msra.mxu0 %v6689_v22  ;;  %v1854_v22 = vld [vmem:[%s7576_s21 + $0x3260] sm:$0xff] }
 0x76f   : > { %6692 = vmatprep.subr.bf16.mxu0 %v6691_v27  ;;  %v2110_v27 = vld [vmem:[%s7576_s21 + $0x3a60] sm:$0xff]  ;;  %v6709_v29 = vpack.c.bf16 %v1854_v22, %v1846_v21  ;;  %v1935_v21 = vld [vmem:[%s7576_s21 + $0x34e8] sm:$0xff] }
 0x770   : > { %6946 = vmatpush1.bf16.xpose.msra.mxu1 %v6945_v23  ;;  %v2102_v23 = vld [vmem:[%s7576_s21 + $0x3a20] sm:$0xff]  ;;  %v2183_v22 = vld [vmem:[%s7576_s21 + $0x3ca8] sm:$0xff] }
 0x771   : > { %6948 = vmatprep.subr.bf16.mxu1 %v6947_v28  ;;  %v1863_v28 = vld [vmem:[%s7576_s21 + $0x32a8] sm:$0xff]  ;;  %v6965_v30 = vpack.c.bf16 %v2110_v27, %v2102_v23 }
 0x772   : > { %v6711_v31 = vpack.c.bf16 %v1871_v48, %v1863_v28  ;;  %v2191_v23 = vld [vmem:[%s7576_s21 + $0x3ce8] sm:$0xff] }
 0x773   : > { %v6983_v51 = vpack.c.bf16 %v2191_v23, %v2183_v22  ;;  %v1990_v23 = vld [vmem:[%s7576_s21 + $0x36a0] sm:$0xff] }
 0x775   : > { %4255 = vmatmul.mubr.f32.vlgmr.msra.gmra.mrb[6].mxu0 %v7887_v55 }
 0x776   : > { %6694 = vmatpush1.bf16.xpose.msra.mxu0 %v6693_v37  ;;  %4325 = vmatprep.mubr.f32.mxu0 %v7893_v62  ;;  %v1870_v37 = vld [vmem:[%s7576_s21 + $0x32e0] sm:$0xff] }
 0x777   : > { %4539 = vmatmul.mubr.f32.vlgmr.msra.gmra.mrb[6].mxu1 %v7887_v55  ;;  %6696 = vmatprep.subr.bf16.mxu0 %v6695_v40  ;;  %v6697_v55 = vpack.c.bf16 %v1806_v44, %v1798_v42  ;;  %v2126_v40 = vld [vmem:[%s7576_s21 + $0x3ae0] sm:$0xff]  ;;  %v1887_v42 = vld [vmem:[%s7576_s21 + $0x3368] sm:$0xff]  ;;  %v6713_v35 = vpack.c.bf16 %v1870_v37, %v1862_v34 }
 0x778   : > { %6950 = vmatpush1.bf16.xpose.msra.mxu1 %v6949_v18  ;;  %4609 = vmatprep.mubr.f32.mxu1 %v7893_v62  ;;  %v1839_v62 = vld [vmem:[%s7576_s21 + $0x31e8] sm:$0xff]  ;;  %v2118_v18 = vld [vmem:[%s7576_s21 + $0x3aa0] sm:$0xff] }
 0x779   : > { %6952 = vmatprep.subr.bf16.mxu1 %v6951_v41  ;;  %v6703_v4 = vpack.c.bf16 %v1839_v62, %v1831_v63  ;;  %v1879_v41 = vld [vmem:[%s7576_s21 + $0x3328] sm:$0xff]  ;;  %v6969_v46 = vpack.c.bf16 %v2126_v40, %v2118_v18 }
 0x77a   : > { %v2135_v44 = vld [vmem:[%s7576_s21 + $0x3b28] sm:$0xff]  ;;  %v6715_v3 = vpack.c.bf16 %v1887_v42, %v1879_v41 }
 0x77b   : > { %v6971_v50 = vpack.c.bf16 %v2143_v45, %v2135_v44  ;;  %v1951_v34 = vld [vmem:[%s7576_s21 + $0x3568] sm:$0xff]  ;;  %v1942_v45 = vld [vmem:[%s7576_s21 + $0x3520] sm:$0xff] }
 0x77c   : > { %v2199_v37 = vld [vmem:[%s7576_s21 + $0x3d28] sm:$0xff] }
 0x77d   : > { %v2207_v18 = vld [vmem:[%s7576_s21 + $0x3d68] sm:$0xff] }
 0x77e   : > { %6698 = vmatpush1.bf16.xpose.msra.mxu0 %v6697_v55  ;;  %v1886_v55 = vld [vmem:[%s7576_s21 + $0x3360] sm:$0xff]  ;;  %v6987_v44 = vpack.c.bf16 %v2207_v18, %v2199_v37 }
 0x77f   : > { %6700 = vmatprep.subr.bf16.mxu0 %v6699_v56  ;;  %v2142_v56 = vld [vmem:[%s7576_s21 + $0x3b60] sm:$0xff]  ;;  %v6717_v61 = vpack.c.bf16 %v1886_v55, %v1878_v52  ;;  %v1967_v52 = vld [vmem:[%s7576_s21 + $0x35e8] sm:$0xff] }
 0x780   : > { %6954 = vmatpush1.bf16.xpose.msra.mxu1 %v6953_v53  ;;  %v2134_v53 = vld [vmem:[%s7576_s21 + $0x3b20] sm:$0xff]  ;;  %v2215_v55 = vld [vmem:[%s7576_s21 + $0x3da8] sm:$0xff] }
 0x781   : > { %6956 = vmatprep.subr.bf16.mxu1 %v6955_v58  ;;  %v1895_v58 = vld [vmem:[%s7576_s21 + $0x33a8] sm:$0xff]  ;;  %v6973_v63 = vpack.c.bf16 %v2142_v56, %v2134_v53  ;;  %v2006_v18 = vld [vmem:[%s7576_s21 + $0x3720] sm:$0xff] }
 0x782   : > { %v6719_v62 = vpack.c.bf16 %v1903_v47, %v1895_v58  ;;  %v2223_v53 = vld [vmem:[%s7576_s21 + $0x3de8] sm:$0xff] }
 0x783   : > { %v6991_v60 = vpack.c.bf16 %v2223_v53, %v2215_v55  ;;  %v2022_v53 = vld [vmem:[%s7576_s21 + $0x37a0] sm:$0xff] }
 0x786   : > { %6702 = vmatpush1.bf16.xpose.msra.mxu0 %v6701_v1  ;;  %v1902_v1 = vld [vmem:[%s7576_s21 + $0x33e0] sm:$0xff] }
 0x787   : > { %6704 = vmatprep.subr.bf16.mxu0 %v6703_v4  ;;  %v2158_v4 = vld [vmem:[%s7576_s21 + $0x3be0] sm:$0xff]  ;;  %v6721_v8 = vpack.c.bf16 %v1902_v1, %v1894_v26  ;;  %v1983_v26 = vld [vmem:[%s7576_s21 + $0x3668] sm:$0xff] }
 0x788   : > { %6958 = vmatpush1.bf16.xpose.msra.mxu1 %v6957_v2  ;;  %v2150_v2 = vld [vmem:[%s7576_s21 + $0x3ba0] sm:$0xff]  ;;  %v2231_v1 = vld [vmem:[%s7576_s21 + $0x3e28] sm:$0xff] }
 0x789   : > { %6960 = vmatprep.subr.bf16.mxu1 %v6959_v5  ;;  %v1911_v5 = vld [vmem:[%s7576_s21 + $0x3428] sm:$0xff]  ;;  %v6977_v9 = vpack.c.bf16 %v2158_v4, %v2150_v2 }
 0x78a   : > { %v6723_v10 = vpack.c.bf16 %v1919_v17, %v1911_v5  ;;  %v2239_v2 = vld [vmem:[%s7576_s21 + $0x3e68] sm:$0xff] }
 0x78b   : > { %v6995_v6 = vpack.c.bf16 %v2239_v2, %v2231_v1  ;;  %v1784_v2 = vld [vmem:[%s7576_s21 + $0x3030] sm:$0xff] }
 0x78e   : > { %6706 = vmatpush1.bf16.xpose.msra.mxu0 %v6705_v14  ;;  %v1918_v14 = vld [vmem:[%s7576_s21 + $0x3460] sm:$0xff] }
 0x78f   : > { %6708 = vmatprep.subr.bf16.mxu0 %v6707_v16  ;;  %v2174_v16 = vld [vmem:[%s7576_s21 + $0x3c60] sm:$0xff]  ;;  %v6725_v27 = vpack.c.bf16 %v1918_v14, %v1910_v13  ;;  %v1999_v13 = vld [vmem:[%s7576_s21 + $0x36e8] sm:$0xff] }
 0x790   : > { %6962 = vmatpush1.bf16.xpose.msra.mxu1 %v6961_v15  ;;  %v2166_v15 = vld [vmem:[%s7576_s21 + $0x3c20] sm:$0xff]  ;;  %v2247_v14 = vld [vmem:[%s7576_s21 + $0x3ea8] sm:$0xff] }
 0x791   : > { %6964 = vmatprep.subr.bf16.mxu1 %v6963_v20  ;;  %v1927_v20 = vld [vmem:[%s7576_s21 + $0x34a8] sm:$0xff]  ;;  %v6981_v28 = vpack.c.bf16 %v2174_v16, %v2166_v15 }
 0x792   : > { %v6727_v48 = vpack.c.bf16 %v1935_v21, %v1927_v20  ;;  %v2255_v15 = vld [vmem:[%s7576_s21 + $0x3ee8] sm:$0xff] }
 0x793   : > { %v6999_v22 = vpack.c.bf16 %v2255_v15, %v2247_v14  ;;  %v1800_v15 = vld [vmem:[%s7576_s21 + $0x30b0] sm:$0xff] }
 0x796   : > { %6710 = vmatpush1.bf16.xpose.msra.mxu0 %v6709_v29  ;;  %v1934_v29 = vld [vmem:[%s7576_s21 + $0x34e0] sm:$0xff] }
 0x797   : > { %6712 = vmatprep.subr.bf16.mxu0 %v6711_v31  ;;  %v2190_v31 = vld [vmem:[%s7576_s21 + $0x3ce0] sm:$0xff]  ;;  %v6729_v40 = vpack.c.bf16 %v1934_v29, %v1926_v57  ;;  %v2015_v57 = vld [vmem:[%s7576_s21 + $0x3768] sm:$0xff] }
 0x798   : > { %6966 = vmatpush1.bf16.xpose.msra.mxu1 %v6965_v30  ;;  %v2182_v30 = vld [vmem:[%s7576_s21 + $0x3ca0] sm:$0xff]  ;;  %v2263_v29 = vld [vmem:[%s7576_s21 + $0x3f28] sm:$0xff] }
 0x799   : > { %6968 = vmatprep.subr.bf16.mxu1 %v6967_v32  ;;  %v1943_v32 = vld [vmem:[%s7576_s21 + $0x3528] sm:$0xff]  ;;  %v6985_v41 = vpack.c.bf16 %v2190_v31, %v2182_v30 }
 0x79a   : > { %v6731_v42 = vpack.c.bf16 %v1951_v34, %v1943_v32  ;;  %v2271_v30 = vld [vmem:[%s7576_s21 + $0x3f68] sm:$0xff] }
 0x79b   : > { %v7003_v37 = vpack.c.bf16 %v2271_v30, %v2263_v29  ;;  %v1816_v29 = vld [vmem:[%s7576_s21 + $0x3130] sm:$0xff] }
 0x79c   : > { %v1824_v30 = vld [vmem:[%s7576_s21 + $0x3170] sm:$0xff] }
 0x79e   : > { %6714 = vmatpush1.bf16.xpose.msra.mxu0 %v6713_v35  ;;  %v1950_v35 = vld [vmem:[%s7576_s21 + $0x3560] sm:$0xff] }
 0x79f   : > { %6716 = vmatprep.subr.bf16.mxu0 %v6715_v3  ;;  %v2206_v3 = vld [vmem:[%s7576_s21 + $0x3d60] sm:$0xff]  ;;  %v6733_v56 = vpack.c.bf16 %v1950_v35, %v1942_v45  ;;  %v2031_v45 = vld [vmem:[%s7576_s21 + $0x37e8] sm:$0xff] }
 0x7a0   : > { %6970 = vmatpush1.bf16.xpose.msra.mxu1 %v6969_v46  ;;  %v2198_v46 = vld [vmem:[%s7576_s21 + $0x3d20] sm:$0xff]  ;;  %v2279_v35 = vld [vmem:[%s7576_s21 + $0x3fa8] sm:$0xff] }
 0x7a1   : > { %6972 = vmatprep.subr.bf16.mxu1 %v6971_v50  ;;  %v1959_v50 = vld [vmem:[%s7576_s21 + $0x35a8] sm:$0xff]  ;;  %v6989_v58 = vpack.c.bf16 %v2206_v3, %v2198_v46 }
 0x7a2   : > { %v6735_v47 = vpack.c.bf16 %v1967_v52, %v1959_v50  ;;  %v2287_v46 = vld [vmem:[%s7576_s21 + $0x3fe8] sm:$0xff] }
 0x7a3   : > { %v7007_v55 = vpack.c.bf16 %v2287_v46, %v2279_v35  ;;  %v1840_v35 = vld [vmem:[%s7576_s21 + $0x31f0] sm:$0xff] }
 0x7a4   : > { %v2088_v46 = vld [vmem:[%s7576_s21 + $0x39b0] sm:$0xff] }
 0x7a6   : > { %6718 = vmatpush1.bf16.xpose.msra.mxu0 %v6717_v61  ;;  %v1966_v61 = vld [vmem:[%s7576_s21 + $0x35e0] sm:$0xff] }
 0x7a7   : > { %6720 = vmatprep.subr.bf16.mxu0 %v6719_v62  ;;  %v2222_v62 = vld [vmem:[%s7576_s21 + $0x3de0] sm:$0xff]  ;;  %v6737_v4 = vpack.c.bf16 %v1966_v61, %v1958_v12  ;;  %v1793_v12 = vld [vmem:[%s7576_s21 + $0x3078] sm:$0xff] }
 0x7a8   : > { %6974 = vmatpush1.bf16.xpose.msra.mxu1 %v6973_v63  ;;  %v2214_v63 = vld [vmem:[%s7576_s21 + $0x3da0] sm:$0xff]  ;;  %v2041_v61 = vld [vmem:[%s7576_s21 + $0x3838] sm:$0xff] }
 0x7a9   : > { %6976 = vmatprep.subr.bf16.mxu1 %v6975_v0  ;;  %v1975_v0 = vld [vmem:[%s7576_s21 + $0x3628] sm:$0xff]  ;;  %v6993_v5 = vpack.c.bf16 %v2222_v62, %v2214_v63  ;;  %v2049_v63 = vld [vmem:[%s7576_s21 + $0x3878] sm:$0xff] }
 0x7aa   : > { %v6739_v17 = vpack.c.bf16 %v1983_v26, %v1975_v0  ;;  %v7011_v1 = vpack.c.bf16 %v2049_v63, %v2041_v61  ;;  %v1856_v61 = vld [vmem:[%s7576_s21 + $0x3270] sm:$0xff] }
 0x7ab   : > { %v2104_v63 = vld [vmem:[%s7576_s21 + $0x3a30] sm:$0xff] }
 0x7ae   : > { %6722 = vmatpush1.bf16.xpose.msra.mxu0 %v6721_v8  ;;  %v1982_v8 = vld [vmem:[%s7576_s21 + $0x3660] sm:$0xff] }
 0x7af   : > { %6724 = vmatprep.subr.bf16.mxu0 %v6723_v10  ;;  %v2238_v10 = vld [vmem:[%s7576_s21 + $0x3e60] sm:$0xff]  ;;  %v6741_v16 = vpack.c.bf16 %v1982_v8, %v1974_v7  ;;  %v1809_v7 = vld [vmem:[%s7576_s21 + $0x30f8] sm:$0xff] }
 0x7b0   : > { %6978 = vmatpush1.bf16.xpose.msra.mxu1 %v6977_v9  ;;  %v2230_v9 = vld [vmem:[%s7576_s21 + $0x3e20] sm:$0xff]  ;;  %v2057_v8 = vld [vmem:[%s7576_s21 + $0x38b8] sm:$0xff] }
 0x7b1   : > { %6980 = vmatprep.subr.bf16.mxu1 %v6979_v11  ;;  %v1991_v11 = vld [vmem:[%s7576_s21 + $0x36a8] sm:$0xff]  ;;  %v6997_v20 = vpack.c.bf16 %v2238_v10, %v2230_v9  ;;  %v2065_v9 = vld [vmem:[%s7576_s21 + $0x38f8] sm:$0xff] }
 0x7b2   : > { %v6743_v21 = vpack.c.bf16 %v1999_v13, %v1991_v11  ;;  %v7015_v14 = vpack.c.bf16 %v2065_v9, %v2057_v8  ;;  %v1872_v8 = vld [vmem:[%s7576_s21 + $0x32f0] sm:$0xff] }
 0x7b3   : > { %v2120_v9 = vld [vmem:[%s7576_s21 + $0x3ab0] sm:$0xff] }
 0x7b6   : > { %6726 = vmatpush1.bf16.xpose.msra.mxu0 %v6725_v27  ;;  %v1998_v27 = vld [vmem:[%s7576_s21 + $0x36e0] sm:$0xff] }
 0x7b7   : > { %6728 = vmatprep.subr.bf16.mxu0 %v6727_v48  ;;  %v2254_v48 = vld [vmem:[%s7576_s21 + $0x3ee0] sm:$0xff]  ;;  %v6745_v31 = vpack.c.bf16 %v1998_v27, %v1990_v23  ;;  %v1825_v23 = vld [vmem:[%s7576_s21 + $0x3178] sm:$0xff] }
 0x7b8   : > { %6982 = vmatpush1.bf16.xpose.msra.mxu1 %v6981_v28  ;;  %v2246_v28 = vld [vmem:[%s7576_s21 + $0x3ea0] sm:$0xff]  ;;  %v2073_v27 = vld [vmem:[%s7576_s21 + $0x3938] sm:$0xff] }
 0x7b9   : > { %6984 = vmatprep.subr.bf16.mxu1 %v6983_v51  ;;  %v2007_v51 = vld [vmem:[%s7576_s21 + $0x3728] sm:$0xff]  ;;  %v7001_v32 = vpack.c.bf16 %v2254_v48, %v2246_v28  ;;  %v2081_v28 = vld [vmem:[%s7576_s21 + $0x3978] sm:$0xff] }
 0x7ba   : > { %v6747_v34 = vpack.c.bf16 %v2015_v57, %v2007_v51  ;;  %v7019_v57 = vpack.c.bf16 %v2081_v28, %v2073_v27  ;;  %v1888_v27 = vld [vmem:[%s7576_s21 + $0x3370] sm:$0xff] }
 0x7bb   : > { %v2136_v28 = vld [vmem:[%s7576_s21 + $0x3b30] sm:$0xff] }
 0x7be   : > { %6730 = vmatpush1.bf16.xpose.msra.mxu0 %v6729_v40  ;;  %v2014_v40 = vld [vmem:[%s7576_s21 + $0x3760] sm:$0xff] }
 0x7bf   : > { %6732 = vmatprep.subr.bf16.mxu0 %v6731_v42  ;;  %v2270_v42 = vld [vmem:[%s7576_s21 + $0x3f60] sm:$0xff]  ;;  %v6749_v3 = vpack.c.bf16 %v2014_v40, %v2006_v18  ;;  %v2097_v18 = vld [vmem:[%s7576_s21 + $0x39f8] sm:$0xff]  ;;  %v6765_v40 = vpack.c.bf16 %v1824_v30, %v1816_v29 }
 0x7c0   : > { %6986 = vmatpush1.bf16.xpose.msra.mxu1 %v6985_v41  ;;  %v2262_v41 = vld [vmem:[%s7576_s21 + $0x3f20] sm:$0xff]  ;;  %v2161_v29 = vld [vmem:[%s7576_s21 + $0x3bf8] sm:$0xff] }
 0x7c1   : > { %6988 = vmatprep.subr.bf16.mxu1 %v6987_v44  ;;  %v2023_v44 = vld [vmem:[%s7576_s21 + $0x37a8] sm:$0xff]  ;;  %v7005_v50 = vpack.c.bf16 %v2270_v42, %v2262_v41 }
 0x7c2   : > { %v6751_v52 = vpack.c.bf16 %v2031_v45, %v2023_v44  ;;  %v1832_v45 = vld [vmem:[%s7576_s21 + $0x31b0] sm:$0xff] }
 0x7c6   : > { %6734 = vmatpush1.bf16.xpose.msra.mxu0 %v6733_v56  ;;  %v2030_v56 = vld [vmem:[%s7576_s21 + $0x37e0] sm:$0xff] }
 0x7c7   : > { %6736 = vmatprep.subr.bf16.mxu0 %v6735_v47  ;;  %v2286_v47 = vld [vmem:[%s7576_s21 + $0x3fe0] sm:$0xff]  ;;  %v6753_v62 = vpack.c.bf16 %v2030_v56, %v2022_v53  ;;  %v2113_v53 = vld [vmem:[%s7576_s21 + $0x3a78] sm:$0xff]  ;;  %v6769_v56 = vpack.c.bf16 %v1840_v35, %v1832_v45 }
 0x7c8   : > { %6990 = vmatpush1.bf16.xpose.msra.mxu1 %v6989_v58  ;;  %v2278_v58 = vld [vmem:[%s7576_s21 + $0x3fa0] sm:$0xff]  ;;  %v2177_v45 = vld [vmem:[%s7576_s21 + $0x3c78] sm:$0xff] }
 0x7c9   : > { %6992 = vmatprep.subr.bf16.mxu1 %v6991_v60  ;;  %v1785_v60 = vld [vmem:[%s7576_s21 + $0x3038] sm:$0xff]  ;;  %v7009_v0 = vpack.c.bf16 %v2286_v47, %v2278_v58 }
 0x7ca   : > { %v6755_v26 = vpack.c.bf16 %v1793_v12, %v1785_v60  ;;  %v1848_v12 = vld [vmem:[%s7576_s21 + $0x3230] sm:$0xff] }
 0x7ce   : > { %6738 = vmatpush1.bf16.xpose.msra.mxu0 %v6737_v4  ;;  %v1792_v4 = vld [vmem:[%s7576_s21 + $0x3070] sm:$0xff] }
 0x7cf   : > { %6740 = vmatprep.subr.bf16.mxu0 %v6739_v17  ;;  %v2048_v17 = vld [vmem:[%s7576_s21 + $0x3870] sm:$0xff]  ;;  %v6757_v10 = vpack.c.bf16 %v1792_v4, %v1784_v2  ;;  %v2129_v2 = vld [vmem:[%s7576_s21 + $0x3af8] sm:$0xff]  ;;  %v6773_v4 = vpack.c.bf16 %v1856_v61, %v1848_v12 }
 0x7d0   : > { %6994 = vmatpush1.bf16.xpose.msra.mxu1 %v6993_v5  ;;  %v2040_v5 = vld [vmem:[%s7576_s21 + $0x3830] sm:$0xff]  ;;  %v2193_v12 = vld [vmem:[%s7576_s21 + $0x3cf8] sm:$0xff] }
 0x7d1   : > { %6996 = vmatprep.subr.bf16.mxu1 %v6995_v6  ;;  %v1801_v6 = vld [vmem:[%s7576_s21 + $0x30b8] sm:$0xff]  ;;  %v7013_v11 = vpack.c.bf16 %v2048_v17, %v2040_v5 }
 0x7d2   : > { %v6759_v13 = vpack.c.bf16 %v1809_v7, %v1801_v6  ;;  %v1864_v7 = vld [vmem:[%s7576_s21 + $0x32b0] sm:$0xff] }
 0x7d6   : > { %6742 = vmatpush1.bf16.xpose.msra.mxu0 %v6741_v16  ;;  %v1808_v16 = vld [vmem:[%s7576_s21 + $0x30f0] sm:$0xff] }
 0x7d7   : > { %6744 = vmatprep.subr.bf16.mxu0 %v6743_v21  ;;  %v2064_v21 = vld [vmem:[%s7576_s21 + $0x38f0] sm:$0xff] }
 0x7d8   : > { %6998 = vmatpush1.bf16.xpose.msra.mxu1 %v6997_v20  ;;  %v2056_v20 = vld [vmem:[%s7576_s21 + $0x38b0] sm:$0xff] }
 0x7d9   : > { %7000 = vmatprep.subr.bf16.mxu1 %v6999_v22  ;;  %v1817_v22 = vld [vmem:[%s7576_s21 + $0x3138] sm:$0xff]  ;;  %v7017_v48 = vpack.c.bf16 %v2064_v21, %v2056_v20 }
 0x7da   : > { %v6763_v51 = vpack.c.bf16 %v1825_v23, %v1817_v22  ;;  %v1880_v23 = vld [vmem:[%s7576_s21 + $0x3330] sm:$0xff] }
 0x7db   : > { %v6781_v30 = vpack.c.bf16 %v1888_v27, %v1880_v23  ;;  %v2225_v23 = vld [vmem:[%s7576_s21 + $0x3df8] sm:$0xff] }
 0x7de   : > { %6746 = vmatpush1.bf16.xpose.msra.mxu0 %v6745_v31  ;;  %v2072_v31 = vld [vmem:[%s7576_s21 + $0x3930] sm:$0xff] }
 0x7df   : > { %6748 = vmatprep.subr.bf16.mxu0 %v6747_v34  ;;  %v1833_v34 = vld [vmem:[%s7576_s21 + $0x31b8] sm:$0xff] }
 0x7e0   : > { %7002 = vmatpush1.bf16.xpose.msra.mxu1 %v7001_v32  ;;  %v2080_v32 = vld [vmem:[%s7576_s21 + $0x3970] sm:$0xff] }
 0x7e1   : > { %7004 = vmatprep.subr.bf16.mxu1 %v7003_v37  ;;  %v2089_v37 = vld [vmem:[%s7576_s21 + $0x39b8] sm:$0xff]  ;;  %v7021_v41 = vpack.c.bf16 %v2080_v32, %v2072_v31 }
 0x7e2   : > { %v7023_v44 = vpack.c.bf16 %v2097_v18, %v2089_v37  ;;  %v1904_v37 = vld [vmem:[%s7576_s21 + $0x33f0] sm:$0xff] }
 0x7e3   : > { %v2152_v18 = vld [vmem:[%s7576_s21 + $0x3bb0] sm:$0xff] }
 0x7e6   : > { %6750 = vmatpush1.bf16.xpose.msra.mxu0 %v6749_v3  ;;  %v2096_v3 = vld [vmem:[%s7576_s21 + $0x39f0] sm:$0xff] }
 0x7e7   : > { %6752 = vmatprep.subr.bf16.mxu0 %v6751_v52  ;;  %v1857_v52 = vld [vmem:[%s7576_s21 + $0x3278] sm:$0xff]  ;;  %v7025_v58 = vpack.c.bf16 %v2096_v3, %v2088_v46 }
 0x7e8   : > { %7006 = vmatpush1.bf16.xpose.msra.mxu1 %v7005_v50  ;;  %v1849_v50 = vld [vmem:[%s7576_s21 + $0x3238] sm:$0xff] }
 0x7e9   : > { %7008 = vmatprep.subr.bf16.mxu1 %v7007_v55  ;;  %v2105_v55 = vld [vmem:[%s7576_s21 + $0x3a38] sm:$0xff]  ;;  %v6771_v47 = vpack.c.bf16 %v1857_v52, %v1849_v50  ;;  %v1912_v52 = vld [vmem:[%s7576_s21 + $0x3430] sm:$0xff] }
 0x7ea   : > { %v7027_v60 = vpack.c.bf16 %v2113_v53, %v2105_v55  ;;  %v1920_v55 = vld [vmem:[%s7576_s21 + $0x3470] sm:$0xff] }
 0x7eb   : > { %v2168_v53 = vld [vmem:[%s7576_s21 + $0x3c30] sm:$0xff]  ;;  %v6789_v61 = vpack.c.bf16 %v1920_v55, %v1912_v52  ;;  %v2257_v52 = vld [vmem:[%s7576_s21 + $0x3ef8] sm:$0xff] }
 0x7ee   : > { %6754 = vmatpush1.bf16.xpose.msra.mxu0 %v6753_v62  ;;  %v2112_v62 = vld [vmem:[%s7576_s21 + $0x3a70] sm:$0xff] }
 0x7ef   : > { %6756 = vmatprep.subr.bf16.mxu0 %v6755_v26  ;;  %v1873_v26 = vld [vmem:[%s7576_s21 + $0x32f8] sm:$0xff]  ;;  %v7029_v5 = vpack.c.bf16 %v2112_v62, %v2104_v63 }
 0x7f0   : > { %7010 = vmatpush1.bf16.xpose.msra.mxu1 %v7009_v0  ;;  %v1865_v0 = vld [vmem:[%s7576_s21 + $0x32b8] sm:$0xff] }
 0x7f1   : > { %7012 = vmatprep.subr.bf16.mxu1 %v7011_v1  ;;  %v2121_v1 = vld [vmem:[%s7576_s21 + $0x3ab8] sm:$0xff]  ;;  %v6775_v17 = vpack.c.bf16 %v1873_v26, %v1865_v0  ;;  %v1928_v26 = vld [vmem:[%s7576_s21 + $0x34b0] sm:$0xff] }
 0x7f2   : > { %v7031_v6 = vpack.c.bf16 %v2129_v2, %v2121_v1  ;;  %v1936_v1 = vld [vmem:[%s7576_s21 + $0x34f0] sm:$0xff] }
 0x7f3   : > { %v2184_v2 = vld [vmem:[%s7576_s21 + $0x3cb0] sm:$0xff] }
 0x7f5   : > { %4326 = vmatmul.mubr.f32.vlgmr.msra.gmra.mrb[6].mxu0 %v8035_v36 }
 0x7f6   : > { %6758 = vmatpush1.bf16.xpose.msra.mxu0 %v6757_v10  ;;  %4396 = vmatprep.mubr.f32.mxu0 %v8041_v43  ;;  %v2128_v10 = vld [vmem:[%s7576_s21 + $0x3af0] sm:$0xff] }
 0x7f7   : > { %4610 = vmatmul.mubr.f32.vlgmr.msra.gmra.mrb[6].mxu1 %v8035_v36  ;;  %6760 = vmatprep.subr.bf16.mxu0 %v6759_v13  ;;  %v6761_v36 = vpack.c.bf16 %v1808_v16, %v1800_v15  ;;  %v1889_v13 = vld [vmem:[%s7576_s21 + $0x3378] sm:$0xff]  ;;  %v6777_v16 = vpack.c.bf16 %v1872_v8, %v1864_v7  ;;  %v7033_v20 = vpack.c.bf16 %v2128_v10, %v2120_v9 }
 0x7f8   : > { %7014 = vmatpush1.bf16.xpose.msra.mxu1 %v7013_v11  ;;  %4680 = vmatprep.mubr.f32.mxu1 %v8041_v43  ;;  %v1841_v43 = vld [vmem:[%s7576_s21 + $0x31f8] sm:$0xff]  ;;  %v6793_v8 = vpack.c.bf16 %v1936_v1, %v1928_v26 }
 0x7f9   : > { %7016 = vmatprep.subr.bf16.mxu1 %v7015_v14  ;;  %v6767_v42 = vpack.c.bf16 %v1841_v43, %v1833_v34  ;;  %v1881_v11 = vld [vmem:[%s7576_s21 + $0x3338] sm:$0xff]  ;;  %v1896_v43 = vld [vmem:[%s7576_s21 + $0x33b0] sm:$0xff] }
 0x7fa   : > { %v2137_v14 = vld [vmem:[%s7576_s21 + $0x3b38] sm:$0xff]  ;;  %v6779_v21 = vpack.c.bf16 %v1889_v13, %v1881_v11  ;;  %v6785_v35 = vpack.c.bf16 %v1904_v37, %v1896_v43  ;;  %v1944_v13 = vld [vmem:[%s7576_s21 + $0x3530] sm:$0xff] }
 0x7fb   : > { %v2145_v15 = vld [vmem:[%s7576_s21 + $0x3b78] sm:$0xff] }
 0x7fc   : > { %v7035_v22 = vpack.c.bf16 %v2145_v15, %v2137_v14  ;;  %v2209_v7 = vld [vmem:[%s7576_s21 + $0x3d78] sm:$0xff]  ;;  %v1952_v14 = vld [vmem:[%s7576_s21 + $0x3570] sm:$0xff] }
 0x7fd   : > { %v2200_v15 = vld [vmem:[%s7576_s21 + $0x3d30] sm:$0xff]  ;;  %v6797_v27 = vpack.c.bf16 %v1952_v14, %v1944_v13  ;;  %v2241_v43 = vld [vmem:[%s7576_s21 + $0x3e78] sm:$0xff] }
 0x7fe   : > { %6762 = vmatpush1.bf16.xpose.msra.mxu0 %v6761_v36  ;;  %v2144_v36 = vld [vmem:[%s7576_s21 + $0x3b70] sm:$0xff]  ;;  %v2273_v26 = vld [vmem:[%s7576_s21 + $0x3f78] sm:$0xff] }
 0x7ff   : > { %6764 = vmatprep.subr.bf16.mxu0 %v6763_v51  ;;  %v1905_v51 = vld [vmem:[%s7576_s21 + $0x33f8] sm:$0xff]  ;;  %v7037_v31 = vpack.c.bf16 %v2144_v36, %v2136_v28 }
 0x800   : > { %7018 = vmatpush1.bf16.xpose.msra.mxu1 %v7017_v48  ;;  %v1897_v48 = vld [vmem:[%s7576_s21 + $0x33b8] sm:$0xff] }
 0x801   : > { %7020 = vmatprep.subr.bf16.mxu1 %v7019_v57  ;;  %v2153_v57 = vld [vmem:[%s7576_s21 + $0x3bb8] sm:$0xff]  ;;  %v6783_v32 = vpack.c.bf16 %v1905_v51, %v1897_v48  ;;  %v1960_v51 = vld [vmem:[%s7576_s21 + $0x35b0] sm:$0xff] }
 0x802   : > { %v7039_v34 = vpack.c.bf16 %v2161_v29, %v2153_v57  ;;  %v1968_v57 = vld [vmem:[%s7576_s21 + $0x35f0] sm:$0xff]  ;;  %v2289_v13 = vld [vmem:[%s7576_s21 + $0x3ff8] sm:$0xff] }
 0x803   : > { %v2216_v29 = vld [vmem:[%s7576_s21 + $0x3db0] sm:$0xff]  ;;  %v6801_v37 = vpack.c.bf16 %v1968_v57, %v1960_v51 }
 0x806   : > { %6766 = vmatpush1.bf16.xpose.msra.mxu0 %v6765_v40  ;;  %v2160_v40 = vld [vmem:[%s7576_s21 + $0x3bf0] sm:$0xff] }
 0x807   : > { %6768 = vmatprep.subr.bf16.mxu0 %v6767_v42  ;;  %v1921_v42 = vld [vmem:[%s7576_s21 + $0x3478] sm:$0xff]  ;;  %v7041_v46 = vpack.c.bf16 %v2160_v40, %v2152_v18 }
 0x808   : > { %7022 = vmatpush1.bf16.xpose.msra.mxu1 %v7021_v41  ;;  %v1913_v41 = vld [vmem:[%s7576_s21 + $0x3438] sm:$0xff] }
 0x809   : > { %7024 = vmatprep.subr.bf16.mxu1 %v7023_v44  ;;  %v2169_v44 = vld [vmem:[%s7576_s21 + $0x3c38] sm:$0xff]  ;;  %v6787_v3 = vpack.c.bf16 %v1921_v42, %v1913_v41  ;;  %v1976_v42 = vld [vmem:[%s7576_s21 + $0x3630] sm:$0xff] }
 0x80a   : > { %v7043_v50 = vpack.c.bf16 %v2177_v45, %v2169_v44  ;;  %v1984_v44 = vld [vmem:[%s7576_s21 + $0x3670] sm:$0xff] }
 0x80b   : > { %v2232_v45 = vld [vmem:[%s7576_s21 + $0x3e30] sm:$0xff]  ;;  %v6805_v55 = vpack.c.bf16 %v1984_v44, %v1976_v42 }
 0x80e   : > { %6770 = vmatpush1.bf16.xpose.msra.mxu0 %v6769_v56  ;;  %v2176_v56 = vld [vmem:[%s7576_s21 + $0x3c70] sm:$0xff] }
 0x80f   : > { %6772 = vmatprep.subr.bf16.mxu0 %v6771_v47  ;;  %v1937_v47 = vld [vmem:[%s7576_s21 + $0x34f8] sm:$0xff]  ;;  %v7045_v63 = vpack.c.bf16 %v2176_v56, %v2168_v53 }
 0x810   : > { %7026 = vmatpush1.bf16.xpose.msra.mxu1 %v7025_v58  ;;  %v1929_v58 = vld [vmem:[%s7576_s21 + $0x34b8] sm:$0xff] }
 0x811   : > { %7028 = vmatprep.subr.bf16.mxu1 %v7027_v60  ;;  %v2185_v60 = vld [vmem:[%s7576_s21 + $0x3cb8] sm:$0xff]  ;;  %v6791_v62 = vpack.c.bf16 %v1937_v47, %v1929_v58  ;;  %v1992_v47 = vld [vmem:[%s7576_s21 + $0x36b0] sm:$0xff] }
 0x812   : > { %v7047_v0 = vpack.c.bf16 %v2193_v12, %v2185_v60  ;;  %v2000_v60 = vld [vmem:[%s7576_s21 + $0x36f0] sm:$0xff] }
 0x813   : > { %v2248_v12 = vld [vmem:[%s7576_s21 + $0x3eb0] sm:$0xff]  ;;  %v6809_v1 = vpack.c.bf16 %v2000_v60, %v1992_v47 }
 0x816   : > { %6774 = vmatpush1.bf16.xpose.msra.mxu0 %v6773_v4  ;;  %v2192_v4 = vld [vmem:[%s7576_s21 + $0x3cf0] sm:$0xff] }
 0x817   : > { %6776 = vmatprep.subr.bf16.mxu0 %v6775_v17  ;;  %v1953_v17 = vld [vmem:[%s7576_s21 + $0x3578] sm:$0xff]  ;;  %v7049_v9 = vpack.c.bf16 %v2192_v4, %v2184_v2 }
 0x818   : > { %7030 = vmatpush1.bf16.xpose.msra.mxu1 %v7029_v5  ;;  %v1945_v5 = vld [vmem:[%s7576_s21 + $0x3538] sm:$0xff] }
 0x819   : > { %7032 = vmatprep.subr.bf16.mxu1 %v7031_v6  ;;  %v2201_v6 = vld [vmem:[%s7576_s21 + $0x3d38] sm:$0xff]  ;;  %v6795_v10 = vpack.c.bf16 %v1953_v17, %v1945_v5  ;;  %v2008_v17 = vld [vmem:[%s7576_s21 + $0x3730] sm:$0xff] }
 0x81a   : > { %v7051_v11 = vpack.c.bf16 %v2209_v7, %v2201_v6  ;;  %v2016_v6 = vld [vmem:[%s7576_s21 + $0x3770] sm:$0xff] }
 0x81b   : > { %v2264_v7 = vld [vmem:[%s7576_s21 + $0x3f30] sm:$0xff]  ;;  %v6813_v14 = vpack.c.bf16 %v2016_v6, %v2008_v17 }
 0x81e   : > { %6778 = vmatpush1.bf16.xpose.msra.mxu0 %v6777_v16  ;;  %v2208_v16 = vld [vmem:[%s7576_s21 + $0x3d70] sm:$0xff] }
 0x81f   : > { %6780 = vmatprep.subr.bf16.mxu0 %v6779_v21  ;;  %v1969_v21 = vld [vmem:[%s7576_s21 + $0x35f8] sm:$0xff]  ;;  %v7053_v28 = vpack.c.bf16 %v2208_v16, %v2200_v15 }
 0x820   : > { %7034 = vmatpush1.bf16.xpose.msra.mxu1 %v7033_v20  ;;  %v1961_v20 = vld [vmem:[%s7576_s21 + $0x35b8] sm:$0xff] }
 0x821   : > { %7036 = vmatprep.subr.bf16.mxu1 %v7035_v22  ;;  %v2217_v22 = vld [vmem:[%s7576_s21 + $0x3db8] sm:$0xff]  ;;  %v6799_v36 = vpack.c.bf16 %v1969_v21, %v1961_v20  ;;  %v2024_v21 = vld [vmem:[%s7576_s21 + $0x37b0] sm:$0xff] }
 0x822   : > { %v7055_v48 = vpack.c.bf16 %v2225_v23, %v2217_v22  ;;  %v2032_v22 = vld [vmem:[%s7576_s21 + $0x37f0] sm:$0xff] }
 0x823   : > { %v2280_v23 = vld [vmem:[%s7576_s21 + $0x3fb0] sm:$0xff] }
 0x826   : > { %6782 = vmatpush1.bf16.xpose.msra.mxu0 %v6781_v30  ;;  %v2224_v30 = vld [vmem:[%s7576_s21 + $0x3df0] sm:$0xff] }
 0x827   : > { %6784 = vmatprep.subr.bf16.mxu0 %v6783_v32  ;;  %v1985_v32 = vld [vmem:[%s7576_s21 + $0x3678] sm:$0xff]  ;;  %v7057_v18 = vpack.c.bf16 %v2224_v30, %v2216_v29 }
 0x828   : > { %7038 = vmatpush1.bf16.xpose.msra.mxu1 %v7037_v31  ;;  %v1977_v31 = vld [vmem:[%s7576_s21 + $0x3638] sm:$0xff] }
 0x829   : > { %7040 = vmatprep.subr.bf16.mxu1 %v7039_v34  ;;  %v2233_v34 = vld [vmem:[%s7576_s21 + $0x3e38] sm:$0xff]  ;;  %v6803_v40 = vpack.c.bf16 %v1985_v32, %v1977_v31 }
 0x82a   : > { %v7059_v41 = vpack.c.bf16 %v2241_v43, %v2233_v34 }
 0x82e   : > { %6786 = vmatpush1.bf16.xpose.msra.mxu0 %v6785_v35  ;;  %v2240_v35 = vld [vmem:[%s7576_s21 + $0x3e70] sm:$0xff] }
 0x82f   : > { %6788 = vmatprep.subr.bf16.mxu0 %v6787_v3  ;;  %v2001_v3 = vld [vmem:[%s7576_s21 + $0x36f8] sm:$0xff]  ;;  %v7061_v53 = vpack.c.bf16 %v2240_v35, %v2232_v45 }
 0x830   : > { %7042 = vmatpush1.bf16.xpose.msra.mxu1 %v7041_v46  ;;  %v1993_v46 = vld [vmem:[%s7576_s21 + $0x36b8] sm:$0xff] }
 0x831   : > { %7044 = vmatprep.subr.bf16.mxu1 %v7043_v50  ;;  %v2249_v50 = vld [vmem:[%s7576_s21 + $0x3eb8] sm:$0xff]  ;;  %v6807_v56 = vpack.c.bf16 %v2001_v3, %v1993_v46 }
 0x832   : > { %v7063_v58 = vpack.c.bf16 %v2257_v52, %v2249_v50 }
 0x836   : > { %6790 = vmatpush1.bf16.xpose.msra.mxu0 %v6789_v61  ;;  %v2256_v61 = vld [vmem:[%s7576_s21 + $0x3ef0] sm:$0xff] }
 0x837   : > { %6792 = vmatprep.subr.bf16.mxu0 %v6791_v62  ;;  %v2017_v62 = vld [vmem:[%s7576_s21 + $0x3778] sm:$0xff]  ;;  %v7065_v2 = vpack.c.bf16 %v2256_v61, %v2248_v12 }
 0x838   : > { %7046 = vmatpush1.bf16.xpose.msra.mxu1 %v7045_v63  ;;  %v2009_v63 = vld [vmem:[%s7576_s21 + $0x3738] sm:$0xff] }
 0x839   : > { %7048 = vmatprep.subr.bf16.mxu1 %v7047_v0  ;;  %v2265_v0 = vld [vmem:[%s7576_s21 + $0x3f38] sm:$0xff]  ;;  %v6811_v4 = vpack.c.bf16 %v2017_v62, %v2009_v63 }
 0x83a   : > { %v7067_v5 = vpack.c.bf16 %v2273_v26, %v2265_v0 }
 0x83e   : > { %6794 = vmatpush1.bf16.xpose.msra.mxu0 %v6793_v8  ;;  %v2272_v8 = vld [vmem:[%s7576_s21 + $0x3f70] sm:$0xff] }
 0x83f   : > { %6796 = vmatprep.subr.bf16.mxu0 %v6795_v10  ;;  %v2033_v10 = vld [vmem:[%s7576_s21 + $0x37f8] sm:$0xff]  ;;  %v7069_v15 = vpack.c.bf16 %v2272_v8, %v2264_v7 }
 0x840   : > { %7050 = vmatpush1.bf16.xpose.msra.mxu1 %v7049_v9  ;;  %v2025_v9 = vld [vmem:[%s7576_s21 + $0x37b8] sm:$0xff] }
 0x841   : > { %7052 = vmatprep.subr.bf16.mxu1 %v7051_v11  ;;  %v2281_v11 = vld [vmem:[%s7576_s21 + $0x3fb8] sm:$0xff]  ;;  %v6815_v16 = vpack.c.bf16 %v2033_v10, %v2025_v9 }
 0x842   : > { %v7071_v20 = vpack.c.bf16 %v2289_v13, %v2281_v11 }
 0x846   : > { %6798 = vmatpush1.bf16.xpose.msra.mxu0 %v6797_v27  ;;  %v2288_v27 = vld [vmem:[%s7576_s21 + $0x3ff0] sm:$0xff] }
 0x847   : > { %6800 = vmatprep.subr.bf16.mxu0 %v6799_v36  ;;  %v7073_v36 = vpack.c.bf16 %v2288_v27, %v2280_v23 }
 0x848   : > { %7054 = vmatpush1.bf16.xpose.msra.mxu1 %v7053_v28  ;;  %v6817_v28 = vpack.c.bf16 %v2032_v22, %v2024_v21 }
 0x849   : > { %7056 = vmatprep.subr.bf16.mxu1 %v7055_v48  ;;  %v7206_v48 = vld [vmem:[%s8401_s4 + $0x8] sm:$0xff] }
 0x84a   : > { %v2386_v51 = vrot.slane %v7206_v48, %v8020_v24  ;;  %v2394_v57 = vrot.slane %v7206_v48, %v8168_v25  ;;  %v2390_v29 = vrot.slane %v7206_v48, %v7883_v54  ;;  %v2398_v30 = vrot.slane %v7206_v48, %v8029_v33 }
 0x84e   : > { %6802 = vmatpush1.bf16.xpose.msra.mxu0 %v6801_v37 }
 0x84f   : > { %6804 = vmatprep.subr.bf16.mxu0 %v6803_v40 }
 0x850   : > { %7058 = vmatpush1.bf16.xpose.msra.mxu1 %v7057_v18 }
 0x851   : > { %7060 = vmatprep.subr.bf16.mxu1 %v7059_v41 }
 0x856   : > { %6806 = vmatpush1.bf16.xpose.msra.mxu0 %v6805_v55 }
 0x857   : > { %6808 = vmatprep.subr.bf16.mxu0 %v6807_v56 }
 0x858   : > { %7062 = vmatpush1.bf16.xpose.msra.mxu1 %v7061_v53 }
 0x859   : > { %7064 = vmatprep.subr.bf16.mxu1 %v7063_v58 }
 0x85e   : > { %6810 = vmatpush1.bf16.xpose.msra.mxu0 %v6809_v1  ;;  %v4872_v1 = vrot.slane %v4864_v59, %v8425_v39 }
 0x85f   : > { %6812 = vmatprep.subr.bf16.mxu0 %v6811_v4 }
 0x860   : > { %7066 = vmatpush1.bf16.xpose.msra.mxu1 %v7065_v2 }
 0x861   : > { %7068 = vmatprep.subr.bf16.mxu1 %v7067_v5 }
 0x866   : > { %6814 = vmatpush1.bf16.xpose.msra.mxu0 %v6813_v14 }
 0x867   : > { %6816 = vmatprep.subr.bf16.mxu0 %v6815_v16 }
 0x868   : > { %7070 = vmatpush1.bf16.xpose.msra.mxu1 %v7069_v15 }
 0x869   : > { %7072 = vmatprep.subr.bf16.mxu1 %v7071_v20 }
 0x86e   : > { %6818 = vmatpush1.bf16.xpose.msra.mxu0 %v6817_v28 }
 0x870   : > { %7074 = vmatpush1.bf16.xpose.msra.mxu1 %v7073_v36 }
 0x875   : > { %4397 = vmatmul.mubr.f32.vlgmr.msra.gmra.mrb[6].mxu0 %v8178_v38 }
 0x877   : > { %4681 = vmatmul.mubr.f32.vlgmr.msra.gmra.mrb[6].mxu1 %v8178_v38 }
 0x948   : > { %v4398_v31 = vpop.f32.mrb[6].mxu0 }
 0x949   : > { %v7087_v32 = vadd.f32 %v4398_v31, %v2386_v51  ;;  %v4400_v43 = vpop.f32.mrb[7].mxu0 }
 0x94a   : > { %v4682_v34 = vpop.f32.mrb[6].mxu1  ;;  %v7088_v18 = vadd.f32 %v4400_v43, %v2390_v29 }
 0x94b   : > { %v7089_v37 = vadd.f32 %v4682_v34, %v2394_v57  ;;  %v4684_v40 = vpop.f32.mrb[7].mxu1  ;;  %v4699_v41 = vadd.f32 3.0, %v7087_v32 }
 0x94c   : > { %v7090_v42 = vadd.f32 %v4684_v40, %v2398_v30  ;;  %v4700_v38 = vadd.f32 3.0, %v7088_v18 }
 0x94d   : > { %v4701_v44 = vadd.f32 3.0, %v7089_v37  ;;  %v4715_v45 = vmax.f32 %v4699_v41, 0.0 }
 0x94e   : > { %v4702_v35 = vadd.f32 3.0, %v7090_v42  ;;  %v4716_v46 = vmax.f32 %v4700_v38, 0.0 }
 0x94f   : > { %v4717_v24 = vmax.f32 %v4701_v44, 0.0  ;;  %v4731_v25 = vmin.f32 %v4715_v45, 6.0 }
 0x950   : > { %v4718_v3 = vmax.f32 %v4702_v35, 0.0  ;;  %v4732_v33 = vmin.f32 %v4716_v46, 6.0 }
 0x951   : > { %v4733_v54 = vmin.f32 %v4717_v24, 6.0  ;;  %v4747_v50 = vmul.f32 %v7087_v32, %v4731_v25 }
 0x952   : > { %v4734_v52 = vmin.f32 %v4718_v3, 6.0  ;;  %v4748_v53 = vmul.f32 %v7088_v18, %v4732_v33 }
 0x953   : > { %v4749_v55 = vmul.f32 %v7089_v37, %v4733_v54  ;;  %v4763_v56 = vmul.f32 0.16666667, %v4747_v50 }
 0x954   : > { %v4750_v58 = vmul.f32 %v7090_v42, %v4734_v52  ;;  %v4764_v60 = vmul.f32 0.16666667, %v4748_v53 }
 0x955   : > { %v4765_v47 = vmul.f32 0.16666667, %v4749_v55 }
 0x956   : > { %v4766_v12 = vmul.f32 0.16666667, %v4750_v58  ;;  %v4834_v61 = vcombine.low %v4763_v56, %v4764_v60 }
 0x958   : > { %v4835_v63 = vcombine.low %v4765_v47, %v4766_v12  ;;  %v4856_v62 = vrot.slane %v4834_v61, %v8425_v39 }
 0x95a   : > { %v4863_v0 = vrot.slane %v4835_v63, %v8425_v39 }
 0x95c   : > { %v4865_v26 = vcombine.low %v4856_v62, %v4863_v0 }
 0x95e   : > { %v4879_v2 = vrot.slane %v4865_v26, %v8425_v39 }
 0x960   : > { %v4880_v4 = vcombine.low %v4872_v1, %v4879_v2 }
 0x962   : > { %4884 = vst [vmem:[%s8993_s6 + $0x8] sm:$0xff] %v4880_v4 }
 0x963   : > { %7308 = shalt.err (!%p7305_p1)
}
 0x964   : > { %s7309_s10 = scalar_lea.hbm %s9824_s5, 256  ;;  %s7313_s17 = scalar_lea.hbm %s9872_s3, 512 }
 0x965   : > { %p7310_p5 = scmp.ne.s32.totalorder %s9824_s5, %s7309_s10  ;;  %p7314_p7 = scmp.lt.u32.totalorder %s9824_s5, %s9872_s3 }
 0x966   : > { %p7315_p4 = scmp.lt.u32.totalorder %s7313_s17, %s7309_s10  ;;  %p7317_p9 = scmp.lt.u32.totalorder %s7309_s10, %s9824_s5 }
 0x967   : > { %p7311_p11 = pnand %p7310_p5, %p9889_p12 }
 0x968   : > { %p7316_p10 = por %p7315_p4, %p7314_p7 }
 0x969   : > { %p7312_p8 = pneg %p7311_p11 }
 0x96a   : > { %p7318_p13 = por %p7317_p9, %p7316_p10 }
 0x96c   : > { %p7319_p6 = pnand %p7318_p13, %p7312_p8 }
 0x96e   : > { %7322 = shalt.err (!%p7319_p6)
}
 0x96f   : > { %7147 = dma.vmem_to_hbm [thread:$0]  (%p9889_p12), %s9826_s20, 256, %s9824_s5, %s4886_s23  }
 0x970 PF: > { %s4912_s25 = sand.u32 1, %s7353_s12   ;;  %p9890_p2 = scmp.ne.s32.totalorder %s9881_s27, 0 }
 0x971   : > { %p9891_p0 = scmp.ge.s32.totalorder %s7365_s15, 2  ;;  %s4913_s4 = scalar_lea.sflag [#allocation4], %s4912_s25 }
 0x973   : > { %p7161_p3 = pnand %p9891_p0, %p9890_p2 }
 0x975   : > { %7348 = dma.done.wait (!%p7161_p3), %s4913_s4, 256  }
 0x976   : > { %7350 = vsyncadd (!%p7161_p3), %s4913_s4, 4294967040  ;;  %p17_p1 = scmp.ge.s32.totalorder %s7415_s16, 4   ;;  %s9892_s12 = smov %s7357_s13 }
 0x977   : > { %s9893_s13 = smov %s7361_s14  ;;  %s9894_s14 = smov %s7426_s19 }
 0x978   : > { %s9895_s15 = smov %s7415_s16  ;;  %19 = sbr.rel (!%p17_p1) target bundleno = 6 (0x6), region = 93 }
 0x97f   :  { %4918 = vsyncpa [#allocation3], 1 }
 0x980   :  { %4920 = vsyncpa [#allocation3 + $0x1], 1 }
 0x981   :  { %4921 = vsyncpa [#allocation6], 1 }
 0x982   :  { %4923 = vsyncpa [#allocation6 + $0x1], 1 }
 0x983   :  { %4924 = vsyncpa [#allocation4], 1 }
 0x984   :  { %4926 = vsyncpa [#allocation4 + $0x1], 1 }

</bundles_post_ra>
